<compile_context>
chip_gen: v7x
topology: tpu7x:2x2x1
jax: 0.10.0
libtpu: 0.0.40
codegen_flags: <defaults>
</compile_context>

<pallas_src>
import functools

import jax
import jax.numpy as jnp
from jax import lax
from jax.experimental import pallas as pl
from jax.experimental.pallas import tpu as pltpu

# Keep the pure-JAX reference matmuls in true f32 so the 1e-4 check is meaningful.
jax.config.update("jax_default_matmul_precision", "highest")

PAD_TOKEN = 0


def _encoder_kernel(S, B, H,
                    x0f_ref, x0b_ref, mask_ref,
                    whh0f_ref, whh0b_ref,
                    w1ff_ref, w1fb_ref, w1bf_ref, w1bb_ref,
                    whh1f_ref, whh1b_ref, b1_ref,
                    wfc_ref, bfc_ref,
                    outf_ref, outb_ref, hid_ref,
                    l0f_buf, l0b_buf, x1f_buf, x1b_buf):
    f32 = jnp.float32

    def lstm_cell(inproj, h, c, whh):
        # inproj already contains x @ W_ih^T + b_ih + b_hh (hoisted out of loop).
        gates = inproj + jnp.dot(h, whh, preferred_element_type=f32)   # [B, 4H]
        sig = jax.nn.sigmoid(gates)        # one EUP pass over the whole tile
        th = jnp.tanh(gates)
        i = sig[:, 0:H]
        f = sig[:, H:2 * H]
        g = th[:, 2 * H:3 * H]
        o = sig[:, 3 * H:4 * H]
        c_new = f * c + i * g
        h_new = o * jnp.tanh(c_new)
        return h_new, c_new

    def run_layer(xf_ref, xb_ref, whhf_ref, whhb_ref, of_ref, ob_ref):
        """One bidirectional layer; fwd (t=s) and bwd (t=S-1-s) interleaved."""
        whh_f = whhf_ref[...]
        whh_b = whhb_ref[...]

        def step(s, carry):
            hf, cf, hb, cb = carry
            tf = s
            tb = S - 1 - s
            mf = mask_ref[tf] > 0.5                     # [B,1] bool, 1 = valid
            mb = mask_ref[tb] > 0.5
            hf_new, cf_new = lstm_cell(xf_ref[tf], hf, cf, whh_f)
            hb_new, cb_new = lstm_cell(xb_ref[tb], hb, cb, whh_b)
            of_ref[tf] = jnp.where(mf, hf_new, 0.0)     # padded steps -> 0
            ob_ref[tb] = jnp.where(mb, hb_new, 0.0)
            hf = jnp.where(mf, hf_new, hf)              # freeze state when padded
            cf = jnp.where(mf, cf_new, cf)
            hb = jnp.where(mb, hb_new, hb)
            cb = jnp.where(mb, cb_new, cb)
            return hf, cf, hb, cb

        zero = jnp.zeros((B, H), f32)
        hf, _, hb, _ = lax.fori_loop(0, S, step, (zero, zero, zero, zero),
                                     unroll=True)
        return hf, hb

    # ---- layer 0: x-projection (embedding + biases already folded in) ----
    run_layer(x0f_ref, x0b_ref, whh0f_ref, whh0b_ref, l0f_buf, l0b_buf)

    # ---- hoisted layer-1 input projection: batched over all timesteps ----
    l0f = l0f_buf[...].reshape(S * B, H)
    l0b = l0b_buf[...].reshape(S * B, H)
    x1f = (jnp.dot(l0f, w1ff_ref[...], preferred_element_type=f32)
           + jnp.dot(l0b, w1fb_ref[...], preferred_element_type=f32)
           + b1_ref[pl.ds(0, 1), :])
    x1b = (jnp.dot(l0f, w1bf_ref[...], preferred_element_type=f32)
           + jnp.dot(l0b, w1bb_ref[...], preferred_element_type=f32)
           + b1_ref[pl.ds(1, 1), :])
    x1f_buf[...] = x1f.reshape(S, B, 4 * H)
    x1b_buf[...] = x1b.reshape(S, B, 4 * H)

    # ---- layer 1 (top): outputs written straight to the two output refs ----
    h_fwd, h_bwd = run_layer(x1f_buf, x1b_buf, whh1f_ref, whh1b_ref,
                             outf_ref, outb_ref)

    # ---- hidden = tanh(fc(cat(h_fwd_top, h_bwd_top))).unsqueeze(0) ----
    hc = jnp.concatenate([h_fwd, h_bwd], axis=1)                     # [B, 2H]
    hid_ref[0] = jnp.tanh(jnp.dot(hc, wfc_ref[...],
                                  preferred_element_type=f32) + bfc_ref[...])


def encoder_forward(src, src_lengths, params):
    """src: [B, S] int token ids (batch-first, like the PyTorch call site)."""
    B, S = src.shape
    H = params["fc_w"].shape[0]
    f32 = jnp.float32

    # Fold embedding + W_ih_l0 + fused biases into per-direction [V,4H] tables
    # and gather by token id (deletes the one-hot and all layer-0 x-matmuls).
    def l0_table(rev):
        suf = "_l0" + ("_rev" if rev else "")
        return (params["emb"] @ params["w_ih" + suf].T
                + params["b_ih" + suf] + params["b_hh" + suf]).astype(f32)

    tok = src.T                                                  # [S, B]
    x0f = jnp.take(l0_table(False), tok, axis=0)                 # [S, B, 4H]
    x0b = jnp.take(l0_table(True), tok, axis=0)

    # validity mask (packed-sequence emulation), [S, B, 1]
    mask = (jnp.arange(S)[:, None] < src_lengths[None, :]).astype(f32)[:, :, None]

    def whh_t(layer, rev):
        suf = f"_l{layer}" + ("_rev" if rev else "")
        return params["w_hh" + suf].T                            # [H, 4H]

    def wih1_split(rev):
        suf = "_l1" + ("_rev" if rev else "")
        w = params["w_ih" + suf].T                               # [2H, 4H]
        return w[:H], w[H:]                                      # (fwd half, bwd half)

    w1ff, w1fb = wih1_split(False)
    w1bf, w1bb = wih1_split(True)
    b1 = jnp.stack([params["b_ih_l1"] + params["b_hh_l1"],
                    params["b_ih_l1_rev"] + params["b_hh_l1_rev"]], axis=0)  # [2,4H]

    args = (x0f, x0b, mask,
            whh_t(0, False), whh_t(0, True),
            w1ff, w1fb, w1bf, w1bb,
            whh_t(1, False), whh_t(1, True), b1,
            params["fc_w"].T, params["fc_b"][None, :])

    kernel = functools.partial(_encoder_kernel, S, B, H)
    vmem = lambda: pl.BlockSpec(memory_space=pltpu.MemorySpace.VMEM)

    out_f, out_b, hidden = pl.pallas_call(
        kernel,
        out_shape=(jax.ShapeDtypeStruct((S, B, H), f32),         # top-layer fwd
                   jax.ShapeDtypeStruct((S, B, H), f32),         # top-layer bwd
                   jax.ShapeDtypeStruct((1, B, H), f32)),        # tanh(fc(.))
        in_specs=[vmem() for _ in args],
        out_specs=(vmem(), vmem(), vmem()),
        scratch_shapes=[pltpu.VMEM((S, B, H), f32),              # layer-0 fwd outs
                        pltpu.VMEM((S, B, H), f32),              # layer-0 bwd outs
                        pltpu.VMEM((S, B, 4 * H), f32),          # layer-1 fwd in-proj
                        pltpu.VMEM((S, B, 4 * H), f32)],         # layer-1 bwd in-proj
    )(*args)

    outputs = jnp.concatenate([out_f, out_b], axis=-1)           # [S, B, 2H]
    return outputs, hidden


def reference_forward(src, src_lengths, params):
    """Pure-JAX reference mirroring the PyTorch Encoder.forward (eval mode)."""
    H = params["fc_w"].shape[0]
    B, S = src.shape
    x = jnp.transpose(params["emb"][src], (1, 0, 2))                      # [S, B, E]
    mask = (jnp.arange(S)[:, None] < src_lengths[None, :]).astype(jnp.float32)

    def run_dir(x_seq, w_ih, w_hh, b_ih, b_hh, reverse):
        h = jnp.zeros((B, H), jnp.float32)
        c = jnp.zeros((B, H), jnp.float32)
        outs = [None] * S
        ts = range(S - 1, -1, -1) if reverse else range(S)
        for t in ts:
            m = mask[t][:, None]
            g = x_seq[t] @ w_ih.T + b_ih + h @ w_hh.T + b_hh
            i = jax.nn.sigmoid(g[:, 0:H]); f = jax.nn.sigmoid(g[:, H:2 * H])
            gg = jnp.tanh(g[:, 2 * H:3 * H]); o = jax.nn.sigmoid(g[:, 3 * H:4 * H])
            c_new = f * c + i * gg
            h_new = o * jnp.tanh(c_new)
            outs[t] = m * h_new
            h = m * h_new + (1.0 - m) * h
            c = m * c_new + (1.0 - m) * c
        return jnp.stack(outs, axis=0), h

    layer_in = x
    h_fwd = h_bwd = None
    for l in range(2):
        of, h_fwd = run_dir(layer_in, params[f"w_ih_l{l}"], params[f"w_hh_l{l}"],
                            params[f"b_ih_l{l}"], params[f"b_hh_l{l}"], False)
        ob, h_bwd = run_dir(layer_in, params[f"w_ih_l{l}_rev"], params[f"w_hh_l{l}_rev"],
                            params[f"b_ih_l{l}_rev"], params[f"b_hh_l{l}_rev"], True)
        layer_in = jnp.concatenate([of, ob], axis=-1)
    outputs = layer_in                                                    # [S, B, 2H]
    hidden = jnp.tanh(jnp.concatenate([h_fwd, h_bwd], axis=1) @ params["fc_w"].T
                      + params["fc_b"])
    return outputs, hidden[None]


if __name__ == "__main__":
    B, S, V, E, H = 2, 8, 32, 16, 32

    key = jax.random.PRNGKey(0)
    ks = iter(jax.random.split(key, 32))

    def u(shape, scale=0.1):
        return jax.random.uniform(next(ks), shape, jnp.float32, -scale, scale)

    params = {
        "emb": u((V, E)).at[PAD_TOKEN].set(0.0),        # padding_idx row is zero
        "fc_w": u((H, 2 * H)),
        "fc_b": u((H,)),
    }
    for layer, in_dim in ((0, E), (1, 2 * H)):
        for suf in ("", "_rev"):
            params[f"w_ih_l{layer}{suf}"] = u((4 * H, in_dim))
            params[f"w_hh_l{layer}{suf}"] = u((4 * H, H))
            params[f"b_ih_l{layer}{suf}"] = u((4 * H,))
            params[f"b_hh_l{layer}{suf}"] = u((4 * H,))

    src_lengths = jnp.array([S, 5], dtype=jnp.int32)    # max length == S
    src = jax.random.randint(next(ks), (B, S), 1, V).astype(jnp.int32)
    valid = jnp.arange(S)[None, :] < src_lengths[:, None]
    src = jnp.where(valid, src, PAD_TOKEN)              # pad tail with PAD token

    outputs, hidden = encoder_forward(src, src_lengths, params)
    jax.block_until_ready((outputs, hidden))

    out_r, hid_r = reference_forward(src, src_lengths, params)
    assert outputs.shape == (S, B, 2 * H) and hidden.shape == (1, B, H)
    assert jnp.allclose(outputs, out_r, atol=1e-4, rtol=1e-4)
    assert jnp.allclose(hidden, hid_r, atol=1e-4, rtol=1e-4)

    print("KERNEL_OK")
</pallas_src>

<mosaic_0001>
module attributes {stable_mosaic.version = 11 : i64} {
  func.func @_encoder_kernel(%arg0: memref<8x2x128xf32, #tpu.memory_space<vmem>>, %arg1: memref<8x2x128xf32, #tpu.memory_space<vmem>>, %arg2: memref<8x2x1xf32, #tpu.memory_space<vmem>>, %arg3: memref<32x128xf32, #tpu.memory_space<vmem>>, %arg4: memref<32x128xf32, #tpu.memory_space<vmem>>, %arg5: memref<32x128xf32, #tpu.memory_space<vmem>>, %arg6: memref<32x128xf32, #tpu.memory_space<vmem>>, %arg7: memref<32x128xf32, #tpu.memory_space<vmem>>, %arg8: memref<32x128xf32, #tpu.memory_space<vmem>>, %arg9: memref<32x128xf32, #tpu.memory_space<vmem>>, %arg10: memref<32x128xf32, #tpu.memory_space<vmem>>, %arg11: memref<2x128xf32, #tpu.memory_space<vmem>>, %arg12: memref<64x32xf32, #tpu.memory_space<vmem>>, %arg13: memref<1x32xf32, #tpu.memory_space<vmem>>, %arg14: memref<8x2x32xf32, #tpu.memory_space<vmem>>, %arg15: memref<8x2x32xf32, #tpu.memory_space<vmem>>, %arg16: memref<1x2x32xf32, #tpu.memory_space<vmem>>, %arg17: memref<8x2x32xf32, #tpu.memory_space<vmem>>, %arg18: memref<8x2x32xf32, #tpu.memory_space<vmem>>, %arg19: memref<8x2x128xf32, #tpu.memory_space<vmem>>, %arg20: memref<8x2x128xf32, #tpu.memory_space<vmem>>) attributes {dimension_semantics = [], scalar_prefetch = 0 : i64, scratch_operands = 4 : i64, tpu.core_type = #tpu.core_type<tc>} {
    %c0 = arith.constant 0 : index
    %c0_0 = arith.constant 0 : index
    %0 = vector.load %arg3[%c0, %c0_0] : memref<32x128xf32, #tpu.memory_space<vmem>>, vector<32x128xf32>
    %c0_1 = arith.constant 0 : index
    %c0_2 = arith.constant 0 : index
    %1 = vector.load %arg4[%c0_1, %c0_2] : memref<32x128xf32, #tpu.memory_space<vmem>>, vector<32x128xf32>
    %cst = arith.constant 0.000000e+00 : f32
    %2 = vector.broadcast %cst : f32 to vector<2x32xf32>
    %c0_i32 = arith.constant 0 : i32
    %c7_i32 = arith.constant 7 : i32
    %3 = arith.subi %c7_i32, %c0_i32 : i32
    %4 = arith.index_cast %c0_i32 : i32 to index
    %c0_3 = arith.constant 0 : index
    %c0_4 = arith.constant 0 : index
    %5 = vector.load %arg2[%4, %c0_3, %c0_4] : memref<8x2x1xf32, #tpu.memory_space<vmem>>, vector<1x2x1xf32>
    %6 = vector.shape_cast %5 : vector<1x2x1xf32> to vector<2x1xf32>
    %cst_5 = arith.constant 5.000000e-01 : f32
    %7 = vector.broadcast %cst_5 : f32 to vector<2x1xf32>
    %8 = arith.cmpf ogt, %6, %7 : vector<2x1xf32>
    %9 = arith.index_cast %3 : i32 to index
    %c0_6 = arith.constant 0 : index
    %c0_7 = arith.constant 0 : index
    %10 = vector.load %arg2[%9, %c0_6, %c0_7] : memref<8x2x1xf32, #tpu.memory_space<vmem>>, vector<1x2x1xf32>
    %11 = vector.shape_cast %10 : vector<1x2x1xf32> to vector<2x1xf32>
    %cst_8 = arith.constant 5.000000e-01 : f32
    %12 = vector.broadcast %cst_8 : f32 to vector<2x1xf32>
    %13 = arith.cmpf ogt, %11, %12 : vector<2x1xf32>
    %14 = arith.index_cast %c0_i32 : i32 to index
    %c0_9 = arith.constant 0 : index
    %c0_10 = arith.constant 0 : index
    %15 = vector.load %arg0[%14, %c0_9, %c0_10] : memref<8x2x128xf32, #tpu.memory_space<vmem>>, vector<1x2x128xf32>
    %16 = vector.shape_cast %15 : vector<1x2x128xf32> to vector<2x128xf32>
    %cst_11 = arith.constant dense<0.000000e+00> : vector<2x128xf32>
    %17 = tpu.matmul %2, %0, %cst_11 {dimension_numbers = #tpu.dot_dimension_numbers<[1], [0], [0], [1], [0, 0, 1, 1], [], []>, precision = #tpu.contract_precision<fp32>} : vector<2x32xf32>, vector<32x128xf32>, vector<2x128xf32> -> vector<2x128xf32>
    %18 = arith.addf %16, %17 : vector<2x128xf32>
    %19 = arith.negf %18 : vector<2x128xf32>
    %20 = math.exp %19 : vector<2x128xf32>
    %cst_12 = arith.constant 1.000000e+00 : f32
    %21 = vector.broadcast %cst_12 : f32 to vector<2x128xf32>
    %22 = arith.addf %21, %20 : vector<2x128xf32>
    %23 = arith.divf %21, %22 : vector<2x128xf32>
    %24 = math.tanh %18 : vector<2x128xf32>
    %25 = vector.extract_strided_slice %23 {offsets = [0, 0], sizes = [2, 32], strides = [1, 1]} : vector<2x128xf32> to vector<2x32xf32>
    %26 = vector.extract_strided_slice %23 {offsets = [0, 32], sizes = [2, 32], strides = [1, 1]} : vector<2x128xf32> to vector<2x32xf32>
    %27 = vector.extract_strided_slice %24 {offsets = [0, 64], sizes = [2, 32], strides = [1, 1]} : vector<2x128xf32> to vector<2x32xf32>
    %28 = vector.extract_strided_slice %23 {offsets = [0, 96], sizes = [2, 32], strides = [1, 1]} : vector<2x128xf32> to vector<2x32xf32>
    %29 = arith.mulf %26, %2 : vector<2x32xf32>
    %30 = arith.mulf %25, %27 : vector<2x32xf32>
    %31 = arith.addf %29, %30 : vector<2x32xf32>
    %32 = math.tanh %31 : vector<2x32xf32>
    %33 = arith.mulf %28, %32 : vector<2x32xf32>
    %34 = arith.index_cast %3 : i32 to index
    %c0_13 = arith.constant 0 : index
    %c0_14 = arith.constant 0 : index
    %35 = vector.load %arg1[%34, %c0_13, %c0_14] : memref<8x2x128xf32, #tpu.memory_space<vmem>>, vector<1x2x128xf32>
    %36 = vector.shape_cast %35 : vector<1x2x128xf32> to vector<2x128xf32>
    %cst_15 = arith.constant dense<0.000000e+00> : vector<2x128xf32>
    %37 = tpu.matmul %2, %1, %cst_15 {dimension_numbers = #tpu.dot_dimension_numbers<[1], [0], [0], [1], [0, 0, 1, 1], [], []>, precision = #tpu.contract_precision<fp32>} : vector<2x32xf32>, vector<32x128xf32>, vector<2x128xf32> -> vector<2x128xf32>
    %38 = arith.addf %36, %37 : vector<2x128xf32>
    %39 = arith.negf %38 : vector<2x128xf32>
    %40 = math.exp %39 : vector<2x128xf32>
    %cst_16 = arith.constant 1.000000e+00 : f32
    %41 = vector.broadcast %cst_16 : f32 to vector<2x128xf32>
    %42 = arith.addf %41, %40 : vector<2x128xf32>
    %43 = arith.divf %41, %42 : vector<2x128xf32>
    %44 = math.tanh %38 : vector<2x128xf32>
    %45 = vector.extract_strided_slice %43 {offsets = [0, 0], sizes = [2, 32], strides = [1, 1]} : vector<2x128xf32> to vector<2x32xf32>
    %46 = vector.extract_strided_slice %43 {offsets = [0, 32], sizes = [2, 32], strides = [1, 1]} : vector<2x128xf32> to vector<2x32xf32>
    %47 = vector.extract_strided_slice %44 {offsets = [0, 64], sizes = [2, 32], strides = [1, 1]} : vector<2x128xf32> to vector<2x32xf32>
    %48 = vector.extract_strided_slice %43 {offsets = [0, 96], sizes = [2, 32], strides = [1, 1]} : vector<2x128xf32> to vector<2x32xf32>
    %49 = arith.mulf %46, %2 : vector<2x32xf32>
    %50 = arith.mulf %45, %47 : vector<2x32xf32>
    %51 = arith.addf %49, %50 : vector<2x32xf32>
    %52 = math.tanh %51 : vector<2x32xf32>
    %53 = arith.mulf %48, %52 : vector<2x32xf32>
    %cst_17 = arith.constant 0.000000e+00 : f32
    %54 = vector.shape_cast %8 : vector<2x1xi1> to vector<2x1xi1>
    %55 = vector.broadcast %54 : vector<2x1xi1> to vector<2x32xi1>
    %56 = vector.broadcast %cst_17 : f32 to vector<2x32xf32>
    %57 = arith.select %55, %33, %56 : vector<2x32xi1>, vector<2x32xf32>
    %58 = arith.index_cast %c0_i32 : i32 to index
    %c0_18 = arith.constant 0 : index
    %c0_19 = arith.constant 0 : index
    %59 = vector.load %arg17[%58, %c0_18, %c0_19] : memref<8x2x32xf32, #tpu.memory_space<vmem>>, vector<1x2x32xf32>
    %60 = vector.shape_cast %59 : vector<1x2x32xf32> to vector<2x32xf32>
    %61 = vector.shape_cast %57 : vector<2x32xf32> to vector<1x2x32xf32>
    tpu.vector_store %arg17[%58, %c0_18, %c0_19], %61 {strides = array<i32>} : memref<8x2x32xf32, #tpu.memory_space<vmem>>, vector<1x2x32xf32>,
    %cst_20 = arith.constant 0.000000e+00 : f32
    %62 = vector.shape_cast %13 : vector<2x1xi1> to vector<2x1xi1>
    %63 = vector.broadcast %62 : vector<2x1xi1> to vector<2x32xi1>
    %64 = vector.broadcast %cst_20 : f32 to vector<2x32xf32>
    %65 = arith.select %63, %53, %64 : vector<2x32xi1>, vector<2x32xf32>
    %66 = arith.index_cast %3 : i32 to index
    %c0_21 = arith.constant 0 : index
    %c0_22 = arith.constant 0 : index
    %67 = vector.load %arg18[%66, %c0_21, %c0_22] : memref<8x2x32xf32, #tpu.memory_space<vmem>>, vector<1x2x32xf32>
    %68 = vector.shape_cast %67 : vector<1x2x32xf32> to vector<2x32xf32>
    %69 = vector.shape_cast %65 : vector<2x32xf32> to vector<1x2x32xf32>
    tpu.vector_store %arg18[%66, %c0_21, %c0_22], %69 {strides = array<i32>} : memref<8x2x32xf32, #tpu.memory_space<vmem>>, vector<1x2x32xf32>,
    %70 = vector.shape_cast %8 : vector<2x1xi1> to vector<2x1xi1>
    %71 = vector.broadcast %70 : vector<2x1xi1> to vector<2x32xi1>
    %72 = arith.select %71, %33, %2 : vector<2x32xi1>, vector<2x32xf32>
    %73 = vector.shape_cast %8 : vector<2x1xi1> to vector<2x1xi1>
    %74 = vector.broadcast %73 : vector<2x1xi1> to vector<2x32xi1>
    %75 = arith.select %74, %31, %2 : vector<2x32xi1>, vector<2x32xf32>
    %76 = vector.shape_cast %13 : vector<2x1xi1> to vector<2x1xi1>
    %77 = vector.broadcast %76 : vector<2x1xi1> to vector<2x32xi1>
    %78 = arith.select %77, %53, %2 : vector<2x32xi1>, vector<2x32xf32>
    %79 = vector.shape_cast %13 : vector<2x1xi1> to vector<2x1xi1>
    %80 = vector.broadcast %79 : vector<2x1xi1> to vector<2x32xi1>
    %81 = arith.select %80, %51, %2 : vector<2x32xi1>, vector<2x32xf32>
    %c1_i32 = arith.constant 1 : i32
    %c7_i32_23 = arith.constant 7 : i32
    %82 = arith.subi %c7_i32_23, %c1_i32 : i32
    %83 = arith.index_cast %c1_i32 : i32 to index
    %c0_24 = arith.constant 0 : index
    %c0_25 = arith.constant 0 : index
    %84 = vector.load %arg2[%83, %c0_24, %c0_25] : memref<8x2x1xf32, #tpu.memory_space<vmem>>, vector<1x2x1xf32>
    %85 = vector.shape_cast %84 : vector<1x2x1xf32> to vector<2x1xf32>
    %cst_26 = arith.constant 5.000000e-01 : f32
    %86 = vector.broadcast %cst_26 : f32 to vector<2x1xf32>
    %87 = arith.cmpf ogt, %85, %86 : vector<2x1xf32>
    %88 = arith.index_cast %82 : i32 to index
    %c0_27 = arith.constant 0 : index
    %c0_28 = arith.constant 0 : index
    %89 = vector.load %arg2[%88, %c0_27, %c0_28] : memref<8x2x1xf32, #tpu.memory_space<vmem>>, vector<1x2x1xf32>
    %90 = vector.shape_cast %89 : vector<1x2x1xf32> to vector<2x1xf32>
    %cst_29 = arith.constant 5.000000e-01 : f32
    %91 = vector.broadcast %cst_29 : f32 to vector<2x1xf32>
    %92 = arith.cmpf ogt, %90, %91 : vector<2x1xf32>
    %93 = arith.index_cast %c1_i32 : i32 to index
    %c0_30 = arith.constant 0 : index
    %c0_31 = arith.constant 0 : index
    %94 = vector.load %arg0[%93, %c0_30, %c0_31] : memref<8x2x128xf32, #tpu.memory_space<vmem>>, vector<1x2x128xf32>
    %95 = vector.shape_cast %94 : vector<1x2x128xf32> to vector<2x128xf32>
    %cst_32 = arith.constant dense<0.000000e+00> : vector<2x128xf32>
    %96 = tpu.matmul %72, %0, %cst_32 {dimension_numbers = #tpu.dot_dimension_numbers<[1], [0], [0], [1], [0, 0, 1, 1], [], []>, precision = #tpu.contract_precision<fp32>} : vector<2x32xf32>, vector<32x128xf32>, vector<2x128xf32> -> vector<2x128xf32>
    %97 = arith.addf %95, %96 : vector<2x128xf32>
    %98 = arith.negf %97 : vector<2x128xf32>
    %99 = math.exp %98 : vector<2x128xf32>
    %cst_33 = arith.constant 1.000000e+00 : f32
    %100 = vector.broadcast %cst_33 : f32 to vector<2x128xf32>
    %101 = arith.addf %100, %99 : vector<2x128xf32>
    %102 = arith.divf %100, %101 : vector<2x128xf32>
    %103 = math.tanh %97 : vector<2x128xf32>
    %104 = vector.extract_strided_slice %102 {offsets = [0, 0], sizes = [2, 32], strides = [1, 1]} : vector<2x128xf32> to vector<2x32xf32>
    %105 = vector.extract_strided_slice %102 {offsets = [0, 32], sizes = [2, 32], strides = [1, 1]} : vector<2x128xf32> to vector<2x32xf32>
    %106 = vector.extract_strided_slice %103 {offsets = [0, 64], sizes = [2, 32], strides = [1, 1]} : vector<2x128xf32> to vector<2x32xf32>
    %107 = vector.extract_strided_slice %102 {offsets = [0, 96], sizes = [2, 32], strides = [1, 1]} : vector<2x128xf32> to vector<2x32xf32>
    %108 = arith.mulf %105, %75 : vector<2x32xf32>
    %109 = arith.mulf %104, %106 : vector<2x32xf32>
    %110 = arith.addf %108, %109 : vector<2x32xf32>
    %111 = math.tanh %110 : vector<2x32xf32>
    %112 = arith.mulf %107, %111 : vector<2x32xf32>
    %113 = arith.index_cast %82 : i32 to index
    %c0_34 = arith.constant 0 : index
    %c0_35 = arith.constant 0 : index
    %114 = vector.load %arg1[%113, %c0_34, %c0_35] : memref<8x2x128xf32, #tpu.memory_space<vmem>>, vector<1x2x128xf32>
    %115 = vector.shape_cast %114 : vector<1x2x128xf32> to vector<2x128xf32>
    %cst_36 = arith.constant dense<0.000000e+00> : vector<2x128xf32>
    %116 = tpu.matmul %78, %1, %cst_36 {dimension_numbers = #tpu.dot_dimension_numbers<[1], [0], [0], [1], [0, 0, 1, 1], [], []>, precision = #tpu.contract_precision<fp32>} : vector<2x32xf32>, vector<32x128xf32>, vector<2x128xf32> -> vector<2x128xf32>
    %117 = arith.addf %115, %116 : vector<2x128xf32>
    %118 = arith.negf %117 : vector<2x128xf32>
    %119 = math.exp %118 : vector<2x128xf32>
    %cst_37 = arith.constant 1.000000e+00 : f32
    %120 = vector.broadcast %cst_37 : f32 to vector<2x128xf32>
    %121 = arith.addf %120, %119 : vector<2x128xf32>
    %122 = arith.divf %120, %121 : vector<2x128xf32>
    %123 = math.tanh %117 : vector<2x128xf32>
    %124 = vector.extract_strided_slice %122 {offsets = [0, 0], sizes = [2, 32], strides = [1, 1]} : vector<2x128xf32> to vector<2x32xf32>
    %125 = vector.extract_strided_slice %122 {offsets = [0, 32], sizes = [2, 32], strides = [1, 1]} : vector<2x128xf32> to vector<2x32xf32>
    %126 = vector.extract_strided_slice %123 {offsets = [0, 64], sizes = [2, 32], strides = [1, 1]} : vector<2x128xf32> to vector<2x32xf32>
    %127 = vector.extract_strided_slice %122 {offsets = [0, 96], sizes = [2, 32], strides = [1, 1]} : vector<2x128xf32> to vector<2x32xf32>
    %128 = arith.mulf %125, %81 : vector<2x32xf32>
    %129 = arith.mulf %124, %126 : vector<2x32xf32>
    %130 = arith.addf %128, %129 : vector<2x32xf32>
    %131 = math.tanh %130 : vector<2x32xf32>
    %132 = arith.mulf %127, %131 : vector<2x32xf32>
    %cst_38 = arith.constant 0.000000e+00 : f32
    %133 = vector.shape_cast %87 : vector<2x1xi1> to vector<2x1xi1>
    %134 = vector.broadcast %133 : vector<2x1xi1> to vector<2x32xi1>
    %135 = vector.broadcast %cst_38 : f32 to vector<2x32xf32>
    %136 = arith.select %134, %112, %135 : vector<2x32xi1>, vector<2x32xf32>
    %137 = arith.index_cast %c1_i32 : i32 to index
    %c0_39 = arith.constant 0 : index
    %c0_40 = arith.constant 0 : index
    %138 = vector.load %arg17[%137, %c0_39, %c0_40] : memref<8x2x32xf32, #tpu.memory_space<vmem>>, vector<1x2x32xf32>
    %139 = vector.shape_cast %138 : vector<1x2x32xf32> to vector<2x32xf32>
    %140 = vector.shape_cast %136 : vector<2x32xf32> to vector<1x2x32xf32>
    tpu.vector_store %arg17[%137, %c0_39, %c0_40], %140 {strides = array<i32>} : memref<8x2x32xf32, #tpu.memory_space<vmem>>, vector<1x2x32xf32>,
    %cst_41 = arith.constant 0.000000e+00 : f32
    %141 = vector.shape_cast %92 : vector<2x1xi1> to vector<2x1xi1>
    %142 = vector.broadcast %141 : vector<2x1xi1> to vector<2x32xi1>
    %143 = vector.broadcast %cst_41 : f32 to vector<2x32xf32>
    %144 = arith.select %142, %132, %143 : vector<2x32xi1>, vector<2x32xf32>
    %145 = arith.index_cast %82 : i32 to index
    %c0_42 = arith.constant 0 : index
    %c0_43 = arith.constant 0 : index
    %146 = vector.load %arg18[%145, %c0_42, %c0_43] : memref<8x2x32xf32, #tpu.memory_space<vmem>>, vector<1x2x32xf32>
    %147 = vector.shape_cast %146 : vector<1x2x32xf32> to vector<2x32xf32>
    %148 = vector.shape_cast %144 : vector<2x32xf32> to vector<1x2x32xf32>
    tpu.vector_store %arg18[%145, %c0_42, %c0_43], %148 {strides = array<i32>} : memref<8x2x32xf32, #tpu.memory_space<vmem>>, vector<1x2x32xf32>,
    %149 = vector.shape_cast %87 : vector<2x1xi1> to vector<2x1xi1>
    %150 = vector.broadcast %149 : vector<2x1xi1> to vector<2x32xi1>
    %151 = arith.select %150, %112, %72 : vector<2x32xi1>, vector<2x32xf32>
    %152 = vector.shape_cast %87 : vector<2x1xi1> to vector<2x1xi1>
    %153 = vector.broadcast %152 : vector<2x1xi1> to vector<2x32xi1>
    %154 = arith.select %153, %110, %75 : vector<2x32xi1>, vector<2x32xf32>
    %155 = vector.shape_cast %92 : vector<2x1xi1> to vector<2x1xi1>
    %156 = vector.broadcast %155 : vector<2x1xi1> to vector<2x32xi1>
    %157 = arith.select %156, %132, %78 : vector<2x32xi1>, vector<2x32xf32>
    %158 = vector.shape_cast %92 : vector<2x1xi1> to vector<2x1xi1>
    %159 = vector.broadcast %158 : vector<2x1xi1> to vector<2x32xi1>
    %160 = arith.select %159, %130, %81 : vector<2x32xi1>, vector<2x32xf32>
    %c2_i32 = arith.constant 2 : i32
    %c7_i32_44 = arith.constant 7 : i32
    %161 = arith.subi %c7_i32_44, %c2_i32 : i32
    %162 = arith.index_cast %c2_i32 : i32 to index
    %c0_45 = arith.constant 0 : index
    %c0_46 = arith.constant 0 : index
    %163 = vector.load %arg2[%162, %c0_45, %c0_46] : memref<8x2x1xf32, #tpu.memory_space<vmem>>, vector<1x2x1xf32>
    %164 = vector.shape_cast %163 : vector<1x2x1xf32> to vector<2x1xf32>
    %cst_47 = arith.constant 5.000000e-01 : f32
    %165 = vector.broadcast %cst_47 : f32 to vector<2x1xf32>
    %166 = arith.cmpf ogt, %164, %165 : vector<2x1xf32>
    %167 = arith.index_cast %161 : i32 to index
    %c0_48 = arith.constant 0 : index
    %c0_49 = arith.constant 0 : index
    %168 = vector.load %arg2[%167, %c0_48, %c0_49] : memref<8x2x1xf32, #tpu.memory_space<vmem>>, vector<1x2x1xf32>
    %169 = vector.shape_cast %168 : vector<1x2x1xf32> to vector<2x1xf32>
    %cst_50 = arith.constant 5.000000e-01 : f32
    %170 = vector.broadcast %cst_50 : f32 to vector<2x1xf32>
    %171 = arith.cmpf ogt, %169, %170 : vector<2x1xf32>
    %172 = arith.index_cast %c2_i32 : i32 to index
    %c0_51 = arith.constant 0 : index
    %c0_52 = arith.constant 0 : index
    %173 = vector.load %arg0[%172, %c0_51, %c0_52] : memref<8x2x128xf32, #tpu.memory_space<vmem>>, vector<1x2x128xf32>
    %174 = vector.shape_cast %173 : vector<1x2x128xf32> to vector<2x128xf32>
    %cst_53 = arith.constant dense<0.000000e+00> : vector<2x128xf32>
    %175 = tpu.matmul %151, %0, %cst_53 {dimension_numbers = #tpu.dot_dimension_numbers<[1], [0], [0], [1], [0, 0, 1, 1], [], []>, precision = #tpu.contract_precision<fp32>} : vector<2x32xf32>, vector<32x128xf32>, vector<2x128xf32> -> vector<2x128xf32>
    %176 = arith.addf %174, %175 : vector<2x128xf32>
    %177 = arith.negf %176 : vector<2x128xf32>
    %178 = math.exp %177 : vector<2x128xf32>
    %cst_54 = arith.constant 1.000000e+00 : f32
    %179 = vector.broadcast %cst_54 : f32 to vector<2x128xf32>
    %180 = arith.addf %179, %178 : vector<2x128xf32>
    %181 = arith.divf %179, %180 : vector<2x128xf32>
    %182 = math.tanh %176 : vector<2x128xf32>
    %183 = vector.extract_strided_slice %181 {offsets = [0, 0], sizes = [2, 32], strides = [1, 1]} : vector<2x128xf32> to vector<2x32xf32>
    %184 = vector.extract_strided_slice %181 {offsets = [0, 32], sizes = [2, 32], strides = [1, 1]} : vector<2x128xf32> to vector<2x32xf32>
    %185 = vector.extract_strided_slice %182 {offsets = [0, 64], sizes = [2, 32], strides = [1, 1]} : vector<2x128xf32> to vector<2x32xf32>
    %186 = vector.extract_strided_slice %181 {offsets = [0, 96], sizes = [2, 32], strides = [1, 1]} : vector<2x128xf32> to vector<2x32xf32>
    %187 = arith.mulf %184, %154 : vector<2x32xf32>
    %188 = arith.mulf %183, %185 : vector<2x32xf32>
    %189 = arith.addf %187, %188 : vector<2x32xf32>
    %190 = math.tanh %189 : vector<2x32xf32>
    %191 = arith.mulf %186, %190 : vector<2x32xf32>
    %192 = arith.index_cast %161 : i32 to index
    %c0_55 = arith.constant 0 : index
    %c0_56 = arith.constant 0 : index
    %193 = vector.load %arg1[%192, %c0_55, %c0_56] : memref<8x2x128xf32, #tpu.memory_space<vmem>>, vector<1x2x128xf32>
    %194 = vector.shape_cast %193 : vector<1x2x128xf32> to vector<2x128xf32>
    %cst_57 = arith.constant dense<0.000000e+00> : vector<2x128xf32>
    %195 = tpu.matmul %157, %1, %cst_57 {dimension_numbers = #tpu.dot_dimension_numbers<[1], [0], [0], [1], [0, 0, 1, 1], [], []>, precision = #tpu.contract_precision<fp32>} : vector<2x32xf32>, vector<32x128xf32>, vector<2x128xf32> -> vector<2x128xf32>
    %196 = arith.addf %194, %195 : vector<2x128xf32>
    %197 = arith.negf %196 : vector<2x128xf32>
    %198 = math.exp %197 : vector<2x128xf32>
    %cst_58 = arith.constant 1.000000e+00 : f32
    %199 = vector.broadcast %cst_58 : f32 to vector<2x128xf32>
    %200 = arith.addf %199, %198 : vector<2x128xf32>
    %201 = arith.divf %199, %200 : vector<2x128xf32>
    %202 = math.tanh %196 : vector<2x128xf32>
    %203 = vector.extract_strided_slice %201 {offsets = [0, 0], sizes = [2, 32], strides = [1, 1]} : vector<2x128xf32> to vector<2x32xf32>
    %204 = vector.extract_strided_slice %201 {offsets = [0, 32], sizes = [2, 32], strides = [1, 1]} : vector<2x128xf32> to vector<2x32xf32>
    %205 = vector.extract_strided_slice %202 {offsets = [0, 64], sizes = [2, 32], strides = [1, 1]} : vector<2x128xf32> to vector<2x32xf32>
    %206 = vector.extract_strided_slice %201 {offsets = [0, 96], sizes = [2, 32], strides = [1, 1]} : vector<2x128xf32> to vector<2x32xf32>
    %207 = arith.mulf %204, %160 : vector<2x32xf32>
    %208 = arith.mulf %203, %205 : vector<2x32xf32>
    %209 = arith.addf %207, %208 : vector<2x32xf32>
    %210 = math.tanh %209 : vector<2x32xf32>
    %211 = arith.mulf %206, %210 : vector<2x32xf32>
    %cst_59 = arith.constant 0.000000e+00 : f32
    %212 = vector.shape_cast %166 : vector<2x1xi1> to vector<2x1xi1>
    %213 = vector.broadcast %212 : vector<2x1xi1> to vector<2x32xi1>
    %214 = vector.broadcast %cst_59 : f32 to vector<2x32xf32>
    %215 = arith.select %213, %191, %214 : vector<2x32xi1>, vector<2x32xf32>
    %216 = arith.index_cast %c2_i32 : i32 to index
    %c0_60 = arith.constant 0 : index
    %c0_61 = arith.constant 0 : index
    %217 = vector.load %arg17[%216, %c0_60, %c0_61] : memref<8x2x32xf32, #tpu.memory_space<vmem>>, vector<1x2x32xf32>
    %218 = vector.shape_cast %217 : vector<1x2x32xf32> to vector<2x32xf32>
    %219 = vector.shape_cast %215 : vector<2x32xf32> to vector<1x2x32xf32>
    tpu.vector_store %arg17[%216, %c0_60, %c0_61], %219 {strides = array<i32>} : memref<8x2x32xf32, #tpu.memory_space<vmem>>, vector<1x2x32xf32>,
    %cst_62 = arith.constant 0.000000e+00 : f32
    %220 = vector.shape_cast %171 : vector<2x1xi1> to vector<2x1xi1>
    %221 = vector.broadcast %220 : vector<2x1xi1> to vector<2x32xi1>
    %222 = vector.broadcast %cst_62 : f32 to vector<2x32xf32>
    %223 = arith.select %221, %211, %222 : vector<2x32xi1>, vector<2x32xf32>
    %224 = arith.index_cast %161 : i32 to index
    %c0_63 = arith.constant 0 : index
    %c0_64 = arith.constant 0 : index
    %225 = vector.load %arg18[%224, %c0_63, %c0_64] : memref<8x2x32xf32, #tpu.memory_space<vmem>>, vector<1x2x32xf32>
    %226 = vector.shape_cast %225 : vector<1x2x32xf32> to vector<2x32xf32>
    %227 = vector.shape_cast %223 : vector<2x32xf32> to vector<1x2x32xf32>
    tpu.vector_store %arg18[%224, %c0_63, %c0_64], %227 {strides = array<i32>} : memref<8x2x32xf32, #tpu.memory_space<vmem>>, vector<1x2x32xf32>,
    %228 = vector.shape_cast %166 : vector<2x1xi1> to vector<2x1xi1>
    %229 = vector.broadcast %228 : vector<2x1xi1> to vector<2x32xi1>
    %230 = arith.select %229, %191, %151 : vector<2x32xi1>, vector<2x32xf32>
    %231 = vector.shape_cast %166 : vector<2x1xi1> to vector<2x1xi1>
    %232 = vector.broadcast %231 : vector<2x1xi1> to vector<2x32xi1>
    %233 = arith.select %232, %189, %154 : vector<2x32xi1>, vector<2x32xf32>
    %234 = vector.shape_cast %171 : vector<2x1xi1> to vector<2x1xi1>
    %235 = vector.broadcast %234 : vector<2x1xi1> to vector<2x32xi1>
    %236 = arith.select %235, %211, %157 : vector<2x32xi1>, vector<2x32xf32>
    %237 = vector.shape_cast %171 : vector<2x1xi1> to vector<2x1xi1>
    %238 = vector.broadcast %237 : vector<2x1xi1> to vector<2x32xi1>
    %239 = arith.select %238, %209, %160 : vector<2x32xi1>, vector<2x32xf32>
    %c3_i32 = arith.constant 3 : i32
    %c7_i32_65 = arith.constant 7 : i32
    %240 = arith.subi %c7_i32_65, %c3_i32 : i32
    %241 = arith.index_cast %c3_i32 : i32 to index
    %c0_66 = arith.constant 0 : index
    %c0_67 = arith.constant 0 : index
    %242 = vector.load %arg2[%241, %c0_66, %c0_67] : memref<8x2x1xf32, #tpu.memory_space<vmem>>, vector<1x2x1xf32>
    %243 = vector.shape_cast %242 : vector<1x2x1xf32> to vector<2x1xf32>
    %cst_68 = arith.constant 5.000000e-01 : f32
    %244 = vector.broadcast %cst_68 : f32 to vector<2x1xf32>
    %245 = arith.cmpf ogt, %243, %244 : vector<2x1xf32>
    %246 = arith.index_cast %240 : i32 to index
    %c0_69 = arith.constant 0 : index
    %c0_70 = arith.constant 0 : index
    %247 = vector.load %arg2[%246, %c0_69, %c0_70] : memref<8x2x1xf32, #tpu.memory_space<vmem>>, vector<1x2x1xf32>
    %248 = vector.shape_cast %247 : vector<1x2x1xf32> to vector<2x1xf32>
    %cst_71 = arith.constant 5.000000e-01 : f32
    %249 = vector.broadcast %cst_71 : f32 to vector<2x1xf32>
    %250 = arith.cmpf ogt, %248, %249 : vector<2x1xf32>
    %251 = arith.index_cast %c3_i32 : i32 to index
    %c0_72 = arith.constant 0 : index
    %c0_73 = arith.constant 0 : index
    %252 = vector.load %arg0[%251, %c0_72, %c0_73] : memref<8x2x128xf32, #tpu.memory_space<vmem>>, vector<1x2x128xf32>
    %253 = vector.shape_cast %252 : vector<1x2x128xf32> to vector<2x128xf32>
    %cst_74 = arith.constant dense<0.000000e+00> : vector<2x128xf32>
    %254 = tpu.matmul %230, %0, %cst_74 {dimension_numbers = #tpu.dot_dimension_numbers<[1], [0], [0], [1], [0, 0, 1, 1], [], []>, precision = #tpu.contract_precision<fp32>} : vector<2x32xf32>, vector<32x128xf32>, vector<2x128xf32> -> vector<2x128xf32>
    %255 = arith.addf %253, %254 : vector<2x128xf32>
    %256 = arith.negf %255 : vector<2x128xf32>
    %257 = math.exp %256 : vector<2x128xf32>
    %cst_75 = arith.constant 1.000000e+00 : f32
    %258 = vector.broadcast %cst_75 : f32 to vector<2x128xf32>
    %259 = arith.addf %258, %257 : vector<2x128xf32>
    %260 = arith.divf %258, %259 : vector<2x128xf32>
    %261 = math.tanh %255 : vector<2x128xf32>
    %262 = vector.extract_strided_slice %260 {offsets = [0, 0], sizes = [2, 32], strides = [1, 1]} : vector<2x128xf32> to vector<2x32xf32>
    %263 = vector.extract_strided_slice %260 {offsets = [0, 32], sizes = [2, 32], strides = [1, 1]} : vector<2x128xf32> to vector<2x32xf32>
    %264 = vector.extract_strided_slice %261 {offsets = [0, 64], sizes = [2, 32], strides = [1, 1]} : vector<2x128xf32> to vector<2x32xf32>
    %265 = vector.extract_strided_slice %260 {offsets = [0, 96], sizes = [2, 32], strides = [1, 1]} : vector<2x128xf32> to vector<2x32xf32>
    %266 = arith.mulf %263, %233 : vector<2x32xf32>
    %267 = arith.mulf %262, %264 : vector<2x32xf32>
    %268 = arith.addf %266, %267 : vector<2x32xf32>
    %269 = math.tanh %268 : vector<2x32xf32>
    %270 = arith.mulf %265, %269 : vector<2x32xf32>
    %271 = arith.index_cast %240 : i32 to index
    %c0_76 = arith.constant 0 : index
    %c0_77 = arith.constant 0 : index
    %272 = vector.load %arg1[%271, %c0_76, %c0_77] : memref<8x2x128xf32, #tpu.memory_space<vmem>>, vector<1x2x128xf32>
    %273 = vector.shape_cast %272 : vector<1x2x128xf32> to vector<2x128xf32>
    %cst_78 = arith.constant dense<0.000000e+00> : vector<2x128xf32>
    %274 = tpu.matmul %236, %1, %cst_78 {dimension_numbers = #tpu.dot_dimension_numbers<[1], [0], [0], [1], [0, 0, 1, 1], [], []>, precision = #tpu.contract_precision<fp32>} : vector<2x32xf32>, vector<32x128xf32>, vector<2x128xf32> -> vector<2x128xf32>
    %275 = arith.addf %273, %274 : vector<2x128xf32>
    %276 = arith.negf %275 : vector<2x128xf32>
    %277 = math.exp %276 : vector<2x128xf32>
    %cst_79 = arith.constant 1.000000e+00 : f32
    %278 = vector.broadcast %cst_79 : f32 to vector<2x128xf32>
    %279 = arith.addf %278, %277 : vector<2x128xf32>
    %280 = arith.divf %278, %279 : vector<2x128xf32>
    %281 = math.tanh %275 : vector<2x128xf32>
    %282 = vector.extract_strided_slice %280 {offsets = [0, 0], sizes = [2, 32], strides = [1, 1]} : vector<2x128xf32> to vector<2x32xf32>
    %283 = vector.extract_strided_slice %280 {offsets = [0, 32], sizes = [2, 32], strides = [1, 1]} : vector<2x128xf32> to vector<2x32xf32>
    %284 = vector.extract_strided_slice %281 {offsets = [0, 64], sizes = [2, 32], strides = [1, 1]} : vector<2x128xf32> to vector<2x32xf32>
    %285 = vector.extract_strided_slice %280 {offsets = [0, 96], sizes = [2, 32], strides = [1, 1]} : vector<2x128xf32> to vector<2x32xf32>
    %286 = arith.mulf %283, %239 : vector<2x32xf32>
    %287 = arith.mulf %282, %284 : vector<2x32xf32>
    %288 = arith.addf %286, %287 : vector<2x32xf32>
    %289 = math.tanh %288 : vector<2x32xf32>
    %290 = arith.mulf %285, %289 : vector<2x32xf32>
    %cst_80 = arith.constant 0.000000e+00 : f32
    %291 = vector.shape_cast %245 : vector<2x1xi1> to vector<2x1xi1>
    %292 = vector.broadcast %291 : vector<2x1xi1> to vector<2x32xi1>
    %293 = vector.broadcast %cst_80 : f32 to vector<2x32xf32>
    %294 = arith.select %292, %270, %293 : vector<2x32xi1>, vector<2x32xf32>
    %295 = arith.index_cast %c3_i32 : i32 to index
    %c0_81 = arith.constant 0 : index
    %c0_82 = arith.constant 0 : index
    %296 = vector.load %arg17[%295, %c0_81, %c0_82] : memref<8x2x32xf32, #tpu.memory_space<vmem>>, vector<1x2x32xf32>
    %297 = vector.shape_cast %296 : vector<1x2x32xf32> to vector<2x32xf32>
    %298 = vector.shape_cast %294 : vector<2x32xf32> to vector<1x2x32xf32>
    tpu.vector_store %arg17[%295, %c0_81, %c0_82], %298 {strides = array<i32>} : memref<8x2x32xf32, #tpu.memory_space<vmem>>, vector<1x2x32xf32>,
    %cst_83 = arith.constant 0.000000e+00 : f32
    %299 = vector.shape_cast %250 : vector<2x1xi1> to vector<2x1xi1>
    %300 = vector.broadcast %299 : vector<2x1xi1> to vector<2x32xi1>
    %301 = vector.broadcast %cst_83 : f32 to vector<2x32xf32>
    %302 = arith.select %300, %290, %301 : vector<2x32xi1>, vector<2x32xf32>
    %303 = arith.index_cast %240 : i32 to index
    %c0_84 = arith.constant 0 : index
    %c0_85 = arith.constant 0 : index
    %304 = vector.load %arg18[%303, %c0_84, %c0_85] : memref<8x2x32xf32, #tpu.memory_space<vmem>>, vector<1x2x32xf32>
    %305 = vector.shape_cast %304 : vector<1x2x32xf32> to vector<2x32xf32>
    %306 = vector.shape_cast %302 : vector<2x32xf32> to vector<1x2x32xf32>
    tpu.vector_store %arg18[%303, %c0_84, %c0_85], %306 {strides = array<i32>} : memref<8x2x32xf32, #tpu.memory_space<vmem>>, vector<1x2x32xf32>,
    %307 = vector.shape_cast %245 : vector<2x1xi1> to vector<2x1xi1>
    %308 = vector.broadcast %307 : vector<2x1xi1> to vector<2x32xi1>
    %309 = arith.select %308, %270, %230 : vector<2x32xi1>, vector<2x32xf32>
    %310 = vector.shape_cast %245 : vector<2x1xi1> to vector<2x1xi1>
    %311 = vector.broadcast %310 : vector<2x1xi1> to vector<2x32xi1>
    %312 = arith.select %311, %268, %233 : vector<2x32xi1>, vector<2x32xf32>
    %313 = vector.shape_cast %250 : vector<2x1xi1> to vector<2x1xi1>
    %314 = vector.broadcast %313 : vector<2x1xi1> to vector<2x32xi1>
    %315 = arith.select %314, %290, %236 : vector<2x32xi1>, vector<2x32xf32>
    %316 = vector.shape_cast %250 : vector<2x1xi1> to vector<2x1xi1>
    %317 = vector.broadcast %316 : vector<2x1xi1> to vector<2x32xi1>
    %318 = arith.select %317, %288, %239 : vector<2x32xi1>, vector<2x32xf32>
    %c4_i32 = arith.constant 4 : i32
    %c7_i32_86 = arith.constant 7 : i32
    %319 = arith.subi %c7_i32_86, %c4_i32 : i32
    %320 = arith.index_cast %c4_i32 : i32 to index
    %c0_87 = arith.constant 0 : index
    %c0_88 = arith.constant 0 : index
    %321 = vector.load %arg2[%320, %c0_87, %c0_88] : memref<8x2x1xf32, #tpu.memory_space<vmem>>, vector<1x2x1xf32>
    %322 = vector.shape_cast %321 : vector<1x2x1xf32> to vector<2x1xf32>
    %cst_89 = arith.constant 5.000000e-01 : f32
    %323 = vector.broadcast %cst_89 : f32 to vector<2x1xf32>
    %324 = arith.cmpf ogt, %322, %323 : vector<2x1xf32>
    %325 = arith.index_cast %319 : i32 to index
    %c0_90 = arith.constant 0 : index
    %c0_91 = arith.constant 0 : index
    %326 = vector.load %arg2[%325, %c0_90, %c0_91] : memref<8x2x1xf32, #tpu.memory_space<vmem>>, vector<1x2x1xf32>
    %327 = vector.shape_cast %326 : vector<1x2x1xf32> to vector<2x1xf32>
    %cst_92 = arith.constant 5.000000e-01 : f32
    %328 = vector.broadcast %cst_92 : f32 to vector<2x1xf32>
    %329 = arith.cmpf ogt, %327, %328 : vector<2x1xf32>
    %330 = arith.index_cast %c4_i32 : i32 to index
    %c0_93 = arith.constant 0 : index
    %c0_94 = arith.constant 0 : index
    %331 = vector.load %arg0[%330, %c0_93, %c0_94] : memref<8x2x128xf32, #tpu.memory_space<vmem>>, vector<1x2x128xf32>
    %332 = vector.shape_cast %331 : vector<1x2x128xf32> to vector<2x128xf32>
    %cst_95 = arith.constant dense<0.000000e+00> : vector<2x128xf32>
    %333 = tpu.matmul %309, %0, %cst_95 {dimension_numbers = #tpu.dot_dimension_numbers<[1], [0], [0], [1], [0, 0, 1, 1], [], []>, precision = #tpu.contract_precision<fp32>} : vector<2x32xf32>, vector<32x128xf32>, vector<2x128xf32> -> vector<2x128xf32>
    %334 = arith.addf %332, %333 : vector<2x128xf32>
    %335 = arith.negf %334 : vector<2x128xf32>
    %336 = math.exp %335 : vector<2x128xf32>
    %cst_96 = arith.constant 1.000000e+00 : f32
    %337 = vector.broadcast %cst_96 : f32 to vector<2x128xf32>
    %338 = arith.addf %337, %336 : vector<2x128xf32>
    %339 = arith.divf %337, %338 : vector<2x128xf32>
    %340 = math.tanh %334 : vector<2x128xf32>
    %341 = vector.extract_strided_slice %339 {offsets = [0, 0], sizes = [2, 32], strides = [1, 1]} : vector<2x128xf32> to vector<2x32xf32>
    %342 = vector.extract_strided_slice %339 {offsets = [0, 32], sizes = [2, 32], strides = [1, 1]} : vector<2x128xf32> to vector<2x32xf32>
    %343 = vector.extract_strided_slice %340 {offsets = [0, 64], sizes = [2, 32], strides = [1, 1]} : vector<2x128xf32> to vector<2x32xf32>
    %344 = vector.extract_strided_slice %339 {offsets = [0, 96], sizes = [2, 32], strides = [1, 1]} : vector<2x128xf32> to vector<2x32xf32>
    %345 = arith.mulf %342, %312 : vector<2x32xf32>
    %346 = arith.mulf %341, %343 : vector<2x32xf32>
    %347 = arith.addf %345, %346 : vector<2x32xf32>
    %348 = math.tanh %347 : vector<2x32xf32>
    %349 = arith.mulf %344, %348 : vector<2x32xf32>
    %350 = arith.index_cast %319 : i32 to index
    %c0_97 = arith.constant 0 : index
    %c0_98 = arith.constant 0 : index
    %351 = vector.load %arg1[%350, %c0_97, %c0_98] : memref<8x2x128xf32, #tpu.memory_space<vmem>>, vector<1x2x128xf32>
    %352 = vector.shape_cast %351 : vector<1x2x128xf32> to vector<2x128xf32>
    %cst_99 = arith.constant dense<0.000000e+00> : vector<2x128xf32>
    %353 = tpu.matmul %315, %1, %cst_99 {dimension_numbers = #tpu.dot_dimension_numbers<[1], [0], [0], [1], [0, 0, 1, 1], [], []>, precision = #tpu.contract_precision<fp32>} : vector<2x32xf32>, vector<32x128xf32>, vector<2x128xf32> -> vector<2x128xf32>
    %354 = arith.addf %352, %353 : vector<2x128xf32>
    %355 = arith.negf %354 : vector<2x128xf32>
    %356 = math.exp %355 : vector<2x128xf32>
    %cst_100 = arith.constant 1.000000e+00 : f32
    %357 = vector.broadcast %cst_100 : f32 to vector<2x128xf32>
    %358 = arith.addf %357, %356 : vector<2x128xf32>
    %359 = arith.divf %357, %358 : vector<2x128xf32>
    %360 = math.tanh %354 : vector<2x128xf32>
    %361 = vector.extract_strided_slice %359 {offsets = [0, 0], sizes = [2, 32], strides = [1, 1]} : vector<2x128xf32> to vector<2x32xf32>
    %362 = vector.extract_strided_slice %359 {offsets = [0, 32], sizes = [2, 32], strides = [1, 1]} : vector<2x128xf32> to vector<2x32xf32>
    %363 = vector.extract_strided_slice %360 {offsets = [0, 64], sizes = [2, 32], strides = [1, 1]} : vector<2x128xf32> to vector<2x32xf32>
    %364 = vector.extract_strided_slice %359 {offsets = [0, 96], sizes = [2, 32], strides = [1, 1]} : vector<2x128xf32> to vector<2x32xf32>
    %365 = arith.mulf %362, %318 : vector<2x32xf32>
    %366 = arith.mulf %361, %363 : vector<2x32xf32>
    %367 = arith.addf %365, %366 : vector<2x32xf32>
    %368 = math.tanh %367 : vector<2x32xf32>
    %369 = arith.mulf %364, %368 : vector<2x32xf32>
    %cst_101 = arith.constant 0.000000e+00 : f32
    %370 = vector.shape_cast %324 : vector<2x1xi1> to vector<2x1xi1>
    %371 = vector.broadcast %370 : vector<2x1xi1> to vector<2x32xi1>
    %372 = vector.broadcast %cst_101 : f32 to vector<2x32xf32>
    %373 = arith.select %371, %349, %372 : vector<2x32xi1>, vector<2x32xf32>
    %374 = arith.index_cast %c4_i32 : i32 to index
    %c0_102 = arith.constant 0 : index
    %c0_103 = arith.constant 0 : index
    %375 = vector.load %arg17[%374, %c0_102, %c0_103] : memref<8x2x32xf32, #tpu.memory_space<vmem>>, vector<1x2x32xf32>
    %376 = vector.shape_cast %375 : vector<1x2x32xf32> to vector<2x32xf32>
    %377 = vector.shape_cast %373 : vector<2x32xf32> to vector<1x2x32xf32>
    tpu.vector_store %arg17[%374, %c0_102, %c0_103], %377 {strides = array<i32>} : memref<8x2x32xf32, #tpu.memory_space<vmem>>, vector<1x2x32xf32>,
    %cst_104 = arith.constant 0.000000e+00 : f32
    %378 = vector.shape_cast %329 : vector<2x1xi1> to vector<2x1xi1>
    %379 = vector.broadcast %378 : vector<2x1xi1> to vector<2x32xi1>
    %380 = vector.broadcast %cst_104 : f32 to vector<2x32xf32>
    %381 = arith.select %379, %369, %380 : vector<2x32xi1>, vector<2x32xf32>
    %382 = arith.index_cast %319 : i32 to index
    %c0_105 = arith.constant 0 : index
    %c0_106 = arith.constant 0 : index
    %383 = vector.load %arg18[%382, %c0_105, %c0_106] : memref<8x2x32xf32, #tpu.memory_space<vmem>>, vector<1x2x32xf32>
    %384 = vector.shape_cast %383 : vector<1x2x32xf32> to vector<2x32xf32>
    %385 = vector.shape_cast %381 : vector<2x32xf32> to vector<1x2x32xf32>
    tpu.vector_store %arg18[%382, %c0_105, %c0_106], %385 {strides = array<i32>} : memref<8x2x32xf32, #tpu.memory_space<vmem>>, vector<1x2x32xf32>,
    %386 = vector.shape_cast %324 : vector<2x1xi1> to vector<2x1xi1>
    %387 = vector.broadcast %386 : vector<2x1xi1> to vector<2x32xi1>
    %388 = arith.select %387, %349, %309 : vector<2x32xi1>, vector<2x32xf32>
    %389 = vector.shape_cast %324 : vector<2x1xi1> to vector<2x1xi1>
    %390 = vector.broadcast %389 : vector<2x1xi1> to vector<2x32xi1>
    %391 = arith.select %390, %347, %312 : vector<2x32xi1>, vector<2x32xf32>
    %392 = vector.shape_cast %329 : vector<2x1xi1> to vector<2x1xi1>
    %393 = vector.broadcast %392 : vector<2x1xi1> to vector<2x32xi1>
    %394 = arith.select %393, %369, %315 : vector<2x32xi1>, vector<2x32xf32>
    %395 = vector.shape_cast %329 : vector<2x1xi1> to vector<2x1xi1>
    %396 = vector.broadcast %395 : vector<2x1xi1> to vector<2x32xi1>
    %397 = arith.select %396, %367, %318 : vector<2x32xi1>, vector<2x32xf32>
    %c5_i32 = arith.constant 5 : i32
    %c7_i32_107 = arith.constant 7 : i32
    %398 = arith.subi %c7_i32_107, %c5_i32 : i32
    %399 = arith.index_cast %c5_i32 : i32 to index
    %c0_108 = arith.constant 0 : index
    %c0_109 = arith.constant 0 : index
    %400 = vector.load %arg2[%399, %c0_108, %c0_109] : memref<8x2x1xf32, #tpu.memory_space<vmem>>, vector<1x2x1xf32>
    %401 = vector.shape_cast %400 : vector<1x2x1xf32> to vector<2x1xf32>
    %cst_110 = arith.constant 5.000000e-01 : f32
    %402 = vector.broadcast %cst_110 : f32 to vector<2x1xf32>
    %403 = arith.cmpf ogt, %401, %402 : vector<2x1xf32>
    %404 = arith.index_cast %398 : i32 to index
    %c0_111 = arith.constant 0 : index
    %c0_112 = arith.constant 0 : index
    %405 = vector.load %arg2[%404, %c0_111, %c0_112] : memref<8x2x1xf32, #tpu.memory_space<vmem>>, vector<1x2x1xf32>
    %406 = vector.shape_cast %405 : vector<1x2x1xf32> to vector<2x1xf32>
    %cst_113 = arith.constant 5.000000e-01 : f32
    %407 = vector.broadcast %cst_113 : f32 to vector<2x1xf32>
    %408 = arith.cmpf ogt, %406, %407 : vector<2x1xf32>
    %409 = arith.index_cast %c5_i32 : i32 to index
    %c0_114 = arith.constant 0 : index
    %c0_115 = arith.constant 0 : index
    %410 = vector.load %arg0[%409, %c0_114, %c0_115] : memref<8x2x128xf32, #tpu.memory_space<vmem>>, vector<1x2x128xf32>
    %411 = vector.shape_cast %410 : vector<1x2x128xf32> to vector<2x128xf32>
    %cst_116 = arith.constant dense<0.000000e+00> : vector<2x128xf32>
    %412 = tpu.matmul %388, %0, %cst_116 {dimension_numbers = #tpu.dot_dimension_numbers<[1], [0], [0], [1], [0, 0, 1, 1], [], []>, precision = #tpu.contract_precision<fp32>} : vector<2x32xf32>, vector<32x128xf32>, vector<2x128xf32> -> vector<2x128xf32>
    %413 = arith.addf %411, %412 : vector<2x128xf32>
    %414 = arith.negf %413 : vector<2x128xf32>
    %415 = math.exp %414 : vector<2x128xf32>
    %cst_117 = arith.constant 1.000000e+00 : f32
    %416 = vector.broadcast %cst_117 : f32 to vector<2x128xf32>
    %417 = arith.addf %416, %415 : vector<2x128xf32>
    %418 = arith.divf %416, %417 : vector<2x128xf32>
    %419 = math.tanh %413 : vector<2x128xf32>
    %420 = vector.extract_strided_slice %418 {offsets = [0, 0], sizes = [2, 32], strides = [1, 1]} : vector<2x128xf32> to vector<2x32xf32>
    %421 = vector.extract_strided_slice %418 {offsets = [0, 32], sizes = [2, 32], strides = [1, 1]} : vector<2x128xf32> to vector<2x32xf32>
    %422 = vector.extract_strided_slice %419 {offsets = [0, 64], sizes = [2, 32], strides = [1, 1]} : vector<2x128xf32> to vector<2x32xf32>
    %423 = vector.extract_strided_slice %418 {offsets = [0, 96], sizes = [2, 32], strides = [1, 1]} : vector<2x128xf32> to vector<2x32xf32>
    %424 = arith.mulf %421, %391 : vector<2x32xf32>
    %425 = arith.mulf %420, %422 : vector<2x32xf32>
    %426 = arith.addf %424, %425 : vector<2x32xf32>
    %427 = math.tanh %426 : vector<2x32xf32>
    %428 = arith.mulf %423, %427 : vector<2x32xf32>
    %429 = arith.index_cast %398 : i32 to index
    %c0_118 = arith.constant 0 : index
    %c0_119 = arith.constant 0 : index
    %430 = vector.load %arg1[%429, %c0_118, %c0_119] : memref<8x2x128xf32, #tpu.memory_space<vmem>>, vector<1x2x128xf32>
    %431 = vector.shape_cast %430 : vector<1x2x128xf32> to vector<2x128xf32>
    %cst_120 = arith.constant dense<0.000000e+00> : vector<2x128xf32>
    %432 = tpu.matmul %394, %1, %cst_120 {dimension_numbers = #tpu.dot_dimension_numbers<[1], [0], [0], [1], [0, 0, 1, 1], [], []>, precision = #tpu.contract_precision<fp32>} : vector<2x32xf32>, vector<32x128xf32>, vector<2x128xf32> -> vector<2x128xf32>
    %433 = arith.addf %431, %432 : vector<2x128xf32>
    %434 = arith.negf %433 : vector<2x128xf32>
    %435 = math.exp %434 : vector<2x128xf32>
    %cst_121 = arith.constant 1.000000e+00 : f32
    %436 = vector.broadcast %cst_121 : f32 to vector<2x128xf32>
    %437 = arith.addf %436, %435 : vector<2x128xf32>
    %438 = arith.divf %436, %437 : vector<2x128xf32>
    %439 = math.tanh %433 : vector<2x128xf32>
    %440 = vector.extract_strided_slice %438 {offsets = [0, 0], sizes = [2, 32], strides = [1, 1]} : vector<2x128xf32> to vector<2x32xf32>
    %441 = vector.extract_strided_slice %438 {offsets = [0, 32], sizes = [2, 32], strides = [1, 1]} : vector<2x128xf32> to vector<2x32xf32>
    %442 = vector.extract_strided_slice %439 {offsets = [0, 64], sizes = [2, 32], strides = [1, 1]} : vector<2x128xf32> to vector<2x32xf32>
    %443 = vector.extract_strided_slice %438 {offsets = [0, 96], sizes = [2, 32], strides = [1, 1]} : vector<2x128xf32> to vector<2x32xf32>
    %444 = arith.mulf %441, %397 : vector<2x32xf32>
    %445 = arith.mulf %440, %442 : vector<2x32xf32>
    %446 = arith.addf %444, %445 : vector<2x32xf32>
    %447 = math.tanh %446 : vector<2x32xf32>
    %448 = arith.mulf %443, %447 : vector<2x32xf32>
    %cst_122 = arith.constant 0.000000e+00 : f32
    %449 = vector.shape_cast %403 : vector<2x1xi1> to vector<2x1xi1>
    %450 = vector.broadcast %449 : vector<2x1xi1> to vector<2x32xi1>
    %451 = vector.broadcast %cst_122 : f32 to vector<2x32xf32>
    %452 = arith.select %450, %428, %451 : vector<2x32xi1>, vector<2x32xf32>
    %453 = arith.index_cast %c5_i32 : i32 to index
    %c0_123 = arith.constant 0 : index
    %c0_124 = arith.constant 0 : index
    %454 = vector.load %arg17[%453, %c0_123, %c0_124] : memref<8x2x32xf32, #tpu.memory_space<vmem>>, vector<1x2x32xf32>
    %455 = vector.shape_cast %454 : vector<1x2x32xf32> to vector<2x32xf32>
    %456 = vector.shape_cast %452 : vector<2x32xf32> to vector<1x2x32xf32>
    tpu.vector_store %arg17[%453, %c0_123, %c0_124], %456 {strides = array<i32>} : memref<8x2x32xf32, #tpu.memory_space<vmem>>, vector<1x2x32xf32>,
    %cst_125 = arith.constant 0.000000e+00 : f32
    %457 = vector.shape_cast %408 : vector<2x1xi1> to vector<2x1xi1>
    %458 = vector.broadcast %457 : vector<2x1xi1> to vector<2x32xi1>
    %459 = vector.broadcast %cst_125 : f32 to vector<2x32xf32>
    %460 = arith.select %458, %448, %459 : vector<2x32xi1>, vector<2x32xf32>
    %461 = arith.index_cast %398 : i32 to index
    %c0_126 = arith.constant 0 : index
    %c0_127 = arith.constant 0 : index
    %462 = vector.load %arg18[%461, %c0_126, %c0_127] : memref<8x2x32xf32, #tpu.memory_space<vmem>>, vector<1x2x32xf32>
    %463 = vector.shape_cast %462 : vector<1x2x32xf32> to vector<2x32xf32>
    %464 = vector.shape_cast %460 : vector<2x32xf32> to vector<1x2x32xf32>
    tpu.vector_store %arg18[%461, %c0_126, %c0_127], %464 {strides = array<i32>} : memref<8x2x32xf32, #tpu.memory_space<vmem>>, vector<1x2x32xf32>,
    %465 = vector.shape_cast %403 : vector<2x1xi1> to vector<2x1xi1>
    %466 = vector.broadcast %465 : vector<2x1xi1> to vector<2x32xi1>
    %467 = arith.select %466, %428, %388 : vector<2x32xi1>, vector<2x32xf32>
    %468 = vector.shape_cast %403 : vector<2x1xi1> to vector<2x1xi1>
    %469 = vector.broadcast %468 : vector<2x1xi1> to vector<2x32xi1>
    %470 = arith.select %469, %426, %391 : vector<2x32xi1>, vector<2x32xf32>
    %471 = vector.shape_cast %408 : vector<2x1xi1> to vector<2x1xi1>
    %472 = vector.broadcast %471 : vector<2x1xi1> to vector<2x32xi1>
    %473 = arith.select %472, %448, %394 : vector<2x32xi1>, vector<2x32xf32>
    %474 = vector.shape_cast %408 : vector<2x1xi1> to vector<2x1xi1>
    %475 = vector.broadcast %474 : vector<2x1xi1> to vector<2x32xi1>
    %476 = arith.select %475, %446, %397 : vector<2x32xi1>, vector<2x32xf32>
    %c6_i32 = arith.constant 6 : i32
    %c7_i32_128 = arith.constant 7 : i32
    %477 = arith.subi %c7_i32_128, %c6_i32 : i32
    %478 = arith.index_cast %c6_i32 : i32 to index
    %c0_129 = arith.constant 0 : index
    %c0_130 = arith.constant 0 : index
    %479 = vector.load %arg2[%478, %c0_129, %c0_130] : memref<8x2x1xf32, #tpu.memory_space<vmem>>, vector<1x2x1xf32>
    %480 = vector.shape_cast %479 : vector<1x2x1xf32> to vector<2x1xf32>
    %cst_131 = arith.constant 5.000000e-01 : f32
    %481 = vector.broadcast %cst_131 : f32 to vector<2x1xf32>
    %482 = arith.cmpf ogt, %480, %481 : vector<2x1xf32>
    %483 = arith.index_cast %477 : i32 to index
    %c0_132 = arith.constant 0 : index
    %c0_133 = arith.constant 0 : index
    %484 = vector.load %arg2[%483, %c0_132, %c0_133] : memref<8x2x1xf32, #tpu.memory_space<vmem>>, vector<1x2x1xf32>
    %485 = vector.shape_cast %484 : vector<1x2x1xf32> to vector<2x1xf32>
    %cst_134 = arith.constant 5.000000e-01 : f32
    %486 = vector.broadcast %cst_134 : f32 to vector<2x1xf32>
    %487 = arith.cmpf ogt, %485, %486 : vector<2x1xf32>
    %488 = arith.index_cast %c6_i32 : i32 to index
    %c0_135 = arith.constant 0 : index
    %c0_136 = arith.constant 0 : index
    %489 = vector.load %arg0[%488, %c0_135, %c0_136] : memref<8x2x128xf32, #tpu.memory_space<vmem>>, vector<1x2x128xf32>
    %490 = vector.shape_cast %489 : vector<1x2x128xf32> to vector<2x128xf32>
    %cst_137 = arith.constant dense<0.000000e+00> : vector<2x128xf32>
    %491 = tpu.matmul %467, %0, %cst_137 {dimension_numbers = #tpu.dot_dimension_numbers<[1], [0], [0], [1], [0, 0, 1, 1], [], []>, precision = #tpu.contract_precision<fp32>} : vector<2x32xf32>, vector<32x128xf32>, vector<2x128xf32> -> vector<2x128xf32>
    %492 = arith.addf %490, %491 : vector<2x128xf32>
    %493 = arith.negf %492 : vector<2x128xf32>
    %494 = math.exp %493 : vector<2x128xf32>
    %cst_138 = arith.constant 1.000000e+00 : f32
    %495 = vector.broadcast %cst_138 : f32 to vector<2x128xf32>
    %496 = arith.addf %495, %494 : vector<2x128xf32>
    %497 = arith.divf %495, %496 : vector<2x128xf32>
    %498 = math.tanh %492 : vector<2x128xf32>
    %499 = vector.extract_strided_slice %497 {offsets = [0, 0], sizes = [2, 32], strides = [1, 1]} : vector<2x128xf32> to vector<2x32xf32>
    %500 = vector.extract_strided_slice %497 {offsets = [0, 32], sizes = [2, 32], strides = [1, 1]} : vector<2x128xf32> to vector<2x32xf32>
    %501 = vector.extract_strided_slice %498 {offsets = [0, 64], sizes = [2, 32], strides = [1, 1]} : vector<2x128xf32> to vector<2x32xf32>
    %502 = vector.extract_strided_slice %497 {offsets = [0, 96], sizes = [2, 32], strides = [1, 1]} : vector<2x128xf32> to vector<2x32xf32>
    %503 = arith.mulf %500, %470 : vector<2x32xf32>
    %504 = arith.mulf %499, %501 : vector<2x32xf32>
    %505 = arith.addf %503, %504 : vector<2x32xf32>
    %506 = math.tanh %505 : vector<2x32xf32>
    %507 = arith.mulf %502, %506 : vector<2x32xf32>
    %508 = arith.index_cast %477 : i32 to index
    %c0_139 = arith.constant 0 : index
    %c0_140 = arith.constant 0 : index
    %509 = vector.load %arg1[%508, %c0_139, %c0_140] : memref<8x2x128xf32, #tpu.memory_space<vmem>>, vector<1x2x128xf32>
    %510 = vector.shape_cast %509 : vector<1x2x128xf32> to vector<2x128xf32>
    %cst_141 = arith.constant dense<0.000000e+00> : vector<2x128xf32>
    %511 = tpu.matmul %473, %1, %cst_141 {dimension_numbers = #tpu.dot_dimension_numbers<[1], [0], [0], [1], [0, 0, 1, 1], [], []>, precision = #tpu.contract_precision<fp32>} : vector<2x32xf32>, vector<32x128xf32>, vector<2x128xf32> -> vector<2x128xf32>
    %512 = arith.addf %510, %511 : vector<2x128xf32>
    %513 = arith.negf %512 : vector<2x128xf32>
    %514 = math.exp %513 : vector<2x128xf32>
    %cst_142 = arith.constant 1.000000e+00 : f32
    %515 = vector.broadcast %cst_142 : f32 to vector<2x128xf32>
    %516 = arith.addf %515, %514 : vector<2x128xf32>
    %517 = arith.divf %515, %516 : vector<2x128xf32>
    %518 = math.tanh %512 : vector<2x128xf32>
    %519 = vector.extract_strided_slice %517 {offsets = [0, 0], sizes = [2, 32], strides = [1, 1]} : vector<2x128xf32> to vector<2x32xf32>
    %520 = vector.extract_strided_slice %517 {offsets = [0, 32], sizes = [2, 32], strides = [1, 1]} : vector<2x128xf32> to vector<2x32xf32>
    %521 = vector.extract_strided_slice %518 {offsets = [0, 64], sizes = [2, 32], strides = [1, 1]} : vector<2x128xf32> to vector<2x32xf32>
    %522 = vector.extract_strided_slice %517 {offsets = [0, 96], sizes = [2, 32], strides = [1, 1]} : vector<2x128xf32> to vector<2x32xf32>
    %523 = arith.mulf %520, %476 : vector<2x32xf32>
    %524 = arith.mulf %519, %521 : vector<2x32xf32>
    %525 = arith.addf %523, %524 : vector<2x32xf32>
    %526 = math.tanh %525 : vector<2x32xf32>
    %527 = arith.mulf %522, %526 : vector<2x32xf32>
    %cst_143 = arith.constant 0.000000e+00 : f32
    %528 = vector.shape_cast %482 : vector<2x1xi1> to vector<2x1xi1>
    %529 = vector.broadcast %528 : vector<2x1xi1> to vector<2x32xi1>
    %530 = vector.broadcast %cst_143 : f32 to vector<2x32xf32>
    %531 = arith.select %529, %507, %530 : vector<2x32xi1>, vector<2x32xf32>
    %532 = arith.index_cast %c6_i32 : i32 to index
    %c0_144 = arith.constant 0 : index
    %c0_145 = arith.constant 0 : index
    %533 = vector.load %arg17[%532, %c0_144, %c0_145] : memref<8x2x32xf32, #tpu.memory_space<vmem>>, vector<1x2x32xf32>
    %534 = vector.shape_cast %533 : vector<1x2x32xf32> to vector<2x32xf32>
    %535 = vector.shape_cast %531 : vector<2x32xf32> to vector<1x2x32xf32>
    tpu.vector_store %arg17[%532, %c0_144, %c0_145], %535 {strides = array<i32>} : memref<8x2x32xf32, #tpu.memory_space<vmem>>, vector<1x2x32xf32>,
    %cst_146 = arith.constant 0.000000e+00 : f32
    %536 = vector.shape_cast %487 : vector<2x1xi1> to vector<2x1xi1>
    %537 = vector.broadcast %536 : vector<2x1xi1> to vector<2x32xi1>
    %538 = vector.broadcast %cst_146 : f32 to vector<2x32xf32>
    %539 = arith.select %537, %527, %538 : vector<2x32xi1>, vector<2x32xf32>
    %540 = arith.index_cast %477 : i32 to index
    %c0_147 = arith.constant 0 : index
    %c0_148 = arith.constant 0 : index
    %541 = vector.load %arg18[%540, %c0_147, %c0_148] : memref<8x2x32xf32, #tpu.memory_space<vmem>>, vector<1x2x32xf32>
    %542 = vector.shape_cast %541 : vector<1x2x32xf32> to vector<2x32xf32>
    %543 = vector.shape_cast %539 : vector<2x32xf32> to vector<1x2x32xf32>
    tpu.vector_store %arg18[%540, %c0_147, %c0_148], %543 {strides = array<i32>} : memref<8x2x32xf32, #tpu.memory_space<vmem>>, vector<1x2x32xf32>,
    %544 = vector.shape_cast %482 : vector<2x1xi1> to vector<2x1xi1>
    %545 = vector.broadcast %544 : vector<2x1xi1> to vector<2x32xi1>
    %546 = arith.select %545, %507, %467 : vector<2x32xi1>, vector<2x32xf32>
    %547 = vector.shape_cast %482 : vector<2x1xi1> to vector<2x1xi1>
    %548 = vector.broadcast %547 : vector<2x1xi1> to vector<2x32xi1>
    %549 = arith.select %548, %505, %470 : vector<2x32xi1>, vector<2x32xf32>
    %550 = vector.shape_cast %487 : vector<2x1xi1> to vector<2x1xi1>
    %551 = vector.broadcast %550 : vector<2x1xi1> to vector<2x32xi1>
    %552 = arith.select %551, %527, %473 : vector<2x32xi1>, vector<2x32xf32>
    %553 = vector.shape_cast %487 : vector<2x1xi1> to vector<2x1xi1>
    %554 = vector.broadcast %553 : vector<2x1xi1> to vector<2x32xi1>
    %555 = arith.select %554, %525, %476 : vector<2x32xi1>, vector<2x32xf32>
    %c7_i32_149 = arith.constant 7 : i32
    %c7_i32_150 = arith.constant 7 : i32
    %556 = arith.subi %c7_i32_150, %c7_i32_149 : i32
    %557 = arith.index_cast %c7_i32_149 : i32 to index
    %c0_151 = arith.constant 0 : index
    %c0_152 = arith.constant 0 : index
    %558 = vector.load %arg2[%557, %c0_151, %c0_152] : memref<8x2x1xf32, #tpu.memory_space<vmem>>, vector<1x2x1xf32>
    %559 = vector.shape_cast %558 : vector<1x2x1xf32> to vector<2x1xf32>
    %cst_153 = arith.constant 5.000000e-01 : f32
    %560 = vector.broadcast %cst_153 : f32 to vector<2x1xf32>
    %561 = arith.cmpf ogt, %559, %560 : vector<2x1xf32>
    %562 = arith.index_cast %556 : i32 to index
    %c0_154 = arith.constant 0 : index
    %c0_155 = arith.constant 0 : index
    %563 = vector.load %arg2[%562, %c0_154, %c0_155] : memref<8x2x1xf32, #tpu.memory_space<vmem>>, vector<1x2x1xf32>
    %564 = vector.shape_cast %563 : vector<1x2x1xf32> to vector<2x1xf32>
    %cst_156 = arith.constant 5.000000e-01 : f32
    %565 = vector.broadcast %cst_156 : f32 to vector<2x1xf32>
    %566 = arith.cmpf ogt, %564, %565 : vector<2x1xf32>
    %567 = arith.index_cast %c7_i32_149 : i32 to index
    %c0_157 = arith.constant 0 : index
    %c0_158 = arith.constant 0 : index
    %568 = vector.load %arg0[%567, %c0_157, %c0_158] : memref<8x2x128xf32, #tpu.memory_space<vmem>>, vector<1x2x128xf32>
    %569 = vector.shape_cast %568 : vector<1x2x128xf32> to vector<2x128xf32>
    %cst_159 = arith.constant dense<0.000000e+00> : vector<2x128xf32>
    %570 = tpu.matmul %546, %0, %cst_159 {dimension_numbers = #tpu.dot_dimension_numbers<[1], [0], [0], [1], [0, 0, 1, 1], [], []>, precision = #tpu.contract_precision<fp32>} : vector<2x32xf32>, vector<32x128xf32>, vector<2x128xf32> -> vector<2x128xf32>
    %571 = arith.addf %569, %570 : vector<2x128xf32>
    %572 = arith.negf %571 : vector<2x128xf32>
    %573 = math.exp %572 : vector<2x128xf32>
    %cst_160 = arith.constant 1.000000e+00 : f32
    %574 = vector.broadcast %cst_160 : f32 to vector<2x128xf32>
    %575 = arith.addf %574, %573 : vector<2x128xf32>
    %576 = arith.divf %574, %575 : vector<2x128xf32>
    %577 = math.tanh %571 : vector<2x128xf32>
    %578 = vector.extract_strided_slice %576 {offsets = [0, 0], sizes = [2, 32], strides = [1, 1]} : vector<2x128xf32> to vector<2x32xf32>
    %579 = vector.extract_strided_slice %576 {offsets = [0, 32], sizes = [2, 32], strides = [1, 1]} : vector<2x128xf32> to vector<2x32xf32>
    %580 = vector.extract_strided_slice %577 {offsets = [0, 64], sizes = [2, 32], strides = [1, 1]} : vector<2x128xf32> to vector<2x32xf32>
    %581 = vector.extract_strided_slice %576 {offsets = [0, 96], sizes = [2, 32], strides = [1, 1]} : vector<2x128xf32> to vector<2x32xf32>
    %582 = arith.mulf %579, %549 : vector<2x32xf32>
    %583 = arith.mulf %578, %580 : vector<2x32xf32>
    %584 = arith.addf %582, %583 : vector<2x32xf32>
    %585 = math.tanh %584 : vector<2x32xf32>
    %586 = arith.mulf %581, %585 : vector<2x32xf32>
    %587 = arith.index_cast %556 : i32 to index
    %c0_161 = arith.constant 0 : index
    %c0_162 = arith.constant 0 : index
    %588 = vector.load %arg1[%587, %c0_161, %c0_162] : memref<8x2x128xf32, #tpu.memory_space<vmem>>, vector<1x2x128xf32>
    %589 = vector.shape_cast %588 : vector<1x2x128xf32> to vector<2x128xf32>
    %cst_163 = arith.constant dense<0.000000e+00> : vector<2x128xf32>
    %590 = tpu.matmul %552, %1, %cst_163 {dimension_numbers = #tpu.dot_dimension_numbers<[1], [0], [0], [1], [0, 0, 1, 1], [], []>, precision = #tpu.contract_precision<fp32>} : vector<2x32xf32>, vector<32x128xf32>, vector<2x128xf32> -> vector<2x128xf32>
    %591 = arith.addf %589, %590 : vector<2x128xf32>
    %592 = arith.negf %591 : vector<2x128xf32>
    %593 = math.exp %592 : vector<2x128xf32>
    %cst_164 = arith.constant 1.000000e+00 : f32
    %594 = vector.broadcast %cst_164 : f32 to vector<2x128xf32>
    %595 = arith.addf %594, %593 : vector<2x128xf32>
    %596 = arith.divf %594, %595 : vector<2x128xf32>
    %597 = math.tanh %591 : vector<2x128xf32>
    %598 = vector.extract_strided_slice %596 {offsets = [0, 0], sizes = [2, 32], strides = [1, 1]} : vector<2x128xf32> to vector<2x32xf32>
    %599 = vector.extract_strided_slice %596 {offsets = [0, 32], sizes = [2, 32], strides = [1, 1]} : vector<2x128xf32> to vector<2x32xf32>
    %600 = vector.extract_strided_slice %597 {offsets = [0, 64], sizes = [2, 32], strides = [1, 1]} : vector<2x128xf32> to vector<2x32xf32>
    %601 = vector.extract_strided_slice %596 {offsets = [0, 96], sizes = [2, 32], strides = [1, 1]} : vector<2x128xf32> to vector<2x32xf32>
    %602 = arith.mulf %599, %555 : vector<2x32xf32>
    %603 = arith.mulf %598, %600 : vector<2x32xf32>
    %604 = arith.addf %602, %603 : vector<2x32xf32>
    %605 = math.tanh %604 : vector<2x32xf32>
    %606 = arith.mulf %601, %605 : vector<2x32xf32>
    %cst_165 = arith.constant 0.000000e+00 : f32
    %607 = vector.shape_cast %561 : vector<2x1xi1> to vector<2x1xi1>
    %608 = vector.broadcast %607 : vector<2x1xi1> to vector<2x32xi1>
    %609 = vector.broadcast %cst_165 : f32 to vector<2x32xf32>
    %610 = arith.select %608, %586, %609 : vector<2x32xi1>, vector<2x32xf32>
    %611 = arith.index_cast %c7_i32_149 : i32 to index
    %c0_166 = arith.constant 0 : index
    %c0_167 = arith.constant 0 : index
    %612 = vector.load %arg17[%611, %c0_166, %c0_167] : memref<8x2x32xf32, #tpu.memory_space<vmem>>, vector<1x2x32xf32>
    %613 = vector.shape_cast %612 : vector<1x2x32xf32> to vector<2x32xf32>
    %614 = vector.shape_cast %610 : vector<2x32xf32> to vector<1x2x32xf32>
    tpu.vector_store %arg17[%611, %c0_166, %c0_167], %614 {strides = array<i32>} : memref<8x2x32xf32, #tpu.memory_space<vmem>>, vector<1x2x32xf32>,
    %cst_168 = arith.constant 0.000000e+00 : f32
    %615 = vector.shape_cast %566 : vector<2x1xi1> to vector<2x1xi1>
    %616 = vector.broadcast %615 : vector<2x1xi1> to vector<2x32xi1>
    %617 = vector.broadcast %cst_168 : f32 to vector<2x32xf32>
    %618 = arith.select %616, %606, %617 : vector<2x32xi1>, vector<2x32xf32>
    %619 = arith.index_cast %556 : i32 to index
    %c0_169 = arith.constant 0 : index
    %c0_170 = arith.constant 0 : index
    %620 = vector.load %arg18[%619, %c0_169, %c0_170] : memref<8x2x32xf32, #tpu.memory_space<vmem>>, vector<1x2x32xf32>
    %621 = vector.shape_cast %620 : vector<1x2x32xf32> to vector<2x32xf32>
    %622 = vector.shape_cast %618 : vector<2x32xf32> to vector<1x2x32xf32>
    tpu.vector_store %arg18[%619, %c0_169, %c0_170], %622 {strides = array<i32>} : memref<8x2x32xf32, #tpu.memory_space<vmem>>, vector<1x2x32xf32>,
    %623 = vector.shape_cast %561 : vector<2x1xi1> to vector<2x1xi1>
    %624 = vector.broadcast %623 : vector<2x1xi1> to vector<2x32xi1>
    %625 = arith.select %624, %586, %546 : vector<2x32xi1>, vector<2x32xf32>
    %626 = vector.shape_cast %561 : vector<2x1xi1> to vector<2x1xi1>
    %627 = vector.broadcast %626 : vector<2x1xi1> to vector<2x32xi1>
    %628 = arith.select %627, %584, %549 : vector<2x32xi1>, vector<2x32xf32>
    %629 = vector.shape_cast %566 : vector<2x1xi1> to vector<2x1xi1>
    %630 = vector.broadcast %629 : vector<2x1xi1> to vector<2x32xi1>
    %631 = arith.select %630, %606, %552 : vector<2x32xi1>, vector<2x32xf32>
    %632 = vector.shape_cast %566 : vector<2x1xi1> to vector<2x1xi1>
    %633 = vector.broadcast %632 : vector<2x1xi1> to vector<2x32xi1>
    %634 = arith.select %633, %604, %555 : vector<2x32xi1>, vector<2x32xf32>
    %c8_i32 = arith.constant 8 : i32
    %c0_171 = arith.constant 0 : index
    %c0_172 = arith.constant 0 : index
    %c0_173 = arith.constant 0 : index
    %635 = vector.load %arg17[%c0_171, %c0_172, %c0_173] : memref<8x2x32xf32, #tpu.memory_space<vmem>>, vector<8x2x32xf32>
    %636 = vector.shape_cast %635 : vector<8x2x32xf32> to vector<16x32xf32>
    %c0_174 = arith.constant 0 : index
    %c0_175 = arith.constant 0 : index
    %c0_176 = arith.constant 0 : index
    %637 = vector.load %arg18[%c0_174, %c0_175, %c0_176] : memref<8x2x32xf32, #tpu.memory_space<vmem>>, vector<8x2x32xf32>
    %638 = vector.shape_cast %637 : vector<8x2x32xf32> to vector<16x32xf32>
    %c0_177 = arith.constant 0 : index
    %c0_178 = arith.constant 0 : index
    %639 = vector.load %arg5[%c0_177, %c0_178] : memref<32x128xf32, #tpu.memory_space<vmem>>, vector<32x128xf32>
    %cst_179 = arith.constant dense<0.000000e+00> : vector<16x128xf32>
    %640 = tpu.matmul %636, %639, %cst_179 {dimension_numbers = #tpu.dot_dimension_numbers<[1], [0], [0], [1], [0, 0, 1, 1], [], []>, precision = #tpu.contract_precision<fp32>} : vector<16x32xf32>, vector<32x128xf32>, vector<16x128xf32> -> vector<16x128xf32>
    %c0_180 = arith.constant 0 : index
    %c0_181 = arith.constant 0 : index
    %641 = vector.load %arg6[%c0_180, %c0_181] : memref<32x128xf32, #tpu.memory_space<vmem>>, vector<32x128xf32>
    %cst_182 = arith.constant dense<0.000000e+00> : vector<16x128xf32>
    %642 = tpu.matmul %638, %641, %cst_182 {dimension_numbers = #tpu.dot_dimension_numbers<[1], [0], [0], [1], [0, 0, 1, 1], [], []>, precision = #tpu.contract_precision<fp32>} : vector<16x32xf32>, vector<32x128xf32>, vector<16x128xf32> -> vector<16x128xf32>
    %643 = arith.addf %640, %642 : vector<16x128xf32>
    %c0_183 = arith.constant 0 : index
    %c0_184 = arith.constant 0 : index
    %644 = vector.load %arg11[%c0_183, %c0_184] : memref<2x128xf32, #tpu.memory_space<vmem>>, vector<1x128xf32>
    %645 = vector.broadcast %644 : vector<1x128xf32> to vector<16x128xf32>
    %646 = arith.addf %643, %645 : vector<16x128xf32>
    %c0_185 = arith.constant 0 : index
    %c0_186 = arith.constant 0 : index
    %647 = vector.load %arg7[%c0_185, %c0_186] : memref<32x128xf32, #tpu.memory_space<vmem>>, vector<32x128xf32>
    %cst_187 = arith.constant dense<0.000000e+00> : vector<16x128xf32>
    %648 = tpu.matmul %636, %647, %cst_187 {dimension_numbers = #tpu.dot_dimension_numbers<[1], [0], [0], [1], [0, 0, 1, 1], [], []>, precision = #tpu.contract_precision<fp32>} : vector<16x32xf32>, vector<32x128xf32>, vector<16x128xf32> -> vector<16x128xf32>
    %c0_188 = arith.constant 0 : index
    %c0_189 = arith.constant 0 : index
    %649 = vector.load %arg8[%c0_188, %c0_189] : memref<32x128xf32, #tpu.memory_space<vmem>>, vector<32x128xf32>
    %cst_190 = arith.constant dense<0.000000e+00> : vector<16x128xf32>
    %650 = tpu.matmul %638, %649, %cst_190 {dimension_numbers = #tpu.dot_dimension_numbers<[1], [0], [0], [1], [0, 0, 1, 1], [], []>, precision = #tpu.contract_precision<fp32>} : vector<16x32xf32>, vector<32x128xf32>, vector<16x128xf32> -> vector<16x128xf32>
    %651 = arith.addf %648, %650 : vector<16x128xf32>
    %c1 = arith.constant 1 : index
    %c0_191 = arith.constant 0 : index
    %652 = vector.load %arg11[%c1, %c0_191] : memref<2x128xf32, #tpu.memory_space<vmem>>, vector<1x128xf32>
    %653 = vector.broadcast %652 : vector<1x128xf32> to vector<16x128xf32>
    %654 = arith.addf %651, %653 : vector<16x128xf32>
    %655 = vector.shape_cast %646 : vector<16x128xf32> to vector<8x2x128xf32>
    %c0_192 = arith.constant 0 : index
    %c0_193 = arith.constant 0 : index
    %c0_194 = arith.constant 0 : index
    %656 = vector.load %arg19[%c0_192, %c0_193, %c0_194] : memref<8x2x128xf32, #tpu.memory_space<vmem>>, vector<8x2x128xf32>
    tpu.vector_store %arg19[%c0_192, %c0_193, %c0_194], %655 {strides = array<i32>} : memref<8x2x128xf32, #tpu.memory_space<vmem>>, vector<8x2x128xf32>,
    %657 = vector.shape_cast %654 : vector<16x128xf32> to vector<8x2x128xf32>
    %c0_195 = arith.constant 0 : index
    %c0_196 = arith.constant 0 : index
    %c0_197 = arith.constant 0 : index
    %658 = vector.load %arg20[%c0_195, %c0_196, %c0_197] : memref<8x2x128xf32, #tpu.memory_space<vmem>>, vector<8x2x128xf32>
    tpu.vector_store %arg20[%c0_195, %c0_196, %c0_197], %657 {strides = array<i32>} : memref<8x2x128xf32, #tpu.memory_space<vmem>>, vector<8x2x128xf32>,
    %c0_198 = arith.constant 0 : index
    %c0_199 = arith.constant 0 : index
    %659 = vector.load %arg9[%c0_198, %c0_199] : memref<32x128xf32, #tpu.memory_space<vmem>>, vector<32x128xf32>
    %c0_200 = arith.constant 0 : index
    %c0_201 = arith.constant 0 : index
    %660 = vector.load %arg10[%c0_200, %c0_201] : memref<32x128xf32, #tpu.memory_space<vmem>>, vector<32x128xf32>
    %cst_202 = arith.constant 0.000000e+00 : f32
    %661 = vector.broadcast %cst_202 : f32 to vector<2x32xf32>
    %c0_i32_203 = arith.constant 0 : i32
    %c7_i32_204 = arith.constant 7 : i32
    %662 = arith.subi %c7_i32_204, %c0_i32_203 : i32
    %663 = arith.index_cast %c0_i32_203 : i32 to index
    %c0_205 = arith.constant 0 : index
    %c0_206 = arith.constant 0 : index
    %664 = vector.load %arg2[%663, %c0_205, %c0_206] : memref<8x2x1xf32, #tpu.memory_space<vmem>>, vector<1x2x1xf32>
    %665 = vector.shape_cast %664 : vector<1x2x1xf32> to vector<2x1xf32>
    %cst_207 = arith.constant 5.000000e-01 : f32
    %666 = vector.broadcast %cst_207 : f32 to vector<2x1xf32>
    %667 = arith.cmpf ogt, %665, %666 : vector<2x1xf32>
    %668 = arith.index_cast %662 : i32 to index
    %c0_208 = arith.constant 0 : index
    %c0_209 = arith.constant 0 : index
    %669 = vector.load %arg2[%668, %c0_208, %c0_209] : memref<8x2x1xf32, #tpu.memory_space<vmem>>, vector<1x2x1xf32>
    %670 = vector.shape_cast %669 : vector<1x2x1xf32> to vector<2x1xf32>
    %cst_210 = arith.constant 5.000000e-01 : f32
    %671 = vector.broadcast %cst_210 : f32 to vector<2x1xf32>
    %672 = arith.cmpf ogt, %670, %671 : vector<2x1xf32>
    %673 = arith.index_cast %c0_i32_203 : i32 to index
    %c0_211 = arith.constant 0 : index
    %c0_212 = arith.constant 0 : index
    %674 = vector.load %arg19[%673, %c0_211, %c0_212] : memref<8x2x128xf32, #tpu.memory_space<vmem>>, vector<1x2x128xf32>
    %675 = vector.shape_cast %674 : vector<1x2x128xf32> to vector<2x128xf32>
    %cst_213 = arith.constant dense<0.000000e+00> : vector<2x128xf32>
    %676 = tpu.matmul %661, %659, %cst_213 {dimension_numbers = #tpu.dot_dimension_numbers<[1], [0], [0], [1], [0, 0, 1, 1], [], []>, precision = #tpu.contract_precision<fp32>} : vector<2x32xf32>, vector<32x128xf32>, vector<2x128xf32> -> vector<2x128xf32>
    %677 = arith.addf %675, %676 : vector<2x128xf32>
    %678 = arith.negf %677 : vector<2x128xf32>
    %679 = math.exp %678 : vector<2x128xf32>
    %cst_214 = arith.constant 1.000000e+00 : f32
    %680 = vector.broadcast %cst_214 : f32 to vector<2x128xf32>
    %681 = arith.addf %680, %679 : vector<2x128xf32>
    %682 = arith.divf %680, %681 : vector<2x128xf32>
    %683 = math.tanh %677 : vector<2x128xf32>
    %684 = vector.extract_strided_slice %682 {offsets = [0, 0], sizes = [2, 32], strides = [1, 1]} : vector<2x128xf32> to vector<2x32xf32>
    %685 = vector.extract_strided_slice %682 {offsets = [0, 32], sizes = [2, 32], strides = [1, 1]} : vector<2x128xf32> to vector<2x32xf32>
    %686 = vector.extract_strided_slice %683 {offsets = [0, 64], sizes = [2, 32], strides = [1, 1]} : vector<2x128xf32> to vector<2x32xf32>
    %687 = vector.extract_strided_slice %682 {offsets = [0, 96], sizes = [2, 32], strides = [1, 1]} : vector<2x128xf32> to vector<2x32xf32>
    %688 = arith.mulf %685, %661 : vector<2x32xf32>
    %689 = arith.mulf %684, %686 : vector<2x32xf32>
    %690 = arith.addf %688, %689 : vector<2x32xf32>
    %691 = math.tanh %690 : vector<2x32xf32>
    %692 = arith.mulf %687, %691 : vector<2x32xf32>
    %693 = arith.index_cast %662 : i32 to index
    %c0_215 = arith.constant 0 : index
    %c0_216 = arith.constant 0 : index
    %694 = vector.load %arg20[%693, %c0_215, %c0_216] : memref<8x2x128xf32, #tpu.memory_space<vmem>>, vector<1x2x128xf32>
    %695 = vector.shape_cast %694 : vector<1x2x128xf32> to vector<2x128xf32>
    %cst_217 = arith.constant dense<0.000000e+00> : vector<2x128xf32>
    %696 = tpu.matmul %661, %660, %cst_217 {dimension_numbers = #tpu.dot_dimension_numbers<[1], [0], [0], [1], [0, 0, 1, 1], [], []>, precision = #tpu.contract_precision<fp32>} : vector<2x32xf32>, vector<32x128xf32>, vector<2x128xf32> -> vector<2x128xf32>
    %697 = arith.addf %695, %696 : vector<2x128xf32>
    %698 = arith.negf %697 : vector<2x128xf32>
    %699 = math.exp %698 : vector<2x128xf32>
    %cst_218 = arith.constant 1.000000e+00 : f32
    %700 = vector.broadcast %cst_218 : f32 to vector<2x128xf32>
    %701 = arith.addf %700, %699 : vector<2x128xf32>
    %702 = arith.divf %700, %701 : vector<2x128xf32>
    %703 = math.tanh %697 : vector<2x128xf32>
    %704 = vector.extract_strided_slice %702 {offsets = [0, 0], sizes = [2, 32], strides = [1, 1]} : vector<2x128xf32> to vector<2x32xf32>
    %705 = vector.extract_strided_slice %702 {offsets = [0, 32], sizes = [2, 32], strides = [1, 1]} : vector<2x128xf32> to vector<2x32xf32>
    %706 = vector.extract_strided_slice %703 {offsets = [0, 64], sizes = [2, 32], strides = [1, 1]} : vector<2x128xf32> to vector<2x32xf32>
    %707 = vector.extract_strided_slice %702 {offsets = [0, 96], sizes = [2, 32], strides = [1, 1]} : vector<2x128xf32> to vector<2x32xf32>
    %708 = arith.mulf %705, %661 : vector<2x32xf32>
    %709 = arith.mulf %704, %706 : vector<2x32xf32>
    %710 = arith.addf %708, %709 : vector<2x32xf32>
    %711 = math.tanh %710 : vector<2x32xf32>
    %712 = arith.mulf %707, %711 : vector<2x32xf32>
    %cst_219 = arith.constant 0.000000e+00 : f32
    %713 = vector.shape_cast %667 : vector<2x1xi1> to vector<2x1xi1>
    %714 = vector.broadcast %713 : vector<2x1xi1> to vector<2x32xi1>
    %715 = vector.broadcast %cst_219 : f32 to vector<2x32xf32>
    %716 = arith.select %714, %692, %715 : vector<2x32xi1>, vector<2x32xf32>
    %717 = arith.index_cast %c0_i32_203 : i32 to index
    %c0_220 = arith.constant 0 : index
    %c0_221 = arith.constant 0 : index
    %718 = vector.load %arg14[%717, %c0_220, %c0_221] : memref<8x2x32xf32, #tpu.memory_space<vmem>>, vector<1x2x32xf32>
    %719 = vector.shape_cast %718 : vector<1x2x32xf32> to vector<2x32xf32>
    %720 = vector.shape_cast %716 : vector<2x32xf32> to vector<1x2x32xf32>
    tpu.vector_store %arg14[%717, %c0_220, %c0_221], %720 {strides = array<i32>} : memref<8x2x32xf32, #tpu.memory_space<vmem>>, vector<1x2x32xf32>,
    %cst_222 = arith.constant 0.000000e+00 : f32
    %721 = vector.shape_cast %672 : vector<2x1xi1> to vector<2x1xi1>
    %722 = vector.broadcast %721 : vector<2x1xi1> to vector<2x32xi1>
    %723 = vector.broadcast %cst_222 : f32 to vector<2x32xf32>
    %724 = arith.select %722, %712, %723 : vector<2x32xi1>, vector<2x32xf32>
    %725 = arith.index_cast %662 : i32 to index
    %c0_223 = arith.constant 0 : index
    %c0_224 = arith.constant 0 : index
    %726 = vector.load %arg15[%725, %c0_223, %c0_224] : memref<8x2x32xf32, #tpu.memory_space<vmem>>, vector<1x2x32xf32>
    %727 = vector.shape_cast %726 : vector<1x2x32xf32> to vector<2x32xf32>
    %728 = vector.shape_cast %724 : vector<2x32xf32> to vector<1x2x32xf32>
    tpu.vector_store %arg15[%725, %c0_223, %c0_224], %728 {strides = array<i32>} : memref<8x2x32xf32, #tpu.memory_space<vmem>>, vector<1x2x32xf32>,
    %729 = vector.shape_cast %667 : vector<2x1xi1> to vector<2x1xi1>
    %730 = vector.broadcast %729 : vector<2x1xi1> to vector<2x32xi1>
    %731 = arith.select %730, %692, %661 : vector<2x32xi1>, vector<2x32xf32>
    %732 = vector.shape_cast %667 : vector<2x1xi1> to vector<2x1xi1>
    %733 = vector.broadcast %732 : vector<2x1xi1> to vector<2x32xi1>
    %734 = arith.select %733, %690, %661 : vector<2x32xi1>, vector<2x32xf32>
    %735 = vector.shape_cast %672 : vector<2x1xi1> to vector<2x1xi1>
    %736 = vector.broadcast %735 : vector<2x1xi1> to vector<2x32xi1>
    %737 = arith.select %736, %712, %661 : vector<2x32xi1>, vector<2x32xf32>
    %738 = vector.shape_cast %672 : vector<2x1xi1> to vector<2x1xi1>
    %739 = vector.broadcast %738 : vector<2x1xi1> to vector<2x32xi1>
    %740 = arith.select %739, %710, %661 : vector<2x32xi1>, vector<2x32xf32>
    %c1_i32_225 = arith.constant 1 : i32
    %c7_i32_226 = arith.constant 7 : i32
    %741 = arith.subi %c7_i32_226, %c1_i32_225 : i32
    %742 = arith.index_cast %c1_i32_225 : i32 to index
    %c0_227 = arith.constant 0 : index
    %c0_228 = arith.constant 0 : index
    %743 = vector.load %arg2[%742, %c0_227, %c0_228] : memref<8x2x1xf32, #tpu.memory_space<vmem>>, vector<1x2x1xf32>
    %744 = vector.shape_cast %743 : vector<1x2x1xf32> to vector<2x1xf32>
    %cst_229 = arith.constant 5.000000e-01 : f32
    %745 = vector.broadcast %cst_229 : f32 to vector<2x1xf32>
    %746 = arith.cmpf ogt, %744, %745 : vector<2x1xf32>
    %747 = arith.index_cast %741 : i32 to index
    %c0_230 = arith.constant 0 : index
    %c0_231 = arith.constant 0 : index
    %748 = vector.load %arg2[%747, %c0_230, %c0_231] : memref<8x2x1xf32, #tpu.memory_space<vmem>>, vector<1x2x1xf32>
    %749 = vector.shape_cast %748 : vector<1x2x1xf32> to vector<2x1xf32>
    %cst_232 = arith.constant 5.000000e-01 : f32
    %750 = vector.broadcast %cst_232 : f32 to vector<2x1xf32>
    %751 = arith.cmpf ogt, %749, %750 : vector<2x1xf32>
    %752 = arith.index_cast %c1_i32_225 : i32 to index
    %c0_233 = arith.constant 0 : index
    %c0_234 = arith.constant 0 : index
    %753 = vector.load %arg19[%752, %c0_233, %c0_234] : memref<8x2x128xf32, #tpu.memory_space<vmem>>, vector<1x2x128xf32>
    %754 = vector.shape_cast %753 : vector<1x2x128xf32> to vector<2x128xf32>
    %cst_235 = arith.constant dense<0.000000e+00> : vector<2x128xf32>
    %755 = tpu.matmul %731, %659, %cst_235 {dimension_numbers = #tpu.dot_dimension_numbers<[1], [0], [0], [1], [0, 0, 1, 1], [], []>, precision = #tpu.contract_precision<fp32>} : vector<2x32xf32>, vector<32x128xf32>, vector<2x128xf32> -> vector<2x128xf32>
    %756 = arith.addf %754, %755 : vector<2x128xf32>
    %757 = arith.negf %756 : vector<2x128xf32>
    %758 = math.exp %757 : vector<2x128xf32>
    %cst_236 = arith.constant 1.000000e+00 : f32
    %759 = vector.broadcast %cst_236 : f32 to vector<2x128xf32>
    %760 = arith.addf %759, %758 : vector<2x128xf32>
    %761 = arith.divf %759, %760 : vector<2x128xf32>
    %762 = math.tanh %756 : vector<2x128xf32>
    %763 = vector.extract_strided_slice %761 {offsets = [0, 0], sizes = [2, 32], strides = [1, 1]} : vector<2x128xf32> to vector<2x32xf32>
    %764 = vector.extract_strided_slice %761 {offsets = [0, 32], sizes = [2, 32], strides = [1, 1]} : vector<2x128xf32> to vector<2x32xf32>
    %765 = vector.extract_strided_slice %762 {offsets = [0, 64], sizes = [2, 32], strides = [1, 1]} : vector<2x128xf32> to vector<2x32xf32>
    %766 = vector.extract_strided_slice %761 {offsets = [0, 96], sizes = [2, 32], strides = [1, 1]} : vector<2x128xf32> to vector<2x32xf32>
    %767 = arith.mulf %764, %734 : vector<2x32xf32>
    %768 = arith.mulf %763, %765 : vector<2x32xf32>
    %769 = arith.addf %767, %768 : vector<2x32xf32>
    %770 = math.tanh %769 : vector<2x32xf32>
    %771 = arith.mulf %766, %770 : vector<2x32xf32>
    %772 = arith.index_cast %741 : i32 to index
    %c0_237 = arith.constant 0 : index
    %c0_238 = arith.constant 0 : index
    %773 = vector.load %arg20[%772, %c0_237, %c0_238] : memref<8x2x128xf32, #tpu.memory_space<vmem>>, vector<1x2x128xf32>
    %774 = vector.shape_cast %773 : vector<1x2x128xf32> to vector<2x128xf32>
    %cst_239 = arith.constant dense<0.000000e+00> : vector<2x128xf32>
    %775 = tpu.matmul %737, %660, %cst_239 {dimension_numbers = #tpu.dot_dimension_numbers<[1], [0], [0], [1], [0, 0, 1, 1], [], []>, precision = #tpu.contract_precision<fp32>} : vector<2x32xf32>, vector<32x128xf32>, vector<2x128xf32> -> vector<2x128xf32>
    %776 = arith.addf %774, %775 : vector<2x128xf32>
    %777 = arith.negf %776 : vector<2x128xf32>
    %778 = math.exp %777 : vector<2x128xf32>
    %cst_240 = arith.constant 1.000000e+00 : f32
    %779 = vector.broadcast %cst_240 : f32 to vector<2x128xf32>
    %780 = arith.addf %779, %778 : vector<2x128xf32>
    %781 = arith.divf %779, %780 : vector<2x128xf32>
    %782 = math.tanh %776 : vector<2x128xf32>
    %783 = vector.extract_strided_slice %781 {offsets = [0, 0], sizes = [2, 32], strides = [1, 1]} : vector<2x128xf32> to vector<2x32xf32>
    %784 = vector.extract_strided_slice %781 {offsets = [0, 32], sizes = [2, 32], strides = [1, 1]} : vector<2x128xf32> to vector<2x32xf32>
    %785 = vector.extract_strided_slice %782 {offsets = [0, 64], sizes = [2, 32], strides = [1, 1]} : vector<2x128xf32> to vector<2x32xf32>
    %786 = vector.extract_strided_slice %781 {offsets = [0, 96], sizes = [2, 32], strides = [1, 1]} : vector<2x128xf32> to vector<2x32xf32>
    %787 = arith.mulf %784, %740 : vector<2x32xf32>
    %788 = arith.mulf %783, %785 : vector<2x32xf32>
    %789 = arith.addf %787, %788 : vector<2x32xf32>
    %790 = math.tanh %789 : vector<2x32xf32>
    %791 = arith.mulf %786, %790 : vector<2x32xf32>
    %cst_241 = arith.constant 0.000000e+00 : f32
    %792 = vector.shape_cast %746 : vector<2x1xi1> to vector<2x1xi1>
    %793 = vector.broadcast %792 : vector<2x1xi1> to vector<2x32xi1>
    %794 = vector.broadcast %cst_241 : f32 to vector<2x32xf32>
    %795 = arith.select %793, %771, %794 : vector<2x32xi1>, vector<2x32xf32>
    %796 = arith.index_cast %c1_i32_225 : i32 to index
    %c0_242 = arith.constant 0 : index
    %c0_243 = arith.constant 0 : index
    %797 = vector.load %arg14[%796, %c0_242, %c0_243] : memref<8x2x32xf32, #tpu.memory_space<vmem>>, vector<1x2x32xf32>
    %798 = vector.shape_cast %797 : vector<1x2x32xf32> to vector<2x32xf32>
    %799 = vector.shape_cast %795 : vector<2x32xf32> to vector<1x2x32xf32>
    tpu.vector_store %arg14[%796, %c0_242, %c0_243], %799 {strides = array<i32>} : memref<8x2x32xf32, #tpu.memory_space<vmem>>, vector<1x2x32xf32>,
    %cst_244 = arith.constant 0.000000e+00 : f32
    %800 = vector.shape_cast %751 : vector<2x1xi1> to vector<2x1xi1>
    %801 = vector.broadcast %800 : vector<2x1xi1> to vector<2x32xi1>
    %802 = vector.broadcast %cst_244 : f32 to vector<2x32xf32>
    %803 = arith.select %801, %791, %802 : vector<2x32xi1>, vector<2x32xf32>
    %804 = arith.index_cast %741 : i32 to index
    %c0_245 = arith.constant 0 : index
    %c0_246 = arith.constant 0 : index
    %805 = vector.load %arg15[%804, %c0_245, %c0_246] : memref<8x2x32xf32, #tpu.memory_space<vmem>>, vector<1x2x32xf32>
    %806 = vector.shape_cast %805 : vector<1x2x32xf32> to vector<2x32xf32>
    %807 = vector.shape_cast %803 : vector<2x32xf32> to vector<1x2x32xf32>
    tpu.vector_store %arg15[%804, %c0_245, %c0_246], %807 {strides = array<i32>} : memref<8x2x32xf32, #tpu.memory_space<vmem>>, vector<1x2x32xf32>,
    %808 = vector.shape_cast %746 : vector<2x1xi1> to vector<2x1xi1>
    %809 = vector.broadcast %808 : vector<2x1xi1> to vector<2x32xi1>
    %810 = arith.select %809, %771, %731 : vector<2x32xi1>, vector<2x32xf32>
    %811 = vector.shape_cast %746 : vector<2x1xi1> to vector<2x1xi1>
    %812 = vector.broadcast %811 : vector<2x1xi1> to vector<2x32xi1>
    %813 = arith.select %812, %769, %734 : vector<2x32xi1>, vector<2x32xf32>
    %814 = vector.shape_cast %751 : vector<2x1xi1> to vector<2x1xi1>
    %815 = vector.broadcast %814 : vector<2x1xi1> to vector<2x32xi1>
    %816 = arith.select %815, %791, %737 : vector<2x32xi1>, vector<2x32xf32>
    %817 = vector.shape_cast %751 : vector<2x1xi1> to vector<2x1xi1>
    %818 = vector.broadcast %817 : vector<2x1xi1> to vector<2x32xi1>
    %819 = arith.select %818, %789, %740 : vector<2x32xi1>, vector<2x32xf32>
    %c2_i32_247 = arith.constant 2 : i32
    %c7_i32_248 = arith.constant 7 : i32
    %820 = arith.subi %c7_i32_248, %c2_i32_247 : i32
    %821 = arith.index_cast %c2_i32_247 : i32 to index
    %c0_249 = arith.constant 0 : index
    %c0_250 = arith.constant 0 : index
    %822 = vector.load %arg2[%821, %c0_249, %c0_250] : memref<8x2x1xf32, #tpu.memory_space<vmem>>, vector<1x2x1xf32>
    %823 = vector.shape_cast %822 : vector<1x2x1xf32> to vector<2x1xf32>
    %cst_251 = arith.constant 5.000000e-01 : f32
    %824 = vector.broadcast %cst_251 : f32 to vector<2x1xf32>
    %825 = arith.cmpf ogt, %823, %824 : vector<2x1xf32>
    %826 = arith.index_cast %820 : i32 to index
    %c0_252 = arith.constant 0 : index
    %c0_253 = arith.constant 0 : index
    %827 = vector.load %arg2[%826, %c0_252, %c0_253] : memref<8x2x1xf32, #tpu.memory_space<vmem>>, vector<1x2x1xf32>
    %828 = vector.shape_cast %827 : vector<1x2x1xf32> to vector<2x1xf32>
    %cst_254 = arith.constant 5.000000e-01 : f32
    %829 = vector.broadcast %cst_254 : f32 to vector<2x1xf32>
    %830 = arith.cmpf ogt, %828, %829 : vector<2x1xf32>
    %831 = arith.index_cast %c2_i32_247 : i32 to index
    %c0_255 = arith.constant 0 : index
    %c0_256 = arith.constant 0 : index
    %832 = vector.load %arg19[%831, %c0_255, %c0_256] : memref<8x2x128xf32, #tpu.memory_space<vmem>>, vector<1x2x128xf32>
    %833 = vector.shape_cast %832 : vector<1x2x128xf32> to vector<2x128xf32>
    %cst_257 = arith.constant dense<0.000000e+00> : vector<2x128xf32>
    %834 = tpu.matmul %810, %659, %cst_257 {dimension_numbers = #tpu.dot_dimension_numbers<[1], [0], [0], [1], [0, 0, 1, 1], [], []>, precision = #tpu.contract_precision<fp32>} : vector<2x32xf32>, vector<32x128xf32>, vector<2x128xf32> -> vector<2x128xf32>
    %835 = arith.addf %833, %834 : vector<2x128xf32>
    %836 = arith.negf %835 : vector<2x128xf32>
    %837 = math.exp %836 : vector<2x128xf32>
    %cst_258 = arith.constant 1.000000e+00 : f32
    %838 = vector.broadcast %cst_258 : f32 to vector<2x128xf32>
    %839 = arith.addf %838, %837 : vector<2x128xf32>
    %840 = arith.divf %838, %839 : vector<2x128xf32>
    %841 = math.tanh %835 : vector<2x128xf32>
    %842 = vector.extract_strided_slice %840 {offsets = [0, 0], sizes = [2, 32], strides = [1, 1]} : vector<2x128xf32> to vector<2x32xf32>
    %843 = vector.extract_strided_slice %840 {offsets = [0, 32], sizes = [2, 32], strides = [1, 1]} : vector<2x128xf32> to vector<2x32xf32>
    %844 = vector.extract_strided_slice %841 {offsets = [0, 64], sizes = [2, 32], strides = [1, 1]} : vector<2x128xf32> to vector<2x32xf32>
    %845 = vector.extract_strided_slice %840 {offsets = [0, 96], sizes = [2, 32], strides = [1, 1]} : vector<2x128xf32> to vector<2x32xf32>
    %846 = arith.mulf %843, %813 : vector<2x32xf32>
    %847 = arith.mulf %842, %844 : vector<2x32xf32>
    %848 = arith.addf %846, %847 : vector<2x32xf32>
    %849 = math.tanh %848 : vector<2x32xf32>
    %850 = arith.mulf %845, %849 : vector<2x32xf32>
    %851 = arith.index_cast %820 : i32 to index
    %c0_259 = arith.constant 0 : index
    %c0_260 = arith.constant 0 : index
    %852 = vector.load %arg20[%851, %c0_259, %c0_260] : memref<8x2x128xf32, #tpu.memory_space<vmem>>, vector<1x2x128xf32>
    %853 = vector.shape_cast %852 : vector<1x2x128xf32> to vector<2x128xf32>
    %cst_261 = arith.constant dense<0.000000e+00> : vector<2x128xf32>
    %854 = tpu.matmul %816, %660, %cst_261 {dimension_numbers = #tpu.dot_dimension_numbers<[1], [0], [0], [1], [0, 0, 1, 1], [], []>, precision = #tpu.contract_precision<fp32>} : vector<2x32xf32>, vector<32x128xf32>, vector<2x128xf32> -> vector<2x128xf32>
    %855 = arith.addf %853, %854 : vector<2x128xf32>
    %856 = arith.negf %855 : vector<2x128xf32>
    %857 = math.exp %856 : vector<2x128xf32>
    %cst_262 = arith.constant 1.000000e+00 : f32
    %858 = vector.broadcast %cst_262 : f32 to vector<2x128xf32>
    %859 = arith.addf %858, %857 : vector<2x128xf32>
    %860 = arith.divf %858, %859 : vector<2x128xf32>
    %861 = math.tanh %855 : vector<2x128xf32>
    %862 = vector.extract_strided_slice %860 {offsets = [0, 0], sizes = [2, 32], strides = [1, 1]} : vector<2x128xf32> to vector<2x32xf32>
    %863 = vector.extract_strided_slice %860 {offsets = [0, 32], sizes = [2, 32], strides = [1, 1]} : vector<2x128xf32> to vector<2x32xf32>
    %864 = vector.extract_strided_slice %861 {offsets = [0, 64], sizes = [2, 32], strides = [1, 1]} : vector<2x128xf32> to vector<2x32xf32>
    %865 = vector.extract_strided_slice %860 {offsets = [0, 96], sizes = [2, 32], strides = [1, 1]} : vector<2x128xf32> to vector<2x32xf32>
    %866 = arith.mulf %863, %819 : vector<2x32xf32>
    %867 = arith.mulf %862, %864 : vector<2x32xf32>
    %868 = arith.addf %866, %867 : vector<2x32xf32>
    %869 = math.tanh %868 : vector<2x32xf32>
    %870 = arith.mulf %865, %869 : vector<2x32xf32>
    %cst_263 = arith.constant 0.000000e+00 : f32
    %871 = vector.shape_cast %825 : vector<2x1xi1> to vector<2x1xi1>
    %872 = vector.broadcast %871 : vector<2x1xi1> to vector<2x32xi1>
    %873 = vector.broadcast %cst_263 : f32 to vector<2x32xf32>
    %874 = arith.select %872, %850, %873 : vector<2x32xi1>, vector<2x32xf32>
    %875 = arith.index_cast %c2_i32_247 : i32 to index
    %c0_264 = arith.constant 0 : index
    %c0_265 = arith.constant 0 : index
    %876 = vector.load %arg14[%875, %c0_264, %c0_265] : memref<8x2x32xf32, #tpu.memory_space<vmem>>, vector<1x2x32xf32>
    %877 = vector.shape_cast %876 : vector<1x2x32xf32> to vector<2x32xf32>
    %878 = vector.shape_cast %874 : vector<2x32xf32> to vector<1x2x32xf32>
    tpu.vector_store %arg14[%875, %c0_264, %c0_265], %878 {strides = array<i32>} : memref<8x2x32xf32, #tpu.memory_space<vmem>>, vector<1x2x32xf32>,
    %cst_266 = arith.constant 0.000000e+00 : f32
    %879 = vector.shape_cast %830 : vector<2x1xi1> to vector<2x1xi1>
    %880 = vector.broadcast %879 : vector<2x1xi1> to vector<2x32xi1>
    %881 = vector.broadcast %cst_266 : f32 to vector<2x32xf32>
    %882 = arith.select %880, %870, %881 : vector<2x32xi1>, vector<2x32xf32>
    %883 = arith.index_cast %820 : i32 to index
    %c0_267 = arith.constant 0 : index
    %c0_268 = arith.constant 0 : index
    %884 = vector.load %arg15[%883, %c0_267, %c0_268] : memref<8x2x32xf32, #tpu.memory_space<vmem>>, vector<1x2x32xf32>
    %885 = vector.shape_cast %884 : vector<1x2x32xf32> to vector<2x32xf32>
    %886 = vector.shape_cast %882 : vector<2x32xf32> to vector<1x2x32xf32>
    tpu.vector_store %arg15[%883, %c0_267, %c0_268], %886 {strides = array<i32>} : memref<8x2x32xf32, #tpu.memory_space<vmem>>, vector<1x2x32xf32>,
    %887 = vector.shape_cast %825 : vector<2x1xi1> to vector<2x1xi1>
    %888 = vector.broadcast %887 : vector<2x1xi1> to vector<2x32xi1>
    %889 = arith.select %888, %850, %810 : vector<2x32xi1>, vector<2x32xf32>
    %890 = vector.shape_cast %825 : vector<2x1xi1> to vector<2x1xi1>
    %891 = vector.broadcast %890 : vector<2x1xi1> to vector<2x32xi1>
    %892 = arith.select %891, %848, %813 : vector<2x32xi1>, vector<2x32xf32>
    %893 = vector.shape_cast %830 : vector<2x1xi1> to vector<2x1xi1>
    %894 = vector.broadcast %893 : vector<2x1xi1> to vector<2x32xi1>
    %895 = arith.select %894, %870, %816 : vector<2x32xi1>, vector<2x32xf32>
    %896 = vector.shape_cast %830 : vector<2x1xi1> to vector<2x1xi1>
    %897 = vector.broadcast %896 : vector<2x1xi1> to vector<2x32xi1>
    %898 = arith.select %897, %868, %819 : vector<2x32xi1>, vector<2x32xf32>
    %c3_i32_269 = arith.constant 3 : i32
    %c7_i32_270 = arith.constant 7 : i32
    %899 = arith.subi %c7_i32_270, %c3_i32_269 : i32
    %900 = arith.index_cast %c3_i32_269 : i32 to index
    %c0_271 = arith.constant 0 : index
    %c0_272 = arith.constant 0 : index
    %901 = vector.load %arg2[%900, %c0_271, %c0_272] : memref<8x2x1xf32, #tpu.memory_space<vmem>>, vector<1x2x1xf32>
    %902 = vector.shape_cast %901 : vector<1x2x1xf32> to vector<2x1xf32>
    %cst_273 = arith.constant 5.000000e-01 : f32
    %903 = vector.broadcast %cst_273 : f32 to vector<2x1xf32>
    %904 = arith.cmpf ogt, %902, %903 : vector<2x1xf32>
    %905 = arith.index_cast %899 : i32 to index
    %c0_274 = arith.constant 0 : index
    %c0_275 = arith.constant 0 : index
    %906 = vector.load %arg2[%905, %c0_274, %c0_275] : memref<8x2x1xf32, #tpu.memory_space<vmem>>, vector<1x2x1xf32>
    %907 = vector.shape_cast %906 : vector<1x2x1xf32> to vector<2x1xf32>
    %cst_276 = arith.constant 5.000000e-01 : f32
    %908 = vector.broadcast %cst_276 : f32 to vector<2x1xf32>
    %909 = arith.cmpf ogt, %907, %908 : vector<2x1xf32>
    %910 = arith.index_cast %c3_i32_269 : i32 to index
    %c0_277 = arith.constant 0 : index
    %c0_278 = arith.constant 0 : index
    %911 = vector.load %arg19[%910, %c0_277, %c0_278] : memref<8x2x128xf32, #tpu.memory_space<vmem>>, vector<1x2x128xf32>
    %912 = vector.shape_cast %911 : vector<1x2x128xf32> to vector<2x128xf32>
    %cst_279 = arith.constant dense<0.000000e+00> : vector<2x128xf32>
    %913 = tpu.matmul %889, %659, %cst_279 {dimension_numbers = #tpu.dot_dimension_numbers<[1], [0], [0], [1], [0, 0, 1, 1], [], []>, precision = #tpu.contract_precision<fp32>} : vector<2x32xf32>, vector<32x128xf32>, vector<2x128xf32> -> vector<2x128xf32>
    %914 = arith.addf %912, %913 : vector<2x128xf32>
    %915 = arith.negf %914 : vector<2x128xf32>
    %916 = math.exp %915 : vector<2x128xf32>
    %cst_280 = arith.constant 1.000000e+00 : f32
    %917 = vector.broadcast %cst_280 : f32 to vector<2x128xf32>
    %918 = arith.addf %917, %916 : vector<2x128xf32>
    %919 = arith.divf %917, %918 : vector<2x128xf32>
    %920 = math.tanh %914 : vector<2x128xf32>
    %921 = vector.extract_strided_slice %919 {offsets = [0, 0], sizes = [2, 32], strides = [1, 1]} : vector<2x128xf32> to vector<2x32xf32>
    %922 = vector.extract_strided_slice %919 {offsets = [0, 32], sizes = [2, 32], strides = [1, 1]} : vector<2x128xf32> to vector<2x32xf32>
    %923 = vector.extract_strided_slice %920 {offsets = [0, 64], sizes = [2, 32], strides = [1, 1]} : vector<2x128xf32> to vector<2x32xf32>
    %924 = vector.extract_strided_slice %919 {offsets = [0, 96], sizes = [2, 32], strides = [1, 1]} : vector<2x128xf32> to vector<2x32xf32>
    %925 = arith.mulf %922, %892 : vector<2x32xf32>
    %926 = arith.mulf %921, %923 : vector<2x32xf32>
    %927 = arith.addf %925, %926 : vector<2x32xf32>
    %928 = math.tanh %927 : vector<2x32xf32>
    %929 = arith.mulf %924, %928 : vector<2x32xf32>
    %930 = arith.index_cast %899 : i32 to index
    %c0_281 = arith.constant 0 : index
    %c0_282 = arith.constant 0 : index
    %931 = vector.load %arg20[%930, %c0_281, %c0_282] : memref<8x2x128xf32, #tpu.memory_space<vmem>>, vector<1x2x128xf32>
    %932 = vector.shape_cast %931 : vector<1x2x128xf32> to vector<2x128xf32>
    %cst_283 = arith.constant dense<0.000000e+00> : vector<2x128xf32>
    %933 = tpu.matmul %895, %660, %cst_283 {dimension_numbers = #tpu.dot_dimension_numbers<[1], [0], [0], [1], [0, 0, 1, 1], [], []>, precision = #tpu.contract_precision<fp32>} : vector<2x32xf32>, vector<32x128xf32>, vector<2x128xf32> -> vector<2x128xf32>
    %934 = arith.addf %932, %933 : vector<2x128xf32>
    %935 = arith.negf %934 : vector<2x128xf32>
    %936 = math.exp %935 : vector<2x128xf32>
    %cst_284 = arith.constant 1.000000e+00 : f32
    %937 = vector.broadcast %cst_284 : f32 to vector<2x128xf32>
    %938 = arith.addf %937, %936 : vector<2x128xf32>
    %939 = arith.divf %937, %938 : vector<2x128xf32>
    %940 = math.tanh %934 : vector<2x128xf32>
    %941 = vector.extract_strided_slice %939 {offsets = [0, 0], sizes = [2, 32], strides = [1, 1]} : vector<2x128xf32> to vector<2x32xf32>
    %942 = vector.extract_strided_slice %939 {offsets = [0, 32], sizes = [2, 32], strides = [1, 1]} : vector<2x128xf32> to vector<2x32xf32>
    %943 = vector.extract_strided_slice %940 {offsets = [0, 64], sizes = [2, 32], strides = [1, 1]} : vector<2x128xf32> to vector<2x32xf32>
    %944 = vector.extract_strided_slice %939 {offsets = [0, 96], sizes = [2, 32], strides = [1, 1]} : vector<2x128xf32> to vector<2x32xf32>
    %945 = arith.mulf %942, %898 : vector<2x32xf32>
    %946 = arith.mulf %941, %943 : vector<2x32xf32>
    %947 = arith.addf %945, %946 : vector<2x32xf32>
    %948 = math.tanh %947 : vector<2x32xf32>
    %949 = arith.mulf %944, %948 : vector<2x32xf32>
    %cst_285 = arith.constant 0.000000e+00 : f32
    %950 = vector.shape_cast %904 : vector<2x1xi1> to vector<2x1xi1>
    %951 = vector.broadcast %950 : vector<2x1xi1> to vector<2x32xi1>
    %952 = vector.broadcast %cst_285 : f32 to vector<2x32xf32>
    %953 = arith.select %951, %929, %952 : vector<2x32xi1>, vector<2x32xf32>
    %954 = arith.index_cast %c3_i32_269 : i32 to index
    %c0_286 = arith.constant 0 : index
    %c0_287 = arith.constant 0 : index
    %955 = vector.load %arg14[%954, %c0_286, %c0_287] : memref<8x2x32xf32, #tpu.memory_space<vmem>>, vector<1x2x32xf32>
    %956 = vector.shape_cast %955 : vector<1x2x32xf32> to vector<2x32xf32>
    %957 = vector.shape_cast %953 : vector<2x32xf32> to vector<1x2x32xf32>
    tpu.vector_store %arg14[%954, %c0_286, %c0_287], %957 {strides = array<i32>} : memref<8x2x32xf32, #tpu.memory_space<vmem>>, vector<1x2x32xf32>,
    %cst_288 = arith.constant 0.000000e+00 : f32
    %958 = vector.shape_cast %909 : vector<2x1xi1> to vector<2x1xi1>
    %959 = vector.broadcast %958 : vector<2x1xi1> to vector<2x32xi1>
    %960 = vector.broadcast %cst_288 : f32 to vector<2x32xf32>
    %961 = arith.select %959, %949, %960 : vector<2x32xi1>, vector<2x32xf32>
    %962 = arith.index_cast %899 : i32 to index
    %c0_289 = arith.constant 0 : index
    %c0_290 = arith.constant 0 : index
    %963 = vector.load %arg15[%962, %c0_289, %c0_290] : memref<8x2x32xf32, #tpu.memory_space<vmem>>, vector<1x2x32xf32>
    %964 = vector.shape_cast %963 : vector<1x2x32xf32> to vector<2x32xf32>
    %965 = vector.shape_cast %961 : vector<2x32xf32> to vector<1x2x32xf32>
    tpu.vector_store %arg15[%962, %c0_289, %c0_290], %965 {strides = array<i32>} : memref<8x2x32xf32, #tpu.memory_space<vmem>>, vector<1x2x32xf32>,
    %966 = vector.shape_cast %904 : vector<2x1xi1> to vector<2x1xi1>
    %967 = vector.broadcast %966 : vector<2x1xi1> to vector<2x32xi1>
    %968 = arith.select %967, %929, %889 : vector<2x32xi1>, vector<2x32xf32>
    %969 = vector.shape_cast %904 : vector<2x1xi1> to vector<2x1xi1>
    %970 = vector.broadcast %969 : vector<2x1xi1> to vector<2x32xi1>
    %971 = arith.select %970, %927, %892 : vector<2x32xi1>, vector<2x32xf32>
    %972 = vector.shape_cast %909 : vector<2x1xi1> to vector<2x1xi1>
    %973 = vector.broadcast %972 : vector<2x1xi1> to vector<2x32xi1>
    %974 = arith.select %973, %949, %895 : vector<2x32xi1>, vector<2x32xf32>
    %975 = vector.shape_cast %909 : vector<2x1xi1> to vector<2x1xi1>
    %976 = vector.broadcast %975 : vector<2x1xi1> to vector<2x32xi1>
    %977 = arith.select %976, %947, %898 : vector<2x32xi1>, vector<2x32xf32>
    %c4_i32_291 = arith.constant 4 : i32
    %c7_i32_292 = arith.constant 7 : i32
    %978 = arith.subi %c7_i32_292, %c4_i32_291 : i32
    %979 = arith.index_cast %c4_i32_291 : i32 to index
    %c0_293 = arith.constant 0 : index
    %c0_294 = arith.constant 0 : index
    %980 = vector.load %arg2[%979, %c0_293, %c0_294] : memref<8x2x1xf32, #tpu.memory_space<vmem>>, vector<1x2x1xf32>
    %981 = vector.shape_cast %980 : vector<1x2x1xf32> to vector<2x1xf32>
    %cst_295 = arith.constant 5.000000e-01 : f32
    %982 = vector.broadcast %cst_295 : f32 to vector<2x1xf32>
    %983 = arith.cmpf ogt, %981, %982 : vector<2x1xf32>
    %984 = arith.index_cast %978 : i32 to index
    %c0_296 = arith.constant 0 : index
    %c0_297 = arith.constant 0 : index
    %985 = vector.load %arg2[%984, %c0_296, %c0_297] : memref<8x2x1xf32, #tpu.memory_space<vmem>>, vector<1x2x1xf32>
    %986 = vector.shape_cast %985 : vector<1x2x1xf32> to vector<2x1xf32>
    %cst_298 = arith.constant 5.000000e-01 : f32
    %987 = vector.broadcast %cst_298 : f32 to vector<2x1xf32>
    %988 = arith.cmpf ogt, %986, %987 : vector<2x1xf32>
    %989 = arith.index_cast %c4_i32_291 : i32 to index
    %c0_299 = arith.constant 0 : index
    %c0_300 = arith.constant 0 : index
    %990 = vector.load %arg19[%989, %c0_299, %c0_300] : memref<8x2x128xf32, #tpu.memory_space<vmem>>, vector<1x2x128xf32>
    %991 = vector.shape_cast %990 : vector<1x2x128xf32> to vector<2x128xf32>
    %cst_301 = arith.constant dense<0.000000e+00> : vector<2x128xf32>
    %992 = tpu.matmul %968, %659, %cst_301 {dimension_numbers = #tpu.dot_dimension_numbers<[1], [0], [0], [1], [0, 0, 1, 1], [], []>, precision = #tpu.contract_precision<fp32>} : vector<2x32xf32>, vector<32x128xf32>, vector<2x128xf32> -> vector<2x128xf32>
    %993 = arith.addf %991, %992 : vector<2x128xf32>
    %994 = arith.negf %993 : vector<2x128xf32>
    %995 = math.exp %994 : vector<2x128xf32>
    %cst_302 = arith.constant 1.000000e+00 : f32
    %996 = vector.broadcast %cst_302 : f32 to vector<2x128xf32>
    %997 = arith.addf %996, %995 : vector<2x128xf32>
    %998 = arith.divf %996, %997 : vector<2x128xf32>
    %999 = math.tanh %993 : vector<2x128xf32>
    %1000 = vector.extract_strided_slice %998 {offsets = [0, 0], sizes = [2, 32], strides = [1, 1]} : vector<2x128xf32> to vector<2x32xf32>
    %1001 = vector.extract_strided_slice %998 {offsets = [0, 32], sizes = [2, 32], strides = [1, 1]} : vector<2x128xf32> to vector<2x32xf32>
    %1002 = vector.extract_strided_slice %999 {offsets = [0, 64], sizes = [2, 32], strides = [1, 1]} : vector<2x128xf32> to vector<2x32xf32>
    %1003 = vector.extract_strided_slice %998 {offsets = [0, 96], sizes = [2, 32], strides = [1, 1]} : vector<2x128xf32> to vector<2x32xf32>
    %1004 = arith.mulf %1001, %971 : vector<2x32xf32>
    %1005 = arith.mulf %1000, %1002 : vector<2x32xf32>
    %1006 = arith.addf %1004, %1005 : vector<2x32xf32>
    %1007 = math.tanh %1006 : vector<2x32xf32>
    %1008 = arith.mulf %1003, %1007 : vector<2x32xf32>
    %1009 = arith.index_cast %978 : i32 to index
    %c0_303 = arith.constant 0 : index
    %c0_304 = arith.constant 0 : index
    %1010 = vector.load %arg20[%1009, %c0_303, %c0_304] : memref<8x2x128xf32, #tpu.memory_space<vmem>>, vector<1x2x128xf32>
    %1011 = vector.shape_cast %1010 : vector<1x2x128xf32> to vector<2x128xf32>
    %cst_305 = arith.constant dense<0.000000e+00> : vector<2x128xf32>
    %1012 = tpu.matmul %974, %660, %cst_305 {dimension_numbers = #tpu.dot_dimension_numbers<[1], [0], [0], [1], [0, 0, 1, 1], [], []>, precision = #tpu.contract_precision<fp32>} : vector<2x32xf32>, vector<32x128xf32>, vector<2x128xf32> -> vector<2x128xf32>
    %1013 = arith.addf %1011, %1012 : vector<2x128xf32>
    %1014 = arith.negf %1013 : vector<2x128xf32>
    %1015 = math.exp %1014 : vector<2x128xf32>
    %cst_306 = arith.constant 1.000000e+00 : f32
    %1016 = vector.broadcast %cst_306 : f32 to vector<2x128xf32>
    %1017 = arith.addf %1016, %1015 : vector<2x128xf32>
    %1018 = arith.divf %1016, %1017 : vector<2x128xf32>
    %1019 = math.tanh %1013 : vector<2x128xf32>
    %1020 = vector.extract_strided_slice %1018 {offsets = [0, 0], sizes = [2, 32], strides = [1, 1]} : vector<2x128xf32> to vector<2x32xf32>
    %1021 = vector.extract_strided_slice %1018 {offsets = [0, 32], sizes = [2, 32], strides = [1, 1]} : vector<2x128xf32> to vector<2x32xf32>
    %1022 = vector.extract_strided_slice %1019 {offsets = [0, 64], sizes = [2, 32], strides = [1, 1]} : vector<2x128xf32> to vector<2x32xf32>
    %1023 = vector.extract_strided_slice %1018 {offsets = [0, 96], sizes = [2, 32], strides = [1, 1]} : vector<2x128xf32> to vector<2x32xf32>
    %1024 = arith.mulf %1021, %977 : vector<2x32xf32>
    %1025 = arith.mulf %1020, %1022 : vector<2x32xf32>
    %1026 = arith.addf %1024, %1025 : vector<2x32xf32>
    %1027 = math.tanh %1026 : vector<2x32xf32>
    %1028 = arith.mulf %1023, %1027 : vector<2x32xf32>
    %cst_307 = arith.constant 0.000000e+00 : f32
    %1029 = vector.shape_cast %983 : vector<2x1xi1> to vector<2x1xi1>
    %1030 = vector.broadcast %1029 : vector<2x1xi1> to vector<2x32xi1>
    %1031 = vector.broadcast %cst_307 : f32 to vector<2x32xf32>
    %1032 = arith.select %1030, %1008, %1031 : vector<2x32xi1>, vector<2x32xf32>
    %1033 = arith.index_cast %c4_i32_291 : i32 to index
    %c0_308 = arith.constant 0 : index
    %c0_309 = arith.constant 0 : index
    %1034 = vector.load %arg14[%1033, %c0_308, %c0_309] : memref<8x2x32xf32, #tpu.memory_space<vmem>>, vector<1x2x32xf32>
    %1035 = vector.shape_cast %1034 : vector<1x2x32xf32> to vector<2x32xf32>
    %1036 = vector.shape_cast %1032 : vector<2x32xf32> to vector<1x2x32xf32>
    tpu.vector_store %arg14[%1033, %c0_308, %c0_309], %1036 {strides = array<i32>} : memref<8x2x32xf32, #tpu.memory_space<vmem>>, vector<1x2x32xf32>,
    %cst_310 = arith.constant 0.000000e+00 : f32
    %1037 = vector.shape_cast %988 : vector<2x1xi1> to vector<2x1xi1>
    %1038 = vector.broadcast %1037 : vector<2x1xi1> to vector<2x32xi1>
    %1039 = vector.broadcast %cst_310 : f32 to vector<2x32xf32>
    %1040 = arith.select %1038, %1028, %1039 : vector<2x32xi1>, vector<2x32xf32>
    %1041 = arith.index_cast %978 : i32 to index
    %c0_311 = arith.constant 0 : index
    %c0_312 = arith.constant 0 : index
    %1042 = vector.load %arg15[%1041, %c0_311, %c0_312] : memref<8x2x32xf32, #tpu.memory_space<vmem>>, vector<1x2x32xf32>
    %1043 = vector.shape_cast %1042 : vector<1x2x32xf32> to vector<2x32xf32>
    %1044 = vector.shape_cast %1040 : vector<2x32xf32> to vector<1x2x32xf32>
    tpu.vector_store %arg15[%1041, %c0_311, %c0_312], %1044 {strides = array<i32>} : memref<8x2x32xf32, #tpu.memory_space<vmem>>, vector<1x2x32xf32>,
    %1045 = vector.shape_cast %983 : vector<2x1xi1> to vector<2x1xi1>
    %1046 = vector.broadcast %1045 : vector<2x1xi1> to vector<2x32xi1>
    %1047 = arith.select %1046, %1008, %968 : vector<2x32xi1>, vector<2x32xf32>
    %1048 = vector.shape_cast %983 : vector<2x1xi1> to vector<2x1xi1>
    %1049 = vector.broadcast %1048 : vector<2x1xi1> to vector<2x32xi1>
    %1050 = arith.select %1049, %1006, %971 : vector<2x32xi1>, vector<2x32xf32>
    %1051 = vector.shape_cast %988 : vector<2x1xi1> to vector<2x1xi1>
    %1052 = vector.broadcast %1051 : vector<2x1xi1> to vector<2x32xi1>
    %1053 = arith.select %1052, %1028, %974 : vector<2x32xi1>, vector<2x32xf32>
    %1054 = vector.shape_cast %988 : vector<2x1xi1> to vector<2x1xi1>
    %1055 = vector.broadcast %1054 : vector<2x1xi1> to vector<2x32xi1>
    %1056 = arith.select %1055, %1026, %977 : vector<2x32xi1>, vector<2x32xf32>
    %c5_i32_313 = arith.constant 5 : i32
    %c7_i32_314 = arith.constant 7 : i32
    %1057 = arith.subi %c7_i32_314, %c5_i32_313 : i32
    %1058 = arith.index_cast %c5_i32_313 : i32 to index
    %c0_315 = arith.constant 0 : index
    %c0_316 = arith.constant 0 : index
    %1059 = vector.load %arg2[%1058, %c0_315, %c0_316] : memref<8x2x1xf32, #tpu.memory_space<vmem>>, vector<1x2x1xf32>
    %1060 = vector.shape_cast %1059 : vector<1x2x1xf32> to vector<2x1xf32>
    %cst_317 = arith.constant 5.000000e-01 : f32
    %1061 = vector.broadcast %cst_317 : f32 to vector<2x1xf32>
    %1062 = arith.cmpf ogt, %1060, %1061 : vector<2x1xf32>
    %1063 = arith.index_cast %1057 : i32 to index
    %c0_318 = arith.constant 0 : index
    %c0_319 = arith.constant 0 : index
    %1064 = vector.load %arg2[%1063, %c0_318, %c0_319] : memref<8x2x1xf32, #tpu.memory_space<vmem>>, vector<1x2x1xf32>
    %1065 = vector.shape_cast %1064 : vector<1x2x1xf32> to vector<2x1xf32>
    %cst_320 = arith.constant 5.000000e-01 : f32
    %1066 = vector.broadcast %cst_320 : f32 to vector<2x1xf32>
    %1067 = arith.cmpf ogt, %1065, %1066 : vector<2x1xf32>
    %1068 = arith.index_cast %c5_i32_313 : i32 to index
    %c0_321 = arith.constant 0 : index
    %c0_322 = arith.constant 0 : index
    %1069 = vector.load %arg19[%1068, %c0_321, %c0_322] : memref<8x2x128xf32, #tpu.memory_space<vmem>>, vector<1x2x128xf32>
    %1070 = vector.shape_cast %1069 : vector<1x2x128xf32> to vector<2x128xf32>
    %cst_323 = arith.constant dense<0.000000e+00> : vector<2x128xf32>
    %1071 = tpu.matmul %1047, %659, %cst_323 {dimension_numbers = #tpu.dot_dimension_numbers<[1], [0], [0], [1], [0, 0, 1, 1], [], []>, precision = #tpu.contract_precision<fp32>} : vector<2x32xf32>, vector<32x128xf32>, vector<2x128xf32> -> vector<2x128xf32>
    %1072 = arith.addf %1070, %1071 : vector<2x128xf32>
    %1073 = arith.negf %1072 : vector<2x128xf32>
    %1074 = math.exp %1073 : vector<2x128xf32>
    %cst_324 = arith.constant 1.000000e+00 : f32
    %1075 = vector.broadcast %cst_324 : f32 to vector<2x128xf32>
    %1076 = arith.addf %1075, %1074 : vector<2x128xf32>
    %1077 = arith.divf %1075, %1076 : vector<2x128xf32>
    %1078 = math.tanh %1072 : vector<2x128xf32>
    %1079 = vector.extract_strided_slice %1077 {offsets = [0, 0], sizes = [2, 32], strides = [1, 1]} : vector<2x128xf32> to vector<2x32xf32>
    %1080 = vector.extract_strided_slice %1077 {offsets = [0, 32], sizes = [2, 32], strides = [1, 1]} : vector<2x128xf32> to vector<2x32xf32>
    %1081 = vector.extract_strided_slice %1078 {offsets = [0, 64], sizes = [2, 32], strides = [1, 1]} : vector<2x128xf32> to vector<2x32xf32>
    %1082 = vector.extract_strided_slice %1077 {offsets = [0, 96], sizes = [2, 32], strides = [1, 1]} : vector<2x128xf32> to vector<2x32xf32>
    %1083 = arith.mulf %1080, %1050 : vector<2x32xf32>
    %1084 = arith.mulf %1079, %1081 : vector<2x32xf32>
    %1085 = arith.addf %1083, %1084 : vector<2x32xf32>
    %1086 = math.tanh %1085 : vector<2x32xf32>
    %1087 = arith.mulf %1082, %1086 : vector<2x32xf32>
    %1088 = arith.index_cast %1057 : i32 to index
    %c0_325 = arith.constant 0 : index
    %c0_326 = arith.constant 0 : index
    %1089 = vector.load %arg20[%1088, %c0_325, %c0_326] : memref<8x2x128xf32, #tpu.memory_space<vmem>>, vector<1x2x128xf32>
    %1090 = vector.shape_cast %1089 : vector<1x2x128xf32> to vector<2x128xf32>
    %cst_327 = arith.constant dense<0.000000e+00> : vector<2x128xf32>
    %1091 = tpu.matmul %1053, %660, %cst_327 {dimension_numbers = #tpu.dot_dimension_numbers<[1], [0], [0], [1], [0, 0, 1, 1], [], []>, precision = #tpu.contract_precision<fp32>} : vector<2x32xf32>, vector<32x128xf32>, vector<2x128xf32> -> vector<2x128xf32>
    %1092 = arith.addf %1090, %1091 : vector<2x128xf32>
    %1093 = arith.negf %1092 : vector<2x128xf32>
    %1094 = math.exp %1093 : vector<2x128xf32>
    %cst_328 = arith.constant 1.000000e+00 : f32
    %1095 = vector.broadcast %cst_328 : f32 to vector<2x128xf32>
    %1096 = arith.addf %1095, %1094 : vector<2x128xf32>
    %1097 = arith.divf %1095, %1096 : vector<2x128xf32>
    %1098 = math.tanh %1092 : vector<2x128xf32>
    %1099 = vector.extract_strided_slice %1097 {offsets = [0, 0], sizes = [2, 32], strides = [1, 1]} : vector<2x128xf32> to vector<2x32xf32>
    %1100 = vector.extract_strided_slice %1097 {offsets = [0, 32], sizes = [2, 32], strides = [1, 1]} : vector<2x128xf32> to vector<2x32xf32>
    %1101 = vector.extract_strided_slice %1098 {offsets = [0, 64], sizes = [2, 32], strides = [1, 1]} : vector<2x128xf32> to vector<2x32xf32>
    %1102 = vector.extract_strided_slice %1097 {offsets = [0, 96], sizes = [2, 32], strides = [1, 1]} : vector<2x128xf32> to vector<2x32xf32>
    %1103 = arith.mulf %1100, %1056 : vector<2x32xf32>
    %1104 = arith.mulf %1099, %1101 : vector<2x32xf32>
    %1105 = arith.addf %1103, %1104 : vector<2x32xf32>
    %1106 = math.tanh %1105 : vector<2x32xf32>
    %1107 = arith.mulf %1102, %1106 : vector<2x32xf32>
    %cst_329 = arith.constant 0.000000e+00 : f32
    %1108 = vector.shape_cast %1062 : vector<2x1xi1> to vector<2x1xi1>
    %1109 = vector.broadcast %1108 : vector<2x1xi1> to vector<2x32xi1>
    %1110 = vector.broadcast %cst_329 : f32 to vector<2x32xf32>
    %1111 = arith.select %1109, %1087, %1110 : vector<2x32xi1>, vector<2x32xf32>
    %1112 = arith.index_cast %c5_i32_313 : i32 to index
    %c0_330 = arith.constant 0 : index
    %c0_331 = arith.constant 0 : index
    %1113 = vector.load %arg14[%1112, %c0_330, %c0_331] : memref<8x2x32xf32, #tpu.memory_space<vmem>>, vector<1x2x32xf32>
    %1114 = vector.shape_cast %1113 : vector<1x2x32xf32> to vector<2x32xf32>
    %1115 = vector.shape_cast %1111 : vector<2x32xf32> to vector<1x2x32xf32>
    tpu.vector_store %arg14[%1112, %c0_330, %c0_331], %1115 {strides = array<i32>} : memref<8x2x32xf32, #tpu.memory_space<vmem>>, vector<1x2x32xf32>,
    %cst_332 = arith.constant 0.000000e+00 : f32
    %1116 = vector.shape_cast %1067 : vector<2x1xi1> to vector<2x1xi1>
    %1117 = vector.broadcast %1116 : vector<2x1xi1> to vector<2x32xi1>
    %1118 = vector.broadcast %cst_332 : f32 to vector<2x32xf32>
    %1119 = arith.select %1117, %1107, %1118 : vector<2x32xi1>, vector<2x32xf32>
    %1120 = arith.index_cast %1057 : i32 to index
    %c0_333 = arith.constant 0 : index
    %c0_334 = arith.constant 0 : index
    %1121 = vector.load %arg15[%1120, %c0_333, %c0_334] : memref<8x2x32xf32, #tpu.memory_space<vmem>>, vector<1x2x32xf32>
    %1122 = vector.shape_cast %1121 : vector<1x2x32xf32> to vector<2x32xf32>
    %1123 = vector.shape_cast %1119 : vector<2x32xf32> to vector<1x2x32xf32>
    tpu.vector_store %arg15[%1120, %c0_333, %c0_334], %1123 {strides = array<i32>} : memref<8x2x32xf32, #tpu.memory_space<vmem>>, vector<1x2x32xf32>,
    %1124 = vector.shape_cast %1062 : vector<2x1xi1> to vector<2x1xi1>
    %1125 = vector.broadcast %1124 : vector<2x1xi1> to vector<2x32xi1>
    %1126 = arith.select %1125, %1087, %1047 : vector<2x32xi1>, vector<2x32xf32>
    %1127 = vector.shape_cast %1062 : vector<2x1xi1> to vector<2x1xi1>
    %1128 = vector.broadcast %1127 : vector<2x1xi1> to vector<2x32xi1>
    %1129 = arith.select %1128, %1085, %1050 : vector<2x32xi1>, vector<2x32xf32>
    %1130 = vector.shape_cast %1067 : vector<2x1xi1> to vector<2x1xi1>
    %1131 = vector.broadcast %1130 : vector<2x1xi1> to vector<2x32xi1>
    %1132 = arith.select %1131, %1107, %1053 : vector<2x32xi1>, vector<2x32xf32>
    %1133 = vector.shape_cast %1067 : vector<2x1xi1> to vector<2x1xi1>
    %1134 = vector.broadcast %1133 : vector<2x1xi1> to vector<2x32xi1>
    %1135 = arith.select %1134, %1105, %1056 : vector<2x32xi1>, vector<2x32xf32>
    %c6_i32_335 = arith.constant 6 : i32
    %c7_i32_336 = arith.constant 7 : i32
    %1136 = arith.subi %c7_i32_336, %c6_i32_335 : i32
    %1137 = arith.index_cast %c6_i32_335 : i32 to index
    %c0_337 = arith.constant 0 : index
    %c0_338 = arith.constant 0 : index
    %1138 = vector.load %arg2[%1137, %c0_337, %c0_338] : memref<8x2x1xf32, #tpu.memory_space<vmem>>, vector<1x2x1xf32>
    %1139 = vector.shape_cast %1138 : vector<1x2x1xf32> to vector<2x1xf32>
    %cst_339 = arith.constant 5.000000e-01 : f32
    %1140 = vector.broadcast %cst_339 : f32 to vector<2x1xf32>
    %1141 = arith.cmpf ogt, %1139, %1140 : vector<2x1xf32>
    %1142 = arith.index_cast %1136 : i32 to index
    %c0_340 = arith.constant 0 : index
    %c0_341 = arith.constant 0 : index
    %1143 = vector.load %arg2[%1142, %c0_340, %c0_341] : memref<8x2x1xf32, #tpu.memory_space<vmem>>, vector<1x2x1xf32>
    %1144 = vector.shape_cast %1143 : vector<1x2x1xf32> to vector<2x1xf32>
    %cst_342 = arith.constant 5.000000e-01 : f32
    %1145 = vector.broadcast %cst_342 : f32 to vector<2x1xf32>
    %1146 = arith.cmpf ogt, %1144, %1145 : vector<2x1xf32>
    %1147 = arith.index_cast %c6_i32_335 : i32 to index
    %c0_343 = arith.constant 0 : index
    %c0_344 = arith.constant 0 : index
    %1148 = vector.load %arg19[%1147, %c0_343, %c0_344] : memref<8x2x128xf32, #tpu.memory_space<vmem>>, vector<1x2x128xf32>
    %1149 = vector.shape_cast %1148 : vector<1x2x128xf32> to vector<2x128xf32>
    %cst_345 = arith.constant dense<0.000000e+00> : vector<2x128xf32>
    %1150 = tpu.matmul %1126, %659, %cst_345 {dimension_numbers = #tpu.dot_dimension_numbers<[1], [0], [0], [1], [0, 0, 1, 1], [], []>, precision = #tpu.contract_precision<fp32>} : vector<2x32xf32>, vector<32x128xf32>, vector<2x128xf32> -> vector<2x128xf32>
    %1151 = arith.addf %1149, %1150 : vector<2x128xf32>
    %1152 = arith.negf %1151 : vector<2x128xf32>
    %1153 = math.exp %1152 : vector<2x128xf32>
    %cst_346 = arith.constant 1.000000e+00 : f32
    %1154 = vector.broadcast %cst_346 : f32 to vector<2x128xf32>
    %1155 = arith.addf %1154, %1153 : vector<2x128xf32>
    %1156 = arith.divf %1154, %1155 : vector<2x128xf32>
    %1157 = math.tanh %1151 : vector<2x128xf32>
    %1158 = vector.extract_strided_slice %1156 {offsets = [0, 0], sizes = [2, 32], strides = [1, 1]} : vector<2x128xf32> to vector<2x32xf32>
    %1159 = vector.extract_strided_slice %1156 {offsets = [0, 32], sizes = [2, 32], strides = [1, 1]} : vector<2x128xf32> to vector<2x32xf32>
    %1160 = vector.extract_strided_slice %1157 {offsets = [0, 64], sizes = [2, 32], strides = [1, 1]} : vector<2x128xf32> to vector<2x32xf32>
    %1161 = vector.extract_strided_slice %1156 {offsets = [0, 96], sizes = [2, 32], strides = [1, 1]} : vector<2x128xf32> to vector<2x32xf32>
    %1162 = arith.mulf %1159, %1129 : vector<2x32xf32>
    %1163 = arith.mulf %1158, %1160 : vector<2x32xf32>
    %1164 = arith.addf %1162, %1163 : vector<2x32xf32>
    %1165 = math.tanh %1164 : vector<2x32xf32>
    %1166 = arith.mulf %1161, %1165 : vector<2x32xf32>
    %1167 = arith.index_cast %1136 : i32 to index
    %c0_347 = arith.constant 0 : index
    %c0_348 = arith.constant 0 : index
    %1168 = vector.load %arg20[%1167, %c0_347, %c0_348] : memref<8x2x128xf32, #tpu.memory_space<vmem>>, vector<1x2x128xf32>
    %1169 = vector.shape_cast %1168 : vector<1x2x128xf32> to vector<2x128xf32>
    %cst_349 = arith.constant dense<0.000000e+00> : vector<2x128xf32>
    %1170 = tpu.matmul %1132, %660, %cst_349 {dimension_numbers = #tpu.dot_dimension_numbers<[1], [0], [0], [1], [0, 0, 1, 1], [], []>, precision = #tpu.contract_precision<fp32>} : vector<2x32xf32>, vector<32x128xf32>, vector<2x128xf32> -> vector<2x128xf32>
    %1171 = arith.addf %1169, %1170 : vector<2x128xf32>
    %1172 = arith.negf %1171 : vector<2x128xf32>
    %1173 = math.exp %1172 : vector<2x128xf32>
    %cst_350 = arith.constant 1.000000e+00 : f32
    %1174 = vector.broadcast %cst_350 : f32 to vector<2x128xf32>
    %1175 = arith.addf %1174, %1173 : vector<2x128xf32>
    %1176 = arith.divf %1174, %1175 : vector<2x128xf32>
    %1177 = math.tanh %1171 : vector<2x128xf32>
    %1178 = vector.extract_strided_slice %1176 {offsets = [0, 0], sizes = [2, 32], strides = [1, 1]} : vector<2x128xf32> to vector<2x32xf32>
    %1179 = vector.extract_strided_slice %1176 {offsets = [0, 32], sizes = [2, 32], strides = [1, 1]} : vector<2x128xf32> to vector<2x32xf32>
    %1180 = vector.extract_strided_slice %1177 {offsets = [0, 64], sizes = [2, 32], strides = [1, 1]} : vector<2x128xf32> to vector<2x32xf32>
    %1181 = vector.extract_strided_slice %1176 {offsets = [0, 96], sizes = [2, 32], strides = [1, 1]} : vector<2x128xf32> to vector<2x32xf32>
    %1182 = arith.mulf %1179, %1135 : vector<2x32xf32>
    %1183 = arith.mulf %1178, %1180 : vector<2x32xf32>
    %1184 = arith.addf %1182, %1183 : vector<2x32xf32>
    %1185 = math.tanh %1184 : vector<2x32xf32>
    %1186 = arith.mulf %1181, %1185 : vector<2x32xf32>
    %cst_351 = arith.constant 0.000000e+00 : f32
    %1187 = vector.shape_cast %1141 : vector<2x1xi1> to vector<2x1xi1>
    %1188 = vector.broadcast %1187 : vector<2x1xi1> to vector<2x32xi1>
    %1189 = vector.broadcast %cst_351 : f32 to vector<2x32xf32>
    %1190 = arith.select %1188, %1166, %1189 : vector<2x32xi1>, vector<2x32xf32>
    %1191 = arith.index_cast %c6_i32_335 : i32 to index
    %c0_352 = arith.constant 0 : index
    %c0_353 = arith.constant 0 : index
    %1192 = vector.load %arg14[%1191, %c0_352, %c0_353] : memref<8x2x32xf32, #tpu.memory_space<vmem>>, vector<1x2x32xf32>
    %1193 = vector.shape_cast %1192 : vector<1x2x32xf32> to vector<2x32xf32>
    %1194 = vector.shape_cast %1190 : vector<2x32xf32> to vector<1x2x32xf32>
    tpu.vector_store %arg14[%1191, %c0_352, %c0_353], %1194 {strides = array<i32>} : memref<8x2x32xf32, #tpu.memory_space<vmem>>, vector<1x2x32xf32>,
    %cst_354 = arith.constant 0.000000e+00 : f32
    %1195 = vector.shape_cast %1146 : vector<2x1xi1> to vector<2x1xi1>
    %1196 = vector.broadcast %1195 : vector<2x1xi1> to vector<2x32xi1>
    %1197 = vector.broadcast %cst_354 : f32 to vector<2x32xf32>
    %1198 = arith.select %1196, %1186, %1197 : vector<2x32xi1>, vector<2x32xf32>
    %1199 = arith.index_cast %1136 : i32 to index
    %c0_355 = arith.constant 0 : index
    %c0_356 = arith.constant 0 : index
    %1200 = vector.load %arg15[%1199, %c0_355, %c0_356] : memref<8x2x32xf32, #tpu.memory_space<vmem>>, vector<1x2x32xf32>
    %1201 = vector.shape_cast %1200 : vector<1x2x32xf32> to vector<2x32xf32>
    %1202 = vector.shape_cast %1198 : vector<2x32xf32> to vector<1x2x32xf32>
    tpu.vector_store %arg15[%1199, %c0_355, %c0_356], %1202 {strides = array<i32>} : memref<8x2x32xf32, #tpu.memory_space<vmem>>, vector<1x2x32xf32>,
    %1203 = vector.shape_cast %1141 : vector<2x1xi1> to vector<2x1xi1>
    %1204 = vector.broadcast %1203 : vector<2x1xi1> to vector<2x32xi1>
    %1205 = arith.select %1204, %1166, %1126 : vector<2x32xi1>, vector<2x32xf32>
    %1206 = vector.shape_cast %1141 : vector<2x1xi1> to vector<2x1xi1>
    %1207 = vector.broadcast %1206 : vector<2x1xi1> to vector<2x32xi1>
    %1208 = arith.select %1207, %1164, %1129 : vector<2x32xi1>, vector<2x32xf32>
    %1209 = vector.shape_cast %1146 : vector<2x1xi1> to vector<2x1xi1>
    %1210 = vector.broadcast %1209 : vector<2x1xi1> to vector<2x32xi1>
    %1211 = arith.select %1210, %1186, %1132 : vector<2x32xi1>, vector<2x32xf32>
    %1212 = vector.shape_cast %1146 : vector<2x1xi1> to vector<2x1xi1>
    %1213 = vector.broadcast %1212 : vector<2x1xi1> to vector<2x32xi1>
    %1214 = arith.select %1213, %1184, %1135 : vector<2x32xi1>, vector<2x32xf32>
    %c7_i32_357 = arith.constant 7 : i32
    %c7_i32_358 = arith.constant 7 : i32
    %1215 = arith.subi %c7_i32_358, %c7_i32_357 : i32
    %1216 = arith.index_cast %c7_i32_357 : i32 to index
    %c0_359 = arith.constant 0 : index
    %c0_360 = arith.constant 0 : index
    %1217 = vector.load %arg2[%1216, %c0_359, %c0_360] : memref<8x2x1xf32, #tpu.memory_space<vmem>>, vector<1x2x1xf32>
    %1218 = vector.shape_cast %1217 : vector<1x2x1xf32> to vector<2x1xf32>
    %cst_361 = arith.constant 5.000000e-01 : f32
    %1219 = vector.broadcast %cst_361 : f32 to vector<2x1xf32>
    %1220 = arith.cmpf ogt, %1218, %1219 : vector<2x1xf32>
    %1221 = arith.index_cast %1215 : i32 to index
    %c0_362 = arith.constant 0 : index
    %c0_363 = arith.constant 0 : index
    %1222 = vector.load %arg2[%1221, %c0_362, %c0_363] : memref<8x2x1xf32, #tpu.memory_space<vmem>>, vector<1x2x1xf32>
    %1223 = vector.shape_cast %1222 : vector<1x2x1xf32> to vector<2x1xf32>
    %cst_364 = arith.constant 5.000000e-01 : f32
    %1224 = vector.broadcast %cst_364 : f32 to vector<2x1xf32>
    %1225 = arith.cmpf ogt, %1223, %1224 : vector<2x1xf32>
    %1226 = arith.index_cast %c7_i32_357 : i32 to index
    %c0_365 = arith.constant 0 : index
    %c0_366 = arith.constant 0 : index
    %1227 = vector.load %arg19[%1226, %c0_365, %c0_366] : memref<8x2x128xf32, #tpu.memory_space<vmem>>, vector<1x2x128xf32>
    %1228 = vector.shape_cast %1227 : vector<1x2x128xf32> to vector<2x128xf32>
    %cst_367 = arith.constant dense<0.000000e+00> : vector<2x128xf32>
    %1229 = tpu.matmul %1205, %659, %cst_367 {dimension_numbers = #tpu.dot_dimension_numbers<[1], [0], [0], [1], [0, 0, 1, 1], [], []>, precision = #tpu.contract_precision<fp32>} : vector<2x32xf32>, vector<32x128xf32>, vector<2x128xf32> -> vector<2x128xf32>
    %1230 = arith.addf %1228, %1229 : vector<2x128xf32>
    %1231 = arith.negf %1230 : vector<2x128xf32>
    %1232 = math.exp %1231 : vector<2x128xf32>
    %cst_368 = arith.constant 1.000000e+00 : f32
    %1233 = vector.broadcast %cst_368 : f32 to vector<2x128xf32>
    %1234 = arith.addf %1233, %1232 : vector<2x128xf32>
    %1235 = arith.divf %1233, %1234 : vector<2x128xf32>
    %1236 = math.tanh %1230 : vector<2x128xf32>
    %1237 = vector.extract_strided_slice %1235 {offsets = [0, 0], sizes = [2, 32], strides = [1, 1]} : vector<2x128xf32> to vector<2x32xf32>
    %1238 = vector.extract_strided_slice %1235 {offsets = [0, 32], sizes = [2, 32], strides = [1, 1]} : vector<2x128xf32> to vector<2x32xf32>
    %1239 = vector.extract_strided_slice %1236 {offsets = [0, 64], sizes = [2, 32], strides = [1, 1]} : vector<2x128xf32> to vector<2x32xf32>
    %1240 = vector.extract_strided_slice %1235 {offsets = [0, 96], sizes = [2, 32], strides = [1, 1]} : vector<2x128xf32> to vector<2x32xf32>
    %1241 = arith.mulf %1238, %1208 : vector<2x32xf32>
    %1242 = arith.mulf %1237, %1239 : vector<2x32xf32>
    %1243 = arith.addf %1241, %1242 : vector<2x32xf32>
    %1244 = math.tanh %1243 : vector<2x32xf32>
    %1245 = arith.mulf %1240, %1244 : vector<2x32xf32>
    %1246 = arith.index_cast %1215 : i32 to index
    %c0_369 = arith.constant 0 : index
    %c0_370 = arith.constant 0 : index
    %1247 = vector.load %arg20[%1246, %c0_369, %c0_370] : memref<8x2x128xf32, #tpu.memory_space<vmem>>, vector<1x2x128xf32>
    %1248 = vector.shape_cast %1247 : vector<1x2x128xf32> to vector<2x128xf32>
    %cst_371 = arith.constant dense<0.000000e+00> : vector<2x128xf32>
    %1249 = tpu.matmul %1211, %660, %cst_371 {dimension_numbers = #tpu.dot_dimension_numbers<[1], [0], [0], [1], [0, 0, 1, 1], [], []>, precision = #tpu.contract_precision<fp32>} : vector<2x32xf32>, vector<32x128xf32>, vector<2x128xf32> -> vector<2x128xf32>
    %1250 = arith.addf %1248, %1249 : vector<2x128xf32>
    %1251 = arith.negf %1250 : vector<2x128xf32>
    %1252 = math.exp %1251 : vector<2x128xf32>
    %cst_372 = arith.constant 1.000000e+00 : f32
    %1253 = vector.broadcast %cst_372 : f32 to vector<2x128xf32>
    %1254 = arith.addf %1253, %1252 : vector<2x128xf32>
    %1255 = arith.divf %1253, %1254 : vector<2x128xf32>
    %1256 = math.tanh %1250 : vector<2x128xf32>
    %1257 = vector.extract_strided_slice %1255 {offsets = [0, 0], sizes = [2, 32], strides = [1, 1]} : vector<2x128xf32> to vector<2x32xf32>
    %1258 = vector.extract_strided_slice %1255 {offsets = [0, 32], sizes = [2, 32], strides = [1, 1]} : vector<2x128xf32> to vector<2x32xf32>
    %1259 = vector.extract_strided_slice %1256 {offsets = [0, 64], sizes = [2, 32], strides = [1, 1]} : vector<2x128xf32> to vector<2x32xf32>
    %1260 = vector.extract_strided_slice %1255 {offsets = [0, 96], sizes = [2, 32], strides = [1, 1]} : vector<2x128xf32> to vector<2x32xf32>
    %1261 = arith.mulf %1258, %1214 : vector<2x32xf32>
    %1262 = arith.mulf %1257, %1259 : vector<2x32xf32>
    %1263 = arith.addf %1261, %1262 : vector<2x32xf32>
    %1264 = math.tanh %1263 : vector<2x32xf32>
    %1265 = arith.mulf %1260, %1264 : vector<2x32xf32>
    %cst_373 = arith.constant 0.000000e+00 : f32
    %1266 = vector.shape_cast %1220 : vector<2x1xi1> to vector<2x1xi1>
    %1267 = vector.broadcast %1266 : vector<2x1xi1> to vector<2x32xi1>
    %1268 = vector.broadcast %cst_373 : f32 to vector<2x32xf32>
    %1269 = arith.select %1267, %1245, %1268 : vector<2x32xi1>, vector<2x32xf32>
    %1270 = arith.index_cast %c7_i32_357 : i32 to index
    %c0_374 = arith.constant 0 : index
    %c0_375 = arith.constant 0 : index
    %1271 = vector.load %arg14[%1270, %c0_374, %c0_375] : memref<8x2x32xf32, #tpu.memory_space<vmem>>, vector<1x2x32xf32>
    %1272 = vector.shape_cast %1271 : vector<1x2x32xf32> to vector<2x32xf32>
    %1273 = vector.shape_cast %1269 : vector<2x32xf32> to vector<1x2x32xf32>
    tpu.vector_store %arg14[%1270, %c0_374, %c0_375], %1273 {strides = array<i32>} : memref<8x2x32xf32, #tpu.memory_space<vmem>>, vector<1x2x32xf32>,
    %cst_376 = arith.constant 0.000000e+00 : f32
    %1274 = vector.shape_cast %1225 : vector<2x1xi1> to vector<2x1xi1>
    %1275 = vector.broadcast %1274 : vector<2x1xi1> to vector<2x32xi1>
    %1276 = vector.broadcast %cst_376 : f32 to vector<2x32xf32>
    %1277 = arith.select %1275, %1265, %1276 : vector<2x32xi1>, vector<2x32xf32>
    %1278 = arith.index_cast %1215 : i32 to index
    %c0_377 = arith.constant 0 : index
    %c0_378 = arith.constant 0 : index
    %1279 = vector.load %arg15[%1278, %c0_377, %c0_378] : memref<8x2x32xf32, #tpu.memory_space<vmem>>, vector<1x2x32xf32>
    %1280 = vector.shape_cast %1279 : vector<1x2x32xf32> to vector<2x32xf32>
    %1281 = vector.shape_cast %1277 : vector<2x32xf32> to vector<1x2x32xf32>
    tpu.vector_store %arg15[%1278, %c0_377, %c0_378], %1281 {strides = array<i32>} : memref<8x2x32xf32, #tpu.memory_space<vmem>>, vector<1x2x32xf32>,
    %1282 = vector.shape_cast %1220 : vector<2x1xi1> to vector<2x1xi1>
    %1283 = vector.broadcast %1282 : vector<2x1xi1> to vector<2x32xi1>
    %1284 = arith.select %1283, %1245, %1205 : vector<2x32xi1>, vector<2x32xf32>
    %1285 = vector.shape_cast %1220 : vector<2x1xi1> to vector<2x1xi1>
    %1286 = vector.broadcast %1285 : vector<2x1xi1> to vector<2x32xi1>
    %1287 = arith.select %1286, %1243, %1208 : vector<2x32xi1>, vector<2x32xf32>
    %1288 = vector.shape_cast %1225 : vector<2x1xi1> to vector<2x1xi1>
    %1289 = vector.broadcast %1288 : vector<2x1xi1> to vector<2x32xi1>
    %1290 = arith.select %1289, %1265, %1211 : vector<2x32xi1>, vector<2x32xf32>
    %1291 = vector.shape_cast %1225 : vector<2x1xi1> to vector<2x1xi1>
    %1292 = vector.broadcast %1291 : vector<2x1xi1> to vector<2x32xi1>
    %1293 = arith.select %1292, %1263, %1214 : vector<2x32xi1>, vector<2x32xf32>
    %c8_i32_379 = arith.constant 8 : i32
    %1294 = tpu.concatenate %1284, %1290 in 1 : vector<2x32xf32>, vector<2x32xf32> -> vector<2x64xf32>
    %c0_380 = arith.constant 0 : index
    %c0_381 = arith.constant 0 : index
    %1295 = vector.load %arg12[%c0_380, %c0_381] : memref<64x32xf32, #tpu.memory_space<vmem>>, vector<64x32xf32>
    %cst_382 = arith.constant dense<0.000000e+00> : vector<2x32xf32>
    %1296 = tpu.matmul %1294, %1295, %cst_382 {dimension_numbers = #tpu.dot_dimension_numbers<[1], [0], [0], [1], [0, 0, 1, 1], [], []>, precision = #tpu.contract_precision<fp32>} : vector<2x64xf32>, vector<64x32xf32>, vector<2x32xf32> -> vector<2x32xf32>
    %c0_383 = arith.constant 0 : index
    %c0_384 = arith.constant 0 : index
    %1297 = vector.load %arg13[%c0_383, %c0_384] : memref<1x32xf32, #tpu.memory_space<vmem>>, vector<1x32xf32>
    %1298 = vector.broadcast %1297 : vector<1x32xf32> to vector<2x32xf32>
    %1299 = arith.addf %1296, %1298 : vector<2x32xf32>
    %1300 = math.tanh %1299 : vector<2x32xf32>
    %c0_385 = arith.constant 0 : index
    %c0_386 = arith.constant 0 : index
    %c0_387 = arith.constant 0 : index
    %1301 = vector.load %arg16[%c0_385, %c0_386, %c0_387] : memref<1x2x32xf32, #tpu.memory_space<vmem>>, vector<1x2x32xf32>
    %1302 = vector.shape_cast %1301 : vector<1x2x32xf32> to vector<2x32xf32>
    %1303 = vector.shape_cast %1300 : vector<2x32xf32> to vector<1x2x32xf32>
    tpu.vector_store %arg16[%c0_385, %c0_386, %c0_387], %1303 {strides = array<i32>} : memref<1x2x32xf32, #tpu.memory_space<vmem>>, vector<1x2x32xf32>,
    return
  }
}

</mosaic_0001>

<bundles_post_ra>
// kernel: tpu_custom_call.1
= control target key start
LH: loop header
LB: loop body
LE: loop exit
PB: predicated region body
PF: predicated region fallthrough
CT: control target
= control target key end

     0   :  { %s28892_s0 = inlined_call_operand.vmem [shape: f32[8,2,128], index: 0, kind: input, shape index: {}]   ;;  %s28893_s1 = inlined_call_operand.hbm [shape: f32[8,2,128], index: 1, kind: input, shape index: {}]   ;;  %s28894_s2 = inlined_call_operand.vmem [shape: f32[8,2,1], index: 2, kind: input, shape index: {}]   ;;  %s28895_s3 = inlined_call_operand.vmem [shape: f32[32,128], index: 3, kind: input, shape index: {}]   ;;  %s28896_s4 = inlined_call_operand.vmem [shape: f32[32,128], index: 4, kind: input, shape index: {}]   ;;  %s28897_s5 = inlined_call_operand.vmem [shape: f32[32,128], index: 5, kind: input, shape index: {}]   ;;  %s28898_s6 = inlined_call_operand.hbm [shape: f32[32,128], index: 6, kind: input, shape index: {}]   ;;  %s28899_s7 = inlined_call_operand.hbm [shape: f32[32,128], index: 7, kind: input, shape index: {}]   ;;  %s28900_s8 = inlined_call_operand.hbm [shape: f32[32,128], index: 8, kind: input, shape index: {}]   ;;  %s28901_s9 = inlined_call_operand.hbm [shape: f32[32,128], index: 9, kind: input, shape index: {}]   ;;  %s28902_s10 = inlined_call_operand.hbm [shape: f32[32,128], index: 10, kind: input, shape index: {}]   ;;  %s28903_s11 = inlined_call_operand.vmem [shape: f32[2,128], index: 11, kind: input, shape index: {}]   ;;  %s28904_s12 = inlined_call_operand.vmem [shape: f32[64,32], index: 12, kind: input, shape index: {}]   ;;  %s28905_s13 = inlined_call_operand.vmem [shape: f32[1,32], index: 13, kind: input, shape index: {}]   ;;  %s28906_s14 = inlined_call_operand.hbm [shape: f32[8,2,32], index: 14, kind: output, shape index: {0}]   ;;  %s28907_s15 = inlined_call_operand.hbm [shape: f32[8,2,32], index: 15, kind: output, shape index: {1}]   ;;  %s28908_s16 = inlined_call_operand.hbm [shape: f32[1,2,32], index: 16, kind: output, shape index: {2}]  }
   0x1   :  { %28918 = sst [smem:[#allocation27_spill]] %s28892_s0 }
   0x2   :  { %28919 = sst [smem:[#allocation28_spill]] %s28908_s16 }
   0x3   :  { %22 = vsyncpa [#allocation7], 0 }
   0x4   :  { %23 = vsyncpa [#allocation10], 0 }
   0x5   :  { %24 = vsyncpa [#allocation13], 0 }
   0x6   :  { %25 = vsyncpa [#allocation16], 0 }
   0x7   :  { %26 = vsyncpa [#allocation8], 0 }
   0x8   :  { %27 = vsyncpa [#allocation19], 0  ;;  %s25823_s21 = smov [#allocation9]   ;;  %s25613_s25 = scalar_lea.hbm %s28898_s6, 512 }
   0x9   :  { %s55_s22 = sshll.u32 %s25823_s21, 4  ;;  %p25614_p0 = scmp.ne.s32.totalorder %s28898_s6, %s25613_s25  ;;  %s56_s22 = int_to_ptr.vmem [resolvable:$true] %s55_s22 }
   0xa   :  { %p25617_p1 = scmp.lt.u32.totalorder %s25613_s25, %s28898_s6 }
   0xc   :  { %p25619_p2 = pnand %p25617_p1, %p25614_p0 }
   0xe   :  { %25622 = shalt.err (!%p25619_p2)
}
   0xf   :  { %s25623_s30 = scalar_lea.vmem %s56_s22, 512  ;;  %p25628_p4 = scmp.lt.s32.totalorder %s56_s22, %s56_s22 }
  0x10   :  { %p25624_p3 = scmp.ne.s32.totalorder %s56_s22, %s25623_s30  ;;  %p25629_p5 = scmp.lt.s32.totalorder %s25623_s30, %s25623_s30 }
  0x12   :  { %p25630_p6 = por %p25629_p5, %p25628_p4 }
  0x14   :  { %p25631_p7 = pnand %p25630_p6, %p25624_p3 }
  0x16   :  { %25634 = shalt.err (!%p25631_p7)
}
  0x17   :  { %s25824_s0 = smov 128   ;;  %s25825_s17 = smov 8  }
  0x18   :  { %61 = dma.hbm_to_vmem [thread:$0]  %s28898_s6, 512, %s56_s22, [#allocation10], %s25824_s0, %s25824_s0, %s25825_s17  }
  0x19   :  { %s25826_s20 = smov [#allocation12]   ;;  %s25827_s23 = smov [#allocation6]  }
  0x1a   :  { %s79_s21 = sshll.u32 %s25826_s20, 4  ;;  %s35_s24 = sshll.u32 %s25827_s23, 4  ;;  %s80_s21 = int_to_ptr.vmem [resolvable:$true] %s79_s21  ;;  %s36_s24 = int_to_ptr.vmem [resolvable:$true] %s35_s24 }
  0x1b   :  { %s25635_s27 = scalar_lea.hbm %s28900_s8, 512 }
  0x1c   :  { %p25636_p8 = scmp.ne.s32.totalorder %s28900_s8, %s25635_s27  ;;  %p25639_p9 = scmp.lt.u32.totalorder %s25635_s27, %s28900_s8 }
  0x1e   :  { %p25641_p10 = pnand %p25639_p9, %p25636_p8 }
  0x20   :  { %25644 = shalt.err (!%p25641_p10)
}
  0x21   :  { %s25645_s6 = scalar_lea.vmem %s80_s21, 512  ;;  %p25650_p12 = scmp.lt.s32.totalorder %s80_s21, %s80_s21 }
  0x22   :  { %p25646_p11 = scmp.ne.s32.totalorder %s80_s21, %s25645_s6  ;;  %p25651_p13 = scmp.lt.s32.totalorder %s25645_s6, %s25645_s6 }
  0x24   :  { %p25652_p0 = por %p25651_p13, %p25650_p12 }
  0x26   :  { %p25653_p1 = pnand %p25652_p0, %p25646_p11 }
  0x28   :  { %25656 = shalt.err (!%p25653_p1)
}
  0x29   :  { %85 = dma.hbm_to_vmem [thread:$0]  %s28900_s8, 512, %s80_s21, [#allocation13], %s25824_s0, %s25824_s0, %s25825_s17  }
  0x2a   :  { %s25657_s20 = scalar_lea.hbm %s28893_s1, 256 }
  0x2b   :  { %p25658_p2 = scmp.ne.s32.totalorder %s28893_s1, %s25657_s20  ;;  %p25661_p3 = scmp.lt.u32.totalorder %s25657_s20, %s28893_s1 }
  0x2d   :  { %p25663_p4 = pnand %p25661_p3, %p25658_p2 }
  0x2f   :  { %25666 = shalt.err (!%p25663_p4)
}
  0x30   :  { %s25667_s28 = scalar_lea.vmem %s36_s24, 256  ;;  %p25672_p6 = scmp.lt.s32.totalorder %s36_s24, %s36_s24 }
  0x31   :  { %p25668_p5 = scmp.ne.s32.totalorder %s36_s24, %s25667_s28  ;;  %p25673_p7 = scmp.lt.s32.totalorder %s25667_s28, %s25667_s28 }
  0x33   :  { %p25674_p8 = por %p25673_p7, %p25672_p6 }
  0x35   :  { %p25675_p9 = pnand %p25674_p8, %p25668_p5 }
  0x37   :  { %25678 = shalt.err (!%p25675_p9)
}
  0x38   :  { %s25828_s8 = smov 32   ;;  %s25829_s21 = smov 2  }
  0x39   :  { %41 = dma.hbm_to_vmem [thread:$0]  %s28893_s1, 256, %s36_s24, [#allocation7], %s25828_s8, %s25828_s8, %s25829_s21  }
  0x3a   :  { %s25830_s6 = smov [#allocation11]   ;;  %s25831_s18 = smov [#allocation14]  }
  0x3b   :  { %s67_s22 = sshll.u32 %s25830_s6, 4  ;;  %s91_s19 = sshll.u32 %s25831_s18, 4  ;;  %s68_s22 = int_to_ptr.vmem [resolvable:$true] %s67_s22  ;;  %s92_s19 = int_to_ptr.vmem [resolvable:$true] %s91_s19 }
  0x3c   :  { %s25679_s23 = scalar_lea.hbm %s28899_s7, 512 }
  0x3d   :  { %p25680_p10 = scmp.ne.s32.totalorder %s28899_s7, %s25679_s23  ;;  %p25683_p11 = scmp.lt.u32.totalorder %s25679_s23, %s28899_s7 }
  0x3f   :  { %p25685_p12 = pnand %p25683_p11, %p25680_p10 }
  0x41   :  { %25688 = shalt.err (!%p25685_p12)
}
  0x42   :  { %s25689_s1 = scalar_lea.vmem %s68_s22, 512  ;;  %p25694_p0 = scmp.lt.s32.totalorder %s68_s22, %s68_s22 }
  0x43   :  { %p25690_p13 = scmp.ne.s32.totalorder %s68_s22, %s25689_s1  ;;  %p25695_p1 = scmp.lt.s32.totalorder %s25689_s1, %s25689_s1 }
  0x45   :  { %p25696_p2 = por %p25695_p1, %p25694_p0 }
  0x47   :  { %p25697_p3 = pnand %p25696_p2, %p25690_p13 }
  0x49   :  { %25700 = shalt.err (!%p25697_p3)
}
  0x4a   :  { %73 = dma.hbm_to_vmem [thread:$0]  %s28899_s7, 512, %s68_s22, [#allocation10], %s25824_s0, %s25824_s0, %s25825_s17  }
  0x4b   :  { %s25701_s18 = scalar_lea.hbm %s28901_s9, 512 }
  0x4c   :  { %p25702_p4 = scmp.ne.s32.totalorder %s28901_s9, %s25701_s18  ;;  %p25705_p5 = scmp.lt.u32.totalorder %s25701_s18, %s28901_s9 }
  0x4e   :  { %p25707_p6 = pnand %p25705_p5, %p25702_p4 }
  0x50   :  { %25710 = shalt.err (!%p25707_p6)
}
  0x51   :  { %s25711_s26 = scalar_lea.vmem %s92_s19, 512  ;;  %p25716_p8 = scmp.lt.s32.totalorder %s92_s19, %s92_s19 }
  0x52   :  { %p25712_p7 = scmp.ne.s32.totalorder %s92_s19, %s25711_s26  ;;  %p25717_p9 = scmp.lt.s32.totalorder %s25711_s26, %s25711_s26 }
  0x54   :  { %p25718_p10 = por %p25717_p9, %p25716_p8 }
  0x56   :  { %p25719_p11 = pnand %p25718_p10, %p25712_p7 }
  0x58   :  { %25722 = shalt.err (!%p25719_p11)
}
  0x59   :  { %97 = dma.hbm_to_vmem [thread:$0]  %s28901_s9, 512, %s92_s19, [#allocation13], %s25824_s0, %s25824_s0, %s25825_s17  }
  0x5a   :  { %s25832_s27 = smov [#allocation15]   ;;  %s25723_s29 = scalar_lea.hbm %s28902_s10, 512 }
  0x5b   :  { %s103_s28 = sshll.u32 %s25832_s27, 4  ;;  %p25724_p12 = scmp.ne.s32.totalorder %s28902_s10, %s25723_s29  ;;  %s104_s28 = int_to_ptr.vmem [resolvable:$true] %s103_s28 }
  0x5c   :  { %p25727_p13 = scmp.lt.u32.totalorder %s25723_s29, %s28902_s10 }
  0x5e   :  { %p25729_p0 = pnand %p25727_p13, %p25724_p12 }
  0x60   :  { %25732 = shalt.err (!%p25729_p0)
}
  0x61   :  { %s25733_s20 = scalar_lea.vmem %s104_s28, 512  ;;  %p25738_p2 = scmp.lt.s32.totalorder %s104_s28, %s104_s28 }
  0x62   :  { %p25734_p1 = scmp.ne.s32.totalorder %s104_s28, %s25733_s20  ;;  %p25739_p3 = scmp.lt.s32.totalorder %s25733_s20, %s25733_s20 }
  0x64   :  { %p25740_p4 = por %p25739_p3, %p25738_p2 }
  0x66   :  { %p25741_p5 = pnand %p25740_p4, %p25734_p1 }
  0x68   :  { %25744 = shalt.err (!%p25741_p5)
}
  0x69   :  { %109 = dma.hbm_to_vmem [thread:$0]  %s28902_s10, 512, %s104_s28, [#allocation16], %s25824_s0, %s25824_s0, %s25825_s17  }
  0x6a   :  { %25811 = dma.done.wait [#allocation7], 256  }
  0x6b   :  { %25812 = vsyncadd [#allocation7], 4294967040 }
  0x6c   :  { %25813 = dma.done.wait [#allocation10], 1024  }
  0x6d   :  { %25814 = vsyncadd [#allocation10], 4294966272 }
  0x6e   :  { %25815 = dma.done.wait [#allocation13], 1024  }
  0x6f   :  { %25816 = vsyncadd [#allocation13], 4294966272 }
  0x70   :  { %25817 = dma.done.wait [#allocation16], 512  }
  0x71   :  { %25818 = vsyncadd [#allocation16], 4294966784  ;;  %v28913_v0 = vmov 0.0|0.0   ;;  %vm28911_vm0 = vmmov 0   ;;  %v28915_v1 = vmov 0.0   ;;  %v134_v2 = vld [vmem:[%s28895_s3] sm:$0xff] }
  0x72   :  { %23864 = vmatprep.subr.bf16.mxu0 %v28913_v0  ;;  %23870 = vmatprep.subr.bf16.mxu1 %v28913_v0  ;;  %v135_v3 = vld [vmem:[%s28895_s3 + $0x8] sm:$0xff]  ;;  %v136_v4 = vld [vmem:[%s28895_s3 + $0x10] sm:$0xff]  ;;  %v153_v5 = vand.u32 4294901760, %v134_v2  ;;  %v137_v7 = vld [vmem:[%s28895_s3 + $0x18] sm:$0xff]  ;;  %s28920_s16 = sld [smem:[#allocation27_spill]]  ;;  %s25837_s20 = smov 64  }
  0x73   :  { %21382 = vmatprep.mubr.msk.f32.mxu0 %vm28911_vm0, %v28915_v1  ;;  %21393 = vmatprep.mubr.msk.f32.mxu1 %vm28911_vm0, %v28915_v1  ;;  %v156_v6 = vand.u32 4294901760, %v135_v3  ;;  %v159_v8 = vand.u32 4294901760, %v136_v4  ;;  %v162_v9 = vand.u32 4294901760, %v137_v7  ;;  %v138_v29 = vld [vmem:[%s28896_s4] sm:$0xff]  ;;  %v139_v30 = vld [vmem:[%s28896_s4 + $0x8] sm:$0xff]  ;;  %v140_v36 = vld [vmem:[%s28896_s4 + $0x10] sm:$0xff] }
  0x74   :  { %v233_v11 = vsub.f32 %v134_v2, %v153_v5  ;;  %v665_v34 = vand.u32 4294901760, %v138_v29  ;;  %v668_v35 = vand.u32 4294901760, %v139_v30  ;;  %v141_v37 = vld [vmem:[%s28896_s4 + $0x18] sm:$0xff]  ;;  %v671_v38 = vand.u32 4294901760, %v140_v36  ;;  %s25840_s30 = smov [#allocation17]  }
  0x75   :  { %v26035_v10 = vpack.c.bf16 %v156_v6, %v153_v5  ;;  %v240_v12 = vsub.f32 %v135_v3, %v156_v6  ;;  %v247_v13 = vsub.f32 %v136_v4, %v159_v8  ;;  %v254_v14 = vsub.f32 %v137_v7, %v162_v9  ;;  %s20094_s6 = sshll.u32 %s25840_s30, 4  ;;  %s20095_s6 = int_to_ptr.vmem [resolvable:$true] %s20094_s6 }
  0x76   :  { %v26038_v15 = vpack.c.bf16 %v162_v9, %v159_v8  ;;  %v234_v16 = vand.u32 4294901760, %v233_v11  ;;  %v674_v40 = vand.u32 4294901760, %v141_v37  ;;  %v745_v41 = vsub.f32 %v138_v29, %v665_v34 }
  0x77   :  { %23866 = vmatpush3.bf16.msra.mxu0 %v26035_v10  ;;  %v241_v17 = vand.u32 4294901760, %v240_v12  ;;  %v248_v18 = vand.u32 4294901760, %v247_v13  ;;  %v255_v19 = vand.u32 4294901760, %v254_v14  ;;  %v26042_v26 = vpack.c.bf16 %v240_v12, %v233_v11 }
  0x78   :  { %23867 = vmatprep.subr.bf16.mxu0 %v28913_v0  ;;  %v235_v20 = vsub.f32 %v233_v11, %v234_v16  ;;  %v26058_v33 = vpack.c.bf16 %v254_v14, %v247_v13  ;;  %v752_v42 = vsub.f32 %v139_v30, %v668_v35  ;;  %v746_v44 = vand.u32 4294901760, %v745_v41 }
  0x79   :  { %v242_v21 = vsub.f32 %v240_v12, %v241_v17  ;;  %v249_v22 = vsub.f32 %v247_v13, %v248_v18  ;;  %v256_v23 = vsub.f32 %v254_v14, %v255_v19  ;;  %v26072_v39 = vpack.c.bf16 %v241_v17, %v234_v16 }
  0x7a   :  { %v236_v24 = vand.u32 4294901760, %v235_v20  ;;  %v26078_v43 = vpack.c.bf16 %v255_v19, %v248_v18  ;;  %v753_v45 = vand.u32 4294901760, %v752_v42  ;;  %v759_v46 = vsub.f32 %v140_v36, %v671_v38 }
  0x7b   :  { %23869 = vmatpush3.bf16.msra.mxu0 %v26038_v15  ;;  %v243_v25 = vand.u32 4294901760, %v242_v21  ;;  %v250_v27 = vand.u32 4294901760, %v249_v22  ;;  %v257_v28 = vand.u32 4294901760, %v256_v23  ;;  %v766_v47 = vsub.f32 %v141_v37, %v674_v40  ;;  %v147_v21 = vld [vmem:[%s28920_s16] sm:$0x3] }
  0x7c   :  { %23876 = vmatprep.subr.bf16.mxu0 %v28913_v0  ;;  %v26088_v48 = vpack.c.bf16 %v668_v35, %v665_v34  ;;  %v747_v49 = vsub.f32 %v745_v41, %v746_v44  ;;  %v754_v50 = vsub.f32 %v752_v42, %v753_v45  ;;  %v760_v51 = vand.u32 4294901760, %v759_v46 }
  0x7d   :  { %v26051_v31 = vpack.c.bf16 %v243_v25, %v236_v24  ;;  %v26056_v32 = vpack.c.bf16 %v257_v28, %v250_v27  ;;  %v767_v52 = vand.u32 4294901760, %v766_v47  ;;  %v26096_v53 = vpack.c.bf16 %v674_v40, %v671_v38 }
  0x7e   :  { %21383 = vmatmul.mubr.f32.vlgmr.msra.gmra.mrb[0].mxu0 %v28915_v1  ;;  %v748_v54 = vand.u32 4294901760, %v747_v49  ;;  %v755_v55 = vand.u32 4294901760, %v754_v50  ;;  %v761_v56 = vsub.f32 %v759_v46, %v760_v51  ;;  %v26110_v59 = vpack.c.bf16 %v752_v42, %v745_v41 }
  0x7f   :  { %23872 = vmatpush3.bf16.msra.mxu1 %v26051_v31  ;;  %23878 = vmatpush3.bf16.msra.mxu0 %v26042_v26  ;;  %v768_v57 = vsub.f32 %v766_v47, %v767_v52  ;;  %v26120_v63 = vpack.c.bf16 %v766_v47, %v759_v46  ;;  %v26130_v2 = vpack.c.bf16 %v753_v45, %v746_v44  ;;  %v25836_v4 = vmov 0   ;;  %v663_v47 = vld [vmem:[#allocation6 + $0xe] sm:$0x3] }
  0x80   :  { %23873 = vmatprep.subr.bf16.mxu1 %v28913_v0  ;;  %23879 = vmatprep.subr.bf16.mxu0 %v28913_v0  ;;  %v26108_v58 = vpack.c.bf16 %v755_v55, %v748_v54  ;;  %v762_v60 = vand.u32 4294901760, %v761_v56  ;;  %v26138_v3 = vpack.c.bf16 %v767_v52, %v760_v51  ;;  %v142_v54 = vld [vmem:[%s28894_s2] sm:$0x3]  ;;  %vm28917_vm5 = vcmask 261120  }
  0x81   :  { %21404 = vmatprep.mubr.msk.f32.mxu0 %vm28911_vm0, %v28915_v1  ;;  %v769_v61 = vand.u32 4294901760, %v768_v57  ;;  %25353 = vset.pattern.permute.xlu0 %v25836_v4  ;;  %vm143_vm1 = vcmp.gt.f32.partialorder %v142_v54, 0.5  ;;  %vm1184_vm6 = vcmask 254976  }
  0x82   :  { %25354 = vset.pattern.permute.xlu1 %v25836_v4  ;;  %v1174_v56 = vsel %vm143_vm1, 1, %v25836_v4 }
  0x83   :  { %23875 = vmatpush3.bf16.msra.mxu1 %v26056_v32  ;;  %23881 = vmatpush3.bf16.msra.mxu0 %v26058_v33  ;;  %v26118_v62 = vpack.c.bf16 %v769_v61, %v762_v60 }
  0x84   :  { %23882 = vmatprep.subr.bf16.mxu1 %v28913_v0  ;;  %23888 = vmatprep.subr.bf16.mxu0 %v28913_v0 }
  0x86   :  { %21394 = vmatmul.mubr.f32.vlgmr.msra.gmra.mrb[0].mxu1 %v28915_v1  ;;  %21405 = vmatmul.mubr.f32.vlgmr.msra.gmra.mrb[2].mxu0 %v28915_v1 }
  0x87   :  { %23884 = vmatpush3.bf16.msra.mxu1 %v26035_v10  ;;  %23890 = vmatpush3.bf16.msra.mxu0 %v26072_v39 }
  0x88   :  { %23885 = vmatprep.subr.bf16.mxu1 %v28913_v0  ;;  %23891 = vmatprep.subr.bf16.mxu0 %v28913_v0 }
  0x89   :  { %21415 = vmatprep.mubr.msk.f32.mxu1 %vm28911_vm0, %v28915_v1  ;;  %21426 = vmatprep.mubr.msk.f32.mxu0 %vm28911_vm0, %v28915_v1 }
  0x8b   :  { %23887 = vmatpush3.bf16.msra.mxu1 %v26038_v15  ;;  %23893 = vmatpush3.bf16.msra.mxu0 %v26078_v43 }
  0x8c   :  { %23894 = vmatprep.subr.bf16.mxu1 %v28913_v0  ;;  %23900 = vmatprep.subr.bf16.mxu0 %v28913_v0 }
  0x8e   :  { %21416 = vmatmul.mubr.f32.vlgmr.msra.gmra.mrb[2].mxu1 %v28915_v1  ;;  %21427 = vmatmul.mubr.f32.vlgmr.msra.gmra.mrb[4].mxu0 %v28915_v1 }
  0x8f   :  { %23896 = vmatpush3.bf16.msra.mxu1 %v26035_v10  ;;  %23902 = vmatpush3.bf16.msra.mxu0 %v26088_v48 }
  0x90   :  { %23897 = vmatprep.subr.bf16.mxu1 %v28913_v0  ;;  %23903 = vmatprep.subr.bf16.mxu0 %v28913_v0 }
  0x91   :  { %21437 = vmatprep.mubr.msk.f32.mxu1 %vm28911_vm0, %v28915_v1  ;;  %21448 = vmatprep.mubr.msk.f32.mxu0 %vm28911_vm0, %v28915_v1 }
  0x93   :  { %23899 = vmatpush3.bf16.msra.mxu1 %v26038_v15  ;;  %23905 = vmatpush3.bf16.msra.mxu0 %v26096_v53 }
  0x94   :  { %23906 = vmatprep.subr.bf16.mxu1 %v28913_v0  ;;  %23912 = vmatprep.subr.bf16.mxu0 %v28913_v0 }
  0x96   :  { %21438 = vmatmul.mubr.f32.vlgmr.msra.gmra.mrb[4].mxu1 %v28915_v1  ;;  %21449 = vmatmul.mubr.f32.vlgmr.msra.gmra.mrb[6].mxu0 %v28915_v1 }
  0x97   :  { %23908 = vmatpush3.bf16.msra.mxu1 %v26108_v58  ;;  %23914 = vmatpush3.bf16.msra.mxu0 %v26110_v59 }
  0x98   :  { %23909 = vmatprep.subr.bf16.mxu1 %v28913_v0  ;;  %23915 = vmatprep.subr.bf16.mxu0 %v28913_v0 }
  0x99   :  { %21459 = vmatprep.mubr.msk.f32.mxu1 %vm28911_vm0, %v28915_v1  ;;  %21470 = vmatprep.mubr.msk.f32.mxu0 %vm28911_vm0, %v28915_v1 }
  0x9b   :  { %23911 = vmatpush3.bf16.msra.mxu1 %v26118_v62  ;;  %23917 = vmatpush3.bf16.msra.mxu0 %v26120_v63 }
  0x9c   :  { %23918 = vmatprep.subr.bf16.mxu1 %v28913_v0  ;;  %23924 = vmatprep.subr.bf16.mxu0 %v28913_v0 }
  0x9e   :  { %21460 = vmatmul.mubr.f32.vlgmr.msra.gmra.mrb[6].mxu1 %v28915_v1  ;;  %21471 = vmatmul.mubr.f32.vlgmr.msra.gmra.mrb[8].mxu0 %v28915_v1 }
  0x9f   :  { %23920 = vmatpush3.bf16.msra.mxu1 %v26088_v48  ;;  %23926 = vmatpush3.bf16.msra.mxu0 %v26130_v2 }
  0xa0   :  { %23921 = vmatprep.subr.bf16.mxu1 %v28913_v0  ;;  %23927 = vmatprep.subr.bf16.mxu0 %v28913_v0 }
  0xa1   :  { %21481 = vmatprep.mubr.msk.f32.mxu1 %vm28911_vm0, %v28915_v1  ;;  %21492 = vmatprep.mubr.msk.f32.mxu0 %vm28911_vm0, %v28915_v1 }
  0xa3   :  { %23923 = vmatpush3.bf16.msra.mxu1 %v26096_v53  ;;  %23929 = vmatpush3.bf16.msra.mxu0 %v26138_v3 }
  0xa4   :  { %23930 = vmatprep.subr.bf16.mxu1 %v28913_v0  ;;  %23936 = vmatprep.subr.bf16.mxu0 %v28913_v0 }
  0xa6   :  { %21482 = vmatmul.mubr.f32.vlgmr.msra.gmra.mrb[8].mxu1 %v28915_v1  ;;  %21493 = vmatmul.mubr.f32.vlgmr.msra.gmra.mrb[10].mxu0 %v28915_v1 }
  0xa7   :  { %23932 = vmatpush3.bf16.msra.mxu1 %v26088_v48  ;;  %21503 = vmatprep.mubr.msk.f32.mxu1 %vm28911_vm0, %v28915_v1 }
  0xa8   :  { %23933 = vmatprep.subr.bf16.mxu1 %v28913_v0  ;;  %23938 = vmatpush3.bf16.msra.mxu0 %v26035_v10 }
  0xa9   :  { %23939 = vmatprep.subr.bf16.mxu0 %v28913_v0  ;;  %21514 = vmatprep.mubr.msk.f32.mxu0 %vm28911_vm0, %v28915_v1 }
  0xab   :  { %23935 = vmatpush3.bf16.msra.mxu1 %v26096_v53 }
  0xac   :  { %23942 = vmatprep.subr.bf16.mxu1 %v28913_v0  ;;  %23941 = vmatpush3.bf16.msra.mxu0 %v26038_v15 }
  0xad   :  { %23948 = vmatprep.subr.bf16.mxu0 %v28913_v0 }
  0xae   :  { %21504 = vmatmul.mubr.f32.vlgmr.msra.gmra.mrb[10].mxu1 %v28915_v1 }
  0xaf   :  { %23944 = vmatpush3.bf16.msra.mxu1 %v26051_v31  ;;  %21525 = vmatprep.mubr.msk.f32.mxu1 %vm28911_vm0, %v28915_v1 }
  0xb0   :  { %23945 = vmatprep.subr.bf16.mxu1 %v28913_v0 }
  0xb3   :  { %23947 = vmatpush3.bf16.msra.mxu1 %v26056_v32 }
  0xb4   :  { %23954 = vmatprep.subr.bf16.mxu1 %v28913_v0 }
 0x151   :  { %v227_v5 = vpop.f32.mrb[0].mxu0 }
 0x152   :  { %v21384_v6 = vpop.f32.mrb[1].mxu0 }
 0x159   :  { %v318_v7 = vpop.f32.mrb[0].mxu1  ;;  %v398_v8 = vpop.f32.mrb[2].mxu0 }
 0x15a   :  { %v319_v9 = vadd.f32 %v318_v7, %v227_v5  ;;  %v21395_v11 = vpop.f32.mrb[1].mxu1  ;;  %v21406_v12 = vpop.f32.mrb[3].mxu0 }
 0x15c   :  { %v399_v13 = vadd.f32 %v398_v8, %v319_v9 }
 0x161   :  { %v475_v14 = vpop.f32.mrb[2].mxu1  ;;  %v558_v16 = vpop.f32.mrb[4].mxu0 }
 0x162   :  { %v476_v17 = vadd.f32 %v475_v14, %v399_v13  ;;  %v21417_v18 = vpop.f32.mrb[3].mxu1  ;;  %v21428_v19 = vpop.f32.mrb[5].mxu0 }
 0x163   :  { %v20138_v19 = vld [vmem:[%s28894_s2 + $0xe] sm:$0x3] }
 0x164   :  { %v559_v20 = vadd.f32 %v558_v16, %v476_v17  ;;  %vm146_vm2 = vcmp.gt.f32.partialorder %v20138_v19, 0.5 }
 0x169   :  { %v633_v22 = vpop.f32.mrb[4].mxu1  ;;  %v739_v23 = vpop.f32.mrb[6].mxu0 }
 0x16a   :  { %v634_v24 = vadd.f32 %v633_v22, %v559_v20  ;;  %v21439_v25 = vpop.f32.mrb[5].mxu1  ;;  %v21450_v27 = vpop.f32.mrb[7].mxu0 }
 0x16c   :  { %v637_v28 = vadd.f32 %v634_v24, %v147_v21  ;;  %v1186_v21 = vsel %vm146_vm2, 1, %v25836_v4 }
 0x16e   :  { %25355 = vtanh.f32 %v637_v28  ;;  %v20139_v57 = vmul.f32 -1.442695, %v637_v28 }
 0x171   :  { %v830_v29 = vpop.f32.mrb[6].mxu1  ;;  %v910_v30 = vpop.f32.mrb[8].mxu0 }
 0x172   :  { %v831_v34 = vadd.f32 %v830_v29, %v739_v23  ;;  %v21461_v35 = vpop.f32.mrb[7].mxu1  ;;  %v21472_v36 = vpop.f32.mrb[9].mxu0 }
 0x174   :  { %v911_v37 = vadd.f32 %v910_v30, %v831_v34 }
 0x178   :  { %v25356_v38 = vpop.eup %25355 }
 0x179   :  { %v987_v40 = vpop.f32.mrb[8].mxu1  ;;  %647 = vrot.lane.b32.xlu0 %v25356_v38, %s25837_s20  ;;  %v1070_v41 = vpop.f32.mrb[10].mxu0 }
 0x17a   :  { %v988_v42 = vadd.f32 %v987_v40, %v911_v37  ;;  %v21483_v44 = vpop.f32.mrb[9].mxu1  ;;  %v21494_v45 = vpop.f32.mrb[11].mxu0 }
 0x17c   :  { %v1071_v46 = vadd.f32 %v1070_v41, %v988_v42 }
 0x181   :  { %v1145_v49 = vpop.f32.mrb[10].mxu1 }
 0x182   :  { %v1146_v50 = vadd.f32 %v1145_v49, %v1071_v46  ;;  %v21505_v51 = vpop.f32.mrb[11].mxu1 }
 0x184   :  { %v1149_v52 = vadd.f32 %v1146_v50, %v663_v47 }
 0x186   :  { %25357 = vtanh.f32 %v1149_v52  ;;  %v20140_v5 = vmul.f32 -1.442695, %v1149_v52 }
 0x187   :  { %25359 = vpow2.f32 %v20139_v57 }
 0x190   :  { %v25358_v55 = vpop.eup %25357 }
 0x191   :  { %1159 = vrot.lane.b32.xlu0 %v25358_v55, %s25837_s20  ;;  %v25360_v60 = vpop.eup %25359 }
 0x192   :  { %v641_v61 = vadd.f32 1.0, %v25360_v60 }
 0x194   :  { %25361 = vrcp.f32 %v641_v61 }
 0x195   :  { %1176 = vperm.xlu0 %25353, %v1174_v56   ;;  %25363 = vpow2.f32 %v20140_v5 }
 0x19e   :  { %v25362_v6 = vpop.eup %25361 }
 0x19f   :  { %v25364_v9 = vpop.eup %25363  ;;  %v645_v16 = vmul.f32 0.0, %v25362_v6 }
 0x1a0   :  { %v1153_v11 = vadd.f32 1.0, %v25364_v9 }
 0x1a2   :  { %25365 = vrcp.f32 %v1153_v11 }
 0x1ac   :  { %v25366_v12 = vpop.eup %25365 }
 0x1ad   :  { %v1157_v22 = vmul.f32 0.0, %v25366_v12 }
 0x1eb   :  { %v648_v7 = vpop.permute.xlu0 %647 }
 0x1ec   :  { %v650_v8 = vmul.f32 %v25362_v6, %v648_v7 }
 0x1ee   :  { %652 = vrot.lane.b32.xlu1 %v650_v8, %s25828_s8 }
 0x203   :  { %v1160_v13 = vpop.permute.xlu0 %1159 }
 0x204   :  { %v1162_v14 = vmul.f32 %v25366_v12, %v1160_v13 }
 0x206   :  { %1164 = vrot.lane.b32.xlu1 %v1162_v14, %s25828_s8 }
 0x214   :  { %v26196_v27 = vpop.permute.xlu0 %1176 }
 0x215   :  { %vm1178_vm3 = vcmp.eq.s32.totalorder %v26196_v27, 1 }
 0x260   :  { %v653_v17 = vpop.permute.xlu1 %652 }
 0x261   :  { %v26184_v18 = vadd.f32 %v653_v17, %v645_v16 }
 0x263   :  { %25367 = vtanh.f32 %v26184_v18 }
 0x26d   :  { %v25368_v20 = vpop.eup %25367 }
 0x26e   :  { %658 = vrot.lane.b32.xlu1 %v25368_v20, %s25837_s20 }
 0x272   :  { %1188 = vperm.xlu1 %25354, %v1186_v21  }
 0x278   :  { %v1165_v23 = vpop.permute.xlu1 %1164 }
 0x279   :  { %v26192_v24 = vadd.f32 %v1165_v23, %v1157_v22  ;;  %v20143_v22 = vld [vmem:[%s28920_s16 + $0x2] sm:$0x3] }
 0x27b   :  { %25369 = vtanh.f32 %v26192_v24 }
 0x285   :  { %v25370_v25 = vpop.eup %25369 }
 0x286   :  { %1170 = vrot.lane.b32.xlu0 %v25370_v25, %s25837_s20 }
 0x2e0   :  { %v659_v28 = vpop.permute.xlu1 %658 }
 0x2e1   :  { %v661_v29 = vmul.f32 %v25362_v6, %v659_v28 }
 0x2e3   :  { %v26201_v30 = vsel %vm1178_vm3, %v661_v29, 0.0 }
 0x2e4   :  { %1181 = vrot.lane.b32.xlu1 %v26201_v30, %s25828_s8 }
 0x2f1   :  { %v26205_v34 = vpop.permute.xlu1 %1188 }
 0x2f2   :  { %vm1190_vm4 = vcmp.eq.s32.totalorder %v26205_v34, 1 }
 0x2f8   :  { %v1171_v35 = vpop.permute.xlu0 %1170 }
 0x2f9   :  { %v1173_v36 = vmul.f32 %v25366_v12, %v1171_v35 }
 0x2fb   :  { %v26210_v37 = vsel %vm1190_vm4, %v1173_v36, 0.0 }
 0x2fc   :  { %1193 = vrot.lane.b32.xlu0 %v26210_v37, %s25828_s8 }
 0x356   :  { %v1182_v38 = vpop.permute.xlu1 %1181 }
 0x357   :  { %1185 = vst.msk [vmem:[#allocation2] sm:$0x3] %vm1184_vm6, %v1182_v38  ;;  %v1208_v40 = vsel %vm28917_vm5, %v1182_v38, 0 }
 0x358   :  { %v1279_v41 = vand.u32 4294901760, %v1208_v40 }
 0x35a   :  { %v1280_v42 = vsub.f32 %v1208_v40, %v1279_v41  ;;  %21526 = vmatmul.mubr.f32.vlgmr.msra.gmra.mrb[12].mxu1 %v1279_v41 }
 0x35b   :  { %23956 = vmatpush3.bf16.msra.mxu1 %v26035_v10  ;;  %21547 = vmatprep.mubr.msk.f32.mxu1 %vm28911_vm0, %v28915_v1 }
 0x35c   :  { %23957 = vmatprep.subr.bf16.mxu1 %v28913_v0  ;;  %v1281_v44 = vand.u32 4294901760, %v1280_v42 }
 0x35e   :  { %v1282_v45 = vsub.f32 %v1280_v42, %v1281_v44 }
 0x35f   :  { %23959 = vmatpush3.bf16.msra.mxu1 %v26038_v15 }
 0x360   :  { %23966 = vmatprep.subr.bf16.mxu1 %v28913_v0  ;;  %v1283_v46 = vand.u32 4294901760, %v1282_v45 }
 0x362   :  { %21548 = vmatmul.mubr.f32.vlgmr.msra.gmra.mrb[14].mxu1 %v1281_v44  ;;  %21515 = vmatmul.mubr.f32.vlgmr.msra.gmra.mrb[12].mxu0 %v1283_v46 }
 0x363   :  { %23950 = vmatpush3.bf16.msra.mxu0 %v26042_v26  ;;  %23968 = vmatpush3.bf16.msra.mxu1 %v26035_v10 }
 0x364   :  { %23951 = vmatprep.subr.bf16.mxu0 %v28913_v0  ;;  %23969 = vmatprep.subr.bf16.mxu1 %v28913_v0 }
 0x365   :  { %21536 = vmatprep.mubr.msk.f32.mxu0 %vm28911_vm0, %v28915_v1  ;;  %21569 = vmatprep.mubr.msk.f32.mxu1 %vm28911_vm0, %v28915_v1 }
 0x367   :  { %23953 = vmatpush3.bf16.msra.mxu0 %v26058_v33  ;;  %23971 = vmatpush3.bf16.msra.mxu1 %v26038_v15 }
 0x368   :  { %23960 = vmatprep.subr.bf16.mxu0 %v28913_v0  ;;  %23978 = vmatprep.subr.bf16.mxu1 %v28913_v0 }
 0x36a   :  { %21537 = vmatmul.mubr.f32.vlgmr.msra.gmra.mrb[14].mxu0 %v1280_v42  ;;  %21570 = vmatmul.mubr.f32.vlgmr.msra.gmra.mrb[16].mxu1 %v1279_v41 }
 0x36b   :  { %23962 = vmatpush3.bf16.msra.mxu0 %v26072_v39  ;;  %23980 = vmatpush3.bf16.msra.mxu1 %v26108_v58 }
 0x36c   :  { %23963 = vmatprep.subr.bf16.mxu0 %v28913_v0  ;;  %23981 = vmatprep.subr.bf16.mxu1 %v28913_v0 }
 0x36d   :  { %21558 = vmatprep.mubr.msk.f32.mxu0 %vm28911_vm0, %v28915_v1  ;;  %21591 = vmatprep.mubr.msk.f32.mxu1 %vm28911_vm0, %v28915_v1 }
 0x36e   :  { %v1194_v47 = vpop.permute.xlu0 %1193 }
 0x36f   :  { %23965 = vmatpush3.bf16.msra.mxu0 %v26078_v43  ;;  %23983 = vmatpush3.bf16.msra.mxu1 %v26118_v62  ;;  %1197 = vst.msk [vmem:[#allocation3 + $0xe] sm:$0x3] %vm1184_vm6, %v1194_v47  ;;  %v1722_v49 = vsel %vm28917_vm5, %v1194_v47, 0 }
 0x370   :  { %v1793_v50 = vand.u32 4294901760, %v1722_v49  ;;  %23972 = vmatprep.subr.bf16.mxu0 %v28913_v0  ;;  %23990 = vmatprep.subr.bf16.mxu1 %v28913_v0 }
 0x372   :  { %v1794_v51 = vsub.f32 %v1722_v49, %v1793_v50  ;;  %21559 = vmatmul.mubr.f32.vlgmr.msra.gmra.mrb[16].mxu0 %v1279_v41  ;;  %21592 = vmatmul.mubr.f32.vlgmr.msra.gmra.mrb[18].mxu1 %v1793_v50 }
 0x373   :  { %23974 = vmatpush3.bf16.msra.mxu0 %v26088_v48  ;;  %23992 = vmatpush3.bf16.msra.mxu1 %v26088_v48 }
 0x374   :  { %23975 = vmatprep.subr.bf16.mxu0 %v28913_v0  ;;  %23993 = vmatprep.subr.bf16.mxu1 %v28913_v0  ;;  %v1795_v52 = vand.u32 4294901760, %v1794_v51 }
 0x375   :  { %21613 = vmatprep.mubr.msk.f32.mxu1 %vm28911_vm0, %v28915_v1  ;;  %21580 = vmatprep.mubr.msk.f32.mxu0 %vm28911_vm0, %v28915_v1 }
 0x376   :  { %v1796_v54 = vsub.f32 %v1794_v51, %v1795_v52 }
 0x377   :  { %23977 = vmatpush3.bf16.msra.mxu0 %v26096_v53  ;;  %23995 = vmatpush3.bf16.msra.mxu1 %v26096_v53 }
 0x378   :  { %23984 = vmatprep.subr.bf16.mxu0 %v28913_v0  ;;  %24002 = vmatprep.subr.bf16.mxu1 %v28913_v0  ;;  %v1797_v55 = vand.u32 4294901760, %v1796_v54 }
 0x37a   :  { %21614 = vmatmul.mubr.f32.vlgmr.msra.gmra.mrb[20].mxu1 %v1795_v52  ;;  %21581 = vmatmul.mubr.f32.vlgmr.msra.gmra.mrb[18].mxu0 %v1797_v55  ;;  %v1721_v52 = vld [vmem:[#allocation6 + $0xc] sm:$0x3] }
 0x37b   :  { %23986 = vmatpush3.bf16.msra.mxu0 %v26110_v59  ;;  %24004 = vmatpush3.bf16.msra.mxu1 %v26088_v48 }
 0x37c   :  { %23987 = vmatprep.subr.bf16.mxu0 %v28913_v0  ;;  %24005 = vmatprep.subr.bf16.mxu1 %v28913_v0 }
 0x37d   :  { %21602 = vmatprep.mubr.msk.f32.mxu0 %vm28911_vm0, %v28915_v1  ;;  %21635 = vmatprep.mubr.msk.f32.mxu1 %vm28911_vm0, %v28915_v1 }
 0x37f   :  { %23989 = vmatpush3.bf16.msra.mxu0 %v26120_v63  ;;  %24007 = vmatpush3.bf16.msra.mxu1 %v26096_v53 }
 0x380   :  { %23996 = vmatprep.subr.bf16.mxu0 %v28913_v0  ;;  %24014 = vmatprep.subr.bf16.mxu1 %v28913_v0 }
 0x382   :  { %21603 = vmatmul.mubr.f32.vlgmr.msra.gmra.mrb[20].mxu0 %v1794_v51  ;;  %21636 = vmatmul.mubr.f32.vlgmr.msra.gmra.mrb[22].mxu1 %v1793_v50 }
 0x383   :  { %23998 = vmatpush3.bf16.msra.mxu0 %v26130_v2  ;;  %21624 = vmatprep.mubr.msk.f32.mxu0 %vm28911_vm0, %v28915_v1 }
 0x384   :  { %23999 = vmatprep.subr.bf16.mxu0 %v28913_v0  ;;  %24016 = vmatpush3.bf16.msra.mxu1 %v26051_v31 }
 0x385   :  { %24017 = vmatprep.subr.bf16.mxu1 %v28913_v0  ;;  %21657 = vmatprep.mubr.msk.f32.mxu1 %vm28911_vm0, %v28915_v1 }
 0x387   :  { %24001 = vmatpush3.bf16.msra.mxu0 %v26138_v3 }
 0x388   :  { %24019 = vmatpush3.bf16.msra.mxu1 %v26056_v32  ;;  %24008 = vmatprep.subr.bf16.mxu0 %v28913_v0 }
 0x389   :  { %24026 = vmatprep.subr.bf16.mxu1 %v28913_v0 }
 0x38a   :  { %21625 = vmatmul.mubr.f32.vlgmr.msra.gmra.mrb[22].mxu0 %v1793_v50 }
 0x38b   :  { %24010 = vmatpush3.bf16.msra.mxu0 %v26035_v10  ;;  %21646 = vmatprep.mubr.msk.f32.mxu0 %vm28911_vm0, %v28915_v1 }
 0x38c   :  { %24011 = vmatprep.subr.bf16.mxu0 %v28913_v0 }
 0x38f   :  { %24013 = vmatpush3.bf16.msra.mxu0 %v26038_v15 }
 0x390   :  { %24020 = vmatprep.subr.bf16.mxu0 %v28913_v0 }
 0x42d   :  { %v1376_v56 = vpop.f32.mrb[12].mxu1 }
 0x42e   :  { %v21527_v57 = vpop.f32.mrb[13].mxu1 }
 0x435   :  { %v1533_v60 = vpop.f32.mrb[14].mxu1  ;;  %v1285_v61 = vpop.f32.mrb[12].mxu0 }
 0x436   :  { %v1377_v5 = vadd.f32 %v1376_v56, %v1285_v61  ;;  %v21549_v6 = vpop.f32.mrb[15].mxu1  ;;  %v21516_v7 = vpop.f32.mrb[13].mxu0 }
 0x437   :  { %v20141_v6 = vld [vmem:[%s28894_s2 + $0x2] sm:$0x3] }
 0x438   :  { %vm1202_vm7 = vcmp.gt.f32.partialorder %v20141_v6, 0.5 }
 0x43d   :  { %v1456_v8 = vpop.f32.mrb[14].mxu0  ;;  %v1691_v9 = vpop.f32.mrb[16].mxu1 }
 0x43e   :  { %v1457_v11 = vadd.f32 %v1456_v8, %v1377_v5  ;;  %v21538_v12 = vpop.f32.mrb[15].mxu0  ;;  %v21571_v13 = vpop.f32.mrb[17].mxu1 }
 0x43f   :  { %v2234_v12 = vsel %vm1202_vm7, 1, %v25836_v4 }
 0x440   :  { %v1534_v14 = vadd.f32 %v1533_v60, %v1457_v11  ;;  %v20142_v11 = vld [vmem:[%s28894_s2 + $0xc] sm:$0x3] }
 0x441   :  { %vm1205_vm8 = vcmp.gt.f32.partialorder %v20142_v11, 0.5 }
 0x445   :  { %v1616_v16 = vpop.f32.mrb[16].mxu0  ;;  %v1890_v17 = vpop.f32.mrb[18].mxu1 }
 0x446   :  { %v1617_v19 = vadd.f32 %v1616_v16, %v1534_v14  ;;  %v21560_v20 = vpop.f32.mrb[17].mxu0  ;;  %v21593_v21 = vpop.f32.mrb[19].mxu1  ;;  %v2246_v14 = vsel %vm1205_vm8, 1, %v25836_v4 }
 0x447   :  { %v26308_v21 = vsel %vm1178_vm3, %v26184_v18, 0.0 }
 0x448   :  { %v1692_v23 = vadd.f32 %v1691_v9, %v1617_v19 }
 0x44a   :  { %v1695_v25 = vadd.f32 %v20143_v22, %v1692_v23 }
 0x44c   :  { %25371 = vtanh.f32 %v1695_v25  ;;  %v20144_v57 = vmul.f32 -1.442695, %v1695_v25 }
 0x44d   :  { %v2047_v28 = vpop.f32.mrb[20].mxu1  ;;  %v1799_v29 = vpop.f32.mrb[18].mxu0 }
 0x44e   :  { %v1891_v35 = vadd.f32 %v1890_v17, %v1799_v29  ;;  %v21615_v36 = vpop.f32.mrb[21].mxu1  ;;  %v21582_v38 = vpop.f32.mrb[19].mxu0  ;;  %v26318_v29 = vsel %vm1190_vm4, %v26192_v24, 0.0 }
 0x455   :  { %v1970_v40 = vpop.f32.mrb[20].mxu0  ;;  %v2205_v41 = vpop.f32.mrb[22].mxu1 }
 0x456   :  { %v25372_v42 = vpop.eup %25371  ;;  %v1971_v44 = vadd.f32 %v1970_v40, %v1891_v35  ;;  %v21604_v45 = vpop.f32.mrb[21].mxu0 }
 0x457   :  { %v21637_v46 = vpop.f32.mrb[23].mxu1  ;;  %1705 = vrot.lane.b32.xlu1 %v25372_v42, %s25837_s20 }
 0x458   :  { %v2048_v47 = vadd.f32 %v2047_v28, %v1971_v44 }
 0x45d   :  { %v2130_v49 = vpop.f32.mrb[22].mxu0 }
 0x45e   :  { %v2131_v50 = vadd.f32 %v2130_v49, %v2048_v47  ;;  %v21626_v51 = vpop.f32.mrb[23].mxu0 }
 0x460   :  { %v2206_v54 = vadd.f32 %v2205_v41, %v2131_v50 }
 0x462   :  { %v2209_v55 = vadd.f32 %v2206_v54, %v1721_v52 }
 0x464   :  { %25373 = vtanh.f32 %v2209_v55  ;;  %v20145_v5 = vmul.f32 -1.442695, %v2209_v55 }
 0x465   :  { %25375 = vpow2.f32 %v20144_v57 }
 0x46e   :  { %v25374_v56 = vpop.eup %25373 }
 0x46f   :  { %2219 = vrot.lane.b32.xlu0 %v25374_v56, %s25837_s20  ;;  %v25376_v60 = vpop.eup %25375 }
 0x470   :  { %v1699_v61 = vadd.f32 1.0, %v25376_v60 }
 0x472   :  { %25377 = vrcp.f32 %v1699_v61 }
 0x473   :  { %25379 = vpow2.f32 %v20145_v5 }
 0x47c   :  { %v25378_v7 = vpop.eup %25377 }
 0x47d   :  { %v25380_v13 = vpop.eup %25379  ;;  %v1703_v22 = vmul.f32 %v25378_v7, %v26308_v21 }
 0x47e   :  { %v2213_v16 = vadd.f32 1.0, %v25380_v13 }
 0x480   :  { %25381 = vrcp.f32 %v2213_v16 }
 0x48a   :  { %v25382_v17 = vpop.eup %25381 }
 0x48b   :  { %v2217_v35 = vmul.f32 %v25382_v17, %v26318_v29 }
 0x4c9   :  { %v1706_v8 = vpop.permute.xlu1 %1705 }
 0x4ca   :  { %v1708_v9 = vmul.f32 %v25378_v7, %v1706_v8 }
 0x4cc   :  { %1710 = vrot.lane.b32.xlu1 %v1708_v9, %s25828_s8 }
 0x4d0   :  { %2236 = vperm.xlu1 %25354, %v2234_v12  }
 0x4d4   :  { %2248 = vperm.xlu1 %25354, %v2246_v14  }
 0x4e1   :  { %v2220_v19 = vpop.permute.xlu0 %2219 }
 0x4e2   :  { %v2222_v20 = vmul.f32 %v25382_v17, %v2220_v19 }
 0x4e4   :  { %2224 = vrot.lane.b32.xlu0 %v2222_v20, %s25828_s8 }
 0x53e   :  { %v1711_v23 = vpop.permute.xlu1 %1710 }
 0x53f   :  { %v26311_v25 = vadd.f32 %v1711_v23, %v1703_v22 }
 0x541   :  { %25383 = vtanh.f32 %v26311_v25 }
 0x54b   :  { %v25384_v28 = vpop.eup %25383 }
 0x54c   :  { %1716 = vrot.lane.b32.xlu0 %v25384_v28, %s25837_s20 }
 0x54f   :  { %v26325_v38 = vpop.permute.xlu1 %2236 }
 0x550   :  { %vm2238_vm9 = vcmp.eq.s32.totalorder %v26325_v38, 1 }
 0x553   :  { %v26338_v34 = vpop.permute.xlu1 %2248 }
 0x554   :  { %vm2250_vm10 = vcmp.eq.s32.totalorder %v26338_v34, 1 }
 0x556   :  { %v2225_v27 = vpop.permute.xlu0 %2224 }
 0x557   :  { %v26321_v18 = vadd.f32 %v2225_v27, %v2217_v35 }
 0x559   :  { %25385 = vtanh.f32 %v26321_v18 }
 0x563   :  { %v25386_v36 = vpop.eup %25385 }
 0x564   :  { %2230 = vrot.lane.b32.xlu0 %v25386_v36, %s25837_s20  ;;  %v20148_v36 = vld [vmem:[%s28920_s16 + $0x4] sm:$0x3] }
 0x5be   :  { %v1717_v40 = vpop.permute.xlu0 %1716 }
 0x5bf   :  { %v26327_v41 = vmul.f32 %v25378_v7, %v1717_v40 }
 0x5c1   :  { %v26334_v24 = vsel %vm2238_vm9, %v26327_v41, %v26201_v30 }
 0x5c2   :  { %2271 = vrot.lane.b32.xlu1 %v26334_v24, %s25828_s8 }
 0x5d6   :  { %v2231_v42 = vpop.permute.xlu0 %2230 }
 0x5d7   :  { %v26340_v44 = vmul.f32 %v25382_v17, %v2231_v42 }
 0x5d9   :  { %v26347_v45 = vsel %vm2250_vm10, %v26340_v44, %v26210_v37 }
 0x5da   :  { %2788 = vrot.lane.b32.xlu0 %v26347_v45, %s25828_s8 }
 0x634   :  { %v2272_v30 = vpop.permute.xlu1 %2271 }
 0x635   :  { %v2273_v46 = vsel %vm28917_vm5, %v2272_v30, 0 }
 0x636   :  { %v2344_v47 = vand.u32 4294901760, %v2273_v46 }
 0x638   :  { %v2345_v49 = vsub.f32 %v2273_v46, %v2344_v47  ;;  %21658 = vmatmul.mubr.f32.vlgmr.msra.gmra.mrb[24].mxu1 %v2344_v47 }
 0x639   :  { %24028 = vmatpush3.bf16.msra.mxu1 %v26035_v10  ;;  %21679 = vmatprep.mubr.msk.f32.mxu1 %vm28911_vm0, %v28915_v1 }
 0x63a   :  { %v2346_v50 = vand.u32 4294901760, %v2345_v49  ;;  %24029 = vmatprep.subr.bf16.mxu1 %v28913_v0 }
 0x63c   :  { %v2347_v51 = vsub.f32 %v2345_v49, %v2346_v50 }
 0x63d   :  { %24031 = vmatpush3.bf16.msra.mxu1 %v26038_v15 }
 0x63e   :  { %24038 = vmatprep.subr.bf16.mxu1 %v28913_v0  ;;  %v2348_v37 = vand.u32 4294901760, %v2347_v51 }
 0x640   :  { %21680 = vmatmul.mubr.f32.vlgmr.msra.gmra.mrb[26].mxu1 %v2346_v50  ;;  %21647 = vmatmul.mubr.f32.vlgmr.msra.gmra.mrb[24].mxu0 %v2348_v37 }
 0x641   :  { %24022 = vmatpush3.bf16.msra.mxu0 %v26042_v26  ;;  %24040 = vmatpush3.bf16.msra.mxu1 %v26035_v10 }
 0x642   :  { %24023 = vmatprep.subr.bf16.mxu0 %v28913_v0  ;;  %24041 = vmatprep.subr.bf16.mxu1 %v28913_v0 }
 0x643   :  { %21668 = vmatprep.mubr.msk.f32.mxu0 %vm28911_vm0, %v28915_v1  ;;  %21701 = vmatprep.mubr.msk.f32.mxu1 %vm28911_vm0, %v28915_v1 }
 0x645   :  { %24025 = vmatpush3.bf16.msra.mxu0 %v26058_v33  ;;  %24043 = vmatpush3.bf16.msra.mxu1 %v26038_v15 }
 0x646   :  { %24032 = vmatprep.subr.bf16.mxu0 %v28913_v0  ;;  %24050 = vmatprep.subr.bf16.mxu1 %v28913_v0 }
 0x648   :  { %21669 = vmatmul.mubr.f32.vlgmr.msra.gmra.mrb[26].mxu0 %v2345_v49  ;;  %21702 = vmatmul.mubr.f32.vlgmr.msra.gmra.mrb[28].mxu1 %v2344_v47 }
 0x649   :  { %24034 = vmatpush3.bf16.msra.mxu0 %v26072_v39  ;;  %24052 = vmatpush3.bf16.msra.mxu1 %v26108_v58 }
 0x64a   :  { %24035 = vmatprep.subr.bf16.mxu0 %v28913_v0  ;;  %24053 = vmatprep.subr.bf16.mxu1 %v28913_v0 }
 0x64b   :  { %21690 = vmatprep.mubr.msk.f32.mxu0 %vm28911_vm0, %v28915_v1  ;;  %21723 = vmatprep.mubr.msk.f32.mxu1 %vm28911_vm0, %v28915_v1 }
 0x64c   :  { %v2789_v52 = vpop.permute.xlu0 %2788 }
 0x64d   :  { %24037 = vmatpush3.bf16.msra.mxu0 %v26078_v43  ;;  %24055 = vmatpush3.bf16.msra.mxu1 %v26118_v62  ;;  %v2790_v54 = vsel %vm28917_vm5, %v2789_v52, 0 }
 0x64e   :  { %v2861_v55 = vand.u32 4294901760, %v2790_v54  ;;  %24044 = vmatprep.subr.bf16.mxu0 %v28913_v0  ;;  %24062 = vmatprep.subr.bf16.mxu1 %v28913_v0 }
 0x650   :  { %v2862_v56 = vsub.f32 %v2790_v54, %v2861_v55  ;;  %21691 = vmatmul.mubr.f32.vlgmr.msra.gmra.mrb[28].mxu0 %v2344_v47  ;;  %21724 = vmatmul.mubr.f32.vlgmr.msra.gmra.mrb[30].mxu1 %v2861_v55 }
 0x651   :  { %24046 = vmatpush3.bf16.msra.mxu0 %v26088_v48  ;;  %24064 = vmatpush3.bf16.msra.mxu1 %v26088_v48 }
 0x652   :  { %v2863_v57 = vand.u32 4294901760, %v2862_v56  ;;  %24047 = vmatprep.subr.bf16.mxu0 %v28913_v0  ;;  %24065 = vmatprep.subr.bf16.mxu1 %v28913_v0 }
 0x653   :  { %21745 = vmatprep.mubr.msk.f32.mxu1 %vm28911_vm0, %v28915_v1  ;;  %21712 = vmatprep.mubr.msk.f32.mxu0 %vm28911_vm0, %v28915_v1 }
 0x654   :  { %v2864_v60 = vsub.f32 %v2862_v56, %v2863_v57 }
 0x655   :  { %24049 = vmatpush3.bf16.msra.mxu0 %v26096_v53  ;;  %24067 = vmatpush3.bf16.msra.mxu1 %v26096_v53 }
 0x656   :  { %24056 = vmatprep.subr.bf16.mxu0 %v28913_v0  ;;  %24074 = vmatprep.subr.bf16.mxu1 %v28913_v0  ;;  %v2865_v61 = vand.u32 4294901760, %v2864_v60 }
 0x658   :  { %21746 = vmatmul.mubr.f32.vlgmr.msra.gmra.mrb[32].mxu1 %v2863_v57  ;;  %21713 = vmatmul.mubr.f32.vlgmr.msra.gmra.mrb[30].mxu0 %v2865_v61 }
 0x659   :  { %24058 = vmatpush3.bf16.msra.mxu0 %v26110_v59  ;;  %24076 = vmatpush3.bf16.msra.mxu1 %v26088_v48 }
 0x65a   :  { %24059 = vmatprep.subr.bf16.mxu0 %v28913_v0  ;;  %24077 = vmatprep.subr.bf16.mxu1 %v28913_v0 }
 0x65b   :  { %21734 = vmatprep.mubr.msk.f32.mxu0 %vm28911_vm0, %v28915_v1  ;;  %21767 = vmatprep.mubr.msk.f32.mxu1 %vm28911_vm0, %v28915_v1 }
 0x65d   :  { %24061 = vmatpush3.bf16.msra.mxu0 %v26120_v63  ;;  %24079 = vmatpush3.bf16.msra.mxu1 %v26096_v53 }
 0x65e   :  { %24068 = vmatprep.subr.bf16.mxu0 %v28913_v0  ;;  %24086 = vmatprep.subr.bf16.mxu1 %v28913_v0 }
 0x660   :  { %21735 = vmatmul.mubr.f32.vlgmr.msra.gmra.mrb[32].mxu0 %v2862_v56  ;;  %21768 = vmatmul.mubr.f32.vlgmr.msra.gmra.mrb[34].mxu1 %v2861_v55 }
 0x661   :  { %24070 = vmatpush3.bf16.msra.mxu0 %v26130_v2  ;;  %21756 = vmatprep.mubr.msk.f32.mxu0 %vm28911_vm0, %v28915_v1 }
 0x662   :  { %24071 = vmatprep.subr.bf16.mxu0 %v28913_v0  ;;  %24088 = vmatpush3.bf16.msra.mxu1 %v26051_v31 }
 0x663   :  { %24089 = vmatprep.subr.bf16.mxu1 %v28913_v0  ;;  %21789 = vmatprep.mubr.msk.f32.mxu1 %vm28911_vm0, %v28915_v1 }
 0x665   :  { %24073 = vmatpush3.bf16.msra.mxu0 %v26138_v3 }
 0x666   :  { %24091 = vmatpush3.bf16.msra.mxu1 %v26056_v32  ;;  %24080 = vmatprep.subr.bf16.mxu0 %v28913_v0 }
 0x667   :  { %24098 = vmatprep.subr.bf16.mxu1 %v28913_v0 }
 0x668   :  { %21757 = vmatmul.mubr.f32.vlgmr.msra.gmra.mrb[34].mxu0 %v2861_v55 }
 0x669   :  { %24082 = vmatpush3.bf16.msra.mxu0 %v26035_v10  ;;  %21778 = vmatprep.mubr.msk.f32.mxu0 %vm28911_vm0, %v28915_v1 }
 0x66a   :  { %24083 = vmatprep.subr.bf16.mxu0 %v28913_v0 }
 0x66d   :  { %24085 = vmatpush3.bf16.msra.mxu0 %v26038_v15 }
 0x66e   :  { %24092 = vmatprep.subr.bf16.mxu0 %v28913_v0 }
 0x70b   :  { %v2441_v5 = vpop.f32.mrb[24].mxu1 }
 0x70c   :  { %v21659_v6 = vpop.f32.mrb[25].mxu1 }
 0x70d   :  { %v2786_v6 = vld [vmem:[#allocation6 + $0xa] sm:$0x3] }
 0x713   :  { %v2598_v7 = vpop.f32.mrb[26].mxu1  ;;  %v2350_v8 = vpop.f32.mrb[24].mxu0 }
 0x714   :  { %v2442_v9 = vadd.f32 %v2441_v5, %v2350_v8  ;;  %v21681_v11 = vpop.f32.mrb[27].mxu1  ;;  %v21648_v12 = vpop.f32.mrb[25].mxu0 }
 0x71b   :  { %v2521_v13 = vpop.f32.mrb[26].mxu0  ;;  %v2756_v14 = vpop.f32.mrb[28].mxu1 }
 0x71c   :  { %v2522_v16 = vadd.f32 %v2521_v13, %v2442_v9  ;;  %v21670_v17 = vpop.f32.mrb[27].mxu0  ;;  %v21703_v19 = vpop.f32.mrb[29].mxu1 }
 0x71e   :  { %v2599_v20 = vadd.f32 %v2598_v7, %v2522_v16  ;;  %v20146_v16 = vld [vmem:[%s28894_s2 + $0x4] sm:$0x3] }
 0x71f   :  { %vm2264_vm11 = vcmp.gt.f32.partialorder %v20146_v16, 0.5 }
 0x723   :  { %v2681_v22 = vpop.f32.mrb[28].mxu0  ;;  %v2958_v23 = vpop.f32.mrb[30].mxu1 }
 0x724   :  { %v2682_v28 = vadd.f32 %v2681_v22, %v2599_v20  ;;  %v21692_v35 = vpop.f32.mrb[29].mxu0  ;;  %v21725_v27 = vpop.f32.mrb[31].mxu1  ;;  %v20147_v22 = vld [vmem:[%s28894_s2 + $0xa] sm:$0x3] }
 0x725   :  { %vm2267_vm12 = vcmp.gt.f32.partialorder %v20147_v22, 0.5 }
 0x726   :  { %v2757_v40 = vadd.f32 %v2756_v14, %v2682_v28  ;;  %v3314_v35 = vsel %vm2267_vm12, 1, %v25836_v4 }
 0x728   :  { %v2760_v42 = vadd.f32 %v20148_v36, %v2757_v40 }
 0x72a   :  { %25387 = vtanh.f32 %v2760_v42  ;;  %v20149_v11 = vmul.f32 -1.442695, %v2760_v42 }
 0x72b   :  { %v3115_v30 = vpop.f32.mrb[32].mxu1  ;;  %v2867_v46 = vpop.f32.mrb[30].mxu0 }
 0x72c   :  { %v2959_v47 = vadd.f32 %v2958_v23, %v2867_v46  ;;  %v21747_v49 = vpop.f32.mrb[33].mxu1  ;;  %v21714_v50 = vpop.f32.mrb[31].mxu0  ;;  %v3302_v23 = vsel %vm2264_vm11, 1, %v25836_v4 }
 0x733   :  { %v3038_v51 = vpop.f32.mrb[32].mxu0  ;;  %v3273_v37 = vpop.f32.mrb[34].mxu1 }
 0x734   :  { %v25388_v52 = vpop.eup %25387  ;;  %v3039_v54 = vadd.f32 %v3038_v51, %v2959_v47  ;;  %v21736_v55 = vpop.f32.mrb[33].mxu0  ;;  %v26455_v51 = vsel %vm2250_vm10, %v26321_v18, %v26318_v29 }
 0x735   :  { %v21769_v56 = vpop.f32.mrb[35].mxu1  ;;  %2770 = vrot.lane.b32.xlu1 %v25388_v52, %s25837_s20 }
 0x736   :  { %v3116_v57 = vadd.f32 %v3115_v30, %v3039_v54  ;;  %v26444_v30 = vsel %vm2238_vm9, %v26311_v25, %v26308_v21 }
 0x73b   :  { %v3198_v60 = vpop.f32.mrb[34].mxu0 }
 0x73c   :  { %v3199_v61 = vadd.f32 %v3198_v60, %v3116_v57  ;;  %v21758_v5 = vpop.f32.mrb[35].mxu0 }
 0x73e   :  { %v3274_v7 = vadd.f32 %v3273_v37, %v3199_v61 }
 0x740   :  { %v3277_v8 = vadd.f32 %v3274_v7, %v2786_v6 }
 0x742   :  { %25389 = vtanh.f32 %v3277_v8  ;;  %v20150_v14 = vmul.f32 -1.442695, %v3277_v8 }
 0x743   :  { %25391 = vpow2.f32 %v20149_v11 }
 0x74c   :  { %v25390_v9 = vpop.eup %25389 }
 0x74d   :  { %3287 = vrot.lane.b32.xlu0 %v25390_v9, %s25837_s20  ;;  %v25392_v12 = vpop.eup %25391 }
 0x74e   :  { %v2764_v13 = vadd.f32 1.0, %v25392_v12 }
 0x750   :  { %25393 = vrcp.f32 %v2764_v13 }
 0x751   :  { %25395 = vpow2.f32 %v20150_v14 }
 0x75a   :  { %v25394_v17 = vpop.eup %25393 }
 0x75b   :  { %v25396_v28 = vpop.eup %25395  ;;  %v2768_v46 = vmul.f32 %v25394_v17, %v26444_v30 }
 0x75c   :  { %v3281_v27 = vadd.f32 1.0, %v25396_v28 }
 0x75e   :  { %25397 = vrcp.f32 %v3281_v27 }
 0x768   :  { %v25398_v36 = vpop.eup %25397 }
 0x769   :  { %v3285_v37 = vmul.f32 %v25398_v36, %v26455_v51 }
 0x7a7   :  { %v2771_v19 = vpop.permute.xlu1 %2770 }
 0x7a8   :  { %v2773_v20 = vmul.f32 %v25394_v17, %v2771_v19 }
 0x7aa   :  { %2775 = vrot.lane.b32.xlu1 %v2773_v20, %s25828_s8 }
 0x7ae   :  { %3304 = vperm.xlu1 %25354, %v3302_v23  }
 0x7b2   :  { %3316 = vperm.xlu1 %25354, %v3314_v35  }
 0x7bf   :  { %v3288_v40 = vpop.permute.xlu0 %3287 }
 0x7c0   :  { %v3290_v42 = vmul.f32 %v25398_v36, %v3288_v40 }
 0x7c2   :  { %3292 = vrot.lane.b32.xlu0 %v3290_v42, %s25828_s8 }
 0x81c   :  { %v2776_v47 = vpop.permute.xlu1 %2775 }
 0x81d   :  { %v26447_v49 = vadd.f32 %v2776_v47, %v2768_v46 }
 0x81f   :  { %25399 = vtanh.f32 %v26447_v49 }
 0x829   :  { %v25400_v50 = vpop.eup %25399 }
 0x82a   :  { %2781 = vrot.lane.b32.xlu0 %v25400_v50, %s25837_s20 }
 0x82d   :  { %v26462_v54 = vpop.permute.xlu1 %3304 }
 0x82e   :  { %vm3306_vm13 = vcmp.eq.s32.totalorder %v26462_v54, 1 }
 0x831   :  { %v26475_v18 = vpop.permute.xlu1 %3316 }
 0x832   :  { %vm3318_vm14 = vcmp.eq.s32.totalorder %v26475_v18, 1  ;;  %v2239_v18 = vsel %vm2238_vm9, %v26327_v41, 0.0 }
 0x834   :  { %v3293_v21 = vpop.permute.xlu0 %3292 }
 0x835   :  { %v26458_v25 = vadd.f32 %v3293_v21, %v3285_v37 }
 0x837   :  { %25401 = vtanh.f32 %v26458_v25 }
 0x841   :  { %v25402_v52 = vpop.eup %25401 }
 0x842   :  { %3298 = vrot.lane.b32.xlu0 %v25402_v52, %s25837_s20 }
 0x89c   :  { %v2782_v55 = vpop.permute.xlu0 %2781 }
 0x89d   :  { %v26464_v56 = vmul.f32 %v25394_v17, %v2782_v55 }
 0x89f   :  { %v26471_v29 = vsel %vm3306_vm13, %v26464_v56, %v26334_v24 }
 0x8a0   :  { %3339 = vrot.lane.b32.xlu1 %v26471_v29, %s25828_s8 }
 0x8b4   :  { %v3299_v57 = vpop.permute.xlu0 %3298 }
 0x8b5   :  { %v26477_v60 = vmul.f32 %v25398_v36, %v3299_v57 }
 0x8b7   :  { %v26484_v61 = vsel %vm3318_vm14, %v26477_v60, %v26347_v45 }
 0x8b8   :  { %3856 = vrot.lane.b32.xlu0 %v26484_v61, %s25828_s8 }
 0x912   :  { %v3340_v24 = vpop.permute.xlu1 %3339 }
 0x913   :  { %v3341_v5 = vsel %vm28917_vm5, %v3340_v24, 0 }
 0x914   :  { %v3412_v6 = vand.u32 4294901760, %v3341_v5 }
 0x916   :  { %v3413_v7 = vsub.f32 %v3341_v5, %v3412_v6  ;;  %21790 = vmatmul.mubr.f32.vlgmr.msra.gmra.mrb[36].mxu1 %v3412_v6  ;;  %v20153_v5 = vld [vmem:[%s28920_s16 + $0x6] sm:$0x3] }
 0x917   :  { %24100 = vmatpush3.bf16.msra.mxu1 %v26035_v10  ;;  %21811 = vmatprep.mubr.msk.f32.mxu1 %vm28911_vm0, %v28915_v1 }
 0x918   :  { %v3414_v8 = vand.u32 4294901760, %v3413_v7  ;;  %24101 = vmatprep.subr.bf16.mxu1 %v28913_v0 }
 0x91a   :  { %v3415_v9 = vsub.f32 %v3413_v7, %v3414_v8 }
 0x91b   :  { %24103 = vmatpush3.bf16.msra.mxu1 %v26038_v15 }
 0x91c   :  { %24110 = vmatprep.subr.bf16.mxu1 %v28913_v0  ;;  %v3416_v45 = vand.u32 4294901760, %v3415_v9 }
 0x91e   :  { %21812 = vmatmul.mubr.f32.vlgmr.msra.gmra.mrb[38].mxu1 %v3414_v8  ;;  %21779 = vmatmul.mubr.f32.vlgmr.msra.gmra.mrb[36].mxu0 %v3416_v45 }
 0x91f   :  { %24094 = vmatpush3.bf16.msra.mxu0 %v26042_v26  ;;  %24112 = vmatpush3.bf16.msra.mxu1 %v26035_v10 }
 0x920   :  { %24095 = vmatprep.subr.bf16.mxu0 %v28913_v0  ;;  %24113 = vmatprep.subr.bf16.mxu1 %v28913_v0 }
 0x921   :  { %21800 = vmatprep.mubr.msk.f32.mxu0 %vm28911_vm0, %v28915_v1  ;;  %21833 = vmatprep.mubr.msk.f32.mxu1 %vm28911_vm0, %v28915_v1 }
 0x923   :  { %24097 = vmatpush3.bf16.msra.mxu0 %v26058_v33  ;;  %24115 = vmatpush3.bf16.msra.mxu1 %v26038_v15 }
 0x924   :  { %24104 = vmatprep.subr.bf16.mxu0 %v28913_v0  ;;  %24122 = vmatprep.subr.bf16.mxu1 %v28913_v0 }
 0x926   :  { %21801 = vmatmul.mubr.f32.vlgmr.msra.gmra.mrb[38].mxu0 %v3413_v7  ;;  %21834 = vmatmul.mubr.f32.vlgmr.msra.gmra.mrb[40].mxu1 %v3412_v6 }
 0x927   :  { %24106 = vmatpush3.bf16.msra.mxu0 %v26072_v39  ;;  %24124 = vmatpush3.bf16.msra.mxu1 %v26108_v58 }
 0x928   :  { %24107 = vmatprep.subr.bf16.mxu0 %v28913_v0  ;;  %24125 = vmatprep.subr.bf16.mxu1 %v28913_v0 }
 0x929   :  { %21822 = vmatprep.mubr.msk.f32.mxu0 %vm28911_vm0, %v28915_v1  ;;  %21855 = vmatprep.mubr.msk.f32.mxu1 %vm28911_vm0, %v28915_v1 }
 0x92a   :  { %v3857_v11 = vpop.permute.xlu0 %3856 }
 0x92b   :  { %24109 = vmatpush3.bf16.msra.mxu0 %v26078_v43  ;;  %24127 = vmatpush3.bf16.msra.mxu1 %v26118_v62  ;;  %v3858_v12 = vsel %vm28917_vm5, %v3857_v11, 0 }
 0x92c   :  { %v3929_v13 = vand.u32 4294901760, %v3858_v12  ;;  %24116 = vmatprep.subr.bf16.mxu0 %v28913_v0  ;;  %24134 = vmatprep.subr.bf16.mxu1 %v28913_v0 }
 0x92e   :  { %v3930_v14 = vsub.f32 %v3858_v12, %v3929_v13  ;;  %21823 = vmatmul.mubr.f32.vlgmr.msra.gmra.mrb[40].mxu0 %v3412_v6  ;;  %21856 = vmatmul.mubr.f32.vlgmr.msra.gmra.mrb[42].mxu1 %v3929_v13 }
 0x92f   :  { %24118 = vmatpush3.bf16.msra.mxu0 %v26088_v48  ;;  %24136 = vmatpush3.bf16.msra.mxu1 %v26088_v48 }
 0x930   :  { %v3931_v16 = vand.u32 4294901760, %v3930_v14  ;;  %24119 = vmatprep.subr.bf16.mxu0 %v28913_v0  ;;  %24137 = vmatprep.subr.bf16.mxu1 %v28913_v0 }
 0x931   :  { %21877 = vmatprep.mubr.msk.f32.mxu1 %vm28911_vm0, %v28915_v1  ;;  %21844 = vmatprep.mubr.msk.f32.mxu0 %vm28911_vm0, %v28915_v1 }
 0x932   :  { %v3932_v17 = vsub.f32 %v3930_v14, %v3931_v16 }
 0x933   :  { %24121 = vmatpush3.bf16.msra.mxu0 %v26096_v53  ;;  %24139 = vmatpush3.bf16.msra.mxu1 %v26096_v53 }
 0x934   :  { %24128 = vmatprep.subr.bf16.mxu0 %v28913_v0  ;;  %24146 = vmatprep.subr.bf16.mxu1 %v28913_v0  ;;  %v3933_v19 = vand.u32 4294901760, %v3932_v17 }
 0x936   :  { %21878 = vmatmul.mubr.f32.vlgmr.msra.gmra.mrb[44].mxu1 %v3931_v16  ;;  %21845 = vmatmul.mubr.f32.vlgmr.msra.gmra.mrb[42].mxu0 %v3933_v19 }
 0x937   :  { %24130 = vmatpush3.bf16.msra.mxu0 %v26110_v59  ;;  %24148 = vmatpush3.bf16.msra.mxu1 %v26088_v48 }
 0x938   :  { %24131 = vmatprep.subr.bf16.mxu0 %v28913_v0  ;;  %24149 = vmatprep.subr.bf16.mxu1 %v28913_v0 }
 0x939   :  { %21866 = vmatprep.mubr.msk.f32.mxu0 %vm28911_vm0, %v28915_v1  ;;  %21899 = vmatprep.mubr.msk.f32.mxu1 %vm28911_vm0, %v28915_v1 }
 0x93b   :  { %24133 = vmatpush3.bf16.msra.mxu0 %v26120_v63  ;;  %24151 = vmatpush3.bf16.msra.mxu1 %v26096_v53 }
 0x93c   :  { %24140 = vmatprep.subr.bf16.mxu0 %v28913_v0  ;;  %24158 = vmatprep.subr.bf16.mxu1 %v28913_v0 }
 0x93e   :  { %21867 = vmatmul.mubr.f32.vlgmr.msra.gmra.mrb[44].mxu0 %v3930_v14  ;;  %21900 = vmatmul.mubr.f32.vlgmr.msra.gmra.mrb[46].mxu1 %v3929_v13 }
 0x93f   :  { %24142 = vmatpush3.bf16.msra.mxu0 %v26130_v2  ;;  %21888 = vmatprep.mubr.msk.f32.mxu0 %vm28911_vm0, %v28915_v1 }
 0x940   :  { %24143 = vmatprep.subr.bf16.mxu0 %v28913_v0  ;;  %24160 = vmatpush3.bf16.msra.mxu1 %v26051_v31 }
 0x941   :  { %24161 = vmatprep.subr.bf16.mxu1 %v28913_v0  ;;  %21921 = vmatprep.mubr.msk.f32.mxu1 %vm28911_vm0, %v28915_v1 }
 0x943   :  { %24145 = vmatpush3.bf16.msra.mxu0 %v26138_v3 }
 0x944   :  { %24163 = vmatpush3.bf16.msra.mxu1 %v26056_v32  ;;  %24152 = vmatprep.subr.bf16.mxu0 %v28913_v0 }
 0x945   :  { %24170 = vmatprep.subr.bf16.mxu1 %v28913_v0 }
 0x946   :  { %21889 = vmatmul.mubr.f32.vlgmr.msra.gmra.mrb[46].mxu0 %v3929_v13 }
 0x947   :  { %24154 = vmatpush3.bf16.msra.mxu0 %v26035_v10  ;;  %21910 = vmatprep.mubr.msk.f32.mxu0 %vm28911_vm0, %v28915_v1 }
 0x948   :  { %24155 = vmatprep.subr.bf16.mxu0 %v28913_v0 }
 0x94b   :  { %24157 = vmatpush3.bf16.msra.mxu0 %v26038_v15 }
 0x94c   :  { %24164 = vmatprep.subr.bf16.mxu0 %v28913_v0 }
 0x9e9   :  { %v3509_v20 = vpop.f32.mrb[36].mxu1 }
 0x9ea   :  { %v21791_v22 = vpop.f32.mrb[37].mxu1 }
 0x9f1   :  { %v3666_v23 = vpop.f32.mrb[38].mxu1  ;;  %v3418_v28 = vpop.f32.mrb[36].mxu0 }
 0x9f2   :  { %v3510_v35 = vadd.f32 %v3509_v20, %v3418_v28  ;;  %v21813_v27 = vpop.f32.mrb[39].mxu1  ;;  %v21780_v36 = vpop.f32.mrb[37].mxu0 }
 0x9f3   :  { %v3854_v27 = vld [vmem:[#allocation6 + $0x8] sm:$0x3] }
 0x9f9   :  { %v3589_v40 = vpop.f32.mrb[38].mxu0  ;;  %v3824_v42 = vpop.f32.mrb[40].mxu1 }
 0x9fa   :  { %v3590_v46 = vadd.f32 %v3589_v40, %v3510_v35  ;;  %v21802_v47 = vpop.f32.mrb[39].mxu0  ;;  %v21835_v50 = vpop.f32.mrb[41].mxu1 }
 0x9fc   :  { %v3667_v37 = vadd.f32 %v3666_v23, %v3590_v46 }
 0xa01   :  { %v3749_v21 = vpop.f32.mrb[40].mxu0  ;;  %v4026_v52 = vpop.f32.mrb[42].mxu1 }
 0xa02   :  { %v3750_v55 = vadd.f32 %v3749_v21, %v3667_v37  ;;  %v21824_v57 = vpop.f32.mrb[41].mxu0  ;;  %v21857_v24 = vpop.f32.mrb[43].mxu1  ;;  %v20151_v21 = vld [vmem:[%s28894_s2 + $0x6] sm:$0x3] }
 0xa03   :  { %vm3332_vm15 = vcmp.gt.f32.partialorder %v20151_v21, 0.5  ;;  %v20152_v24 = vld [vmem:[%s28894_s2 + $0x8] sm:$0x3] }
 0xa04   :  { %v3825_v6 = vadd.f32 %v3824_v42, %v3750_v55  ;;  %vm3335_vm1 = vcmp.gt.f32.partialorder %v20152_v24, 0.5 }
 0xa06   :  { %v3828_v7 = vadd.f32 %v20153_v5, %v3825_v6  ;;  %v4370_v5 = vsel %vm3332_vm15, 1, %v25836_v4 }
 0xa08   :  { %25403 = vtanh.f32 %v3828_v7  ;;  %v20154_v46 = vmul.f32 -1.442695, %v3828_v7  ;;  %v4382_v7 = vsel %vm3335_vm1, 1, %v25836_v4 }
 0xa09   :  { %v4183_v8 = vpop.f32.mrb[44].mxu1  ;;  %v3935_v9 = vpop.f32.mrb[42].mxu0 }
 0xa0a   :  { %v4027_v45 = vadd.f32 %v4026_v52, %v3935_v9  ;;  %v21879_v11 = vpop.f32.mrb[45].mxu1  ;;  %v21846_v12 = vpop.f32.mrb[43].mxu0 }
 0xa0b   :  { %v26581_v12 = vsel %vm3306_vm13, %v26447_v49, %v26444_v30 }
 0xa11   :  { %v4106_v13 = vpop.f32.mrb[44].mxu0  ;;  %v4341_v14 = vpop.f32.mrb[46].mxu1 }
 0xa12   :  { %v25404_v16 = vpop.eup %25403  ;;  %v4107_v17 = vadd.f32 %v4106_v13, %v4027_v45  ;;  %v21868_v19 = vpop.f32.mrb[45].mxu0 }
 0xa13   :  { %v21901_v20 = vpop.f32.mrb[47].mxu1  ;;  %3838 = vrot.lane.b32.xlu1 %v25404_v16, %s25837_s20  ;;  %v26592_v19 = vsel %vm3318_vm14, %v26458_v25, %v26455_v51 }
 0xa14   :  { %v4184_v22 = vadd.f32 %v4183_v8, %v4107_v17 }
 0xa19   :  { %v4266_v23 = vpop.f32.mrb[46].mxu0 }
 0xa1a   :  { %v4267_v28 = vadd.f32 %v4266_v23, %v4184_v22  ;;  %v21890_v35 = vpop.f32.mrb[47].mxu0 }
 0xa1c   :  { %v4342_v36 = vadd.f32 %v4341_v14, %v4267_v28 }
 0xa1e   :  { %v4345_v40 = vadd.f32 %v4342_v36, %v3854_v27 }
 0xa20   :  { %25405 = vtanh.f32 %v4345_v40  ;;  %v20155_v37 = vmul.f32 -1.442695, %v4345_v40 }
 0xa21   :  { %25407 = vpow2.f32 %v20154_v46 }
 0xa2a   :  { %v25406_v42 = vpop.eup %25405 }
 0xa2b   :  { %4355 = vrot.lane.b32.xlu0 %v25406_v42, %s25837_s20  ;;  %v25408_v47 = vpop.eup %25407 }
 0xa2c   :  { %v3832_v50 = vadd.f32 1.0, %v25408_v47 }
 0xa2e   :  { %25409 = vrcp.f32 %v3832_v50 }
 0xa2f   :  { %25411 = vpow2.f32 %v20155_v37 }
 0xa38   :  { %v25410_v52 = vpop.eup %25409 }
 0xa39   :  { %v25412_v6 = vpop.eup %25411  ;;  %v3836_v13 = vmul.f32 %v25410_v52, %v26581_v12 }
 0xa3a   :  { %v4349_v8 = vadd.f32 1.0, %v25412_v6 }
 0xa3c   :  { %25413 = vrcp.f32 %v4349_v8 }
 0xa46   :  { %v25414_v9 = vpop.eup %25413 }
 0xa47   :  { %v4353_v20 = vmul.f32 %v25414_v9, %v26592_v19 }
 0xa85   :  { %v3839_v55 = vpop.permute.xlu1 %3838 }
 0xa86   :  { %v3841_v57 = vmul.f32 %v25410_v52, %v3839_v55 }
 0xa88   :  { %3843 = vrot.lane.b32.xlu1 %v3841_v57, %s25828_s8 }
 0xa8c   :  { %4372 = vperm.xlu1 %25354, %v4370_v5  }
 0xa90   :  { %4384 = vperm.xlu1 %25354, %v4382_v7  }
 0xa9d   :  { %v4356_v45 = vpop.permute.xlu0 %4355 }
 0xa9e   :  { %v4358_v11 = vmul.f32 %v25414_v9, %v4356_v45 }
 0xaa0   :  { %4360 = vrot.lane.b32.xlu0 %v4358_v11, %s25828_s8 }
 0xafa   :  { %v3844_v14 = vpop.permute.xlu1 %3843 }
 0xafb   :  { %v26584_v16 = vadd.f32 %v3844_v14, %v3836_v13 }
 0xafd   :  { %25415 = vtanh.f32 %v26584_v16 }
 0xb07   :  { %v25416_v17 = vpop.eup %25415 }
 0xb08   :  { %3849 = vrot.lane.b32.xlu0 %v25416_v17, %s25837_s20 }
 0xb0b   :  { %v26599_v23 = vpop.permute.xlu1 %4372 }
 0xb0c   :  { %vm4374_vm2 = vcmp.eq.s32.totalorder %v26599_v23, 1 }
 0xb0f   :  { %v26612_v25 = vpop.permute.xlu1 %4384 }
 0xb10   :  { %vm4386_vm3 = vcmp.eq.s32.totalorder %v26612_v25, 1 }
 0xb12   :  { %v4361_v30 = vpop.permute.xlu0 %4360 }
 0xb13   :  { %v26595_v49 = vadd.f32 %v4361_v30, %v4353_v20 }
 0xb15   :  { %25417 = vtanh.f32 %v26595_v49 }
 0xb1f   :  { %v25418_v22 = vpop.eup %25417 }
 0xb20   :  { %4366 = vrot.lane.b32.xlu0 %v25418_v22, %s25837_s20 }
 0xb7a   :  { %v3850_v28 = vpop.permute.xlu0 %3849 }
 0xb7b   :  { %v26601_v35 = vmul.f32 %v25410_v52, %v3850_v28 }
 0xb7d   :  { %v26608_v51 = vsel %vm4374_vm2, %v26601_v35, %v26471_v29 }
 0xb7e   :  { %4405 = vrot.lane.b32.xlu1 %v26608_v51, %s25828_s8 }
 0xb92   :  { %v4367_v27 = vpop.permute.xlu0 %4366 }
 0xb93   :  { %v26614_v36 = vmul.f32 %v25414_v9, %v4367_v27 }
 0xb95   :  { %v26621_v40 = vsel %vm4386_vm3, %v26614_v36, %v26484_v61 }
 0xb96   :  { %4922 = vrot.lane.b32.xlu0 %v26621_v40, %s25828_s8 }
 0xbf0   :  { %v4406_v29 = vpop.permute.xlu1 %4405 }
 0xbf1   :  { %v4407_v42 = vsel %vm28917_vm5, %v4406_v29, 0 }
 0xbf2   :  { %v4478_v46 = vand.u32 4294901760, %v4407_v42 }
 0xbf4   :  { %v4479_v47 = vsub.f32 %v4407_v42, %v4478_v46  ;;  %21922 = vmatmul.mubr.f32.vlgmr.msra.gmra.mrb[48].mxu1 %v4478_v46 }
 0xbf5   :  { %24172 = vmatpush3.bf16.msra.mxu1 %v26035_v10  ;;  %21943 = vmatprep.mubr.msk.f32.mxu1 %vm28911_vm0, %v28915_v1 }
 0xbf6   :  { %v4480_v50 = vand.u32 4294901760, %v4479_v47  ;;  %24173 = vmatprep.subr.bf16.mxu1 %v28913_v0 }
 0xbf8   :  { %v4481_v37 = vsub.f32 %v4479_v47, %v4480_v50 }
 0xbf9   :  { %24175 = vmatpush3.bf16.msra.mxu1 %v26038_v15 }
 0xbfa   :  { %24182 = vmatprep.subr.bf16.mxu1 %v28913_v0  ;;  %v4482_v61 = vand.u32 4294901760, %v4481_v37  ;;  %v20158_v37 = vld [vmem:[%s28920_s16 + $0x8] sm:$0x3] }
 0xbfc   :  { %21944 = vmatmul.mubr.f32.vlgmr.msra.gmra.mrb[50].mxu1 %v4480_v50  ;;  %21911 = vmatmul.mubr.f32.vlgmr.msra.gmra.mrb[48].mxu0 %v4482_v61 }
 0xbfd   :  { %24166 = vmatpush3.bf16.msra.mxu0 %v26042_v26  ;;  %24184 = vmatpush3.bf16.msra.mxu1 %v26035_v10 }
 0xbfe   :  { %24167 = vmatprep.subr.bf16.mxu0 %v28913_v0  ;;  %24185 = vmatprep.subr.bf16.mxu1 %v28913_v0 }
 0xbff   :  { %21932 = vmatprep.mubr.msk.f32.mxu0 %vm28911_vm0, %v28915_v1  ;;  %21965 = vmatprep.mubr.msk.f32.mxu1 %vm28911_vm0, %v28915_v1 }
 0xc01   :  { %24169 = vmatpush3.bf16.msra.mxu0 %v26058_v33  ;;  %24187 = vmatpush3.bf16.msra.mxu1 %v26038_v15 }
 0xc02   :  { %24176 = vmatprep.subr.bf16.mxu0 %v28913_v0  ;;  %24194 = vmatprep.subr.bf16.mxu1 %v28913_v0 }
 0xc04   :  { %21933 = vmatmul.mubr.f32.vlgmr.msra.gmra.mrb[50].mxu0 %v4479_v47  ;;  %21966 = vmatmul.mubr.f32.vlgmr.msra.gmra.mrb[52].mxu1 %v4478_v46 }
 0xc05   :  { %24178 = vmatpush3.bf16.msra.mxu0 %v26072_v39  ;;  %24196 = vmatpush3.bf16.msra.mxu1 %v26108_v58 }
 0xc06   :  { %24179 = vmatprep.subr.bf16.mxu0 %v28913_v0  ;;  %24197 = vmatprep.subr.bf16.mxu1 %v28913_v0 }
 0xc07   :  { %21954 = vmatprep.mubr.msk.f32.mxu0 %vm28911_vm0, %v28915_v1  ;;  %21987 = vmatprep.mubr.msk.f32.mxu1 %vm28911_vm0, %v28915_v1 }
 0xc08   :  { %v4923_v21 = vpop.permute.xlu0 %4922 }
 0xc09   :  { %24181 = vmatpush3.bf16.msra.mxu0 %v26078_v43  ;;  %24199 = vmatpush3.bf16.msra.mxu1 %v26118_v62  ;;  %v4924_v52 = vsel %vm28917_vm5, %v4923_v21, 0 }
 0xc0a   :  { %v4995_v55 = vand.u32 4294901760, %v4924_v52  ;;  %24188 = vmatprep.subr.bf16.mxu0 %v28913_v0  ;;  %24206 = vmatprep.subr.bf16.mxu1 %v28913_v0 }
 0xc0c   :  { %v4996_v57 = vsub.f32 %v4924_v52, %v4995_v55  ;;  %21955 = vmatmul.mubr.f32.vlgmr.msra.gmra.mrb[52].mxu0 %v4478_v46  ;;  %21988 = vmatmul.mubr.f32.vlgmr.msra.gmra.mrb[54].mxu1 %v4995_v55 }
 0xc0d   :  { %24190 = vmatpush3.bf16.msra.mxu0 %v26088_v48  ;;  %24208 = vmatpush3.bf16.msra.mxu1 %v26088_v48 }
 0xc0e   :  { %v4997_v24 = vand.u32 4294901760, %v4996_v57  ;;  %24191 = vmatprep.subr.bf16.mxu0 %v28913_v0  ;;  %24209 = vmatprep.subr.bf16.mxu1 %v28913_v0 }
 0xc0f   :  { %22009 = vmatprep.mubr.msk.f32.mxu1 %vm28911_vm0, %v28915_v1  ;;  %21976 = vmatprep.mubr.msk.f32.mxu0 %vm28911_vm0, %v28915_v1 }
 0xc10   :  { %v4998_v5 = vsub.f32 %v4996_v57, %v4997_v24 }
 0xc11   :  { %24193 = vmatpush3.bf16.msra.mxu0 %v26096_v53  ;;  %24211 = vmatpush3.bf16.msra.mxu1 %v26096_v53 }
 0xc12   :  { %24200 = vmatprep.subr.bf16.mxu0 %v28913_v0  ;;  %24218 = vmatprep.subr.bf16.mxu1 %v28913_v0  ;;  %v4999_v6 = vand.u32 4294901760, %v4998_v5 }
 0xc14   :  { %22010 = vmatmul.mubr.f32.vlgmr.msra.gmra.mrb[56].mxu1 %v4997_v24  ;;  %21977 = vmatmul.mubr.f32.vlgmr.msra.gmra.mrb[54].mxu0 %v4999_v6 }
 0xc15   :  { %24202 = vmatpush3.bf16.msra.mxu0 %v26110_v59  ;;  %24220 = vmatpush3.bf16.msra.mxu1 %v26088_v48 }
 0xc16   :  { %24203 = vmatprep.subr.bf16.mxu0 %v28913_v0  ;;  %24221 = vmatprep.subr.bf16.mxu1 %v28913_v0 }
 0xc17   :  { %21998 = vmatprep.mubr.msk.f32.mxu0 %vm28911_vm0, %v28915_v1  ;;  %22031 = vmatprep.mubr.msk.f32.mxu1 %vm28911_vm0, %v28915_v1 }
 0xc19   :  { %24205 = vmatpush3.bf16.msra.mxu0 %v26120_v63  ;;  %24223 = vmatpush3.bf16.msra.mxu1 %v26096_v53 }
 0xc1a   :  { %24212 = vmatprep.subr.bf16.mxu0 %v28913_v0  ;;  %24230 = vmatprep.subr.bf16.mxu1 %v28913_v0 }
 0xc1c   :  { %21999 = vmatmul.mubr.f32.vlgmr.msra.gmra.mrb[56].mxu0 %v4996_v57  ;;  %22032 = vmatmul.mubr.f32.vlgmr.msra.gmra.mrb[58].mxu1 %v4995_v55 }
 0xc1d   :  { %24214 = vmatpush3.bf16.msra.mxu0 %v26130_v2  ;;  %22020 = vmatprep.mubr.msk.f32.mxu0 %vm28911_vm0, %v28915_v1 }
 0xc1e   :  { %24215 = vmatprep.subr.bf16.mxu0 %v28913_v0  ;;  %24232 = vmatpush3.bf16.msra.mxu1 %v26051_v31 }
 0xc1f   :  { %24233 = vmatprep.subr.bf16.mxu1 %v28913_v0  ;;  %22053 = vmatprep.mubr.msk.f32.mxu1 %vm28911_vm0, %v28915_v1 }
 0xc21   :  { %24217 = vmatpush3.bf16.msra.mxu0 %v26138_v3 }
 0xc22   :  { %24235 = vmatpush3.bf16.msra.mxu1 %v26056_v32  ;;  %24224 = vmatprep.subr.bf16.mxu0 %v28913_v0 }
 0xc23   :  { %24242 = vmatprep.subr.bf16.mxu1 %v28913_v0 }
 0xc24   :  { %22021 = vmatmul.mubr.f32.vlgmr.msra.gmra.mrb[58].mxu0 %v4995_v55 }
 0xc25   :  { %24226 = vmatpush3.bf16.msra.mxu0 %v26035_v10  ;;  %22042 = vmatprep.mubr.msk.f32.mxu0 %vm28911_vm0, %v28915_v1 }
 0xc26   :  { %24227 = vmatprep.subr.bf16.mxu0 %v28913_v0 }
 0xc29   :  { %24229 = vmatpush3.bf16.msra.mxu0 %v26038_v15 }
 0xc2a   :  { %24236 = vmatprep.subr.bf16.mxu0 %v28913_v0 }
 0xcc7   :  { %v4575_v7 = vpop.f32.mrb[48].mxu1 }
 0xcc8   :  { %v21923_v8 = vpop.f32.mrb[49].mxu1 }
 0xccf   :  { %v4732_v9 = vpop.f32.mrb[50].mxu1  ;;  %v4484_v45 = vpop.f32.mrb[48].mxu0 }
 0xcd0   :  { %v4576_v11 = vadd.f32 %v4575_v7, %v4484_v45  ;;  %v21945_v13 = vpop.f32.mrb[51].mxu1  ;;  %v21912_v14 = vpop.f32.mrb[49].mxu0 }
 0xcd7   :  { %v4655_v17 = vpop.f32.mrb[50].mxu0  ;;  %v4890_v20 = vpop.f32.mrb[52].mxu1 }
 0xcd8   :  { %v4656_v30 = vadd.f32 %v4655_v17, %v4576_v11  ;;  %v21934_v22 = vpop.f32.mrb[51].mxu0  ;;  %v21967_v28 = vpop.f32.mrb[53].mxu1 }
 0xcda   :  { %v4733_v27 = vadd.f32 %v4732_v9, %v4656_v30 }
 0xcdf   :  { %v4815_v29 = vpop.f32.mrb[52].mxu0  ;;  %v5092_v42 = vpop.f32.mrb[54].mxu1 }
 0xce0   :  { %v4816_v46 = vadd.f32 %v4815_v29, %v4733_v27  ;;  %v21956_v47 = vpop.f32.mrb[53].mxu0  ;;  %v21989_v50 = vpop.f32.mrb[55].mxu1 }
 0xce1   :  { %v20156_v50 = vld [vmem:[%s28894_s2 + $0x8] sm:$0x3] }
 0xce2   :  { %v4891_v61 = vadd.f32 %v4890_v20, %v4816_v46  ;;  %v4920_v20 = vld [vmem:[#allocation6 + $0x6] sm:$0x3]  ;;  %vm4399_vm4 = vcmp.gt.f32.partialorder %v20156_v50, 0.5 }
 0xce4   :  { %v4894_v21 = vadd.f32 %v20158_v37, %v4891_v61 }
 0xce6   :  { %25419 = vtanh.f32 %v4894_v21  ;;  %v20159_v29 = vmul.f32 -1.442695, %v4894_v21  ;;  %v5436_v21 = vsel %vm4399_vm4, 1, %v25836_v4 }
 0xce7   :  { %v5249_v52 = vpop.f32.mrb[56].mxu1  ;;  %v5001_v55 = vpop.f32.mrb[54].mxu0 }
 0xce8   :  { %v5093_v57 = vadd.f32 %v5092_v42, %v5001_v55  ;;  %v22011_v24 = vpop.f32.mrb[57].mxu1  ;;  %v21978_v5 = vpop.f32.mrb[55].mxu0  ;;  %v20157_v55 = vld [vmem:[%s28894_s2 + $0x6] sm:$0x3] }
 0xce9   :  { %vm4401_vm7 = vcmp.gt.f32.partialorder %v20157_v55, 0.5 }
 0xcea   :  { %v5448_v24 = vsel %vm4401_vm7, 1, %v25836_v4 }
 0xcef   :  { %v5172_v6 = vpop.f32.mrb[56].mxu0  ;;  %v5407_v7 = vpop.f32.mrb[58].mxu1 }
 0xcf0   :  { %v25420_v8 = vpop.eup %25419  ;;  %v5173_v9 = vadd.f32 %v5172_v6, %v5093_v57  ;;  %v22000_v45 = vpop.f32.mrb[57].mxu0 }
 0xcf1   :  { %v22033_v11 = vpop.f32.mrb[59].mxu1  ;;  %4904 = vrot.lane.b32.xlu1 %v25420_v8, %s25837_s20 }
 0xcf2   :  { %v5250_v13 = vadd.f32 %v5249_v52, %v5173_v9  ;;  %v26718_v9 = vsel %vm4374_vm2, %v26584_v16, %v26581_v12 }
 0xcf7   :  { %v5332_v14 = vpop.f32.mrb[58].mxu0 }
 0xcf8   :  { %v5333_v17 = vadd.f32 %v5332_v14, %v5250_v13  ;;  %v22022_v30 = vpop.f32.mrb[59].mxu0 }
 0xcfa   :  { %v5408_v22 = vadd.f32 %v5407_v7, %v5333_v17  ;;  %v26729_v17 = vsel %vm4386_vm3, %v26595_v49, %v26592_v19 }
 0xcfc   :  { %v5411_v28 = vadd.f32 %v5408_v22, %v4920_v20 }
 0xcfe   :  { %25421 = vtanh.f32 %v5411_v28  ;;  %v20160_v47 = vmul.f32 -1.442695, %v5411_v28 }
 0xcff   :  { %25423 = vpow2.f32 %v20159_v29 }
 0xd08   :  { %v25422_v27 = vpop.eup %25421 }
 0xd09   :  { %5421 = vrot.lane.b32.xlu0 %v25422_v27, %s25837_s20  ;;  %v25424_v42 = vpop.eup %25423 }
 0xd0a   :  { %v4898_v46 = vadd.f32 1.0, %v25424_v42 }
 0xd0c   :  { %25425 = vrcp.f32 %v4898_v46 }
 0xd0d   :  { %25427 = vpow2.f32 %v20160_v47 }
 0xd16   :  { %v25426_v37 = vpop.eup %25425 }
 0xd17   :  { %v25428_v57 = vpop.eup %25427  ;;  %v4902_v45 = vmul.f32 %v25426_v37, %v26718_v9 }
 0xd18   :  { %v5415_v5 = vadd.f32 1.0, %v25428_v57 }
 0xd1a   :  { %25429 = vrcp.f32 %v5415_v5 }
 0xd24   :  { %v25430_v6 = vpop.eup %25429 }
 0xd25   :  { %v5419_v30 = vmul.f32 %v25430_v6, %v26729_v17 }
 0xd63   :  { %v4905_v61 = vpop.permute.xlu1 %4904 }
 0xd64   :  { %v4907_v52 = vmul.f32 %v25426_v37, %v4905_v61 }
 0xd66   :  { %4909 = vrot.lane.b32.xlu1 %v4907_v52, %s25828_s8 }
 0xd6a   :  { %5438 = vperm.xlu1 %25354, %v5436_v21  }
 0xd6e   :  { %5450 = vperm.xlu1 %25354, %v5448_v24  }
 0xd7b   :  { %v5422_v7 = vpop.permute.xlu0 %5421 }
 0xd7c   :  { %v5424_v8 = vmul.f32 %v25430_v6, %v5422_v7 }
 0xd7e   :  { %5426 = vrot.lane.b32.xlu0 %v5424_v8, %s25828_s8 }
 0xdd8   :  { %v4910_v11 = vpop.permute.xlu1 %4909 }
 0xdd9   :  { %v26721_v13 = vadd.f32 %v4910_v11, %v4902_v45 }
 0xddb   :  { %25431 = vtanh.f32 %v26721_v13 }
 0xde5   :  { %v25432_v14 = vpop.eup %25431 }
 0xde6   :  { %4915 = vrot.lane.b32.xlu0 %v25432_v14, %s25837_s20 }
 0xde9   :  { %v26736_v22 = vpop.permute.xlu1 %5438 }
 0xdea   :  { %vm5440_vm8 = vcmp.eq.s32.totalorder %v26736_v22, 1 }
 0xded   :  { %v26749_v49 = vpop.permute.xlu1 %5450 }
 0xdee   :  { %vm5452_vm11 = vcmp.eq.s32.totalorder %v26749_v49, 1  ;;  %v3307_v49 = vsel %vm3306_vm13, %v26464_v56, 0.0 }
 0xdf0   :  { %v5427_v12 = vpop.permute.xlu0 %5426 }
 0xdf1   :  { %v26732_v16 = vadd.f32 %v5427_v12, %v5419_v30 }
 0xdf3   :  { %25433 = vtanh.f32 %v26732_v16 }
 0xdfd   :  { %v25434_v20 = vpop.eup %25433 }
 0xdfe   :  { %5432 = vrot.lane.b32.xlu0 %v25434_v20, %s25837_s20 }
 0xe58   :  { %v4916_v28 = vpop.permute.xlu0 %4915 }
 0xe59   :  { %v26738_v27 = vmul.f32 %v25426_v37, %v4916_v28 }
 0xe5b   :  { %v26745_v19 = vsel %vm5440_vm8, %v26738_v27, %v26608_v51 }
 0xe5c   :  { %5471 = vrot.lane.b32.xlu1 %v26745_v19, %s25828_s8 }
 0xe70   :  { %v5433_v29 = vpop.permute.xlu0 %5432 }
 0xe71   :  { %v26751_v42 = vmul.f32 %v25430_v6, %v5433_v29 }
 0xe73   :  { %v26758_v46 = vsel %vm5452_vm11, %v26751_v42, %v26621_v40 }
 0xe74   :  { %5988 = vrot.lane.b32.xlu0 %v26758_v46, %s25828_s8 }
 0xece   :  { %v5472_v51 = vpop.permute.xlu1 %5471 }
 0xecf   :  { %v5473_v47 = vsel %vm28917_vm5, %v5472_v51, 0 }
 0xed0   :  { %v5544_v50 = vand.u32 4294901760, %v5473_v47 }
 0xed2   :  { %v5545_v37 = vsub.f32 %v5473_v47, %v5544_v50  ;;  %22054 = vmatmul.mubr.f32.vlgmr.msra.gmra.mrb[60].mxu1 %v5544_v50 }
 0xed3   :  { %24244 = vmatpush3.bf16.msra.mxu1 %v26035_v10  ;;  %22075 = vmatprep.mubr.msk.f32.mxu1 %vm28911_vm0, %v28915_v1 }
 0xed4   :  { %v5546_v61 = vand.u32 4294901760, %v5545_v37  ;;  %24245 = vmatprep.subr.bf16.mxu1 %v28913_v0 }
 0xed6   :  { %v5547_v52 = vsub.f32 %v5545_v37, %v5546_v61 }
 0xed7   :  { %24247 = vmatpush3.bf16.msra.mxu1 %v26038_v15 }
 0xed8   :  { %24254 = vmatprep.subr.bf16.mxu1 %v28913_v0  ;;  %v5548_v40 = vand.u32 4294901760, %v5547_v52 }
 0xeda   :  { %22076 = vmatmul.mubr.f32.vlgmr.msra.gmra.mrb[62].mxu1 %v5546_v61  ;;  %22043 = vmatmul.mubr.f32.vlgmr.msra.gmra.mrb[60].mxu0 %v5548_v40 }
 0xedb   :  { %24238 = vmatpush3.bf16.msra.mxu0 %v26042_v26  ;;  %24256 = vmatpush3.bf16.msra.mxu1 %v26035_v10 }
 0xedc   :  { %24239 = vmatprep.subr.bf16.mxu0 %v28913_v0  ;;  %24257 = vmatprep.subr.bf16.mxu1 %v28913_v0 }
 0xedd   :  { %22064 = vmatprep.mubr.msk.f32.mxu0 %vm28911_vm0, %v28915_v1  ;;  %22097 = vmatprep.mubr.msk.f32.mxu1 %vm28911_vm0, %v28915_v1 }
 0xedf   :  { %24241 = vmatpush3.bf16.msra.mxu0 %v26058_v33  ;;  %24259 = vmatpush3.bf16.msra.mxu1 %v26038_v15 }
 0xee0   :  { %24248 = vmatprep.subr.bf16.mxu0 %v28913_v0  ;;  %24266 = vmatprep.subr.bf16.mxu1 %v28913_v0 }
 0xee2   :  { %22065 = vmatmul.mubr.f32.vlgmr.msra.gmra.mrb[62].mxu0 %v5545_v37  ;;  %22098 = vmatmul.mubr.f32.vlgmr.msra.gmra.mrb[64].mxu1 %v5544_v50 }
 0xee3   :  { %24250 = vmatpush3.bf16.msra.mxu0 %v26072_v39  ;;  %24268 = vmatpush3.bf16.msra.mxu1 %v26108_v58 }
 0xee4   :  { %24251 = vmatprep.subr.bf16.mxu0 %v28913_v0  ;;  %24269 = vmatprep.subr.bf16.mxu1 %v28913_v0 }
 0xee5   :  { %22086 = vmatprep.mubr.msk.f32.mxu0 %vm28911_vm0, %v28915_v1  ;;  %22119 = vmatprep.mubr.msk.f32.mxu1 %vm28911_vm0, %v28915_v1 }
 0xee6   :  { %v5989_v55 = vpop.permute.xlu0 %5988 }
 0xee7   :  { %24253 = vmatpush3.bf16.msra.mxu0 %v26078_v43  ;;  %24271 = vmatpush3.bf16.msra.mxu1 %v26118_v62  ;;  %v5990_v21 = vsel %vm28917_vm5, %v5989_v55, 0 }
 0xee8   :  { %v6061_v57 = vand.u32 4294901760, %v5990_v21  ;;  %24260 = vmatprep.subr.bf16.mxu0 %v28913_v0  ;;  %24278 = vmatprep.subr.bf16.mxu1 %v28913_v0 }
 0xeea   :  { %v6062_v24 = vsub.f32 %v5990_v21, %v6061_v57  ;;  %22087 = vmatmul.mubr.f32.vlgmr.msra.gmra.mrb[64].mxu0 %v5544_v50  ;;  %22120 = vmatmul.mubr.f32.vlgmr.msra.gmra.mrb[66].mxu1 %v6061_v57 }
 0xeeb   :  { %24262 = vmatpush3.bf16.msra.mxu0 %v26088_v48  ;;  %24280 = vmatpush3.bf16.msra.mxu1 %v26088_v48 }
 0xeec   :  { %v6063_v5 = vand.u32 4294901760, %v6062_v24  ;;  %24263 = vmatprep.subr.bf16.mxu0 %v28913_v0  ;;  %24281 = vmatprep.subr.bf16.mxu1 %v28913_v0 }
 0xeed   :  { %22141 = vmatprep.mubr.msk.f32.mxu1 %vm28911_vm0, %v28915_v1  ;;  %22108 = vmatprep.mubr.msk.f32.mxu0 %vm28911_vm0, %v28915_v1 }
 0xeee   :  { %v6064_v6 = vsub.f32 %v6062_v24, %v6063_v5 }
 0xeef   :  { %24265 = vmatpush3.bf16.msra.mxu0 %v26096_v53  ;;  %24283 = vmatpush3.bf16.msra.mxu1 %v26096_v53 }
 0xef0   :  { %24272 = vmatprep.subr.bf16.mxu0 %v28913_v0  ;;  %24290 = vmatprep.subr.bf16.mxu1 %v28913_v0  ;;  %v6065_v7 = vand.u32 4294901760, %v6064_v6 }
 0xef2   :  { %22142 = vmatmul.mubr.f32.vlgmr.msra.gmra.mrb[68].mxu1 %v6063_v5  ;;  %22109 = vmatmul.mubr.f32.vlgmr.msra.gmra.mrb[66].mxu0 %v6065_v7 }
 0xef3   :  { %24274 = vmatpush3.bf16.msra.mxu0 %v26110_v59  ;;  %24292 = vmatpush3.bf16.msra.mxu1 %v26088_v48 }
 0xef4   :  { %24275 = vmatprep.subr.bf16.mxu0 %v28913_v0  ;;  %24293 = vmatprep.subr.bf16.mxu1 %v28913_v0 }
 0xef5   :  { %22130 = vmatprep.mubr.msk.f32.mxu0 %vm28911_vm0, %v28915_v1  ;;  %22163 = vmatprep.mubr.msk.f32.mxu1 %vm28911_vm0, %v28915_v1 }
 0xef7   :  { %24277 = vmatpush3.bf16.msra.mxu0 %v26120_v63  ;;  %24295 = vmatpush3.bf16.msra.mxu1 %v26096_v53 }
 0xef8   :  { %24284 = vmatprep.subr.bf16.mxu0 %v28913_v0  ;;  %24302 = vmatprep.subr.bf16.mxu1 %v28913_v0 }
 0xefa   :  { %22131 = vmatmul.mubr.f32.vlgmr.msra.gmra.mrb[68].mxu0 %v6062_v24  ;;  %22164 = vmatmul.mubr.f32.vlgmr.msra.gmra.mrb[70].mxu1 %v6061_v57 }
 0xefb   :  { %24286 = vmatpush3.bf16.msra.mxu0 %v26130_v2  ;;  %22152 = vmatprep.mubr.msk.f32.mxu0 %vm28911_vm0, %v28915_v1 }
 0xefc   :  { %24287 = vmatprep.subr.bf16.mxu0 %v28913_v0  ;;  %24304 = vmatpush3.bf16.msra.mxu1 %v26051_v31 }
 0xefd   :  { %24305 = vmatprep.subr.bf16.mxu1 %v28913_v0  ;;  %22185 = vmatprep.mubr.msk.f32.mxu1 %vm28911_vm0, %v28915_v1 }
 0xeff   :  { %24289 = vmatpush3.bf16.msra.mxu0 %v26138_v3 }
 0xf00   :  { %24307 = vmatpush3.bf16.msra.mxu1 %v26056_v32  ;;  %24296 = vmatprep.subr.bf16.mxu0 %v28913_v0 }
 0xf01   :  { %24314 = vmatprep.subr.bf16.mxu1 %v28913_v0 }
 0xf02   :  { %22153 = vmatmul.mubr.f32.vlgmr.msra.gmra.mrb[70].mxu0 %v6061_v57  ;;  %v20163_v57 = vld [vmem:[%s28920_s16 + $0xa] sm:$0x3] }
 0xf03   :  { %24298 = vmatpush3.bf16.msra.mxu0 %v26035_v10  ;;  %22174 = vmatprep.mubr.msk.f32.mxu0 %vm28911_vm0, %v28915_v1 }
 0xf04   :  { %24299 = vmatprep.subr.bf16.mxu0 %v28913_v0 }
 0xf07   :  { %24301 = vmatpush3.bf16.msra.mxu0 %v26038_v15 }
 0xf08   :  { %24308 = vmatprep.subr.bf16.mxu0 %v28913_v0 }
 0xfa5   :  { %v5641_v8 = vpop.f32.mrb[60].mxu1 }
 0xfa6   :  { %v22055_v45 = vpop.f32.mrb[61].mxu1 }
 0xfad   :  { %v5798_v11 = vpop.f32.mrb[62].mxu1  ;;  %v5550_v14 = vpop.f32.mrb[60].mxu0 }
 0xfae   :  { %v5642_v30 = vadd.f32 %v5641_v8, %v5550_v14  ;;  %v22077_v12 = vpop.f32.mrb[63].mxu1  ;;  %v22044_v20 = vpop.f32.mrb[61].mxu0 }
 0xfb5   :  { %v5721_v28 = vpop.f32.mrb[62].mxu0  ;;  %v5956_v29 = vpop.f32.mrb[64].mxu1 }
 0xfb6   :  { %v5722_v51 = vadd.f32 %v5721_v28, %v5642_v30  ;;  %v22066_v47 = vpop.f32.mrb[63].mxu0  ;;  %v22099_v50 = vpop.f32.mrb[65].mxu1 }
 0xfb8   :  { %v5799_v37 = vadd.f32 %v5798_v11, %v5722_v51 }
 0xfbd   :  { %v5881_v61 = vpop.f32.mrb[64].mxu0  ;;  %v6158_v52 = vpop.f32.mrb[66].mxu1 }
 0xfbe   :  { %v5882_v40 = vadd.f32 %v5881_v61, %v5799_v37  ;;  %v22088_v55 = vpop.f32.mrb[65].mxu0  ;;  %v22121_v21 = vpop.f32.mrb[67].mxu1 }
 0xfc0   :  { %v5957_v24 = vadd.f32 %v5956_v29, %v5882_v40  ;;  %v5986_v29 = vld [vmem:[#allocation6 + $0x4] sm:$0x3] }
 0xfc2   :  { %v5960_v5 = vadd.f32 %v20163_v57, %v5957_v24 }
 0xfc4   :  { %25435 = vtanh.f32 %v5960_v5 }
 0xfc5   :  { %v6315_v6 = vpop.f32.mrb[68].mxu1  ;;  %v6067_v7 = vpop.f32.mrb[66].mxu0 }
 0xfc6   :  { %v6159_v8 = vadd.f32 %v6158_v52, %v6067_v7  ;;  %v22143_v45 = vpop.f32.mrb[69].mxu1  ;;  %v22110_v14 = vpop.f32.mrb[67].mxu0  ;;  %v20164_v52 = vmul.f32 -1.442695, %v5960_v5 }
 0xfcd   :  { %v6238_v30 = vpop.f32.mrb[68].mxu0  ;;  %v6473_v12 = vpop.f32.mrb[70].mxu1 }
 0xfce   :  { %v25436_v11 = vpop.eup %25435  ;;  %v6239_v20 = vadd.f32 %v6238_v30, %v6159_v8  ;;  %v22132_v28 = vpop.f32.mrb[69].mxu0  ;;  %v20162_v30 = vld [vmem:[%s28894_s2 + $0x4] sm:$0x3] }
 0xfcf   :  { %v22165_v51 = vpop.f32.mrb[71].mxu1  ;;  %5970 = vrot.lane.b32.xlu1 %v25436_v11, %s25837_s20  ;;  %vm5467_vm15 = vcmp.gt.f32.partialorder %v20162_v30, 0.5 }
 0xfd0   :  { %v6316_v47 = vadd.f32 %v6315_v6, %v6239_v20  ;;  %v20161_v6 = vld [vmem:[%s28894_s2 + $0xa] sm:$0x3]  ;;  %v6514_v11 = vsel %vm5467_vm15, 1, %v25836_v4 }
 0xfd1   :  { %vm5465_vm12 = vcmp.gt.f32.partialorder %v20161_v6, 0.5 }
 0xfd2   :  { %v6502_v5 = vsel %vm5465_vm12, 1, %v25836_v4 }
 0xfd5   :  { %v6398_v50 = vpop.f32.mrb[70].mxu0 }
 0xfd6   :  { %v6399_v37 = vadd.f32 %v6398_v50, %v6316_v47  ;;  %v22154_v61 = vpop.f32.mrb[71].mxu0  ;;  %v26855_v50 = vsel %vm5440_vm8, %v26721_v13, %v26718_v9 }
 0xfd8   :  { %v6474_v40 = vadd.f32 %v6473_v12, %v6399_v37 }
 0xfda   :  { %v6477_v55 = vadd.f32 %v6474_v40, %v5986_v29 }
 0xfdc   :  { %25437 = vtanh.f32 %v6477_v55  ;;  %v20165_v7 = vmul.f32 -1.442695, %v6477_v55  ;;  %v26866_v55 = vsel %vm5452_vm11, %v26732_v16, %v26729_v17 }
 0xfdd   :  { %25439 = vpow2.f32 %v20164_v52 }
 0xfe6   :  { %v25438_v21 = vpop.eup %25437 }
 0xfe7   :  { %6487 = vrot.lane.b32.xlu0 %v25438_v21, %s25837_s20  ;;  %v25440_v57 = vpop.eup %25439 }
 0xfe8   :  { %v5964_v24 = vadd.f32 1.0, %v25440_v57 }
 0xfea   :  { %25441 = vrcp.f32 %v5964_v24 }
 0xfeb   :  { %25443 = vpow2.f32 %v20165_v7 }
 0xff4   :  { %v25442_v8 = vpop.eup %25441 }
 0xff5   :  { %v25444_v12 = vpop.eup %25443  ;;  %v5968_v37 = vmul.f32 %v25442_v8, %v26855_v50 }
 0xff6   :  { %v6481_v20 = vadd.f32 1.0, %v25444_v12 }
 0xff8   :  { %25445 = vrcp.f32 %v6481_v20 }
0x1002   :  { %v25446_v28 = vpop.eup %25445 }
0x1003   :  { %v6485_v21 = vmul.f32 %v25446_v28, %v26866_v55 }
0x1041   :  { %v5971_v45 = vpop.permute.xlu1 %5970 }
0x1042   :  { %v5973_v14 = vmul.f32 %v25442_v8, %v5971_v45 }
0x1044   :  { %5975 = vrot.lane.b32.xlu1 %v5973_v14, %s25828_s8 }
0x1048   :  { %6504 = vperm.xlu1 %25354, %v6502_v5  }
0x104c   :  { %6516 = vperm.xlu1 %25354, %v6514_v11  }
0x1059   :  { %v6488_v51 = vpop.permute.xlu0 %6487 }
0x105a   :  { %v6490_v47 = vmul.f32 %v25446_v28, %v6488_v51 }
0x105c   :  { %6492 = vrot.lane.b32.xlu0 %v6490_v47, %s25828_s8 }
0x10b6   :  { %v5976_v61 = vpop.permute.xlu1 %5975 }
0x10b7   :  { %v26858_v29 = vadd.f32 %v5976_v61, %v5968_v37 }
0x10b9   :  { %25447 = vtanh.f32 %v26858_v29 }
0x10c3   :  { %v25448_v40 = vpop.eup %25447 }
0x10c4   :  { %5981 = vrot.lane.b32.xlu0 %v25448_v40, %s25837_s20 }
0x10c7   :  { %v26873_v57 = vpop.permute.xlu1 %6504 }
0x10c8   :  { %vm6506_vm1 = vcmp.eq.s32.totalorder %v26873_v57, 1 }
0x10cb   :  { %v26886_v16 = vpop.permute.xlu1 %6516 }
0x10cc   :  { %vm6518_vm4 = vcmp.eq.s32.totalorder %v26886_v16, 1 }
0x10ce   :  { %v6493_v9 = vpop.permute.xlu0 %6492 }
0x10cf   :  { %v26869_v13 = vadd.f32 %v6493_v9, %v6485_v21 }
0x10d1   :  { %25449 = vtanh.f32 %v26869_v13 }
0x10db   :  { %v25450_v52 = vpop.eup %25449 }
0x10dc   :  { %6498 = vrot.lane.b32.xlu0 %v25450_v52, %s25837_s20 }
0x1136   :  { %v5982_v24 = vpop.permute.xlu0 %5981 }
0x1137   :  { %v26875_v7 = vmul.f32 %v25442_v8, %v5982_v24 }
0x1139   :  { %v26882_v17 = vsel %vm6506_vm1, %v26875_v7, %v26745_v19 }
0x113a   :  { %6537 = vrot.lane.b32.xlu1 %v26882_v17, %s25828_s8 }
0x114e   :  { %v6499_v6 = vpop.permute.xlu0 %6498 }
0x114f   :  { %v26888_v45 = vmul.f32 %v25446_v28, %v6499_v6 }
0x1151   :  { %v26895_v8 = vsel %vm6518_vm4, %v26888_v45, %v26758_v46 }
0x1152   :  { %7054 = vrot.lane.b32.xlu0 %v26895_v8, %s25828_s8 }
0x11ac   :  { %v6538_v19 = vpop.permute.xlu1 %6537 }
0x11ad   :  { %v6539_v14 = vsel %vm28917_vm5, %v6538_v19, 0 }
0x11ae   :  { %v6610_v30 = vand.u32 4294901760, %v6539_v14 }
0x11b0   :  { %v6611_v5 = vsub.f32 %v6539_v14, %v6610_v30  ;;  %22186 = vmatmul.mubr.f32.vlgmr.msra.gmra.mrb[72].mxu1 %v6610_v30 }
0x11b1   :  { %24316 = vmatpush3.bf16.msra.mxu1 %v26035_v10  ;;  %22207 = vmatprep.mubr.msk.f32.mxu1 %vm28911_vm0, %v28915_v1 }
0x11b2   :  { %v6612_v12 = vand.u32 4294901760, %v6611_v5  ;;  %24317 = vmatprep.subr.bf16.mxu1 %v28913_v0 }
0x11b4   :  { %v6613_v11 = vsub.f32 %v6611_v5, %v6612_v12 }
0x11b5   :  { %24319 = vmatpush3.bf16.msra.mxu1 %v26038_v15 }
0x11b6   :  { %24326 = vmatprep.subr.bf16.mxu1 %v28913_v0  ;;  %v6614_v46 = vand.u32 4294901760, %v6613_v11 }
0x11b8   :  { %22208 = vmatmul.mubr.f32.vlgmr.msra.gmra.mrb[74].mxu1 %v6612_v12  ;;  %22175 = vmatmul.mubr.f32.vlgmr.msra.gmra.mrb[72].mxu0 %v6614_v46 }
0x11b9   :  { %24310 = vmatpush3.bf16.msra.mxu0 %v26042_v26  ;;  %24328 = vmatpush3.bf16.msra.mxu1 %v26035_v10 }
0x11ba   :  { %24311 = vmatprep.subr.bf16.mxu0 %v28913_v0  ;;  %24329 = vmatprep.subr.bf16.mxu1 %v28913_v0 }
0x11bb   :  { %22196 = vmatprep.mubr.msk.f32.mxu0 %vm28911_vm0, %v28915_v1  ;;  %22229 = vmatprep.mubr.msk.f32.mxu1 %vm28911_vm0, %v28915_v1 }
0x11bd   :  { %24313 = vmatpush3.bf16.msra.mxu0 %v26058_v33  ;;  %24331 = vmatpush3.bf16.msra.mxu1 %v26038_v15 }
0x11be   :  { %24320 = vmatprep.subr.bf16.mxu0 %v28913_v0  ;;  %24338 = vmatprep.subr.bf16.mxu1 %v28913_v0 }
0x11c0   :  { %22197 = vmatmul.mubr.f32.vlgmr.msra.gmra.mrb[74].mxu0 %v6611_v5  ;;  %22230 = vmatmul.mubr.f32.vlgmr.msra.gmra.mrb[76].mxu1 %v6610_v30 }
0x11c1   :  { %24322 = vmatpush3.bf16.msra.mxu0 %v26072_v39  ;;  %24340 = vmatpush3.bf16.msra.mxu1 %v26108_v58 }
0x11c2   :  { %24323 = vmatprep.subr.bf16.mxu0 %v28913_v0  ;;  %24341 = vmatprep.subr.bf16.mxu1 %v28913_v0 }
0x11c3   :  { %22218 = vmatprep.mubr.msk.f32.mxu0 %vm28911_vm0, %v28915_v1  ;;  %22251 = vmatprep.mubr.msk.f32.mxu1 %vm28911_vm0, %v28915_v1 }
0x11c4   :  { %v7055_v20 = vpop.permute.xlu0 %7054 }
0x11c5   :  { %24325 = vmatpush3.bf16.msra.mxu0 %v26078_v43  ;;  %24343 = vmatpush3.bf16.msra.mxu1 %v26118_v62  ;;  %v7056_v28 = vsel %vm28917_vm5, %v7055_v20, 0 }
0x11c6   :  { %v7127_v51 = vand.u32 4294901760, %v7056_v28  ;;  %24332 = vmatprep.subr.bf16.mxu0 %v28913_v0  ;;  %24350 = vmatprep.subr.bf16.mxu1 %v28913_v0 }
0x11c8   :  { %v7128_v47 = vsub.f32 %v7056_v28, %v7127_v51  ;;  %22219 = vmatmul.mubr.f32.vlgmr.msra.gmra.mrb[76].mxu0 %v6610_v30  ;;  %22252 = vmatmul.mubr.f32.vlgmr.msra.gmra.mrb[78].mxu1 %v7127_v51 }
0x11c9   :  { %24334 = vmatpush3.bf16.msra.mxu0 %v26088_v48  ;;  %24352 = vmatpush3.bf16.msra.mxu1 %v26088_v48 }
0x11ca   :  { %v7129_v37 = vand.u32 4294901760, %v7128_v47  ;;  %24335 = vmatprep.subr.bf16.mxu0 %v28913_v0  ;;  %24353 = vmatprep.subr.bf16.mxu1 %v28913_v0 }
0x11cb   :  { %22273 = vmatprep.mubr.msk.f32.mxu1 %vm28911_vm0, %v28915_v1  ;;  %22240 = vmatprep.mubr.msk.f32.mxu0 %vm28911_vm0, %v28915_v1 }
0x11cc   :  { %v7130_v61 = vsub.f32 %v7128_v47, %v7129_v37 }
0x11cd   :  { %24337 = vmatpush3.bf16.msra.mxu0 %v26096_v53  ;;  %24355 = vmatpush3.bf16.msra.mxu1 %v26096_v53 }
0x11ce   :  { %24344 = vmatprep.subr.bf16.mxu0 %v28913_v0  ;;  %24362 = vmatprep.subr.bf16.mxu1 %v28913_v0  ;;  %v7131_v40 = vand.u32 4294901760, %v7130_v61 }
0x11d0   :  { %22274 = vmatmul.mubr.f32.vlgmr.msra.gmra.mrb[80].mxu1 %v7129_v37  ;;  %22241 = vmatmul.mubr.f32.vlgmr.msra.gmra.mrb[78].mxu0 %v7131_v40  ;;  %v20168_v37 = vld [vmem:[%s28920_s16 + $0xc] sm:$0x3] }
0x11d1   :  { %24346 = vmatpush3.bf16.msra.mxu0 %v26110_v59  ;;  %24364 = vmatpush3.bf16.msra.mxu1 %v26088_v48 }
0x11d2   :  { %24347 = vmatprep.subr.bf16.mxu0 %v28913_v0  ;;  %24365 = vmatprep.subr.bf16.mxu1 %v28913_v0 }
0x11d3   :  { %22262 = vmatprep.mubr.msk.f32.mxu0 %vm28911_vm0, %v28915_v1  ;;  %22295 = vmatprep.mubr.msk.f32.mxu1 %vm28911_vm0, %v28915_v1 }
0x11d5   :  { %24349 = vmatpush3.bf16.msra.mxu0 %v26120_v63  ;;  %24367 = vmatpush3.bf16.msra.mxu1 %v26096_v53 }
0x11d6   :  { %24356 = vmatprep.subr.bf16.mxu0 %v28913_v0  ;;  %24374 = vmatprep.subr.bf16.mxu1 %v28913_v0 }
0x11d8   :  { %22263 = vmatmul.mubr.f32.vlgmr.msra.gmra.mrb[80].mxu0 %v7128_v47  ;;  %22296 = vmatmul.mubr.f32.vlgmr.msra.gmra.mrb[82].mxu1 %v7127_v51 }
0x11d9   :  { %24358 = vmatpush3.bf16.msra.mxu0 %v26130_v2  ;;  %22284 = vmatprep.mubr.msk.f32.mxu0 %vm28911_vm0, %v28915_v1 }
0x11da   :  { %24359 = vmatprep.subr.bf16.mxu0 %v28913_v0  ;;  %24376 = vmatpush3.bf16.msra.mxu1 %v26051_v31 }
0x11db   :  { %24377 = vmatprep.subr.bf16.mxu1 %v28913_v0  ;;  %22317 = vmatprep.mubr.msk.f32.mxu1 %vm28911_vm0, %v28915_v1 }
0x11dd   :  { %24361 = vmatpush3.bf16.msra.mxu0 %v26138_v3 }
0x11de   :  { %24379 = vmatpush3.bf16.msra.mxu1 %v26056_v32  ;;  %24368 = vmatprep.subr.bf16.mxu0 %v28913_v0 }
0x11df   :  { %24386 = vmatprep.subr.bf16.mxu1 %v28913_v0 }
0x11e0   :  { %22285 = vmatmul.mubr.f32.vlgmr.msra.gmra.mrb[82].mxu0 %v7127_v51 }
0x11e1   :  { %24370 = vmatpush3.bf16.msra.mxu0 %v26035_v10  ;;  %22306 = vmatprep.mubr.msk.f32.mxu0 %vm28911_vm0, %v28915_v1 }
0x11e2   :  { %24371 = vmatprep.subr.bf16.mxu0 %v28913_v0 }
0x11e5   :  { %24373 = vmatpush3.bf16.msra.mxu0 %v26038_v15 }
0x11e6   :  { %24380 = vmatprep.subr.bf16.mxu0 %v28913_v0 }
0x1283   :  { %v6707_v31 = vpop.f32.mrb[72].mxu1 }
0x1284   :  { %v22187_v21 = vpop.f32.mrb[73].mxu1 }
0x128b   :  { %v6864_v9 = vpop.f32.mrb[74].mxu1  ;;  %v6616_v32 = vpop.f32.mrb[72].mxu0 }
0x128c   :  { %v6708_v52 = vadd.f32 %v6707_v31, %v6616_v32  ;;  %v22209_v24 = vpop.f32.mrb[75].mxu1  ;;  %v22176_v6 = vpop.f32.mrb[73].mxu0 }
0x1293   :  { %v6787_v19 = vpop.f32.mrb[74].mxu0  ;;  %v7022_v14 = vpop.f32.mrb[76].mxu1 }
0x1294   :  { %v6788_v30 = vadd.f32 %v6787_v19, %v6708_v52  ;;  %v22198_v5 = vpop.f32.mrb[75].mxu0  ;;  %v22231_v12 = vpop.f32.mrb[77].mxu1 }
0x1296   :  { %v6865_v11 = vadd.f32 %v6864_v9, %v6788_v30 }
0x129b   :  { %v6947_v46 = vpop.f32.mrb[76].mxu0  ;;  %v7224_v20 = vpop.f32.mrb[78].mxu1 }
0x129c   :  { %v6948_v28 = vadd.f32 %v6947_v46, %v6865_v11  ;;  %v22220_v51 = vpop.f32.mrb[77].mxu0  ;;  %v22253_v47 = vpop.f32.mrb[79].mxu1 }
0x129e   :  { %v7023_v61 = vadd.f32 %v7022_v14, %v6948_v28  ;;  %v7052_v14 = vld [vmem:[#allocation6 + $0x2] sm:$0x3] }
0x12a0   :  { %v7026_v40 = vadd.f32 %v20168_v37, %v7023_v61 }
0x12a2   :  { %25451 = vtanh.f32 %v7026_v40 }
0x12a3   :  { %v7381_v31 = vpop.f32.mrb[80].mxu1  ;;  %v7133_v21 = vpop.f32.mrb[78].mxu0 }
0x12a4   :  { %v7225_v32 = vadd.f32 %v7224_v20, %v7133_v21  ;;  %v22275_v24 = vpop.f32.mrb[81].mxu1  ;;  %v22242_v52 = vpop.f32.mrb[79].mxu0  ;;  %v20169_v20 = vmul.f32 -1.442695, %v7026_v40 }
0x12ab   :  { %v7304_v6 = vpop.f32.mrb[80].mxu0  ;;  %v7539_v19 = vpop.f32.mrb[82].mxu1 }
0x12ac   :  { %v25452_v9 = vpop.eup %25451  ;;  %v7305_v30 = vadd.f32 %v7304_v6, %v7225_v32  ;;  %v22264_v5 = vpop.f32.mrb[81].mxu0 }
0x12ad   :  { %v22297_v12 = vpop.f32.mrb[83].mxu1  ;;  %7036 = vrot.lane.b32.xlu1 %v25452_v9, %s25837_s20 }
0x12ae   :  { %v7382_v11 = vadd.f32 %v7381_v31, %v7305_v30  ;;  %v20166_v31 = vld [vmem:[%s28894_s2 + $0xc] sm:$0x3] }
0x12af   :  { %vm6531_vm7 = vcmp.gt.f32.partialorder %v20166_v31, 0.5 }
0x12b0   :  { %v7568_v40 = vsel %vm6531_vm7, 1, %v25836_v4 }
0x12b3   :  { %v7464_v46 = vpop.f32.mrb[82].mxu0 }
0x12b4   :  { %v7465_v51 = vadd.f32 %v7464_v46, %v7382_v11  ;;  %v22286_v47 = vpop.f32.mrb[83].mxu0 }
0x12b5   :  { %v26992_v47 = vsel %vm6506_vm1, %v26858_v29, %v26855_v50 }
0x12b6   :  { %v7540_v28 = vadd.f32 %v7539_v19, %v7465_v51  ;;  %v20167_v19 = vld [vmem:[%s28894_s2 + $0x2] sm:$0x3] }
0x12b7   :  { %vm6533_vm12 = vcmp.gt.f32.partialorder %v20167_v19, 0.5 }
0x12b8   :  { %v7543_v37 = vadd.f32 %v7540_v28, %v7052_v14  ;;  %v7580_v5 = vsel %vm6533_vm12, 1, %v25836_v4 }
0x12ba   :  { %25453 = vtanh.f32 %v7543_v37  ;;  %v20170_v32 = vmul.f32 -1.442695, %v7543_v37 }
0x12bb   :  { %25455 = vpow2.f32 %v20169_v20  ;;  %v27003_v20 = vsel %vm6518_vm4, %v26869_v13, %v26866_v55 }
0x12c4   :  { %v25454_v61 = vpop.eup %25453 }
0x12c5   :  { %7553 = vrot.lane.b32.xlu0 %v25454_v61, %s25837_s20  ;;  %v25456_v21 = vpop.eup %25455 }
0x12c6   :  { %v7030_v24 = vadd.f32 1.0, %v25456_v21 }
0x12c8   :  { %25457 = vrcp.f32 %v7030_v24 }
0x12c9   :  { %25459 = vpow2.f32 %v20170_v32 }
0x12d2   :  { %v25458_v52 = vpop.eup %25457 }
0x12d3   :  { %v25460_v30 = vpop.eup %25459  ;;  %v7034_v14 = vmul.f32 %v25458_v52, %v26992_v47 }
0x12d4   :  { %v7547_v12 = vadd.f32 1.0, %v25460_v30 }
0x12d6   :  { %25461 = vrcp.f32 %v7547_v12 }
0x12e0   :  { %v25462_v11 = vpop.eup %25461 }
0x12e1   :  { %v7551_v21 = vmul.f32 %v25462_v11, %v27003_v20 }
0x131f   :  { %v7037_v6 = vpop.permute.xlu1 %7036 }
0x1320   :  { %v7039_v9 = vmul.f32 %v25458_v52, %v7037_v6 }
0x1322   :  { %7041 = vrot.lane.b32.xlu1 %v7039_v9, %s25828_s8 }
0x1326   :  { %7570 = vperm.xlu1 %25354, %v7568_v40  }
0x132a   :  { %7582 = vperm.xlu1 %25354, %v7580_v5  }
0x1337   :  { %v7554_v46 = vpop.permute.xlu0 %7553 }
0x1338   :  { %v7556_v51 = vmul.f32 %v25462_v11, %v7554_v46 }
0x133a   :  { %7558 = vrot.lane.b32.xlu0 %v7556_v51, %s25828_s8 }
0x1394   :  { %v7042_v28 = vpop.permute.xlu1 %7041 }
0x1395   :  { %v26995_v37 = vadd.f32 %v7042_v28, %v7034_v14 }
0x1397   :  { %25463 = vtanh.f32 %v26995_v37 }
0x13a1   :  { %v25464_v61 = vpop.eup %25463 }
0x13a2   :  { %7047 = vrot.lane.b32.xlu0 %v25464_v61, %s25837_s20 }
0x13a5   :  { %v27010_v32 = vpop.permute.xlu1 %7570 }
0x13a6   :  { %vm7572_vm15 = vcmp.eq.s32.totalorder %v27010_v32, 1 }
0x13a7   :  { %v7593_v56 = vsel %vm7572_vm15, %v26995_v37, %v26992_v47  ;;  %v6519_v47 = vsel %vm6518_vm4, %v26888_v45, 0.0 }
0x13a9   :  { %v27020_v13 = vpop.permute.xlu1 %7582 }
0x13aa   :  { %vm7584_vm7 = vcmp.eq.s32.totalorder %v27020_v13, 1 }
0x13ac   :  { %v7559_v50 = vpop.permute.xlu0 %7558 }
0x13ad   :  { %v27006_v29 = vadd.f32 %v7559_v50, %v7551_v21 }
0x13af   :  { %25465 = vtanh.f32 %v27006_v29 }
0x13b9   :  { %v25466_v24 = vpop.eup %25465 }
0x13ba   :  { %7564 = vrot.lane.b32.xlu0 %v25466_v24, %s25837_s20 }
0x1414   :  { %v7048_v31 = vpop.permute.xlu0 %7047 }
0x1415   :  { %v27012_v6 = vmul.f32 %v25458_v52, %v7048_v31 }
0x1417   :  { %v7592_v55 = vsel %vm7572_vm15, %v27012_v6, %v26882_v17  ;;  %v7573_v34 = vsel %vm7572_vm15, %v27012_v6, 0.0 }
0x1418   :  { %7603 = vrot.lane.b32.xlu1 %v7592_v55, %s25828_s8 }
0x142c   :  { %v7565_v9 = vpop.permute.xlu0 %7564 }
0x142d   :  { %v27022_v19 = vmul.f32 %v25462_v11, %v7565_v9 }
0x142f   :  { %v7594_v52 = vsel %vm7584_vm7, %v27022_v19, %v26895_v8 }
0x1430   :  { %8119 = vrot.lane.b32.xlu0 %v7594_v52, %s25828_s8 }
0x148a   :  { %v7604_v40 = vpop.permute.xlu1 %7603 }
0x148b   :  { %v7605_v30 = vsel %vm28917_vm5, %v7604_v40, 0 }
0x148c   :  { %v7676_v17 = vand.u32 4294901760, %v7605_v30 }
0x148e   :  { %v7677_v5 = vsub.f32 %v7605_v30, %v7676_v17  ;;  %22318 = vmatmul.mubr.f32.vlgmr.msra.gmra.mrb[84].mxu1 %v7676_v17 }
0x148f   :  { %24388 = vmatpush3.bf16.msra.mxu1 %v26035_v10  ;;  %22339 = vmatprep.mubr.msk.f32.mxu1 %vm28911_vm0, %v28915_v1 }
0x1490   :  { %v7678_v12 = vand.u32 4294901760, %v7677_v5  ;;  %24389 = vmatprep.subr.bf16.mxu1 %v28913_v0 }
0x1492   :  { %v7679_v11 = vsub.f32 %v7677_v5, %v7678_v12 }
0x1493   :  { %24391 = vmatpush3.bf16.msra.mxu1 %v26038_v15 }
0x1494   :  { %24398 = vmatprep.subr.bf16.mxu1 %v28913_v0  ;;  %v7680_v8 = vand.u32 4294901760, %v7679_v11 }
0x1496   :  { %22340 = vmatmul.mubr.f32.vlgmr.msra.gmra.mrb[86].mxu1 %v7678_v12  ;;  %22307 = vmatmul.mubr.f32.vlgmr.msra.gmra.mrb[84].mxu0 %v7680_v8 }
0x1497   :  { %24382 = vmatpush3.bf16.msra.mxu0 %v26042_v26  ;;  %24400 = vmatpush3.bf16.msra.mxu1 %v26035_v10 }
0x1498   :  { %24383 = vmatprep.subr.bf16.mxu0 %v28913_v0  ;;  %24401 = vmatprep.subr.bf16.mxu1 %v28913_v0 }
0x1499   :  { %22328 = vmatprep.mubr.msk.f32.mxu0 %vm28911_vm0, %v28915_v1  ;;  %22361 = vmatprep.mubr.msk.f32.mxu1 %vm28911_vm0, %v28915_v1 }
0x149b   :  { %24385 = vmatpush3.bf16.msra.mxu0 %v26058_v33  ;;  %24403 = vmatpush3.bf16.msra.mxu1 %v26038_v15 }
0x149c   :  { %24392 = vmatprep.subr.bf16.mxu0 %v28913_v0  ;;  %24410 = vmatprep.subr.bf16.mxu1 %v28913_v0 }
0x149e   :  { %22329 = vmatmul.mubr.f32.vlgmr.msra.gmra.mrb[86].mxu0 %v7677_v5  ;;  %22362 = vmatmul.mubr.f32.vlgmr.msra.gmra.mrb[88].mxu1 %v7676_v17 }
0x149f   :  { %24394 = vmatpush3.bf16.msra.mxu0 %v26072_v39  ;;  %24412 = vmatpush3.bf16.msra.mxu1 %v26108_v58 }
0x14a0   :  { %24395 = vmatprep.subr.bf16.mxu0 %v28913_v0  ;;  %24413 = vmatprep.subr.bf16.mxu1 %v28913_v0 }
0x14a1   :  { %22350 = vmatprep.mubr.msk.f32.mxu0 %vm28911_vm0, %v28915_v1  ;;  %22383 = vmatprep.mubr.msk.f32.mxu1 %vm28911_vm0, %v28915_v1 }
0x14a2   :  { %v8120_v10 = vpop.permute.xlu0 %8119 }
0x14a3   :  { %24397 = vmatpush3.bf16.msra.mxu0 %v26078_v43  ;;  %24415 = vmatpush3.bf16.msra.mxu1 %v26118_v62  ;;  %v8121_v15 = vsel %vm28917_vm5, %v8120_v10, 0 }
0x14a4   :  { %v8192_v26 = vand.u32 4294901760, %v8121_v15  ;;  %24404 = vmatprep.subr.bf16.mxu0 %v28913_v0  ;;  %24422 = vmatprep.subr.bf16.mxu1 %v28913_v0 }
0x14a6   :  { %v8193_v33 = vsub.f32 %v8121_v15, %v8192_v26  ;;  %22351 = vmatmul.mubr.f32.vlgmr.msra.gmra.mrb[88].mxu0 %v7676_v17  ;;  %22384 = vmatmul.mubr.f32.vlgmr.msra.gmra.mrb[90].mxu1 %v8192_v26 }
0x14a7   :  { %24406 = vmatpush3.bf16.msra.mxu0 %v26088_v48  ;;  %24424 = vmatpush3.bf16.msra.mxu1 %v26088_v48 }
0x14a8   :  { %v8194_v39 = vand.u32 4294901760, %v8193_v33  ;;  %24407 = vmatprep.subr.bf16.mxu0 %v28913_v0  ;;  %24425 = vmatprep.subr.bf16.mxu1 %v28913_v0 }
0x14a9   :  { %22405 = vmatprep.mubr.msk.f32.mxu1 %vm28911_vm0, %v28915_v1  ;;  %22372 = vmatprep.mubr.msk.f32.mxu0 %vm28911_vm0, %v28915_v1 }
0x14aa   :  { %v8195_v43 = vsub.f32 %v8193_v33, %v8194_v39 }
0x14ab   :  { %24409 = vmatpush3.bf16.msra.mxu0 %v26096_v53  ;;  %24427 = vmatpush3.bf16.msra.mxu1 %v26096_v53 }
0x14ac   :  { %24416 = vmatprep.subr.bf16.mxu0 %v28913_v0  ;;  %24434 = vmatprep.subr.bf16.mxu1 %v28913_v0  ;;  %v8196_v58 = vand.u32 4294901760, %v8195_v43 }
0x14ae   :  { %22406 = vmatmul.mubr.f32.vlgmr.msra.gmra.mrb[92].mxu1 %v8194_v39  ;;  %22373 = vmatmul.mubr.f32.vlgmr.msra.gmra.mrb[90].mxu0 %v8196_v58 }
0x14af   :  { %24418 = vmatpush3.bf16.msra.mxu0 %v26110_v59  ;;  %24436 = vmatpush3.bf16.msra.mxu1 %v26088_v48 }
0x14b0   :  { %24419 = vmatprep.subr.bf16.mxu0 %v28913_v0  ;;  %24437 = vmatprep.subr.bf16.mxu1 %v28913_v0 }
0x14b1   :  { %22394 = vmatprep.mubr.msk.f32.mxu0 %vm28911_vm0, %v28915_v1  ;;  %22427 = vmatprep.mubr.msk.f32.mxu1 %vm28911_vm0, %v28915_v1 }
0x14b3   :  { %24421 = vmatpush3.bf16.msra.mxu0 %v26120_v63  ;;  %24439 = vmatpush3.bf16.msra.mxu1 %v26096_v53 }
0x14b4   :  { %24428 = vmatprep.subr.bf16.mxu0 %v28913_v0 }
0x14b6   :  { %22395 = vmatmul.mubr.f32.vlgmr.msra.gmra.mrb[92].mxu0 %v8193_v33  ;;  %22428 = vmatmul.mubr.f32.vlgmr.msra.gmra.mrb[94].mxu1 %v8192_v26 }
0x14b7   :  { %24430 = vmatpush3.bf16.msra.mxu0 %v26130_v2  ;;  %22416 = vmatprep.mubr.msk.f32.mxu0 %vm28911_vm0, %v28915_v1 }
0x14b8   :  { %24431 = vmatprep.subr.bf16.mxu0 %v28913_v0 }
0x14bb   :  { %24433 = vmatpush3.bf16.msra.mxu0 %v26138_v3  ;;  %v20172_v3 = vld [vmem:[%s28920_s16 + $0xe] sm:$0x3] }
0x14be   :  { %22417 = vmatmul.mubr.f32.vlgmr.msra.gmra.mrb[94].mxu0 %v8192_v26 }
0x1561   :  { %v7773_v48 = vpop.f32.mrb[84].mxu1 }
0x1562   :  { %v22319_v59 = vpop.f32.mrb[85].mxu1 }
0x1569   :  { %v7930_v62 = vpop.f32.mrb[86].mxu1  ;;  %v7682_v63 = vpop.f32.mrb[84].mxu0 }
0x156a   :  { %v7774_v46 = vadd.f32 %v7773_v48, %v7682_v63  ;;  %v22341_v53 = vpop.f32.mrb[87].mxu1  ;;  %v22308_v51 = vpop.f32.mrb[85].mxu0  ;;  %v8117_v63 = vld [vmem:[#allocation6] sm:$0x3] }
0x1571   :  { %v7853_v14 = vpop.f32.mrb[86].mxu0  ;;  %v8088_v28 = vpop.f32.mrb[88].mxu1 }
0x1572   :  { %v7854_v61 = vadd.f32 %v7853_v14, %v7774_v46  ;;  %v22330_v21 = vpop.f32.mrb[87].mxu0  ;;  %v22363_v2 = vpop.f32.mrb[89].mxu1 }
0x1574   :  { %v7931_v50 = vadd.f32 %v7930_v62, %v7854_v61 }
0x1579   :  { %v8013_v24 = vpop.f32.mrb[88].mxu0  ;;  %v8289_v31 = vpop.f32.mrb[90].mxu1 }
0x157a   :  { %v8014_v55 = vadd.f32 %v8013_v24, %v7931_v50  ;;  %v22352_v9 = vpop.f32.mrb[89].mxu0  ;;  %v22385_v52 = vpop.f32.mrb[91].mxu1 }
0x157b   :  { %v7598_v9 = vld [vmem:[%s28894_s2] sm:$0x3] }
0x157c   :  { %v8089_v40 = vadd.f32 %v8088_v28, %v8014_v55  ;;  %vm7599_vm12 = vcmp.gt.f32.partialorder %v7598_v9, 0.5  ;;  %v8679_v9 = vld [vmem:[#allocation9 + $0x18] sm:$0xff] }
0x157e   :  { %v8092_v30 = vadd.f32 %v20172_v3, %v8089_v40 }
0x1580   :  { %25467 = vtanh.f32 %v8092_v30  ;;  %v20173_v14 = vmul.f32 -1.442695, %v8092_v30  ;;  %v20171_v30 = vld [vmem:[%s28894_s2 + $0xe] sm:$0x3] }
0x1581   :  { %v8446_v17 = vpop.f32.mrb[92].mxu1  ;;  %v8198_v5 = vpop.f32.mrb[90].mxu0  ;;  %vm7597_vm0 = vcmp.gt.f32.partialorder %v20171_v30, 0.5  ;;  %v9842_v30 = vld [vmem:[#allocation12 + $0x18] sm:$0xff] }
0x1582   :  { %v8290_v12 = vadd.f32 %v8289_v31, %v8198_v5  ;;  %v22407_v11 = vpop.f32.mrb[93].mxu1  ;;  %v22374_v8 = vpop.f32.mrb[91].mxu0  ;;  %v8633_v5 = vsel %vm7597_vm0, 1, %v25836_v4  ;;  %v9853_v41 = vand.u32 4294901760, %v9842_v30 }
0x1583   :  { %v7585_v11 = vsel %vm7584_vm7, %v27022_v19, 0.0  ;;  %v2251_v8 = vsel %vm2250_vm10, %v26340_v44, 0.0  ;;  %v7595_v44 = vsel %vm7584_vm7, %v27006_v29, %v27003_v20  ;;  %vm28921_vm10 = vmmov 0  }
0x1589   :  { %v8369_v10 = vpop.f32.mrb[92].mxu0  ;;  %v8604_v15 = vpop.f32.mrb[94].mxu1 }
0x158a   :  { %v25468_v26 = vpop.eup %25467  ;;  %v8370_v33 = vadd.f32 %v8369_v10, %v8290_v12  ;;  %v22396_v39 = vpop.f32.mrb[93].mxu0  ;;  %v5453_v12 = vsel %vm5452_vm11, %v26751_v42, 0.0  ;;  %v4387_v10 = vsel %vm4386_vm3, %v26614_v36, 0.0  ;;  %v5441_v42 = vsel %vm5440_vm8, %v26738_v27, 0.0 }
0x158b   :  { %v22429_v43 = vpop.f32.mrb[95].mxu1  ;;  %8102 = vrot.lane.b32.xlu0 %v25468_v26, %s25837_s20 }
0x158c   :  { %v8447_v58 = vadd.f32 %v8446_v17, %v8370_v33  ;;  %v8645_v17 = vsel %vm7599_vm12, 1, %v25836_v4 }
0x1591   :  { %v8529_v48 = vpop.f32.mrb[94].mxu0 }
0x1592   :  { %v8530_v59 = vadd.f32 %v8529_v48, %v8447_v58  ;;  %v22418_v62 = vpop.f32.mrb[95].mxu0 }
0x1593   :  { %v8677_v62 = vld [vmem:[#allocation9 + $0x8] sm:$0xff] }
0x1594   :  { %v8605_v46 = vadd.f32 %v8604_v15, %v8530_v59  ;;  %v8676_v59 = vld [vmem:[#allocation9] sm:$0xff] }
0x1596   :  { %v8608_v53 = vadd.f32 %v8605_v46, %v8117_v63  ;;  %v3319_v63 = vsel %vm3318_vm14, %v26477_v60, 0.0  ;;  %v8727_v46 = vand.u32 4294901760, %v8676_v59 }
0x1598   :  { %25469 = vtanh.f32 %v8608_v53  ;;  %v20174_v21 = vmul.f32 -1.442695, %v8608_v53  ;;  %v8730_v53 = vand.u32 4294901760, %v8677_v62 }
0x1599   :  { %25471 = vpow2.f32 %v20173_v14  ;;  %v9840_v14 = vld [vmem:[#allocation12 + $0x8] sm:$0xff] }
0x15a2   :  { %v25470_v51 = vpop.eup %25469 }
0x15a3   :  { %8618 = vrot.lane.b32.xlu1 %v25470_v51, %s25837_s20  ;;  %v25472_v28 = vpop.eup %25471  ;;  %v9839_v51 = vld [vmem:[#allocation12] sm:$0xff] }
0x15a4   :  { %v8096_v61 = vadd.f32 1.0, %v25472_v28 }
0x15a6   :  { %25473 = vrcp.f32 %v8096_v61  ;;  %v9844_v61 = vand.u32 4294901760, %v9839_v51 }
0x15a7   :  { %25475 = vpow2.f32 %v20174_v21  ;;  %v9847_v21 = vand.u32 4294901760, %v9840_v14 }
0x15a9   :  { %v27177_v60 = vpack.c.bf16 %v9847_v21, %v9844_v61 }
0x15ab   :  { %24537 = vmatprep.subr.bf16.mxu1 %v27177_v60 }
0x15ac   :  { %24539 = vmatpush3.bf16.msra.mxu1 %v27177_v60 }
0x15b0   :  { %v27095_v2 = vpop.eup %25473 }
0x15b1   :  { %v25476_v31 = vpop.eup %25475  ;;  %v8100_v22 = vmul.f32 %v27095_v2, %v7593_v56 }
0x15b2   :  { %v8612_v55 = vadd.f32 1.0, %v25476_v31  ;;  %v27172_v31 = vsub.f32 %v8677_v62, %v8730_v53 }
0x15b4   :  { %25477 = vrcp.f32 %v8612_v55  ;;  %v8678_v55 = vld [vmem:[#allocation9 + $0x10] sm:$0xff] }
0x15be   :  { %v25478_v52 = vpop.eup %25477 }
0x15bf   :  { %v8616_v54 = vmul.f32 %v25478_v52, %v7595_v44 }
0x15fd   :  { %v8103_v50 = vpop.permute.xlu0 %8102 }
0x15fe   :  { %v8105_v24 = vmul.f32 %v27095_v2, %v8103_v50  ;;  %v27168_v50 = vpack.c.bf16 %v8730_v53, %v8727_v46 }
0x1600   :  { %8107 = vrot.lane.b32.xlu0 %v8105_v24, %s25828_s8  ;;  %v27170_v24 = vsub.f32 %v8676_v59, %v8727_v46  ;;  %24441 = vmatprep.subr.bf16.mxu0 %v27168_v50 }
0x1601   :  { %24443 = vmatpush3.bf16.msra.mxu0 %v27168_v50 }
0x1602   :  { %v27220_v46 = vpack.c.bf16 %v27172_v31, %v27170_v24 }
0x1615   :  { %v8619_v3 = vpop.permute.xlu1 %8618 }
0x1616   :  { %v8621_v40 = vmul.f32 %v25478_v52, %v8619_v3  ;;  %v8736_v3 = vand.u32 4294901760, %v8679_v9 }
0x1618   :  { %8623 = vrot.lane.b32.xlu1 %v8621_v40, %s25828_s8  ;;  %v9841_v40 = vld [vmem:[#allocation12 + $0x10] sm:$0xff] }
0x1619   :  { %v9850_v38 = vand.u32 4294901760, %v9841_v40 }
0x161c   :  { %8647 = vperm.xlu1 %25354, %v8645_v17   ;;  %v8818_v17 = vand.u32 4294901760, %v27170_v24 }
0x1620   :  { %8635 = vperm.xlu1 %25354, %v8633_v5   ;;  %v8825_v5 = vand.u32 4294901760, %v27172_v31 }
0x1624   :  { %5455 = vrot.lane.b32.xlu1 %v5453_v12, %s25828_s8  ;;  %v9934_v12 = vsub.f32 %v9839_v51, %v9844_v61 }
0x1626   :  { %v9935_v44 = vand.u32 4294901760, %v9934_v12 }
0x1628   :  { %7587 = vrot.lane.b32.xlu1 %v7585_v11, %s25828_s8  ;;  %v9941_v11 = vsub.f32 %v9840_v14, %v9847_v21 }
0x162a   :  { %v27222_v53 = vpack.c.bf16 %v9941_v11, %v9934_v12 }
0x162c   :  { %2253 = vrot.lane.b32.xlu1 %v2251_v8, %s25828_s8  ;;  %v4375_v8 = vsel %vm4374_vm2, %v26601_v35, 0.0  ;;  %v8838_v35 = vsub.f32 %v8679_v9, %v8736_v3 }
0x1630   :  { %4389 = vrot.lane.b32.xlu1 %v4387_v10, %s25828_s8 }
0x1634   :  { %3309 = vrot.lane.b32.xlu1 %v3307_v49, %s25828_s8  ;;  %v8819_v49 = vsub.f32 %v27170_v24, %v8818_v17 }
0x1638   :  { %5443 = vrot.lane.b32.xlu1 %v5441_v42, %s25828_s8  ;;  %v8826_v42 = vsub.f32 %v27172_v31, %v8825_v5  ;;  %v8693_v31 = vlaneseq }
0x163a   :  { %v8827_v23 = vand.u32 4294901760, %v8826_v42 }
0x163c   :  { %7575 = vrot.lane.b32.xlu1 %v7573_v34, %s25828_s8  ;;  %v27193_v34 = vpack.c.bf16 %v9853_v41, %v9850_v38 }
0x163e   :  { %24541 = vmatprep.subr.bf16.mxu1 %v27193_v34 }
0x163f   :  { %24543 = vmatpush3.bf16.msra.mxu1 %v27193_v34 }
0x1672   :  { %v8108_v25 = vpop.permute.xlu0 %8107 }
0x1673   :  { %v8110_v19 = vadd.f32 %v8108_v25, %v8100_v22  ;;  %v8820_v25 = vand.u32 4294901760, %v8819_v49  ;;  %v9936_v22 = vsub.f32 %v9934_v12, %v9935_v44  ;;  %v8671_v49 = vld [vmem:[#allocation3 + $0xe] sm:$0x3] }
0x168a   :  { %v8624_v36 = vpop.permute.xlu1 %8623 }
0x168b   :  { %v8626_v27 = vadd.f32 %v8624_v36, %v8616_v54  ;;  %v9942_v54 = vand.u32 4294901760, %v9941_v11  ;;  %v9948_v36 = vsub.f32 %v9841_v40, %v9850_v38  ;;  %v8694_v40 = vshrl.u32 %v8693_v31, 7 }
0x168d   :  { %25479 = vtanh.f32 %v8626_v27  ;;  %v9943_v27 = vsub.f32 %v9941_v11, %v9942_v54 }
0x168e   :  { %25481 = vtanh.f32 %v8110_v19 }
0x1697   :  { %v25480_v6 = vpop.eup %25479 }
0x1698   :  { %8629 = vrot.lane.b32.xlu0 %v25480_v6, %s25837_s20  ;;  %v25482_v15 = vpop.eup %25481  ;;  %v9955_v6 = vsub.f32 %v9842_v30, %v9853_v41 }
0x169a   :  { %v27226_v14 = vpack.c.bf16 %v9955_v6, %v9948_v36 }
0x169b   :  { %v8648_v13 = vpop.permute.xlu1 %8647 }
0x169c   :  { %8113 = vrot.lane.b32.xlu0 %v25482_v15, %s25837_s20  ;;  %vm8649_vm0 = vcmp.eq.s32.totalorder %v8648_v13, 1  ;;  %v27199_v15 = vpack.c.bf16 %v8827_v23, %v8820_v25  ;;  %v8839_v13 = vand.u32 4294901760, %v8838_v35 }
0x169f   :  { %v27147_v20 = vpop.permute.xlu1 %8635 }
0x16a0   :  { %6521 = vrot.lane.b32.xlu0 %v6519_v47, %s25828_s8  ;;  %v9949_v47 = vand.u32 4294901760, %v9948_v36  ;;  %vm8637_vm9 = vcmp.eq.s32.totalorder %v27147_v20, 1  ;;  %v27228_v20 = vpack.c.bf16 %v8825_v5, %v8818_v17 }
0x16a3   :  { %v5456_v37 = vpop.permute.xlu1 %5455 }
0x16a4   :  { %5459 = vst.msk [vmem:[#allocation3 + $0x6] sm:$0x3] %vm1184_vm6, %v5456_v37  ;;  %v9937_v37 = vand.u32 4294901760, %v9936_v22 }
0x16a7   :  { %v7588_v29 = vpop.permute.xlu1 %7587 }
0x16a8   :  { %7591 = vst.msk [vmem:[#allocation3 + $0x2] sm:$0x3] %vm1184_vm6, %v7588_v29  ;;  %v9944_v29 = vand.u32 4294901760, %v9943_v27 }
0x16ab   :  { %v2254_v32 = vpop.permute.xlu1 %2253  ;;  %v8667_v30 = vld [vmem:[#allocation3 + $0x6] sm:$0x3] }
0x16ac   :  { %2257 = vst.msk [vmem:[#allocation3 + $0xc] sm:$0x3] %vm1184_vm6, %v2254_v32 }
0x16af   :  { %v4390_v26 = vpop.permute.xlu1 %4389  ;;  %v8665_v41 = vld [vmem:[#allocation3 + $0x2] sm:$0x3] }
0x16b0   :  { %4393 = vst.msk [vmem:[#allocation3 + $0x8] sm:$0x3] %vm1184_vm6, %v4390_v26  ;;  %v9956_v26 = vand.u32 4294901760, %v9955_v6 }
0x16b2   :  { %v9957_v59 = vsub.f32 %v9955_v6, %v9956_v26  ;;  %v27234_v21 = vpack.c.bf16 %v9956_v26, %v9949_v47 }
0x16b3   :  { %v3310_v33 = vpop.permute.xlu1 %3309  ;;  %v8670_v12 = vld [vmem:[#allocation3 + $0xc] sm:$0x3] }
0x16b4   :  { %3313 = vst.msk [vmem:[#allocation2 + $0x4] sm:$0x3] %vm1184_vm6, %v3310_v33 }
0x16b7   :  { %v5444_v39 = vpop.permute.xlu1 %5443  ;;  %v8668_v25 = vld [vmem:[#allocation3 + $0x8] sm:$0x3] }
0x16b8   :  { %5447 = vst.msk [vmem:[#allocation2 + $0x8] sm:$0x3] %vm1184_vm6, %v5444_v39  ;;  %v6507_v39 = vsel %vm6506_vm1, %v26875_v7, 0.0 }
0x16bb   :  { %v7576_v16 = vpop.permute.xlu1 %7575 }
0x16bc   :  { %7579 = vst.msk [vmem:[#allocation2 + $0xc] sm:$0x3] %vm1184_vm6, %v7576_v16  ;;  %v8840_v16 = vsub.f32 %v8838_v35, %v8839_v13 }
0x16be   :  { %v8841_v62 = vand.u32 4294901760, %v8840_v16 }
0x16bf   :  { %v8660_v31 = vld [vmem:[#allocation2 + $0x8] sm:$0x3] }
0x170a   :  { %v8630_v45 = vpop.permute.xlu0 %8629 }
0x170b   :  { %v8632_v43 = vmul.f32 %v25478_v52, %v8630_v45  ;;  %v8733_v52 = vand.u32 4294901760, %v8678_v55  ;;  %v9950_v45 = vsub.f32 %v9948_v36, %v9949_v47 }
0x170d   :  { %v8650_v58 = vsel %vm8649_vm0, %v8632_v43, 0.0  ;;  %v27188_v10 = vpack.c.bf16 %v8736_v3, %v8733_v52  ;;  %v8831_v56 = vsub.f32 %v8678_v55, %v8733_v52  ;;  %v27209_v43 = vpack.c.bf16 %v9944_v29, %v9937_v37 }
0x170e   :  { %8652 = vrot.lane.b32.xlu0 %v8650_v58, %s25828_s8  ;;  %v27161_v48 = vpop.permute.xlu0 %8113  ;;  %v25838_v55 = vmov 1983009808  }
0x170f   :  { %24445 = vmatprep.subr.bf16.mxu0 %v27188_v10  ;;  %v8832_v19 = vand.u32 4294901760, %v8831_v56  ;;  %v8116_v33 = vmul.f32 %v27095_v2, %v27161_v48  ;;  %24545 = vmatprep.subr.bf16.mxu1 %v27209_v43  ;;  %v9958_v2 = vand.u32 4294901760, %v9957_v59  ;;  %v27224_v51 = vpack.c.bf16 %v8838_v35, %v8831_v56 }
0x1710   :  { %24447 = vmatpush3.bf16.msra.mxu0 %v27188_v10  ;;  %v8691_v24 = vunpack.c.l.s4 %v25838_v55  ;;  %v8662_v55 = vld [vmem:[#allocation2 + $0xc] sm:$0x3] }
0x1711   :  { %v8833_v32 = vsub.f32 %v8831_v56, %v8832_v19  ;;  %24449 = vmatprep.subr.bf16.mxu0 %v27199_v15  ;;  %v8638_v48 = vsel %vm8637_vm9, %v8116_v33, 0.0  ;;  %v27232_v61 = vpack.c.bf16 %v8839_v13, %v8832_v19 }
0x1712   :  { %3321 = vrot.lane.b32.xlu0 %v3319_v63, %s25828_s8  ;;  %v6522_v28 = vpop.permute.xlu0 %6521  ;;  %v9951_v63 = vand.u32 4294901760, %v9950_v45  ;;  %v8692_v3 = vunpack.c.0.s8 %v8691_v24 }
0x1713   :  { %6525 = vst.msk [vmem:[#allocation3 + $0x4] sm:$0x3] %vm1184_vm6, %v6522_v28  ;;  %v8834_v58 = vand.u32 4294901760, %v8833_v32  ;;  %v27230_v28 = vpack.c.bf16 %v9942_v54, %v9935_v44  ;;  %v8706_v54 = vcombine.low %v8670_v12, %v8671_v49 }
0x1714   :  { %v27216_v7 = vpack.c.bf16 %v9958_v2, %v9951_v63  ;;  %v8658_v2 = vld [vmem:[#allocation2 + $0x4] sm:$0x3] }
0x1715   :  { %v27213_v57 = vpack.c.bf16 %v8841_v62, %v8834_v58 }
0x1716   :  { %2241 = vrot.lane.b32.xlu0 %v2239_v18, %s25828_s8 }
0x171a   :  { %4377 = vrot.lane.b32.xlu0 %v4375_v8, %s25828_s8  ;;  %v8666_v52 = vld [vmem:[#allocation3 + $0x4] sm:$0x3]  ;;  %v27239_v8 = vsub.s32 %v8692_v3, %v8694_v40 }
0x171b   :  { %v8689_v17 = vcombine.low %v8666_v52, %v8667_v30  ;;  %v8673_v52 = vld [vmem:[%s28897_s5 + $0x8] sm:$0xff]  ;;  %v9835_v3 = vld [vmem:[#allocation11] sm:$0xff]  ;;  %v9836_v30 = vld [vmem:[#allocation11 + $0x8] sm:$0xff] }
0x171c   :  { %v8720_v19 = vrot.slane %v8706_v54, %v27239_v8  ;;  %v10372_v12 = vand.u32 4294901760, %v9835_v3  ;;  %v8675_v54 = vld [vmem:[%s28897_s5 + $0x18] sm:$0xff] }
0x171d   :  { %v8703_v44 = vrot.slane %v8689_v17, %v27239_v8 }
0x171e   :  { %6509 = vrot.lane.b32.xlu0 %v6507_v39, %s25828_s8 }
0x1722   :  { %8640 = vrot.lane.b32.xlu0 %v8638_v48, %s25828_s8  ;;  %v8656_v48 = vld [vmem:[#allocation2] sm:$0x3] }
0x1780   :  { %v8653_v18 = vpop.permute.xlu0 %8652 }
0x1781   :  { %8655 = vst.msk [vmem:[#allocation3] sm:$0x3] %vm1184_vm6, %v8653_v18 }
0x1784   :  { %v3322_v9 = vpop.permute.xlu0 %3321 }
0x1785   :  { %3325 = vst.msk [vmem:[#allocation3 + $0xa] sm:$0x3] %vm1184_vm6, %v3322_v9 }
0x1788   :  { %v2242_v5 = vpop.permute.xlu0 %2241  ;;  %v8664_v38 = vld [vmem:[#allocation3] sm:$0x3] }
0x1789   :  { %2245 = vst.msk [vmem:[#allocation2 + $0x2] sm:$0x3] %vm1184_vm6, %v2242_v5  ;;  %v8688_v11 = vcombine.low %v8664_v38, %v8665_v41  ;;  %v9304_v41 = vand.u32 4294901760, %v8673_v52 }
0x178b   :  { %v8696_v42 = vrot.slane %v8688_v11, %v27239_v8  ;;  %v10375_v11 = vand.u32 4294901760, %v9836_v30 }
0x178c   :  { %v4378_v56 = vpop.permute.xlu0 %4377  ;;  %v8669_v23 = vld [vmem:[#allocation3 + $0xa] sm:$0x3] }
0x178d   :  { %4381 = vst.msk [vmem:[#allocation2 + $0x6] sm:$0x3] %vm1184_vm6, %v4378_v56  ;;  %v8704_v35 = vcombine.low %v8696_v42, %v8703_v44  ;;  %v8705_v36 = vcombine.low %v8668_v25, %v8669_v23  ;;  %v8674_v44 = vld [vmem:[%s28897_s5 + $0x10] sm:$0xff]  ;;  %v27309_v56 = vld [vmem:[#allocation11 + $0x10] sm:$0xff]  ;;  %v27311_v25 = vld [vmem:[#allocation11 + $0x18] sm:$0xff] }
0x178f   :  { %v8722_v22 = vsel %vm28917_vm5, %v8704_v35, 0  ;;  %v8713_v27 = vrot.slane %v8705_v36, %v27239_v8  ;;  %v27317_v35 = vsub.f32 %v8673_v52, %v9304_v41  ;;  %v27319_v36 = vsub.f32 %v9835_v3, %v10372_v12 }
0x1790   :  { %v6510_v6 = vpop.permute.xlu0 %6509  ;;  %v27247_v13 = vand.u32 4294901760, %v8722_v22 }
0x1791   :  { %6513 = vst.msk [vmem:[#allocation2 + $0xa] sm:$0x3] %vm1184_vm6, %v6510_v6  ;;  %v8721_v47 = vcombine.low %v8713_v27, %v8720_v19  ;;  %v27324_v19 = vsub.f32 %v9836_v30, %v10375_v11  ;;  %v10378_v6 = vand.u32 4294901760, %v27309_v56 }
0x1792   :  { %v8796_v37 = vsub.f32 %v8722_v22, %v27247_v13  ;;  %v9310_v22 = vand.u32 4294901760, %v8675_v54 }
0x1793   :  { %v8724_v29 = vsel %vm28917_vm5, %v8721_v47, 0  ;;  %v10381_v47 = vand.u32 4294901760, %v27311_v25 }
0x1794   :  { %v8641_v32 = vpop.permute.xlu0 %8640  ;;  %v8797_v26 = vand.u32 4294901760, %v8796_v37  ;;  %v27252_v33 = vand.u32 4294901760, %v8724_v29  ;;  %v8659_v63 = vld [vmem:[#allocation2 + $0x6] sm:$0x3] }
0x1795   :  { %8644 = vst.msk [vmem:[#allocation2 + $0xe] sm:$0x3] %vm1184_vm6, %v8641_v32 }
0x1796   :  { %v8798_v39 = vsub.f32 %v8796_v37, %v8797_v26  ;;  %v8806_v16 = vsub.f32 %v8724_v29, %v27252_v33  ;;  %v9399_v29 = vand.u32 4294901760, %v27317_v35 }
0x1798   :  { %v8799_v45 = vand.u32 4294901760, %v8798_v39  ;;  %v27256_v58 = vand.u32 4294901760, %v8806_v16  ;;  %v10470_v39 = vand.u32 4294901760, %v27324_v19 }
0x179a   :  { %22438 = vmatprep.mubr.f32.mxu0 %v8799_v45  ;;  %22570 = vmatprep.mubr.f32.mxu1 %v8799_v45  ;;  %v8808_v59 = vsub.f32 %v8806_v16, %v27256_v58  ;;  %v27344_v45 = vsub.f32 %v8675_v54, %v9310_v22 }
0x179c   :  { %v8809_v62 = vand.u32 4294901760, %v8808_v59 }
0x179e   :  { %22439 = vmatmul.mubr.f32.vlgmr.msra.gmra.mrb[96].mxu0 %v8809_v62  ;;  %22571 = vmatmul.mubr.f32.vlgmr.msra.gmra.mrb[96].mxu1 %v8809_v62  ;;  %v27360_v62 = vpack.c.bf16 %v10375_v11, %v10372_v12 }
0x179f   :  { %24451 = vmatpush3.bf16.msra.mxu0 %v27199_v15  ;;  %22449 = vmatprep.mubr.f32.mxu0 %v27247_v13  ;;  %v8657_v15 = vld [vmem:[#allocation2 + $0x2] sm:$0x3] }
0x17a0   :  { %24547 = vmatpush3.bf16.msra.mxu1 %v27209_v43  ;;  %22581 = vmatprep.mubr.f32.mxu1 %v27247_v13  ;;  %v9263_v43 = vcombine.low %v8658_v2, %v8659_v63 }
0x17a1   :  { %24453 = vmatprep.subr.bf16.mxu0 %v27213_v57  ;;  %24549 = vmatprep.subr.bf16.mxu1 %v27216_v7 }
0x17a2   :  { %v9277_v18 = vrot.slane %v9263_v43, %v27239_v8 }
0x17a3   :  { %24455 = vmatpush3.bf16.msra.mxu0 %v27213_v57  ;;  %v9262_v57 = vcombine.low %v8656_v48, %v8657_v15  ;;  %v9400_v15 = vsub.f32 %v27317_v35, %v9399_v29  ;;  %v9413_v48 = vand.u32 4294901760, %v27344_v45 }
0x17a4   :  { %24551 = vmatpush3.bf16.msra.mxu1 %v27216_v7  ;;  %24457 = vmatprep.subr.bf16.mxu0 %v27220_v46  ;;  %v8663_v7 = vld [vmem:[#allocation2 + $0xe] sm:$0x3] }
0x17a5   :  { %24553 = vmatprep.subr.bf16.mxu1 %v27222_v53  ;;  %v9280_v24 = vcombine.low %v8662_v55, %v8663_v7  ;;  %v9401_v55 = vand.u32 4294901760, %v9400_v15 }
0x17a6   :  { %22450 = vmatmul.mubr.f32.vlgmr.msra.gmra.mrb[96].mxu0 %v27252_v33 }
0x17a7   :  { %24459 = vmatpush3.bf16.msra.mxu0 %v27220_v46  ;;  %22582 = vmatmul.mubr.f32.vlgmr.msra.gmra.mrb[96].mxu1 %v27252_v33  ;;  %v8661_v46 = vld [vmem:[#allocation2 + $0xa] sm:$0x3]  ;;  %v9294_v40 = vrot.slane %v9280_v24, %v27239_v8 }
0x17a8   :  { %22460 = vmatprep.mubr.f32.mxu0 %v8796_v37  ;;  %24555 = vmatpush3.bf16.msra.mxu1 %v27222_v53  ;;  %v9270_v53 = vrot.slane %v9262_v57, %v27239_v8 }
0x17a9   :  { %22592 = vmatprep.mubr.f32.mxu1 %v8796_v37  ;;  %24461 = vmatprep.subr.bf16.mxu0 %v27224_v51 }
0x17aa   :  { %24557 = vmatprep.subr.bf16.mxu1 %v27226_v14  ;;  %v9278_v9 = vcombine.low %v9270_v53, %v9277_v18 }
0x17ab   :  { %24463 = vmatpush3.bf16.msra.mxu0 %v27224_v51  ;;  %v9279_v51 = vcombine.low %v8660_v31, %v8661_v46 }
0x17ac   :  { %24559 = vmatpush3.bf16.msra.mxu1 %v27226_v14  ;;  %24465 = vmatprep.subr.bf16.mxu0 %v27168_v50  ;;  %v8672_v14 = vld [vmem:[%s28897_s5] sm:$0xff]  ;;  %v9296_v17 = vsel %vm28917_vm5, %v9278_v9, 0 }
0x17ad   :  { %24561 = vmatprep.subr.bf16.mxu1 %v27177_v60  ;;  %v9287_v5 = vrot.slane %v9279_v51, %v27239_v8  ;;  %v9301_v38 = vand.u32 4294901760, %v8672_v14  ;;  %v27299_v42 = vand.u32 4294901760, %v9296_v17  ;;  %v27404_v51 = vpack.c.bf16 %v10381_v47, %v10378_v6 }
0x17ae   :  { %22461 = vmatmul.mubr.f32.vlgmr.msra.gmra.mrb[96].mxu0 %v8806_v16 }
0x17af   :  { %24467 = vmatpush3.bf16.msra.mxu0 %v27168_v50  ;;  %22593 = vmatmul.mubr.f32.vlgmr.msra.gmra.mrb[96].mxu1 %v8806_v16  ;;  %v9295_v49 = vcombine.low %v9287_v5, %v9294_v40  ;;  %v27315_v23 = vsub.f32 %v8672_v14, %v9301_v38  ;;  %v27358_v59 = vpack.c.bf16 %v9304_v41, %v9301_v38 }
0x17b0   :  { %22471 = vmatprep.mubr.f32.mxu0 %v8797_v26  ;;  %24563 = vmatpush3.bf16.msra.mxu1 %v27177_v60 }
0x17b1   :  { %22603 = vmatprep.mubr.f32.mxu1 %v8797_v26  ;;  %24469 = vmatprep.subr.bf16.mxu0 %v27188_v10  ;;  %v9298_v27 = vsel %vm28917_vm5, %v9295_v49, 0  ;;  %v9392_v37 = vand.u32 4294901760, %v27315_v23  ;;  %v10463_v26 = vand.u32 4294901760, %v27319_v36  ;;  %v24504_v49 = vpack.c.bf16 %v27317_v35, %v27315_v23 }
0x17b2   :  { %24565 = vmatprep.subr.bf16.mxu1 %v27193_v34  ;;  %v27337_v32 = vand.u32 4294901760, %v9298_v27 }
0x17b3   :  { %24471 = vmatpush3.bf16.msra.mxu0 %v27188_v10  ;;  %v9393_v63 = vsub.f32 %v27315_v23, %v9392_v37  ;;  %v10464_v2 = vsub.f32 %v27319_v36, %v10463_v26 }
0x17b4   :  { %24567 = vmatpush3.bf16.msra.mxu1 %v27193_v34  ;;  %24473 = vmatprep.subr.bf16.mxu0 %v27228_v20 }
0x17b5   :  { %24569 = vmatprep.subr.bf16.mxu1 %v27230_v28  ;;  %v9394_v46 = vand.u32 4294901760, %v9393_v63  ;;  %v10465_v24 = vand.u32 4294901760, %v10464_v2  ;;  %v11013_v63 = vld [vmem:[#allocation14 + $0x18] sm:$0xff] }
0x17b6   :  { %22472 = vmatmul.mubr.f32.vlgmr.msra.gmra.mrb[96].mxu0 %v27256_v58 }
0x17b7   :  { %24475 = vmatpush3.bf16.msra.mxu0 %v27228_v20  ;;  %22604 = vmatmul.mubr.f32.vlgmr.msra.gmra.mrb[96].mxu1 %v27256_v58  ;;  %v9307_v20 = vand.u32 4294901760, %v8674_v44  ;;  %v27354_v58 = vsub.f32 %v27311_v25, %v10381_v47  ;;  %v24496_v3 = vpack.c.bf16 %v9401_v55, %v9394_v46  ;;  %v11010_v25 = vld [vmem:[#allocation14] sm:$0xff]  ;;  %v11012_v47 = vld [vmem:[#allocation14 + $0x10] sm:$0xff] }
0x17b8   :  { %22482 = vmatprep.mubr.f32.mxu0 %v27247_v13  ;;  %24571 = vmatpush3.bf16.msra.mxu1 %v27230_v28  ;;  %v27328_v28 = vsub.f32 %v9296_v17, %v27299_v42 }
0x17b9   :  { %22614 = vmatprep.mubr.f32.mxu1 %v27247_v13  ;;  %24477 = vmatprep.subr.bf16.mxu0 %v27232_v61  ;;  %v27342_v16 = vsub.f32 %v8674_v44, %v9307_v20  ;;  %v10484_v7 = vand.u32 4294901760, %v27354_v58  ;;  %v27391_v18 = vpack.c.bf16 %v9310_v22, %v9307_v20  ;;  %v24600_v44 = vpack.c.bf16 %v27324_v19, %v27319_v36  ;;  %v11011_v20 = vld [vmem:[#allocation14 + $0x8] sm:$0xff] }
0x17ba   :  { %24573 = vmatprep.subr.bf16.mxu1 %v27234_v21  ;;  %v24520_v22 = vpack.c.bf16 %v9399_v29, %v9392_v37  ;;  %v11030_v37 = vand.u32 4294901760, %v11012_v47  ;;  %v11033_v29 = vand.u32 4294901760, %v11013_v63 }
0x17bb   :  { %24479 = vmatpush3.bf16.msra.mxu0 %v27232_v61  ;;  %v27348_v61 = vand.u32 4294901760, %v27328_v28  ;;  %v9406_v43 = vand.u32 4294901760, %v27342_v16  ;;  %v10485_v52 = vsub.f32 %v27354_v58, %v10484_v7  ;;  %v24508_v54 = vpack.c.bf16 %v27344_v45, %v27342_v16 }
0x17bc   :  { %24575 = vmatpush3.bf16.msra.mxu1 %v27234_v21  ;;  %24481 = vmatprep.subr.bf16.mxu0 %v27168_v50  ;;  %v27351_v21 = vsub.f32 %v27309_v56, %v10378_v6  ;;  %v24616_v6 = vpack.c.bf16 %v10470_v39, %v10463_v26 }
0x17bd   :  { %24577 = vmatprep.subr.bf16.mxu1 %v27177_v60  ;;  %v9372_v57 = vsub.f32 %v27328_v28, %v27348_v61  ;;  %v9407_v9 = vsub.f32 %v27342_v16, %v9406_v43  ;;  %v10486_v41 = vand.u32 4294901760, %v10485_v52  ;;  %v24524_v36 = vpack.c.bf16 %v9413_v48, %v9406_v43 }
0x17be   :  { %22483 = vmatmul.mubr.f32.vlgmr.msra.gmra.mrb[96].mxu0 %v27252_v33  ;;  %v24604_v56 = vpack.c.bf16 %v27354_v58, %v27351_v21  ;;  %v27472_v16 = vsub.f32 %v11012_v47, %v11030_v37 }
0x17bf   :  { %24483 = vmatpush3.bf16.msra.mxu0 %v27168_v50  ;;  %22615 = vmatmul.mubr.f32.vlgmr.msra.gmra.mrb[96].mxu1 %v27252_v33  ;;  %v27371_v50 = vsub.f32 %v9298_v27, %v27337_v32  ;;  %v9408_v17 = vand.u32 4294901760, %v9407_v9  ;;  %v11024_v27 = vand.u32 4294901760, %v11010_v25 }
0x17c0   :  { %22493 = vmatprep.mubr.f32.mxu0 %v27247_v13  ;;  %24579 = vmatpush3.bf16.msra.mxu1 %v27177_v60  ;;  %v10471_v60 = vsub.f32 %v27324_v19, %v10470_v39  ;;  %v11119_v58 = vand.u32 4294901760, %v27472_v16 }
0x17c1   :  { %22625 = vmatprep.mubr.f32.mxu1 %v27247_v13  ;;  %24485 = vmatprep.subr.bf16.mxu0 %v27188_v10  ;;  %v10477_v13 = vand.u32 4294901760, %v27351_v21  ;;  %v27394_v53 = vand.u32 4294901760, %v27371_v50  ;;  %v27455_v23 = vsub.f32 %v11010_v25, %v11024_v27 }
0x17c2   :  { %24581 = vmatprep.subr.bf16.mxu1 %v27193_v34  ;;  %v10472_v31 = vand.u32 4294901760, %v10471_v60  ;;  %v11120_v60 = vsub.f32 %v27472_v16, %v11119_v58 }
0x17c3   :  { %24487 = vmatpush3.bf16.msra.mxu0 %v27188_v10  ;;  %v9414_v10 = vsub.f32 %v27344_v45, %v9413_v48  ;;  %v10478_v14 = vsub.f32 %v27351_v21, %v10477_v13  ;;  %v9382_v40 = vsub.f32 %v27371_v50, %v27394_v53  ;;  %v24620_v19 = vpack.c.bf16 %v10484_v7, %v10477_v13  ;;  %v11014_v13 = vld [vmem:[#allocation15] sm:$0xff] }
0x17c4   :  { %24583 = vmatpush3.bf16.msra.mxu1 %v27193_v34  ;;  %24489 = vmatprep.subr.bf16.mxu0 %v27358_v59  ;;  %v9373_v34 = vand.u32 4294901760, %v9372_v57  ;;  %v24592_v30 = vpack.c.bf16 %v10472_v31, %v10465_v24  ;;  %v11105_v26 = vand.u32 4294901760, %v27455_v23  ;;  %v27474_v45 = vsub.f32 %v11013_v63, %v11033_v29  ;;  %v11017_v24 = vld [vmem:[#allocation15 + $0x18] sm:$0xff] }
0x17c5   :  { %24585 = vmatprep.subr.bf16.mxu1 %v27360_v62  ;;  %v9415_v5 = vand.u32 4294901760, %v9414_v10  ;;  %v10479_v38 = vand.u32 4294901760, %v10478_v14  ;;  %v11121_v48 = vand.u32 4294901760, %v11120_v60  ;;  %v27512_v7 = vpack.c.bf16 %v11033_v29, %v11030_v37 }
0x17c6   :  { %22494 = vmatmul.mubr.f32.vlgmr.msra.gmra.mrb[96].mxu0 %v27252_v33  ;;  %v11126_v15 = vand.u32 4294901760, %v27474_v45  ;;  %v11536_v46 = vand.u32 4294901760, %v11014_v13 }
0x17c7   :  { %24491 = vmatpush3.bf16.msra.mxu0 %v27358_v59  ;;  %22626 = vmatmul.mubr.f32.vlgmr.msra.gmra.mrb[96].mxu1 %v27252_v33  ;;  %v9383_v33 = vand.u32 4294901760, %v9382_v40  ;;  %v24500_v12 = vpack.c.bf16 %v9415_v5, %v9408_v17  ;;  %v24596_v11 = vpack.c.bf16 %v10486_v41, %v10479_v38 }
0x17c8   :  { %22504 = vmatprep.mubr.f32.mxu0 %v9373_v34  ;;  %24587 = vmatpush3.bf16.msra.mxu1 %v27360_v62  ;;  %v11127_v43 = vsub.f32 %v27474_v45, %v11126_v15  ;;  %v27530_v31 = vsub.f32 %v11014_v13, %v11536_v46 }
0x17c9   :  { %22636 = vmatprep.mubr.f32.mxu1 %v9373_v34  ;;  %24493 = vmatprep.subr.bf16.mxu0 %v27391_v18  ;;  %v11545_v34 = vand.u32 4294901760, %v11017_v24 }
0x17ca   :  { %24589 = vmatprep.subr.bf16.mxu1 %v27404_v51  ;;  %v11128_v57 = vand.u32 4294901760, %v11127_v43  ;;  %v11617_v14 = vand.u32 4294901760, %v27530_v31 }
0x17cb   :  { %24495 = vmatpush3.bf16.msra.mxu0 %v27391_v18  ;;  %v27548_v40 = vsub.f32 %v11017_v24, %v11545_v34 }
0x17cc   :  { %24591 = vmatpush3.bf16.msra.mxu1 %v27404_v51  ;;  %24497 = vmatprep.subr.bf16.mxu0 %v24496_v3  ;;  %v11618_v17 = vsub.f32 %v27530_v31, %v11617_v14 }
0x17cd   :  { %24593 = vmatprep.subr.bf16.mxu1 %v24592_v30  ;;  %v11638_v41 = vand.u32 4294901760, %v27548_v40 }
0x17ce   :  { %22505 = vmatmul.mubr.f32.vlgmr.msra.gmra.mrb[96].mxu0 %v9383_v33 }
0x17cf   :  { %24499 = vmatpush3.bf16.msra.mxu0 %v24496_v3  ;;  %22637 = vmatmul.mubr.f32.vlgmr.msra.gmra.mrb[96].mxu1 %v9383_v33  ;;  %v27576_v33 = vpack.c.bf16 %v11126_v15, %v11119_v58 }
0x17d0   :  { %22515 = vmatprep.mubr.f32.mxu0 %v27299_v42  ;;  %24595 = vmatpush3.bf16.msra.mxu1 %v24592_v30 }
0x17d1   :  { %22647 = vmatprep.mubr.f32.mxu1 %v27299_v42  ;;  %24501 = vmatprep.subr.bf16.mxu0 %v24500_v12 }
0x17d2   :  { %24597 = vmatprep.subr.bf16.mxu1 %v24596_v11 }
0x17d3   :  { %24503 = vmatpush3.bf16.msra.mxu0 %v24500_v12  ;;  %v11619_v12 = vand.u32 4294901760, %v11618_v17 }
0x17d4   :  { %24599 = vmatpush3.bf16.msra.mxu1 %v24596_v11  ;;  %24505 = vmatprep.subr.bf16.mxu0 %v24504_v49 }
0x17d5   :  { %24601 = vmatprep.subr.bf16.mxu1 %v24600_v44 }
0x17d6   :  { %22516 = vmatmul.mubr.f32.vlgmr.msra.gmra.mrb[96].mxu0 %v27337_v32 }
0x17d7   :  { %24507 = vmatpush3.bf16.msra.mxu0 %v24504_v49  ;;  %22648 = vmatmul.mubr.f32.vlgmr.msra.gmra.mrb[96].mxu1 %v27337_v32 }
0x17d8   :  { %22526 = vmatprep.mubr.f32.mxu0 %v27328_v28  ;;  %24603 = vmatpush3.bf16.msra.mxu1 %v24600_v44  ;;  %v11639_v44 = vsub.f32 %v27548_v40, %v11638_v41 }
0x17d9   :  { %22658 = vmatprep.mubr.f32.mxu1 %v27328_v28  ;;  %24509 = vmatprep.subr.bf16.mxu0 %v24508_v54  ;;  %v11027_v28 = vand.u32 4294901760, %v11011_v20 }
0x17da   :  { %24605 = vmatprep.subr.bf16.mxu1 %v24604_v56 }
0x17db   :  { %24511 = vmatpush3.bf16.msra.mxu0 %v24508_v54  ;;  %v27457_v35 = vsub.f32 %v11011_v20, %v11027_v28  ;;  %v11640_v20 = vand.u32 4294901760, %v11639_v44 }
0x17dc   :  { %24607 = vmatpush3.bf16.msra.mxu1 %v24604_v56  ;;  %24513 = vmatprep.subr.bf16.mxu0 %v27358_v59 }
0x17dd   :  { %24609 = vmatprep.subr.bf16.mxu1 %v27360_v62  ;;  %v11112_v39 = vand.u32 4294901760, %v27457_v35 }
0x17de   :  { %22527 = vmatmul.mubr.f32.vlgmr.msra.gmra.mrb[96].mxu0 %v27371_v50 }
0x17df   :  { %24515 = vmatpush3.bf16.msra.mxu0 %v27358_v59  ;;  %22659 = vmatmul.mubr.f32.vlgmr.msra.gmra.mrb[96].mxu1 %v27371_v50  ;;  %v11113_v21 = vsub.f32 %v27457_v35, %v11112_v39  ;;  %v27560_v30 = vpack.c.bf16 %v11112_v39, %v11105_v26 }
0x17e0   :  { %22537 = vmatprep.mubr.f32.mxu0 %v27348_v61  ;;  %24611 = vmatpush3.bf16.msra.mxu1 %v27360_v62 }
0x17e1   :  { %22669 = vmatprep.mubr.f32.mxu1 %v27348_v61  ;;  %24517 = vmatprep.subr.bf16.mxu0 %v27391_v18  ;;  %v11106_v61 = vsub.f32 %v27455_v23, %v11105_v26  ;;  %v11114_v2 = vand.u32 4294901760, %v11113_v21 }
0x17e2   :  { %24613 = vmatprep.subr.bf16.mxu1 %v27404_v51 }
0x17e3   :  { %24519 = vmatpush3.bf16.msra.mxu0 %v27391_v18  ;;  %v11107_v50 = vand.u32 4294901760, %v11106_v61 }
0x17e4   :  { %24615 = vmatpush3.bf16.msra.mxu1 %v27404_v51  ;;  %24521 = vmatprep.subr.bf16.mxu0 %v24520_v22 }
0x17e5   :  { %24617 = vmatprep.subr.bf16.mxu1 %v24616_v6 }
0x17e6   :  { %22538 = vmatmul.mubr.f32.vlgmr.msra.gmra.mrb[96].mxu0 %v27394_v53 }
0x17e7   :  { %24523 = vmatpush3.bf16.msra.mxu0 %v24520_v22  ;;  %22670 = vmatmul.mubr.f32.vlgmr.msra.gmra.mrb[96].mxu1 %v27394_v53  ;;  %v11016_v53 = vld [vmem:[#allocation15 + $0x10] sm:$0xff] }
0x17e8   :  { %22548 = vmatprep.mubr.f32.mxu0 %v27299_v42  ;;  %24619 = vmatpush3.bf16.msra.mxu1 %v24616_v6  ;;  %v11542_v10 = vand.u32 4294901760, %v11016_v53 }
0x17e9   :  { %22680 = vmatprep.mubr.f32.mxu1 %v27299_v42  ;;  %24525 = vmatprep.subr.bf16.mxu0 %v24524_v36 }
0x17ea   :  { %24621 = vmatprep.subr.bf16.mxu1 %v24620_v19  ;;  %v27546_v3 = vsub.f32 %v11016_v53, %v11542_v10  ;;  %v27598_v22 = vpack.c.bf16 %v11545_v34, %v11542_v10 }
0x17eb   :  { %24527 = vmatpush3.bf16.msra.mxu0 %v24524_v36 }
0x17ec   :  { %24623 = vmatpush3.bf16.msra.mxu1 %v24620_v19  ;;  %24529 = vmatprep.subr.bf16.mxu0 %v27358_v59  ;;  %v11631_v38 = vand.u32 4294901760, %v27546_v3  ;;  %v27622_v6 = vpack.c.bf16 %v27548_v40, %v27546_v3 }
0x17ed   :  { %24625 = vmatprep.subr.bf16.mxu1 %v27360_v62 }
0x17ee   :  { %22549 = vmatmul.mubr.f32.vlgmr.msra.gmra.mrb[96].mxu0 %v27337_v32  ;;  %v11632_v49 = vsub.f32 %v27546_v3, %v11631_v38  ;;  %v27640_v63 = vpack.c.bf16 %v11638_v41, %v11631_v38 }
0x17ef   :  { %24531 = vmatpush3.bf16.msra.mxu0 %v27358_v59  ;;  %22681 = vmatmul.mubr.f32.vlgmr.msra.gmra.mrb[96].mxu1 %v27337_v32  ;;  %v27502_v59 = vpack.c.bf16 %v11027_v28, %v11024_v27 }
0x17f0   :  { %22559 = vmatprep.mubr.f32.mxu0 %v27299_v42  ;;  %24627 = vmatpush3.bf16.msra.mxu1 %v27360_v62  ;;  %v27506_v62 = vpack.c.bf16 %v11114_v2, %v11107_v50  ;;  %v11633_v25 = vand.u32 4294901760, %v11632_v49 }
0x17f1   :  { %22691 = vmatprep.mubr.f32.mxu1 %v27299_v42  ;;  %24533 = vmatprep.subr.bf16.mxu0 %v27391_v18  ;;  %v11015_v42 = vld [vmem:[#allocation15 + $0x8] sm:$0xff] }
0x17f2   :  { %24629 = vmatprep.subr.bf16.mxu1 %v27404_v51  ;;  %v11539_v55 = vand.u32 4294901760, %v11015_v42  ;;  %v27602_v27 = vpack.c.bf16 %v11640_v20, %v11633_v25 }
0x17f3   :  { %24535 = vmatpush3.bf16.msra.mxu0 %v27391_v18  ;;  %v27516_v18 = vpack.c.bf16 %v11128_v57, %v11121_v48 }
0x17f4   :  { %24631 = vmatpush3.bf16.msra.mxu1 %v27404_v51  ;;  %24632 = vmatprep.subr.bf16.mxu0 %v28913_v0  ;;  %v27532_v9 = vsub.f32 %v11015_v42, %v11539_v55  ;;  %v27540_v51 = vpack.c.bf16 %v27474_v45, %v27472_v16  ;;  %v27588_v54 = vpack.c.bf16 %v11539_v55, %v11536_v46 }
0x17f5   :  { %24638 = vmatprep.subr.bf16.mxu1 %v28913_v0 }
0x17f6   :  { %22560 = vmatmul.mubr.f32.vlgmr.msra.gmra.mrb[96].mxu0 %v27337_v32  ;;  %v11624_v52 = vand.u32 4294901760, %v27532_v9  ;;  %v27612_v28 = vpack.c.bf16 %v27532_v9, %v27530_v31 }
0x17f7   :  { %22692 = vmatmul.mubr.f32.vlgmr.msra.gmra.mrb[96].mxu1 %v27337_v32  ;;  %24634 = vmatpush3.bf16.msra.mxu0 %v27502_v59  ;;  %v27526_v32 = vpack.c.bf16 %v27457_v35, %v27455_v23  ;;  %v20175_v23 = vld [vmem:[%s28903_s11] ss:$0 sm:$0xff]  ;;  %v20176_v35 = vld [vmem:[%s28903_s11 + $0x1] ss:$0 sm:$0xff] }
0x17f8   :  { %24640 = vmatpush3.bf16.msra.mxu1 %v27506_v62  ;;  %24635 = vmatprep.subr.bf16.mxu0 %v28913_v0  ;;  %v11625_v5 = vsub.f32 %v27532_v9, %v11624_v52  ;;  %v27632_v47 = vpack.c.bf16 %v11624_v52, %v11617_v14 }
0x17f9   :  { %24641 = vmatprep.subr.bf16.mxu1 %v28913_v0  ;;  %22702 = vmatprep.mubr.msk.f32.mxu0 %vm28921_vm10, %v28915_v1 }
0x17fa   :  { %22713 = vmatprep.mubr.msk.f32.mxu1 %vm28921_vm10, %v28915_v1  ;;  %v11626_v11 = vand.u32 4294901760, %v11625_v5 }
0x17fb   :  { %24637 = vmatpush3.bf16.msra.mxu0 %v27512_v7 }
0x17fc   :  { %24643 = vmatpush3.bf16.msra.mxu1 %v27516_v18  ;;  %24644 = vmatprep.subr.bf16.mxu0 %v28913_v0  ;;  %v27592_v56 = vpack.c.bf16 %v11626_v11, %v11619_v12 }
0x17fd   :  { %24650 = vmatprep.subr.bf16.mxu1 %v28913_v0 }
0x17fe   :  { %22703 = vmatmul.mubr.f32.vlgmr.msra.gmra.mrb[98].mxu0 %v28915_v1 }
0x17ff   :  { %22714 = vmatmul.mubr.f32.vlgmr.msra.gmra.mrb[98].mxu1 %v28915_v1  ;;  %24646 = vmatpush3.bf16.msra.mxu0 %v27526_v32 }
0x1800   :  { %24652 = vmatpush3.bf16.msra.mxu1 %v27502_v59  ;;  %24647 = vmatprep.subr.bf16.mxu0 %v28913_v0 }
0x1801   :  { %24653 = vmatprep.subr.bf16.mxu1 %v28913_v0  ;;  %22724 = vmatprep.mubr.msk.f32.mxu0 %vm28921_vm10, %v28915_v1 }
0x1802   :  { %22735 = vmatprep.mubr.msk.f32.mxu1 %vm28921_vm10, %v28915_v1 }
0x1803   :  { %24649 = vmatpush3.bf16.msra.mxu0 %v27540_v51 }
0x1804   :  { %24655 = vmatpush3.bf16.msra.mxu1 %v27512_v7  ;;  %24656 = vmatprep.subr.bf16.mxu0 %v28913_v0 }
0x1805   :  { %24662 = vmatprep.subr.bf16.mxu1 %v28913_v0 }
0x1806   :  { %22725 = vmatmul.mubr.f32.vlgmr.msra.gmra.mrb[100].mxu0 %v28915_v1 }
0x1807   :  { %24658 = vmatpush3.bf16.msra.mxu0 %v27560_v30  ;;  %22736 = vmatmul.mubr.f32.vlgmr.msra.gmra.mrb[100].mxu1 %v28915_v1 }
0x1808   :  { %24664 = vmatpush3.bf16.msra.mxu1 %v27502_v59  ;;  %24659 = vmatprep.subr.bf16.mxu0 %v28913_v0 }
0x1809   :  { %24665 = vmatprep.subr.bf16.mxu1 %v28913_v0  ;;  %22746 = vmatprep.mubr.msk.f32.mxu0 %vm28921_vm10, %v28915_v1 }
0x180a   :  { %22757 = vmatprep.mubr.msk.f32.mxu1 %vm28921_vm10, %v28915_v1 }
0x180b   :  { %24661 = vmatpush3.bf16.msra.mxu0 %v27576_v33 }
0x180c   :  { %24667 = vmatpush3.bf16.msra.mxu1 %v27512_v7  ;;  %24668 = vmatprep.subr.bf16.mxu0 %v28913_v0 }
0x180d   :  { %24674 = vmatprep.subr.bf16.mxu1 %v28913_v0 }
0x180e   :  { %22747 = vmatmul.mubr.f32.vlgmr.msra.gmra.mrb[102].mxu0 %v28915_v1 }
0x180f   :  { %22758 = vmatmul.mubr.f32.vlgmr.msra.gmra.mrb[102].mxu1 %v28915_v1  ;;  %24670 = vmatpush3.bf16.msra.mxu0 %v27588_v54 }
0x1810   :  { %24676 = vmatpush3.bf16.msra.mxu1 %v27592_v56  ;;  %24671 = vmatprep.subr.bf16.mxu0 %v28913_v0 }
0x1811   :  { %24677 = vmatprep.subr.bf16.mxu1 %v28913_v0  ;;  %22768 = vmatprep.mubr.msk.f32.mxu0 %vm28921_vm10, %v28915_v1 }
0x1812   :  { %22779 = vmatprep.mubr.msk.f32.mxu1 %vm28921_vm10, %v28915_v1 }
0x1813   :  { %24673 = vmatpush3.bf16.msra.mxu0 %v27598_v22 }
0x1814   :  { %24679 = vmatpush3.bf16.msra.mxu1 %v27602_v27  ;;  %24680 = vmatprep.subr.bf16.mxu0 %v28913_v0 }
0x1815   :  { %24686 = vmatprep.subr.bf16.mxu1 %v28913_v0 }
0x1816   :  { %22769 = vmatmul.mubr.f32.vlgmr.msra.gmra.mrb[104].mxu0 %v28915_v1 }
0x1817   :  { %22780 = vmatmul.mubr.f32.vlgmr.msra.gmra.mrb[104].mxu1 %v28915_v1  ;;  %24682 = vmatpush3.bf16.msra.mxu0 %v27612_v28 }
0x1818   :  { %24688 = vmatpush3.bf16.msra.mxu1 %v27588_v54  ;;  %24683 = vmatprep.subr.bf16.mxu0 %v28913_v0 }
0x1819   :  { %24689 = vmatprep.subr.bf16.mxu1 %v28913_v0  ;;  %22790 = vmatprep.mubr.msk.f32.mxu0 %vm28921_vm10, %v28915_v1 }
0x181a   :  { %22801 = vmatprep.mubr.msk.f32.mxu1 %vm28921_vm10, %v28915_v1 }
0x181b   :  { %24685 = vmatpush3.bf16.msra.mxu0 %v27622_v6 }
0x181c   :  { %24691 = vmatpush3.bf16.msra.mxu1 %v27598_v22  ;;  %24692 = vmatprep.subr.bf16.mxu0 %v28913_v0 }
0x181d   :  { %24698 = vmatprep.subr.bf16.mxu1 %v28913_v0 }
0x181e   :  { %22791 = vmatmul.mubr.f32.vlgmr.msra.gmra.mrb[106].mxu0 %v28915_v1 }
0x181f   :  { %24694 = vmatpush3.bf16.msra.mxu0 %v27632_v47  ;;  %22802 = vmatmul.mubr.f32.vlgmr.msra.gmra.mrb[106].mxu1 %v28915_v1 }
0x1820   :  { %24700 = vmatpush3.bf16.msra.mxu1 %v27588_v54  ;;  %24695 = vmatprep.subr.bf16.mxu0 %v28913_v0 }
0x1821   :  { %24701 = vmatprep.subr.bf16.mxu1 %v28913_v0  ;;  %22812 = vmatprep.mubr.msk.f32.mxu0 %vm28921_vm10, %v28915_v1 }
0x1822   :  { %22823 = vmatprep.mubr.msk.f32.mxu1 %vm28921_vm10, %v28915_v1 }
0x1823   :  { %24697 = vmatpush3.bf16.msra.mxu0 %v27640_v63 }
0x1824   :  { %24703 = vmatpush3.bf16.msra.mxu1 %v27598_v22  ;;  %24704 = vmatprep.subr.bf16.mxu0 %v28913_v0 }
0x1825   :  { %24710 = vmatprep.subr.bf16.mxu1 %v28913_v0 }
0x1826   :  { %22813 = vmatmul.mubr.f32.vlgmr.msra.gmra.mrb[108].mxu0 %v28915_v1 }
0x1827   :  { %22824 = vmatmul.mubr.f32.vlgmr.msra.gmra.mrb[108].mxu1 %v28915_v1  ;;  %24706 = vmatpush3.bf16.msra.mxu0 %v27502_v59 }
0x1828   :  { %24712 = vmatpush3.bf16.msra.mxu1 %v27506_v62  ;;  %22845 = vmatprep.mubr.msk.f32.mxu1 %vm28921_vm10, %v28915_v1 }
0x1829   :  { %24713 = vmatprep.subr.bf16.mxu1 %v28913_v0  ;;  %24707 = vmatprep.subr.bf16.mxu0 %v28913_v0 }
0x182a   :  { %22834 = vmatprep.mubr.msk.f32.mxu0 %vm28921_vm10, %v28915_v1 }
0x182b   :  { %24709 = vmatpush3.bf16.msra.mxu0 %v27512_v7 }
0x182c   :  { %24715 = vmatpush3.bf16.msra.mxu1 %v27516_v18  ;;  %24716 = vmatprep.subr.bf16.mxu0 %v28913_v0 }
0x182d   :  { %24722 = vmatprep.subr.bf16.mxu1 %v28913_v0 }
0x18c9   :  { %v22561_v37 = vpop.f32.mrb[96].mxu0 }
0x18ca   :  { %v9834_v29 = vadd.f32 %v22561_v37, %v20175_v23  ;;  %v22693_v36 = vpop.f32.mrb[96].mxu1  ;;  %v9818_v19 = vpop.f32.mrb[97].mxu0 }
0x18cb   :  { %v10905_v26 = vadd.f32 %v22693_v36, %v20176_v35  ;;  %v9833_v39 = vadd.f32 %v20175_v23, %v9818_v19  ;;  %v10889_v16 = vpop.f32.mrb[97].mxu1 }
0x18cc   :  { %v10925_v45 = vcombine.high %v9834_v29, %v9834_v29  ;;  %v10932_v61 = vrot.slane %v9834_v29, %v27239_v8  ;;  %20179 = vst.sshfl [vmem:[#allocation4 + $0x8] sm:$0x3 pattern:$0x76325410] %v9834_v29  ;;  %v10904_v21 = vadd.f32 %v20176_v35, %v10889_v16 }
0x18cd   :  { %v10977_v58 = vcombine.high %v10905_v26, %v10905_v26  ;;  %v10984_v15 = vrot.slane %v10905_v26, %v27239_v8  ;;  %20183 = vst.sshfl [vmem:[#allocation5 + $0x8] sm:$0x3 pattern:$0x76325410] %v10905_v26  ;;  %v10908_v50 = vcombine.high %v9833_v39, %v9833_v39  ;;  %v10915_v2 = vrot.slane %v9833_v39, %v27239_v8 }
0x18ce   :  { %20177 = vst.sshfl [vmem:[#allocation4] sm:$0x3 pattern:$0x76325410] %v9833_v39  ;;  %v10939_v60 = vrot.slane %v10925_v45, %v27239_v8  ;;  %v10940_v43 = vcombine.high %v10932_v61, %v10932_v61  ;;  %v10960_v48 = vcombine.high %v10904_v21, %v10904_v21  ;;  %v10967_v57 = vrot.slane %v10904_v21, %v27239_v8 }
0x18cf   :  { %20180 = vst.sshfl [vmem:[#allocation4 + $0xc] sm:$0x3 pattern:$0x76325410] %v10925_v45  ;;  %v10991_v13 = vrot.slane %v10977_v58, %v27239_v8  ;;  %v10992_v42 = vcombine.high %v10984_v15, %v10984_v15  ;;  %v10922_v46 = vrot.slane %v10908_v50, %v27239_v8  ;;  %v10923_v55 = vcombine.high %v10915_v2, %v10915_v2 }
0x18d0   :  { %20181 = vst.sshfl [vmem:[#allocation5] sm:$0x3 pattern:$0x76325410] %v10904_v21  ;;  %v10941_v53 = vcombine.high %v10939_v60, %v10939_v60  ;;  %10955 = vst [vmem:[#allocation4 + $0xa] sm:$0x3] %v10940_v43  ;;  %v10974_v24 = vrot.slane %v10960_v48, %v27239_v8  ;;  %v10975_v31 = vcombine.high %v10967_v57, %v10967_v57 }
0x18d1   :  { %20184 = vst.sshfl [vmem:[#allocation5 + $0xc] sm:$0x3 pattern:$0x76325410] %v10977_v58  ;;  %v10993_v9 = vcombine.high %v10991_v13, %v10991_v13  ;;  %11007 = vst [vmem:[#allocation5 + $0xa] sm:$0x3] %v10992_v42  ;;  %v10924_v10 = vcombine.high %v10922_v46, %v10922_v46 }
0x18d2   :  { %20178 = vst.sshfl [vmem:[#allocation4 + $0x4] sm:$0x3 pattern:$0x76325410] %v10908_v50  ;;  %10951 = vst [vmem:[#allocation4 + $0x2] sm:$0x3] %v10923_v55  ;;  %v10976_v14 = vcombine.high %v10974_v24, %v10974_v24 }
0x18d3   :  { %20182 = vst.sshfl [vmem:[#allocation5 + $0x4] sm:$0x3 pattern:$0x76325410] %v10960_v48  ;;  %v11098_v34 = vpop.f32.mrb[98].mxu0  ;;  %v11189_v3 = vpop.f32.mrb[98].mxu1 }
0x18d4   :  { %10957 = vst [vmem:[#allocation4 + $0xe] sm:$0x3] %v10941_v53  ;;  %11003 = vst [vmem:[#allocation5 + $0x2] sm:$0x3] %v10975_v31  ;;  %v22704_v52 = vpop.f32.mrb[99].mxu0  ;;  %v11190_v40 = vadd.f32 %v11189_v3, %v11098_v34  ;;  %v22715_v17 = vpop.f32.mrb[99].mxu1 }
0x18d5   :  { %11009 = vst [vmem:[#allocation5 + $0xe] sm:$0x3] %v10993_v9  ;;  %10953 = vst [vmem:[#allocation4 + $0x6] sm:$0x3] %v10924_v10  ;;  %v11022_v37 = vld [vmem:[#allocation4] sm:$0x3] }
0x18d6   :  { %11005 = vst [vmem:[#allocation5 + $0x6] sm:$0x3] %v10976_v14  ;;  %v11018_v34 = vld [vmem:[%s28894_s2] sm:$0x3] }
0x18d7   :  { %vm11019_vm13 = vcmp.gt.f32.partialorder %v11018_v34, 0.5 }
0x18d8   :  { %v12045_v17 = vsel %vm11019_vm13, 1, %v25836_v4 }
0x18d9   :  { %v11269_v5 = vpop.f32.mrb[100].mxu0 }
0x18da   :  { %v11270_v38 = vadd.f32 %v11269_v5, %v11190_v40  ;;  %v22726_v8 = vpop.f32.mrb[101].mxu0  ;;  %v11346_v41 = vpop.f32.mrb[100].mxu1  ;;  %v20185_v40 = vld [vmem:[%s28894_s2 + $0xe] sm:$0x3] }
0x18db   :  { %v22737_v12 = vpop.f32.mrb[101].mxu1  ;;  %vm11021_vm14 = vcmp.gt.f32.partialorder %v20185_v40, 0.5 }
0x18dc   :  { %v11347_v11 = vadd.f32 %v11346_v41, %v11270_v38  ;;  %v11534_v46 = vld [vmem:[#allocation5 + $0xe] sm:$0x3]  ;;  %v12056_v38 = vsel %vm11021_vm14, 1, %v25836_v4 }
0x18e1   :  { %v11429_v49 = vpop.f32.mrb[102].mxu0 }
0x18e2   :  { %v11430_v44 = vadd.f32 %v11429_v49, %v11347_v11  ;;  %v22748_v25 = vpop.f32.mrb[103].mxu0  ;;  %v11504_v20 = vpop.f32.mrb[102].mxu1 }
0x18e3   :  { %v22759_v23 = vpop.f32.mrb[103].mxu1 }
0x18e4   :  { %v11505_v35 = vadd.f32 %v11504_v20, %v11430_v44 }
0x18e6   :  { %v11508_v29 = vadd.f32 %v11505_v35, %v11022_v37 }
0x18e8   :  { %25483 = vtanh.f32 %v11508_v29  ;;  %v20186_v24 = vmul.f32 -1.442695, %v11508_v29 }
0x18e9   :  { %v11610_v36 = vpop.f32.mrb[104].mxu0 }
0x18ea   :  { %v22770_v19 = vpop.f32.mrb[105].mxu0  ;;  %v11701_v26 = vpop.f32.mrb[104].mxu1 }
0x18eb   :  { %v11702_v39 = vadd.f32 %v11701_v26, %v11610_v36  ;;  %v22781_v16 = vpop.f32.mrb[105].mxu1 }
0x18f1   :  { %v11781_v45 = vpop.f32.mrb[106].mxu0 }
0x18f2   :  { %v25484_v61 = vpop.eup %25483  ;;  %v11782_v21 = vadd.f32 %v11781_v45, %v11702_v39  ;;  %v22792_v58 = vpop.f32.mrb[107].mxu0 }
0x18f3   :  { %v11858_v15 = vpop.f32.mrb[106].mxu1  ;;  %11518 = vrot.lane.b32.xlu1 %v25484_v61, %s25837_s20 }
0x18f4   :  { %v22803_v50 = vpop.f32.mrb[107].mxu1  ;;  %v11859_v2 = vadd.f32 %v11858_v15, %v11782_v21 }
0x18f9   :  { %v11941_v60 = vpop.f32.mrb[108].mxu0 }
0x18fa   :  { %v11942_v43 = vadd.f32 %v11941_v60, %v11859_v2  ;;  %v22814_v48 = vpop.f32.mrb[109].mxu0  ;;  %v12016_v57 = vpop.f32.mrb[108].mxu1 }
0x18fb   :  { %v22825_v13 = vpop.f32.mrb[109].mxu1 }
0x18fc   :  { %v12017_v42 = vadd.f32 %v12016_v57, %v11942_v43 }
0x18fe   :  { %v12020_v55 = vadd.f32 %v12017_v42, %v11534_v46 }
0x1900   :  { %25485 = vtanh.f32 %v12020_v55  ;;  %v20187_v10 = vmul.f32 -1.442695, %v12020_v55 }
0x1901   :  { %25487 = vpow2.f32 %v20186_v24 }
0x190a   :  { %v25486_v53 = vpop.eup %25485 }
0x190b   :  { %12030 = vrot.lane.b32.xlu0 %v25486_v53, %s25837_s20  ;;  %v25488_v31 = vpop.eup %25487 }
0x190c   :  { %v11512_v9 = vadd.f32 1.0, %v25488_v31 }
0x190e   :  { %25489 = vrcp.f32 %v11512_v9 }
0x190f   :  { %25491 = vpow2.f32 %v20187_v10 }
0x1918   :  { %v25490_v14 = vpop.eup %25489 }
0x1919   :  { %v25492_v5 = vpop.eup %25491  ;;  %v11516_v49 = vmul.f32 0.0, %v25490_v14 }
0x191a   :  { %v12024_v8 = vadd.f32 1.0, %v25492_v5 }
0x191c   :  { %25493 = vrcp.f32 %v12024_v8 }
0x1926   :  { %v25494_v41 = vpop.eup %25493 }
0x1927   :  { %v12028_v23 = vmul.f32 0.0, %v25494_v41 }
0x1965   :  { %v11519_v52 = vpop.permute.xlu1 %11518 }
0x1966   :  { %v11521_v3 = vmul.f32 %v25490_v14, %v11519_v52 }
0x1968   :  { %11523 = vrot.lane.b32.xlu1 %v11521_v3, %s25828_s8 }
0x196c   :  { %12047 = vperm.xlu1 %25354, %v12045_v17  }
0x1970   :  { %12058 = vperm.xlu1 %25354, %v12056_v38  }
0x197d   :  { %v12031_v12 = vpop.permute.xlu0 %12030 }
0x197e   :  { %v12033_v11 = vmul.f32 %v25494_v41, %v12031_v12 }
0x1980   :  { %12035 = vrot.lane.b32.xlu0 %v12033_v11, %s25828_s8 }
0x19da   :  { %v11524_v44 = vpop.permute.xlu1 %11523 }
0x19db   :  { %v27693_v25 = vadd.f32 %v11524_v44, %v11516_v49 }
0x19dd   :  { %25495 = vtanh.f32 %v27693_v25 }
0x19e7   :  { %v25496_v20 = vpop.eup %25495 }
0x19e8   :  { %11529 = vrot.lane.b32.xlu0 %v25496_v20, %s25837_s20 }
0x19eb   :  { %v27701_v36 = vpop.permute.xlu1 %12047 }
0x19ec   :  { %vm12049_vm2 = vcmp.eq.s32.totalorder %v27701_v36, 1 }
0x19ef   :  { %v27710_v16 = vpop.permute.xlu1 %12058 }
0x19f0   :  { %vm12060_vm3 = vcmp.eq.s32.totalorder %v27710_v16, 1 }
0x19f2   :  { %v12036_v35 = vpop.permute.xlu0 %12035 }
0x19f3   :  { %v27697_v37 = vadd.f32 %v12036_v35, %v12028_v23  ;;  %v12075_v35 = vld [vmem:[#allocation4 + $0x2] sm:$0x3] }
0x19f5   :  { %25497 = vtanh.f32 %v27697_v37 }
0x19ff   :  { %v25498_v29 = vpop.eup %25497 }
0x1a00   :  { %12041 = vrot.lane.b32.xlu0 %v25498_v29, %s25837_s20 }
0x1a5a   :  { %v11530_v19 = vpop.permute.xlu0 %11529 }
0x1a5b   :  { %v11532_v26 = vmul.f32 %v25490_v14, %v11530_v19 }
0x1a5d   :  { %v27706_v39 = vsel %vm12049_vm2, %v11532_v26, 0.0 }
0x1a5e   :  { %12052 = vrot.lane.b32.xlu1 %v27706_v39, %s25828_s8 }
0x1a72   :  { %v12042_v45 = vpop.permute.xlu0 %12041 }
0x1a73   :  { %v12044_v61 = vmul.f32 %v25494_v41, %v12042_v45 }
0x1a75   :  { %v27715_v21 = vsel %vm12060_vm3, %v12044_v61, 0.0 }
0x1a76   :  { %12063 = vrot.lane.b32.xlu0 %v27715_v21, %s25828_s8 }
0x1ad0   :  { %v12053_v58 = vpop.permute.xlu1 %12052 }
0x1ad1   :  { %12055 = vst.msk [vmem:[#allocation17] sm:$0x3] %vm1184_vm6, %v12053_v58  ;;  %v12076_v15 = vsel %vm28917_vm5, %v12053_v58, 0 }
0x1ad2   :  { %v12147_v50 = vand.u32 4294901760, %v12076_v15 }
0x1ad4   :  { %v12148_v2 = vsub.f32 %v12076_v15, %v12147_v50  ;;  %22846 = vmatmul.mubr.f32.vlgmr.msra.gmra.mrb[110].mxu1 %v12147_v50 }
0x1ad5   :  { %24724 = vmatpush3.bf16.msra.mxu1 %v27502_v59  ;;  %22867 = vmatprep.mubr.msk.f32.mxu1 %vm28921_vm10, %v28915_v1 }
0x1ad6   :  { %v12149_v60 = vand.u32 4294901760, %v12148_v2  ;;  %24725 = vmatprep.subr.bf16.mxu1 %v28913_v0 }
0x1ad8   :  { %v12150_v43 = vsub.f32 %v12148_v2, %v12149_v60 }
0x1ad9   :  { %24727 = vmatpush3.bf16.msra.mxu1 %v27512_v7 }
0x1ada   :  { %24734 = vmatprep.subr.bf16.mxu1 %v28913_v0  ;;  %v12151_v48 = vand.u32 4294901760, %v12150_v43 }
0x1adc   :  { %22868 = vmatmul.mubr.f32.vlgmr.msra.gmra.mrb[112].mxu1 %v12149_v60  ;;  %22835 = vmatmul.mubr.f32.vlgmr.msra.gmra.mrb[110].mxu0 %v12151_v48 }
0x1add   :  { %24718 = vmatpush3.bf16.msra.mxu0 %v27526_v32  ;;  %24736 = vmatpush3.bf16.msra.mxu1 %v27502_v59 }
0x1ade   :  { %24719 = vmatprep.subr.bf16.mxu0 %v28913_v0  ;;  %24737 = vmatprep.subr.bf16.mxu1 %v28913_v0 }
0x1adf   :  { %22856 = vmatprep.mubr.msk.f32.mxu0 %vm28921_vm10, %v28915_v1  ;;  %22889 = vmatprep.mubr.msk.f32.mxu1 %vm28921_vm10, %v28915_v1 }
0x1ae1   :  { %24721 = vmatpush3.bf16.msra.mxu0 %v27540_v51  ;;  %24739 = vmatpush3.bf16.msra.mxu1 %v27512_v7 }
0x1ae2   :  { %24728 = vmatprep.subr.bf16.mxu0 %v28913_v0  ;;  %24746 = vmatprep.subr.bf16.mxu1 %v28913_v0 }
0x1ae4   :  { %22857 = vmatmul.mubr.f32.vlgmr.msra.gmra.mrb[112].mxu0 %v12148_v2  ;;  %22890 = vmatmul.mubr.f32.vlgmr.msra.gmra.mrb[114].mxu1 %v12147_v50 }
0x1ae5   :  { %24730 = vmatpush3.bf16.msra.mxu0 %v27560_v30  ;;  %24748 = vmatpush3.bf16.msra.mxu1 %v27592_v56 }
0x1ae6   :  { %24731 = vmatprep.subr.bf16.mxu0 %v28913_v0  ;;  %24749 = vmatprep.subr.bf16.mxu1 %v28913_v0 }
0x1ae7   :  { %22878 = vmatprep.mubr.msk.f32.mxu0 %vm28921_vm10, %v28915_v1  ;;  %22911 = vmatprep.mubr.msk.f32.mxu1 %vm28921_vm10, %v28915_v1 }
0x1ae8   :  { %v12064_v57 = vpop.permute.xlu0 %12063 }
0x1ae9   :  { %24733 = vmatpush3.bf16.msra.mxu0 %v27576_v33  ;;  %24751 = vmatpush3.bf16.msra.mxu1 %v27602_v27  ;;  %12067 = vst.msk [vmem:[#allocation18 + $0xe] sm:$0x3] %vm1184_vm6, %v12064_v57  ;;  %v12590_v13 = vsel %vm28917_vm5, %v12064_v57, 0 }
0x1aea   :  { %v12661_v42 = vand.u32 4294901760, %v12590_v13  ;;  %24740 = vmatprep.subr.bf16.mxu0 %v28913_v0  ;;  %24758 = vmatprep.subr.bf16.mxu1 %v28913_v0 }
0x1aec   :  { %v12662_v46 = vsub.f32 %v12590_v13, %v12661_v42  ;;  %22879 = vmatmul.mubr.f32.vlgmr.msra.gmra.mrb[114].mxu0 %v12147_v50  ;;  %22912 = vmatmul.mubr.f32.vlgmr.msra.gmra.mrb[116].mxu1 %v12661_v42 }
0x1aed   :  { %24742 = vmatpush3.bf16.msra.mxu0 %v27588_v54  ;;  %24760 = vmatpush3.bf16.msra.mxu1 %v27588_v54 }
0x1aee   :  { %v12663_v55 = vand.u32 4294901760, %v12662_v46  ;;  %24743 = vmatprep.subr.bf16.mxu0 %v28913_v0  ;;  %24761 = vmatprep.subr.bf16.mxu1 %v28913_v0 }
0x1aef   :  { %22933 = vmatprep.mubr.msk.f32.mxu1 %vm28921_vm10, %v28915_v1  ;;  %22900 = vmatprep.mubr.msk.f32.mxu0 %vm28921_vm10, %v28915_v1 }
0x1af0   :  { %v12664_v53 = vsub.f32 %v12662_v46, %v12663_v55 }
0x1af1   :  { %24745 = vmatpush3.bf16.msra.mxu0 %v27598_v22  ;;  %24763 = vmatpush3.bf16.msra.mxu1 %v27598_v22 }
0x1af2   :  { %24752 = vmatprep.subr.bf16.mxu0 %v28913_v0  ;;  %24770 = vmatprep.subr.bf16.mxu1 %v28913_v0  ;;  %v12665_v24 = vand.u32 4294901760, %v12664_v53  ;;  %v12589_v53 = vld [vmem:[#allocation5 + $0xc] sm:$0x3] }
0x1af4   :  { %22934 = vmatmul.mubr.f32.vlgmr.msra.gmra.mrb[118].mxu1 %v12663_v55  ;;  %22901 = vmatmul.mubr.f32.vlgmr.msra.gmra.mrb[116].mxu0 %v12665_v24 }
0x1af5   :  { %24754 = vmatpush3.bf16.msra.mxu0 %v27612_v28  ;;  %24772 = vmatpush3.bf16.msra.mxu1 %v27588_v54 }
0x1af6   :  { %24755 = vmatprep.subr.bf16.mxu0 %v28913_v0  ;;  %24773 = vmatprep.subr.bf16.mxu1 %v28913_v0 }
0x1af7   :  { %22922 = vmatprep.mubr.msk.f32.mxu0 %vm28921_vm10, %v28915_v1  ;;  %22955 = vmatprep.mubr.msk.f32.mxu1 %vm28921_vm10, %v28915_v1 }
0x1af9   :  { %24757 = vmatpush3.bf16.msra.mxu0 %v27622_v6  ;;  %24775 = vmatpush3.bf16.msra.mxu1 %v27598_v22 }
0x1afa   :  { %24764 = vmatprep.subr.bf16.mxu0 %v28913_v0  ;;  %24782 = vmatprep.subr.bf16.mxu1 %v28913_v0 }
0x1afc   :  { %22923 = vmatmul.mubr.f32.vlgmr.msra.gmra.mrb[118].mxu0 %v12662_v46  ;;  %22956 = vmatmul.mubr.f32.vlgmr.msra.gmra.mrb[120].mxu1 %v12661_v42 }
0x1afd   :  { %24766 = vmatpush3.bf16.msra.mxu0 %v27632_v47  ;;  %22944 = vmatprep.mubr.msk.f32.mxu0 %vm28921_vm10, %v28915_v1 }
0x1afe   :  { %24767 = vmatprep.subr.bf16.mxu0 %v28913_v0  ;;  %24784 = vmatpush3.bf16.msra.mxu1 %v27506_v62 }
0x1aff   :  { %24785 = vmatprep.subr.bf16.mxu1 %v28913_v0  ;;  %22977 = vmatprep.mubr.msk.f32.mxu1 %vm28921_vm10, %v28915_v1 }
0x1b01   :  { %24769 = vmatpush3.bf16.msra.mxu0 %v27640_v63 }
0x1b02   :  { %24787 = vmatpush3.bf16.msra.mxu1 %v27516_v18  ;;  %24776 = vmatprep.subr.bf16.mxu0 %v28913_v0 }
0x1b03   :  { %24794 = vmatprep.subr.bf16.mxu1 %v28913_v0 }
0x1b04   :  { %22945 = vmatmul.mubr.f32.vlgmr.msra.gmra.mrb[120].mxu0 %v12661_v42 }
0x1b05   :  { %24778 = vmatpush3.bf16.msra.mxu0 %v27502_v59  ;;  %22966 = vmatprep.mubr.msk.f32.mxu0 %vm28921_vm10, %v28915_v1 }
0x1b06   :  { %24779 = vmatprep.subr.bf16.mxu0 %v28913_v0 }
0x1b09   :  { %24781 = vmatpush3.bf16.msra.mxu0 %v27512_v7 }
0x1b0a   :  { %24788 = vmatprep.subr.bf16.mxu0 %v28913_v0 }
0x1ba7   :  { %v12244_v31 = vpop.f32.mrb[110].mxu1 }
0x1ba8   :  { %v22847_v9 = vpop.f32.mrb[111].mxu1 }
0x1baf   :  { %v12401_v10 = vpop.f32.mrb[112].mxu1  ;;  %v12153_v34 = vpop.f32.mrb[110].mxu0 }
0x1bb0   :  { %v12245_v14 = vadd.f32 %v12244_v31, %v12153_v34  ;;  %v22869_v52 = vpop.f32.mrb[113].mxu1  ;;  %v22836_v3 = vpop.f32.mrb[111].mxu0 }
0x1bb1   :  { %v20188_v52 = vld [vmem:[%s28894_s2 + $0x2] sm:$0x3] }
0x1bb2   :  { %vm12071_vm8 = vcmp.gt.f32.partialorder %v20188_v52, 0.5 }
0x1bb7   :  { %v12324_v40 = vpop.f32.mrb[112].mxu0  ;;  %v12559_v17 = vpop.f32.mrb[114].mxu1 }
0x1bb8   :  { %v12325_v5 = vadd.f32 %v12324_v40, %v12245_v14  ;;  %v22858_v38 = vpop.f32.mrb[113].mxu0  ;;  %v22891_v8 = vpop.f32.mrb[115].mxu1 }
0x1bb9   :  { %v13102_v38 = vsel %vm12071_vm8, 1, %v25836_v4 }
0x1bba   :  { %v12402_v41 = vadd.f32 %v12401_v10, %v12325_v5  ;;  %v20189_v5 = vld [vmem:[%s28894_s2 + $0xc] sm:$0x3] }
0x1bbb   :  { %vm12073_vm11 = vcmp.gt.f32.partialorder %v20189_v5, 0.5 }
0x1bbf   :  { %v12484_v12 = vpop.f32.mrb[114].mxu0  ;;  %v12758_v11 = vpop.f32.mrb[116].mxu1 }
0x1bc0   :  { %v12485_v49 = vadd.f32 %v12484_v12, %v12402_v41  ;;  %v22880_v44 = vpop.f32.mrb[115].mxu0  ;;  %v22913_v20 = vpop.f32.mrb[117].mxu1  ;;  %v13114_v41 = vsel %vm12073_vm11, 1, %v25836_v4 }
0x1bc1   :  { %v27810_v20 = vsel %vm12049_vm2, %v27693_v25, 0.0 }
0x1bc2   :  { %v12560_v23 = vadd.f32 %v12559_v17, %v12485_v49 }
0x1bc4   :  { %v12563_v29 = vadd.f32 %v12560_v23, %v12075_v35 }
0x1bc6   :  { %25499 = vtanh.f32 %v12563_v29  ;;  %v20190_v9 = vmul.f32 -1.442695, %v12563_v29 }
0x1bc7   :  { %v12915_v19 = vpop.f32.mrb[118].mxu1  ;;  %v12667_v26 = vpop.f32.mrb[116].mxu0 }
0x1bc8   :  { %v12759_v45 = vadd.f32 %v12758_v11, %v12667_v26  ;;  %v22935_v61 = vpop.f32.mrb[119].mxu1  ;;  %v22902_v58 = vpop.f32.mrb[117].mxu0  ;;  %v27820_v26 = vsel %vm12060_vm3, %v27697_v37, 0.0 }
0x1bcf   :  { %v12838_v15 = vpop.f32.mrb[118].mxu0  ;;  %v13073_v50 = vpop.f32.mrb[120].mxu1 }
0x1bd0   :  { %v25500_v2 = vpop.eup %25499  ;;  %v12839_v60 = vadd.f32 %v12838_v15, %v12759_v45  ;;  %v22924_v43 = vpop.f32.mrb[119].mxu0 }
0x1bd1   :  { %v22957_v48 = vpop.f32.mrb[121].mxu1  ;;  %12573 = vrot.lane.b32.xlu1 %v25500_v2, %s25837_s20 }
0x1bd2   :  { %v12916_v57 = vadd.f32 %v12915_v19, %v12839_v60 }
0x1bd7   :  { %v12998_v13 = vpop.f32.mrb[120].mxu0 }
0x1bd8   :  { %v12999_v42 = vadd.f32 %v12998_v13, %v12916_v57  ;;  %v22946_v46 = vpop.f32.mrb[121].mxu0 }
0x1bda   :  { %v13074_v55 = vadd.f32 %v13073_v50, %v12999_v42 }
0x1bdc   :  { %v13077_v24 = vadd.f32 %v13074_v55, %v12589_v53 }
0x1bde   :  { %25501 = vtanh.f32 %v13077_v24  ;;  %v20191_v14 = vmul.f32 -1.442695, %v13077_v24 }
0x1bdf   :  { %25503 = vpow2.f32 %v20190_v9 }
0x1be8   :  { %v25502_v31 = vpop.eup %25501 }
0x1be9   :  { %13087 = vrot.lane.b32.xlu0 %v25502_v31, %s25837_s20  ;;  %v25504_v10 = vpop.eup %25503 }
0x1bea   :  { %v12567_v34 = vadd.f32 1.0, %v25504_v10 }
0x1bec   :  { %25505 = vrcp.f32 %v12567_v34 }
0x1bed   :  { %25507 = vpow2.f32 %v20191_v14 }
0x1bf6   :  { %v25506_v3 = vpop.eup %25505 }
0x1bf7   :  { %v25508_v8 = vpop.eup %25507  ;;  %v12571_v23 = vmul.f32 %v25506_v3, %v27810_v20 }
0x1bf8   :  { %v13081_v12 = vadd.f32 1.0, %v25508_v8 }
0x1bfa   :  { %25509 = vrcp.f32 %v13081_v12 }
0x1c04   :  { %v25510_v11 = vpop.eup %25509 }
0x1c05   :  { %v13085_v45 = vmul.f32 %v25510_v11, %v27820_v26 }
0x1c43   :  { %v12574_v40 = vpop.permute.xlu1 %12573 }
0x1c44   :  { %v12576_v17 = vmul.f32 %v25506_v3, %v12574_v40 }
0x1c46   :  { %12578 = vrot.lane.b32.xlu1 %v12576_v17, %s25828_s8 }
0x1c4a   :  { %13104 = vperm.xlu1 %25354, %v13102_v38  }
0x1c4e   :  { %13116 = vperm.xlu1 %25354, %v13114_v41  }
0x1c5b   :  { %v13088_v49 = vpop.permute.xlu0 %13087 }
0x1c5c   :  { %v13090_v44 = vmul.f32 %v25510_v11, %v13088_v49 }
0x1c5e   :  { %13092 = vrot.lane.b32.xlu0 %v13090_v44, %s25828_s8 }
0x1cb8   :  { %v12579_v35 = vpop.permute.xlu1 %12578 }
0x1cb9   :  { %v27813_v29 = vadd.f32 %v12579_v35, %v12571_v23 }
0x1cbb   :  { %25511 = vtanh.f32 %v27813_v29 }
0x1cc5   :  { %v25512_v19 = vpop.eup %25511 }
0x1cc6   :  { %12584 = vrot.lane.b32.xlu0 %v25512_v19, %s25837_s20 }
0x1cc9   :  { %v27827_v58 = vpop.permute.xlu1 %13104 }
0x1cca   :  { %vm13106_vm1 = vcmp.eq.s32.totalorder %v27827_v58, 1 }
0x1ccd   :  { %v27840_v16 = vpop.permute.xlu1 %13116 }
0x1cce   :  { %vm13118_vm4 = vcmp.eq.s32.totalorder %v27840_v16, 1 }
0x1cd0   :  { %v13093_v36 = vpop.permute.xlu0 %13092 }
0x1cd1   :  { %v27823_v25 = vadd.f32 %v13093_v36, %v13085_v45 }
0x1cd3   :  { %25513 = vtanh.f32 %v27823_v25 }
0x1cdd   :  { %v25514_v61 = vpop.eup %25513 }
0x1cde   :  { %13098 = vrot.lane.b32.xlu0 %v25514_v61, %s25837_s20 }
0x1d38   :  { %v12585_v15 = vpop.permute.xlu0 %12584 }
0x1d39   :  { %v27829_v50 = vmul.f32 %v25506_v3, %v12585_v15  ;;  %v13135_v15 = vld [vmem:[#allocation4 + $0x4] sm:$0x3] }
0x1d3b   :  { %v27836_v37 = vsel %vm13106_vm1, %v27829_v50, %v27706_v39 }
0x1d3c   :  { %13137 = vrot.lane.b32.xlu1 %v27836_v37, %s25828_s8 }
0x1d50   :  { %v13099_v2 = vpop.permute.xlu0 %13098 }
0x1d51   :  { %v27842_v60 = vmul.f32 %v25510_v11, %v13099_v2 }
0x1d53   :  { %v27849_v43 = vsel %vm13118_vm4, %v27842_v60, %v27715_v21 }
0x1d54   :  { %13654 = vrot.lane.b32.xlu0 %v27849_v43, %s25828_s8 }
0x1dae   :  { %v13138_v39 = vpop.permute.xlu1 %13137 }
0x1daf   :  { %v13139_v48 = vsel %vm28917_vm5, %v13138_v39, 0 }
0x1db0   :  { %v13210_v57 = vand.u32 4294901760, %v13139_v48 }
0x1db2   :  { %v13211_v13 = vsub.f32 %v13139_v48, %v13210_v57  ;;  %22978 = vmatmul.mubr.f32.vlgmr.msra.gmra.mrb[122].mxu1 %v13210_v57 }
0x1db3   :  { %24796 = vmatpush3.bf16.msra.mxu1 %v27502_v59  ;;  %22999 = vmatprep.mubr.msk.f32.mxu1 %vm28921_vm10, %v28915_v1 }
0x1db4   :  { %v13212_v42 = vand.u32 4294901760, %v13211_v13  ;;  %24797 = vmatprep.subr.bf16.mxu1 %v28913_v0 }
0x1db6   :  { %v13213_v46 = vsub.f32 %v13211_v13, %v13212_v42 }
0x1db7   :  { %24799 = vmatpush3.bf16.msra.mxu1 %v27512_v7 }
0x1db8   :  { %v13214_v21 = vand.u32 4294901760, %v13213_v46  ;;  %24806 = vmatprep.subr.bf16.mxu1 %v28913_v0 }
0x1dba   :  { %23000 = vmatmul.mubr.f32.vlgmr.msra.gmra.mrb[124].mxu1 %v13212_v42  ;;  %22967 = vmatmul.mubr.f32.vlgmr.msra.gmra.mrb[122].mxu0 %v13214_v21 }
0x1dbb   :  { %24790 = vmatpush3.bf16.msra.mxu0 %v27526_v32  ;;  %24808 = vmatpush3.bf16.msra.mxu1 %v27502_v59 }
0x1dbc   :  { %24791 = vmatprep.subr.bf16.mxu0 %v28913_v0  ;;  %24809 = vmatprep.subr.bf16.mxu1 %v28913_v0 }
0x1dbd   :  { %22988 = vmatprep.mubr.msk.f32.mxu0 %vm28921_vm10, %v28915_v1  ;;  %23021 = vmatprep.mubr.msk.f32.mxu1 %vm28921_vm10, %v28915_v1 }
0x1dbf   :  { %24793 = vmatpush3.bf16.msra.mxu0 %v27540_v51  ;;  %24811 = vmatpush3.bf16.msra.mxu1 %v27512_v7 }
0x1dc0   :  { %24800 = vmatprep.subr.bf16.mxu0 %v28913_v0  ;;  %24818 = vmatprep.subr.bf16.mxu1 %v28913_v0 }
0x1dc2   :  { %22989 = vmatmul.mubr.f32.vlgmr.msra.gmra.mrb[124].mxu0 %v13211_v13  ;;  %23022 = vmatmul.mubr.f32.vlgmr.msra.gmra.mrb[126].mxu1 %v13210_v57 }
0x1dc3   :  { %24802 = vmatpush3.bf16.msra.mxu0 %v27560_v30  ;;  %24820 = vmatpush3.bf16.msra.mxu1 %v27592_v56 }
0x1dc4   :  { %24803 = vmatprep.subr.bf16.mxu0 %v28913_v0  ;;  %24821 = vmatprep.subr.bf16.mxu1 %v28913_v0 }
0x1dc5   :  { %23010 = vmatprep.mubr.msk.f32.mxu0 %vm28921_vm10, %v28915_v1  ;;  %23043 = vmatprep.mubr.msk.f32.mxu1 %vm28921_vm10, %v28915_v1 }
0x1dc6   :  { %v13655_v55 = vpop.permute.xlu0 %13654 }
0x1dc7   :  { %24805 = vmatpush3.bf16.msra.mxu0 %v27576_v33  ;;  %24823 = vmatpush3.bf16.msra.mxu1 %v27602_v27  ;;  %v13656_v53 = vsel %vm28917_vm5, %v13655_v55, 0 }
0x1dc8   :  { %v13727_v24 = vand.u32 4294901760, %v13656_v53  ;;  %24812 = vmatprep.subr.bf16.mxu0 %v28913_v0  ;;  %24830 = vmatprep.subr.bf16.mxu1 %v28913_v0 }
0x1dca   :  { %v13728_v31 = vsub.f32 %v13656_v53, %v13727_v24  ;;  %23011 = vmatmul.mubr.f32.vlgmr.msra.gmra.mrb[126].mxu0 %v13210_v57  ;;  %23044 = vmatmul.mubr.f32.vlgmr.msra.gmra.mrb[128].mxu1 %v13727_v24 }
0x1dcb   :  { %24814 = vmatpush3.bf16.msra.mxu0 %v27588_v54  ;;  %24832 = vmatpush3.bf16.msra.mxu1 %v27588_v54 }
0x1dcc   :  { %v13729_v9 = vand.u32 4294901760, %v13728_v31  ;;  %24815 = vmatprep.subr.bf16.mxu0 %v28913_v0  ;;  %24833 = vmatprep.subr.bf16.mxu1 %v28913_v0 }
0x1dcd   :  { %23065 = vmatprep.mubr.msk.f32.mxu1 %vm28921_vm10, %v28915_v1  ;;  %23032 = vmatprep.mubr.msk.f32.mxu0 %vm28921_vm10, %v28915_v1 }
0x1dce   :  { %v13730_v10 = vsub.f32 %v13728_v31, %v13729_v9 }
0x1dcf   :  { %24817 = vmatpush3.bf16.msra.mxu0 %v27598_v22  ;;  %24835 = vmatpush3.bf16.msra.mxu1 %v27598_v22 }
0x1dd0   :  { %v13731_v34 = vand.u32 4294901760, %v13730_v10  ;;  %24824 = vmatprep.subr.bf16.mxu0 %v28913_v0  ;;  %24842 = vmatprep.subr.bf16.mxu1 %v28913_v0 }
0x1dd2   :  { %23066 = vmatmul.mubr.f32.vlgmr.msra.gmra.mrb[130].mxu1 %v13729_v9  ;;  %23033 = vmatmul.mubr.f32.vlgmr.msra.gmra.mrb[128].mxu0 %v13731_v34 }
0x1dd3   :  { %24826 = vmatpush3.bf16.msra.mxu0 %v27612_v28  ;;  %24844 = vmatpush3.bf16.msra.mxu1 %v27588_v54 }
0x1dd4   :  { %24827 = vmatprep.subr.bf16.mxu0 %v28913_v0  ;;  %24845 = vmatprep.subr.bf16.mxu1 %v28913_v0 }
0x1dd5   :  { %23054 = vmatprep.mubr.msk.f32.mxu0 %vm28921_vm10, %v28915_v1  ;;  %23087 = vmatprep.mubr.msk.f32.mxu1 %vm28921_vm10, %v28915_v1 }
0x1dd7   :  { %24829 = vmatpush3.bf16.msra.mxu0 %v27622_v6  ;;  %24847 = vmatpush3.bf16.msra.mxu1 %v27598_v22 }
0x1dd8   :  { %24836 = vmatprep.subr.bf16.mxu0 %v28913_v0  ;;  %24854 = vmatprep.subr.bf16.mxu1 %v28913_v0 }
0x1dda   :  { %23055 = vmatmul.mubr.f32.vlgmr.msra.gmra.mrb[130].mxu0 %v13728_v31  ;;  %23088 = vmatmul.mubr.f32.vlgmr.msra.gmra.mrb[132].mxu1 %v13727_v24 }
0x1ddb   :  { %24838 = vmatpush3.bf16.msra.mxu0 %v27632_v47  ;;  %23076 = vmatprep.mubr.msk.f32.mxu0 %vm28921_vm10, %v28915_v1 }
0x1ddc   :  { %24839 = vmatprep.subr.bf16.mxu0 %v28913_v0  ;;  %24856 = vmatpush3.bf16.msra.mxu1 %v27506_v62 }
0x1ddd   :  { %24857 = vmatprep.subr.bf16.mxu1 %v28913_v0  ;;  %23109 = vmatprep.mubr.msk.f32.mxu1 %vm28921_vm10, %v28915_v1 }
0x1ddf   :  { %24841 = vmatpush3.bf16.msra.mxu0 %v27640_v63 }
0x1de0   :  { %24859 = vmatpush3.bf16.msra.mxu1 %v27516_v18  ;;  %24848 = vmatprep.subr.bf16.mxu0 %v28913_v0 }
0x1de1   :  { %24866 = vmatprep.subr.bf16.mxu1 %v28913_v0 }
0x1de2   :  { %23077 = vmatmul.mubr.f32.vlgmr.msra.gmra.mrb[132].mxu0 %v13727_v24 }
0x1de3   :  { %24850 = vmatpush3.bf16.msra.mxu0 %v27502_v59  ;;  %23098 = vmatprep.mubr.msk.f32.mxu0 %vm28921_vm10, %v28915_v1 }
0x1de4   :  { %24851 = vmatprep.subr.bf16.mxu0 %v28913_v0 }
0x1de7   :  { %24853 = vmatpush3.bf16.msra.mxu0 %v27512_v7 }
0x1de8   :  { %24860 = vmatprep.subr.bf16.mxu0 %v28913_v0 }
0x1e85   :  { %v13307_v14 = vpop.f32.mrb[122].mxu1 }
0x1e86   :  { %v22979_v52 = vpop.f32.mrb[123].mxu1 }
0x1e8d   :  { %v13464_v3 = vpop.f32.mrb[124].mxu1  ;;  %v13216_v40 = vpop.f32.mrb[122].mxu0 }
0x1e8e   :  { %v13308_v17 = vadd.f32 %v13307_v14, %v13216_v40  ;;  %v23001_v5 = vpop.f32.mrb[125].mxu1  ;;  %v22968_v38 = vpop.f32.mrb[123].mxu0 }
0x1e95   :  { %v13387_v8 = vpop.f32.mrb[124].mxu0  ;;  %v13622_v41 = vpop.f32.mrb[126].mxu1 }
0x1e96   :  { %v13388_v12 = vadd.f32 %v13387_v8, %v13308_v17  ;;  %v22990_v11 = vpop.f32.mrb[125].mxu0  ;;  %v23023_v49 = vpop.f32.mrb[127].mxu1 }
0x1e98   :  { %v13465_v44 = vadd.f32 %v13464_v3, %v13388_v12  ;;  %v13652_v3 = vld [vmem:[#allocation5 + $0xa] sm:$0x3]  ;;  %v20192_v12 = vld [vmem:[%s28894_s2 + $0x4] sm:$0x3] }
0x1e99   :  { %vm13131_vm15 = vcmp.gt.f32.partialorder %v20192_v12, 0.5 }
0x1e9d   :  { %v13547_v23 = vpop.f32.mrb[126].mxu0  ;;  %v13824_v35 = vpop.f32.mrb[128].mxu1 }
0x1e9e   :  { %v13548_v19 = vadd.f32 %v13547_v23, %v13465_v44  ;;  %v23012_v45 = vpop.f32.mrb[127].mxu0  ;;  %v23045_v36 = vpop.f32.mrb[129].mxu1  ;;  %v20193_v23 = vld [vmem:[%s28894_s2 + $0xa] sm:$0x3] }
0x1e9f   :  { %vm13133_vm7 = vcmp.gt.f32.partialorder %v20193_v23, 0.5 }
0x1ea0   :  { %v13623_v61 = vadd.f32 %v13622_v41, %v13548_v19  ;;  %v14180_v45 = vsel %vm13133_vm7, 1, %v25836_v4 }
0x1ea2   :  { %v13626_v2 = vadd.f32 %v13623_v61, %v13135_v15 }
0x1ea4   :  { %25515 = vtanh.f32 %v13626_v2  ;;  %v20194_v5 = vmul.f32 -1.442695, %v13626_v2 }
0x1ea5   :  { %v13981_v39 = vpop.f32.mrb[130].mxu1  ;;  %v13733_v48 = vpop.f32.mrb[128].mxu0 }
0x1ea6   :  { %v13825_v57 = vadd.f32 %v13824_v35, %v13733_v48  ;;  %v23067_v13 = vpop.f32.mrb[131].mxu1  ;;  %v23034_v42 = vpop.f32.mrb[129].mxu0  ;;  %v14168_v35 = vsel %vm13131_vm15, 1, %v25836_v4 }
0x1ead   :  { %v13904_v46 = vpop.f32.mrb[130].mxu0  ;;  %v14139_v21 = vpop.f32.mrb[132].mxu1 }
0x1eae   :  { %v25516_v55 = vpop.eup %25515  ;;  %v13905_v53 = vadd.f32 %v13904_v46, %v13825_v57  ;;  %v23056_v24 = vpop.f32.mrb[131].mxu0  ;;  %v27954_v46 = vsel %vm13118_vm4, %v27823_v25, %v27820_v26 }
0x1eaf   :  { %v23089_v31 = vpop.f32.mrb[133].mxu1  ;;  %13636 = vrot.lane.b32.xlu1 %v25516_v55, %s25837_s20 }
0x1eb0   :  { %v13982_v9 = vadd.f32 %v13981_v39, %v13905_v53  ;;  %v27943_v39 = vsel %vm13106_vm1, %v27813_v29, %v27810_v20 }
0x1eb5   :  { %v14064_v10 = vpop.f32.mrb[132].mxu0 }
0x1eb6   :  { %v14065_v34 = vadd.f32 %v14064_v10, %v13982_v9  ;;  %v23078_v14 = vpop.f32.mrb[133].mxu0 }
0x1eb8   :  { %v14140_v52 = vadd.f32 %v14139_v21, %v14065_v34 }
0x1eba   :  { %v14143_v40 = vadd.f32 %v14140_v52, %v13652_v3 }
0x1ebc   :  { %25517 = vtanh.f32 %v14143_v40  ;;  %v20195_v41 = vmul.f32 -1.442695, %v14143_v40 }
0x1ebd   :  { %25519 = vpow2.f32 %v20194_v5 }
0x1ec6   :  { %v25518_v17 = vpop.eup %25517 }
0x1ec7   :  { %14153 = vrot.lane.b32.xlu0 %v25518_v17, %s25837_s20  ;;  %v25520_v38 = vpop.eup %25519 }
0x1ec8   :  { %v13630_v8 = vadd.f32 1.0, %v25520_v38 }
0x1eca   :  { %25521 = vrcp.f32 %v13630_v8 }
0x1ecb   :  { %25523 = vpow2.f32 %v20195_v41 }
0x1ed4   :  { %v25522_v11 = vpop.eup %25521 }
0x1ed5   :  { %v25524_v19 = vpop.eup %25523  ;;  %v13634_v48 = vmul.f32 %v25522_v11, %v27943_v39 }
0x1ed6   :  { %v14147_v36 = vadd.f32 1.0, %v25524_v19 }
0x1ed8   :  { %25525 = vrcp.f32 %v14147_v36 }
0x1ee2   :  { %v25526_v61 = vpop.eup %25525 }
0x1ee3   :  { %v14151_v21 = vmul.f32 %v25526_v61, %v27954_v46 }
0x1f21   :  { %v13637_v49 = vpop.permute.xlu1 %13636 }
0x1f22   :  { %v13639_v44 = vmul.f32 %v25522_v11, %v13637_v49 }
0x1f24   :  { %13641 = vrot.lane.b32.xlu1 %v13639_v44, %s25828_s8 }
0x1f28   :  { %14170 = vperm.xlu1 %25354, %v14168_v35  }
0x1f2c   :  { %14182 = vperm.xlu1 %25354, %v14180_v45  }
0x1f39   :  { %v14154_v15 = vpop.permute.xlu0 %14153 }
0x1f3a   :  { %v14156_v2 = vmul.f32 %v25526_v61, %v14154_v15 }
0x1f3c   :  { %14158 = vrot.lane.b32.xlu0 %v14156_v2, %s25828_s8 }
0x1f96   :  { %v13642_v57 = vpop.permute.xlu1 %13641 }
0x1f97   :  { %v27946_v13 = vadd.f32 %v13642_v57, %v13634_v48 }
0x1f99   :  { %25527 = vtanh.f32 %v27946_v13 }
0x1fa3   :  { %v25528_v42 = vpop.eup %25527 }
0x1fa4   :  { %13647 = vrot.lane.b32.xlu0 %v25528_v42, %s25837_s20 }
0x1fa7   :  { %v27961_v53 = vpop.permute.xlu1 %14170 }
0x1fa8   :  { %vm14172_vm12 = vcmp.eq.s32.totalorder %v27961_v53, 1 }
0x1fab   :  { %v27974_v25 = vpop.permute.xlu1 %14182 }
0x1fac   :  { %vm14184_vm0 = vcmp.eq.s32.totalorder %v27974_v25, 1 }
0x1fae   :  { %v14159_v20 = vpop.permute.xlu0 %14158 }
0x1faf   :  { %v27957_v29 = vadd.f32 %v14159_v20, %v14151_v21 }
0x1fb1   :  { %25529 = vtanh.f32 %v27957_v29 }
0x1fbb   :  { %v25530_v55 = vpop.eup %25529 }
0x1fbc   :  { %14164 = vrot.lane.b32.xlu0 %v25530_v55, %s25837_s20 }
0x2016   :  { %v13648_v24 = vpop.permute.xlu0 %13647 }
0x2017   :  { %v27963_v31 = vmul.f32 %v25522_v11, %v13648_v24 }
0x2019   :  { %v27970_v26 = vsel %vm14172_vm12, %v27963_v31, %v27836_v37 }
0x201a   :  { %14203 = vrot.lane.b32.xlu1 %v27970_v26, %s25828_s8 }
0x202e   :  { %v14165_v9 = vpop.permute.xlu0 %14164 }
0x202f   :  { %v27976_v10 = vmul.f32 %v25526_v61, %v14165_v9 }
0x2031   :  { %v27983_v34 = vsel %vm14184_vm0, %v27976_v10, %v27849_v43 }
0x2032   :  { %14720 = vrot.lane.b32.xlu0 %v27983_v34, %s25828_s8 }
0x208c   :  { %v14204_v37 = vpop.permute.xlu1 %14203 }
0x208d   :  { %v14205_v14 = vsel %vm28917_vm5, %v14204_v37, 0 }
0x208e   :  { %v14276_v52 = vand.u32 4294901760, %v14205_v14 }
0x2090   :  { %v14277_v3 = vsub.f32 %v14205_v14, %v14276_v52  ;;  %23110 = vmatmul.mubr.f32.vlgmr.msra.gmra.mrb[134].mxu1 %v14276_v52 }
0x2091   :  { %24868 = vmatpush3.bf16.msra.mxu1 %v27502_v59  ;;  %23131 = vmatprep.mubr.msk.f32.mxu1 %vm28921_vm10, %v28915_v1 }
0x2092   :  { %v14278_v40 = vand.u32 4294901760, %v14277_v3  ;;  %24869 = vmatprep.subr.bf16.mxu1 %v28913_v0 }
0x2094   :  { %v14279_v17 = vsub.f32 %v14277_v3, %v14278_v40 }
0x2095   :  { %24871 = vmatpush3.bf16.msra.mxu1 %v27512_v7 }
0x2096   :  { %v14280_v43 = vand.u32 4294901760, %v14279_v17  ;;  %24878 = vmatprep.subr.bf16.mxu1 %v28913_v0 }
0x2098   :  { %23132 = vmatmul.mubr.f32.vlgmr.msra.gmra.mrb[136].mxu1 %v14278_v40  ;;  %23099 = vmatmul.mubr.f32.vlgmr.msra.gmra.mrb[134].mxu0 %v14280_v43 }
0x2099   :  { %24862 = vmatpush3.bf16.msra.mxu0 %v27526_v32  ;;  %24880 = vmatpush3.bf16.msra.mxu1 %v27502_v59 }
0x209a   :  { %24863 = vmatprep.subr.bf16.mxu0 %v28913_v0  ;;  %24881 = vmatprep.subr.bf16.mxu1 %v28913_v0 }
0x209b   :  { %23120 = vmatprep.mubr.msk.f32.mxu0 %vm28921_vm10, %v28915_v1  ;;  %23153 = vmatprep.mubr.msk.f32.mxu1 %vm28921_vm10, %v28915_v1 }
0x209d   :  { %24865 = vmatpush3.bf16.msra.mxu0 %v27540_v51  ;;  %24883 = vmatpush3.bf16.msra.mxu1 %v27512_v7 }
0x209e   :  { %24872 = vmatprep.subr.bf16.mxu0 %v28913_v0  ;;  %24890 = vmatprep.subr.bf16.mxu1 %v28913_v0 }
0x20a0   :  { %23121 = vmatmul.mubr.f32.vlgmr.msra.gmra.mrb[136].mxu0 %v14277_v3  ;;  %23154 = vmatmul.mubr.f32.vlgmr.msra.gmra.mrb[138].mxu1 %v14276_v52 }
0x20a1   :  { %24874 = vmatpush3.bf16.msra.mxu0 %v27560_v30  ;;  %24892 = vmatpush3.bf16.msra.mxu1 %v27592_v56 }
0x20a2   :  { %24875 = vmatprep.subr.bf16.mxu0 %v28913_v0  ;;  %24893 = vmatprep.subr.bf16.mxu1 %v28913_v0 }
0x20a3   :  { %23142 = vmatprep.mubr.msk.f32.mxu0 %vm28921_vm10, %v28915_v1  ;;  %23175 = vmatprep.mubr.msk.f32.mxu1 %vm28921_vm10, %v28915_v1 }
0x20a4   :  { %v14721_v5 = vpop.permute.xlu0 %14720 }
0x20a5   :  { %24877 = vmatpush3.bf16.msra.mxu0 %v27576_v33  ;;  %24895 = vmatpush3.bf16.msra.mxu1 %v27602_v27  ;;  %v14722_v38 = vsel %vm28917_vm5, %v14721_v5, 0 }
0x20a6   :  { %v14793_v8 = vand.u32 4294901760, %v14722_v38  ;;  %24884 = vmatprep.subr.bf16.mxu0 %v28913_v0  ;;  %24902 = vmatprep.subr.bf16.mxu1 %v28913_v0 }
0x20a8   :  { %v14794_v41 = vsub.f32 %v14722_v38, %v14793_v8  ;;  %23143 = vmatmul.mubr.f32.vlgmr.msra.gmra.mrb[138].mxu0 %v14276_v52  ;;  %23176 = vmatmul.mubr.f32.vlgmr.msra.gmra.mrb[140].mxu1 %v14793_v8  ;;  %v14201_v52 = vld [vmem:[#allocation4 + $0x6] sm:$0x3] }
0x20a9   :  { %24886 = vmatpush3.bf16.msra.mxu0 %v27588_v54  ;;  %24904 = vmatpush3.bf16.msra.mxu1 %v27588_v54 }
0x20aa   :  { %v14795_v12 = vand.u32 4294901760, %v14794_v41  ;;  %24887 = vmatprep.subr.bf16.mxu0 %v28913_v0  ;;  %24905 = vmatprep.subr.bf16.mxu1 %v28913_v0 }
0x20ab   :  { %23197 = vmatprep.mubr.msk.f32.mxu1 %vm28921_vm10, %v28915_v1  ;;  %23164 = vmatprep.mubr.msk.f32.mxu0 %vm28921_vm10, %v28915_v1 }
0x20ac   :  { %v14796_v11 = vsub.f32 %v14794_v41, %v14795_v12 }
0x20ad   :  { %24889 = vmatpush3.bf16.msra.mxu0 %v27598_v22  ;;  %24907 = vmatpush3.bf16.msra.mxu1 %v27598_v22 }
0x20ae   :  { %v14797_v49 = vand.u32 4294901760, %v14796_v11  ;;  %24896 = vmatprep.subr.bf16.mxu0 %v28913_v0  ;;  %24914 = vmatprep.subr.bf16.mxu1 %v28913_v0 }
0x20b0   :  { %23198 = vmatmul.mubr.f32.vlgmr.msra.gmra.mrb[142].mxu1 %v14795_v12  ;;  %23165 = vmatmul.mubr.f32.vlgmr.msra.gmra.mrb[140].mxu0 %v14797_v49 }
0x20b1   :  { %24898 = vmatpush3.bf16.msra.mxu0 %v27612_v28  ;;  %24916 = vmatpush3.bf16.msra.mxu1 %v27588_v54 }
0x20b2   :  { %24899 = vmatprep.subr.bf16.mxu0 %v28913_v0  ;;  %24917 = vmatprep.subr.bf16.mxu1 %v28913_v0 }
0x20b3   :  { %23186 = vmatprep.mubr.msk.f32.mxu0 %vm28921_vm10, %v28915_v1  ;;  %23219 = vmatprep.mubr.msk.f32.mxu1 %vm28921_vm10, %v28915_v1 }
0x20b5   :  { %24901 = vmatpush3.bf16.msra.mxu0 %v27622_v6  ;;  %24919 = vmatpush3.bf16.msra.mxu1 %v27598_v22 }
0x20b6   :  { %24908 = vmatprep.subr.bf16.mxu0 %v28913_v0  ;;  %24926 = vmatprep.subr.bf16.mxu1 %v28913_v0 }
0x20b8   :  { %23187 = vmatmul.mubr.f32.vlgmr.msra.gmra.mrb[142].mxu0 %v14794_v41  ;;  %23220 = vmatmul.mubr.f32.vlgmr.msra.gmra.mrb[144].mxu1 %v14793_v8 }
0x20b9   :  { %24910 = vmatpush3.bf16.msra.mxu0 %v27632_v47  ;;  %23208 = vmatprep.mubr.msk.f32.mxu0 %vm28921_vm10, %v28915_v1 }
0x20ba   :  { %24911 = vmatprep.subr.bf16.mxu0 %v28913_v0  ;;  %24928 = vmatpush3.bf16.msra.mxu1 %v27506_v62 }
0x20bb   :  { %24929 = vmatprep.subr.bf16.mxu1 %v28913_v0  ;;  %23241 = vmatprep.mubr.msk.f32.mxu1 %vm28921_vm10, %v28915_v1 }
0x20bd   :  { %24913 = vmatpush3.bf16.msra.mxu0 %v27640_v63 }
0x20be   :  { %24931 = vmatpush3.bf16.msra.mxu1 %v27516_v18  ;;  %24920 = vmatprep.subr.bf16.mxu0 %v28913_v0 }
0x20bf   :  { %24938 = vmatprep.subr.bf16.mxu1 %v28913_v0 }
0x20c0   :  { %23209 = vmatmul.mubr.f32.vlgmr.msra.gmra.mrb[144].mxu0 %v14793_v8 }
0x20c1   :  { %24922 = vmatpush3.bf16.msra.mxu0 %v27502_v59  ;;  %23230 = vmatprep.mubr.msk.f32.mxu0 %vm28921_vm10, %v28915_v1 }
0x20c2   :  { %24923 = vmatprep.subr.bf16.mxu0 %v28913_v0 }
0x20c5   :  { %24925 = vmatpush3.bf16.msra.mxu0 %v27512_v7 }
0x20c6   :  { %24932 = vmatprep.subr.bf16.mxu0 %v28913_v0 }
0x2163   :  { %v14373_v44 = vpop.f32.mrb[134].mxu1 }
0x2164   :  { %v23111_v23 = vpop.f32.mrb[135].mxu1 }
0x216b   :  { %v14530_v35 = vpop.f32.mrb[136].mxu1  ;;  %v14282_v19 = vpop.f32.mrb[134].mxu0 }
0x216c   :  { %v14374_v45 = vadd.f32 %v14373_v44, %v14282_v19  ;;  %v23133_v36 = vpop.f32.mrb[137].mxu1  ;;  %v23100_v61 = vpop.f32.mrb[135].mxu0 }
0x216d   :  { %v14718_v61 = vld [vmem:[#allocation5 + $0x8] sm:$0x3] }
0x2173   :  { %v14453_v15 = vpop.f32.mrb[136].mxu0  ;;  %v14688_v2 = vpop.f32.mrb[138].mxu1 }
0x2174   :  { %v14454_v48 = vadd.f32 %v14453_v15, %v14374_v45  ;;  %v23122_v57 = vpop.f32.mrb[137].mxu0  ;;  %v23155_v42 = vpop.f32.mrb[139].mxu1 }
0x2176   :  { %v14531_v21 = vadd.f32 %v14530_v35, %v14454_v48 }
0x217b   :  { %v14613_v20 = vpop.f32.mrb[138].mxu0  ;;  %v14890_v55 = vpop.f32.mrb[140].mxu1 }
0x217c   :  { %v14614_v24 = vadd.f32 %v14613_v20, %v14531_v21  ;;  %v23144_v9 = vpop.f32.mrb[139].mxu0  ;;  %v23177_v37 = vpop.f32.mrb[141].mxu1  ;;  %v20196_v20 = vld [vmem:[%s28894_s2 + $0x6] sm:$0x3] }
0x217d   :  { %vm14197_vm9 = vcmp.gt.f32.partialorder %v20196_v20, 0.5  ;;  %v20197_v37 = vld [vmem:[%s28894_s2 + $0x8] sm:$0x3] }
0x217e   :  { %v14689_v14 = vadd.f32 %v14688_v2, %v14614_v24  ;;  %vm14199_vm13 = vcmp.gt.f32.partialorder %v20197_v37, 0.5 }
0x2180   :  { %v14692_v3 = vadd.f32 %v14689_v14, %v14201_v52  ;;  %v15234_v14 = vsel %vm14197_vm9, 1, %v25836_v4 }
0x2182   :  { %25531 = vtanh.f32 %v14692_v3  ;;  %v20198_v48 = vmul.f32 -1.442695, %v14692_v3  ;;  %v15246_v3 = vsel %vm14199_vm13, 1, %v25836_v4 }
0x2183   :  { %v15047_v40 = vpop.f32.mrb[142].mxu1  ;;  %v14799_v17 = vpop.f32.mrb[140].mxu0 }
0x2184   :  { %v14891_v43 = vadd.f32 %v14890_v55, %v14799_v17  ;;  %v23199_v5 = vpop.f32.mrb[143].mxu1  ;;  %v23166_v38 = vpop.f32.mrb[141].mxu0 }
0x2185   :  { %v28077_v38 = vsel %vm14172_vm12, %v27946_v13, %v27943_v39 }
0x218b   :  { %v14970_v8 = vpop.f32.mrb[142].mxu0  ;;  %v15205_v41 = vpop.f32.mrb[144].mxu1 }
0x218c   :  { %v25532_v12 = vpop.eup %25531  ;;  %v14971_v11 = vadd.f32 %v14970_v8, %v14891_v43  ;;  %v23188_v49 = vpop.f32.mrb[143].mxu0 }
0x218d   :  { %v23221_v44 = vpop.f32.mrb[145].mxu1  ;;  %14702 = vrot.lane.b32.xlu1 %v25532_v12, %s25837_s20  ;;  %v28088_v49 = vsel %vm14184_vm0, %v27957_v29, %v27954_v46 }
0x218e   :  { %v15048_v23 = vadd.f32 %v15047_v40, %v14971_v11 }
0x2193   :  { %v15130_v35 = vpop.f32.mrb[144].mxu0 }
0x2194   :  { %v15131_v19 = vadd.f32 %v15130_v35, %v15048_v23  ;;  %v23210_v45 = vpop.f32.mrb[145].mxu0 }
0x2196   :  { %v15206_v36 = vadd.f32 %v15205_v41, %v15131_v19 }
0x2198   :  { %v15209_v15 = vadd.f32 %v15206_v36, %v14718_v61 }
0x219a   :  { %25533 = vtanh.f32 %v15209_v15  ;;  %v20199_v21 = vmul.f32 -1.442695, %v15209_v15 }
0x219b   :  { %25535 = vpow2.f32 %v20198_v48 }
0x21a4   :  { %v25534_v2 = vpop.eup %25533 }
0x21a5   :  { %15219 = vrot.lane.b32.xlu0 %v25534_v2, %s25837_s20  ;;  %v25536_v57 = vpop.eup %25535 }
0x21a6   :  { %v14696_v42 = vadd.f32 1.0, %v25536_v57 }
0x21a8   :  { %25537 = vrcp.f32 %v14696_v42 }
0x21a9   :  { %25539 = vpow2.f32 %v20199_v21 }
0x21b2   :  { %v25538_v55 = vpop.eup %25537 }
0x21b3   :  { %v25540_v52 = vpop.eup %25539  ;;  %v14700_v8 = vmul.f32 %v25538_v55, %v28077_v38 }
0x21b4   :  { %v15213_v40 = vadd.f32 1.0, %v25540_v52 }
0x21b6   :  { %25541 = vrcp.f32 %v15213_v40 }
0x21c0   :  { %v25542_v17 = vpop.eup %25541 }
0x21c1   :  { %v15217_v44 = vmul.f32 %v25542_v17, %v28088_v49 }
0x21ff   :  { %v14703_v24 = vpop.permute.xlu1 %14702 }
0x2200   :  { %v14705_v9 = vmul.f32 %v25538_v55, %v14703_v24 }
0x2202   :  { %14707 = vrot.lane.b32.xlu1 %v14705_v9, %s25828_s8 }
0x2206   :  { %15236 = vperm.xlu1 %25354, %v15234_v14  }
0x220a   :  { %15248 = vperm.xlu1 %25354, %v15246_v3  }
0x2217   :  { %v15220_v43 = vpop.permute.xlu0 %15219 }
0x2218   :  { %v15222_v5 = vmul.f32 %v25542_v17, %v15220_v43 }
0x221a   :  { %15224 = vrot.lane.b32.xlu0 %v15222_v5, %s25828_s8 }
0x2274   :  { %v14708_v41 = vpop.permute.xlu1 %14707 }
0x2275   :  { %v28080_v12 = vadd.f32 %v14708_v41, %v14700_v8 }
0x2277   :  { %25543 = vtanh.f32 %v28080_v12 }
0x2281   :  { %v25544_v11 = vpop.eup %25543 }
0x2282   :  { %14713 = vrot.lane.b32.xlu0 %v25544_v11, %s25837_s20 }
0x2285   :  { %v28095_v35 = vpop.permute.xlu1 %15236 }
0x2286   :  { %vm15238_vm14 = vcmp.eq.s32.totalorder %v28095_v35, 1 }
0x2289   :  { %v28108_v29 = vpop.permute.xlu1 %15248 }
0x228a   :  { %vm15250_vm2 = vcmp.eq.s32.totalorder %v28108_v29, 1  ;;  %v19537_v29 = vld [vmem:[%s28904_s12 + $0x30] sm:$0xff] }
0x228c   :  { %v15225_v39 = vpop.permute.xlu0 %15224 }
0x228d   :  { %v28091_v13 = vadd.f32 %v15225_v39, %v15217_v44 }
0x228f   :  { %25545 = vtanh.f32 %v28091_v13 }
0x2299   :  { %v25546_v23 = vpop.eup %25545 }
0x229a   :  { %15230 = vrot.lane.b32.xlu0 %v25546_v23, %s25837_s20 }
0x22f4   :  { %v14714_v19 = vpop.permute.xlu0 %14713 }
0x22f5   :  { %v28097_v45 = vmul.f32 %v25538_v55, %v14714_v19 }
0x22f7   :  { %v28104_v46 = vsel %vm15238_vm14, %v28097_v45, %v27970_v26 }
0x22f8   :  { %15269 = vrot.lane.b32.xlu1 %v28104_v46, %s25828_s8 }
0x230c   :  { %v15231_v36 = vpop.permute.xlu0 %15230 }
0x230d   :  { %v28110_v61 = vmul.f32 %v25542_v17, %v15231_v36 }
0x230f   :  { %v28117_v15 = vsel %vm15250_vm2, %v28110_v61, %v27983_v34 }
0x2310   :  { %15786 = vrot.lane.b32.xlu0 %v28117_v15, %s25828_s8 }
0x236a   :  { %v15270_v26 = vpop.permute.xlu1 %15269 }
0x236b   :  { %v15271_v2 = vsel %vm28917_vm5, %v15270_v26, 0 }
0x236c   :  { %v15342_v48 = vand.u32 4294901760, %v15271_v2 }
0x236e   :  { %v15343_v57 = vsub.f32 %v15271_v2, %v15342_v48  ;;  %23242 = vmatmul.mubr.f32.vlgmr.msra.gmra.mrb[146].mxu1 %v15342_v48 }
0x236f   :  { %24940 = vmatpush3.bf16.msra.mxu1 %v27502_v59  ;;  %23263 = vmatprep.mubr.msk.f32.mxu1 %vm28921_vm10, %v28915_v1 }
0x2370   :  { %v15344_v42 = vand.u32 4294901760, %v15343_v57  ;;  %24941 = vmatprep.subr.bf16.mxu1 %v28913_v0 }
0x2372   :  { %v15345_v21 = vsub.f32 %v15343_v57, %v15344_v42 }
0x2373   :  { %24943 = vmatpush3.bf16.msra.mxu1 %v27512_v7 }
0x2374   :  { %v15346_v34 = vand.u32 4294901760, %v15345_v21  ;;  %24950 = vmatprep.subr.bf16.mxu1 %v28913_v0 }
0x2376   :  { %23264 = vmatmul.mubr.f32.vlgmr.msra.gmra.mrb[148].mxu1 %v15344_v42  ;;  %23231 = vmatmul.mubr.f32.vlgmr.msra.gmra.mrb[146].mxu0 %v15346_v34  ;;  %v15267_v34 = vld [vmem:[#allocation4 + $0x8] sm:$0x3] }
0x2377   :  { %24934 = vmatpush3.bf16.msra.mxu0 %v27526_v32  ;;  %24952 = vmatpush3.bf16.msra.mxu1 %v27502_v59 }
0x2378   :  { %24935 = vmatprep.subr.bf16.mxu0 %v28913_v0  ;;  %24953 = vmatprep.subr.bf16.mxu1 %v28913_v0 }
0x2379   :  { %23252 = vmatprep.mubr.msk.f32.mxu0 %vm28921_vm10, %v28915_v1  ;;  %23285 = vmatprep.mubr.msk.f32.mxu1 %vm28921_vm10, %v28915_v1 }
0x237b   :  { %24937 = vmatpush3.bf16.msra.mxu0 %v27540_v51  ;;  %24955 = vmatpush3.bf16.msra.mxu1 %v27512_v7 }
0x237c   :  { %24944 = vmatprep.subr.bf16.mxu0 %v28913_v0  ;;  %24962 = vmatprep.subr.bf16.mxu1 %v28913_v0 }
0x237e   :  { %23253 = vmatmul.mubr.f32.vlgmr.msra.gmra.mrb[148].mxu0 %v15343_v57  ;;  %23286 = vmatmul.mubr.f32.vlgmr.msra.gmra.mrb[150].mxu1 %v15342_v48 }
0x237f   :  { %24946 = vmatpush3.bf16.msra.mxu0 %v27560_v30  ;;  %24964 = vmatpush3.bf16.msra.mxu1 %v27592_v56 }
0x2380   :  { %24947 = vmatprep.subr.bf16.mxu0 %v28913_v0  ;;  %24965 = vmatprep.subr.bf16.mxu1 %v28913_v0 }
0x2381   :  { %23274 = vmatprep.mubr.msk.f32.mxu0 %vm28921_vm10, %v28915_v1  ;;  %23307 = vmatprep.mubr.msk.f32.mxu1 %vm28921_vm10, %v28915_v1 }
0x2382   :  { %v15787_v20 = vpop.permute.xlu0 %15786 }
0x2383   :  { %24949 = vmatpush3.bf16.msra.mxu0 %v27576_v33  ;;  %24967 = vmatpush3.bf16.msra.mxu1 %v27602_v27  ;;  %v15788_v55 = vsel %vm28917_vm5, %v15787_v20, 0 }
0x2384   :  { %v15859_v24 = vand.u32 4294901760, %v15788_v55  ;;  %24956 = vmatprep.subr.bf16.mxu0 %v28913_v0  ;;  %24974 = vmatprep.subr.bf16.mxu1 %v28913_v0 }
0x2386   :  { %v15860_v9 = vsub.f32 %v15788_v55, %v15859_v24  ;;  %23275 = vmatmul.mubr.f32.vlgmr.msra.gmra.mrb[150].mxu0 %v15342_v48  ;;  %23308 = vmatmul.mubr.f32.vlgmr.msra.gmra.mrb[152].mxu1 %v15859_v24 }
0x2387   :  { %24958 = vmatpush3.bf16.msra.mxu0 %v27588_v54  ;;  %24976 = vmatpush3.bf16.msra.mxu1 %v27588_v54 }
0x2388   :  { %v15861_v37 = vand.u32 4294901760, %v15860_v9  ;;  %24959 = vmatprep.subr.bf16.mxu0 %v28913_v0  ;;  %24977 = vmatprep.subr.bf16.mxu1 %v28913_v0 }
0x2389   :  { %23329 = vmatprep.mubr.msk.f32.mxu1 %vm28921_vm10, %v28915_v1  ;;  %23296 = vmatprep.mubr.msk.f32.mxu0 %vm28921_vm10, %v28915_v1 }
0x238a   :  { %v15862_v14 = vsub.f32 %v15860_v9, %v15861_v37 }
0x238b   :  { %24961 = vmatpush3.bf16.msra.mxu0 %v27598_v22  ;;  %24979 = vmatpush3.bf16.msra.mxu1 %v27598_v22 }
0x238c   :  { %v15863_v52 = vand.u32 4294901760, %v15862_v14  ;;  %24968 = vmatprep.subr.bf16.mxu0 %v28913_v0  ;;  %24986 = vmatprep.subr.bf16.mxu1 %v28913_v0 }
0x238e   :  { %23330 = vmatmul.mubr.f32.vlgmr.msra.gmra.mrb[154].mxu1 %v15861_v37  ;;  %23297 = vmatmul.mubr.f32.vlgmr.msra.gmra.mrb[152].mxu0 %v15863_v52 }
0x238f   :  { %24970 = vmatpush3.bf16.msra.mxu0 %v27612_v28  ;;  %24988 = vmatpush3.bf16.msra.mxu1 %v27588_v54 }
0x2390   :  { %24971 = vmatprep.subr.bf16.mxu0 %v28913_v0  ;;  %24989 = vmatprep.subr.bf16.mxu1 %v28913_v0 }
0x2391   :  { %23318 = vmatprep.mubr.msk.f32.mxu0 %vm28921_vm10, %v28915_v1  ;;  %23351 = vmatprep.mubr.msk.f32.mxu1 %vm28921_vm10, %v28915_v1 }
0x2393   :  { %24973 = vmatpush3.bf16.msra.mxu0 %v27622_v6  ;;  %24991 = vmatpush3.bf16.msra.mxu1 %v27598_v22 }
0x2394   :  { %24980 = vmatprep.subr.bf16.mxu0 %v28913_v0  ;;  %24998 = vmatprep.subr.bf16.mxu1 %v28913_v0 }
0x2396   :  { %23319 = vmatmul.mubr.f32.vlgmr.msra.gmra.mrb[154].mxu0 %v15860_v9  ;;  %23352 = vmatmul.mubr.f32.vlgmr.msra.gmra.mrb[156].mxu1 %v15859_v24 }
0x2397   :  { %24982 = vmatpush3.bf16.msra.mxu0 %v27632_v47  ;;  %23340 = vmatprep.mubr.msk.f32.mxu0 %vm28921_vm10, %v28915_v1 }
0x2398   :  { %24983 = vmatprep.subr.bf16.mxu0 %v28913_v0  ;;  %25000 = vmatpush3.bf16.msra.mxu1 %v27506_v62 }
0x2399   :  { %25001 = vmatprep.subr.bf16.mxu1 %v28913_v0  ;;  %23373 = vmatprep.mubr.msk.f32.mxu1 %vm28921_vm10, %v28915_v1 }
0x239b   :  { %24985 = vmatpush3.bf16.msra.mxu0 %v27640_v63 }
0x239c   :  { %25003 = vmatpush3.bf16.msra.mxu1 %v27516_v18  ;;  %24992 = vmatprep.subr.bf16.mxu0 %v28913_v0 }
0x239d   :  { %25010 = vmatprep.subr.bf16.mxu1 %v28913_v0 }
0x239e   :  { %23341 = vmatmul.mubr.f32.vlgmr.msra.gmra.mrb[156].mxu0 %v15859_v24 }
0x239f   :  { %24994 = vmatpush3.bf16.msra.mxu0 %v27502_v59  ;;  %23362 = vmatprep.mubr.msk.f32.mxu0 %vm28921_vm10, %v28915_v1 }
0x23a0   :  { %24995 = vmatprep.subr.bf16.mxu0 %v28913_v0 }
0x23a3   :  { %24997 = vmatpush3.bf16.msra.mxu0 %v27512_v7 }
0x23a4   :  { %25004 = vmatprep.subr.bf16.mxu0 %v28913_v0 }
0x2441   :  { %v15439_v3 = vpop.f32.mrb[146].mxu1 }
0x2442   :  { %v23243_v40 = vpop.f32.mrb[147].mxu1 }
0x2449   :  { %v15596_v17 = vpop.f32.mrb[148].mxu1  ;;  %v15348_v43 = vpop.f32.mrb[146].mxu0 }
0x244a   :  { %v15440_v5 = vadd.f32 %v15439_v3, %v15348_v43  ;;  %v23265_v8 = vpop.f32.mrb[149].mxu1  ;;  %v23232_v41 = vpop.f32.mrb[147].mxu0 }
0x2451   :  { %v15519_v11 = vpop.f32.mrb[148].mxu0  ;;  %v15754_v44 = vpop.f32.mrb[150].mxu1 }
0x2452   :  { %v15520_v39 = vadd.f32 %v15519_v11, %v15440_v5  ;;  %v23254_v23 = vpop.f32.mrb[149].mxu0  ;;  %v23287_v19 = vpop.f32.mrb[151].mxu1 }
0x2453   :  { %v15784_v23 = vld [vmem:[#allocation5 + $0x6] sm:$0x3] }
0x2454   :  { %v15597_v36 = vadd.f32 %v15596_v17, %v15520_v39 }
0x2459   :  { %v15679_v26 = vpop.f32.mrb[150].mxu0  ;;  %v15956_v2 = vpop.f32.mrb[152].mxu1 }
0x245a   :  { %v15680_v48 = vadd.f32 %v15679_v26, %v15597_v36  ;;  %v23276_v57 = vpop.f32.mrb[151].mxu0  ;;  %v23309_v42 = vpop.f32.mrb[153].mxu1 }
0x245b   :  { %v20200_v42 = vld [vmem:[%s28894_s2 + $0x8] sm:$0x3] }
0x245c   :  { %v15755_v21 = vadd.f32 %v15754_v44, %v15680_v48  ;;  %vm15263_vm3 = vcmp.gt.f32.partialorder %v20200_v42, 0.5 }
0x245e   :  { %v15758_v20 = vadd.f32 %v15755_v21, %v15267_v34 }
0x2460   :  { %25547 = vtanh.f32 %v15758_v20  ;;  %v20202_v26 = vmul.f32 -1.442695, %v15758_v20  ;;  %v16300_v20 = vsel %vm15263_vm3, 1, %v25836_v4 }
0x2461   :  { %v16113_v55 = vpop.f32.mrb[154].mxu1  ;;  %v15865_v24 = vpop.f32.mrb[152].mxu0 }
0x2462   :  { %v15957_v9 = vadd.f32 %v15956_v2, %v15865_v24  ;;  %v23331_v37 = vpop.f32.mrb[155].mxu1  ;;  %v23298_v14 = vpop.f32.mrb[153].mxu0  ;;  %v20201_v24 = vld [vmem:[%s28894_s2 + $0x6] sm:$0x3] }
0x2463   :  { %vm15265_vm8 = vcmp.gt.f32.partialorder %v20201_v24, 0.5 }
0x2464   :  { %v16312_v37 = vsel %vm15265_vm8, 1, %v25836_v4 }
0x2469   :  { %v16036_v52 = vpop.f32.mrb[154].mxu0  ;;  %v16271_v3 = vpop.f32.mrb[156].mxu1 }
0x246a   :  { %v25548_v40 = vpop.eup %25547  ;;  %v16037_v43 = vadd.f32 %v16036_v52, %v15957_v9  ;;  %v23320_v5 = vpop.f32.mrb[155].mxu0 }
0x246b   :  { %v23353_v17 = vpop.f32.mrb[157].mxu1  ;;  %15768 = vrot.lane.b32.xlu1 %v25548_v40, %s25837_s20 }
0x246c   :  { %v16114_v8 = vadd.f32 %v16113_v55, %v16037_v43  ;;  %v28211_v43 = vsel %vm15238_vm14, %v28080_v12, %v28077_v38 }
0x2471   :  { %v16196_v41 = vpop.f32.mrb[156].mxu0 }
0x2472   :  { %v16197_v11 = vadd.f32 %v16196_v41, %v16114_v8  ;;  %v23342_v44 = vpop.f32.mrb[157].mxu0 }
0x2474   :  { %v16272_v39 = vadd.f32 %v16271_v3, %v16197_v11  ;;  %v28222_v11 = vsel %vm15250_vm2, %v28091_v13, %v28088_v49 }
0x2476   :  { %v16275_v19 = vadd.f32 %v16272_v39, %v15784_v23 }
0x2478   :  { %25549 = vtanh.f32 %v16275_v19  ;;  %v20203_v57 = vmul.f32 -1.442695, %v16275_v19 }
0x2479   :  { %25551 = vpow2.f32 %v20202_v26 }
0x2482   :  { %v25550_v36 = vpop.eup %25549 }
0x2483   :  { %16285 = vrot.lane.b32.xlu0 %v25550_v36, %s25837_s20  ;;  %v25552_v2 = vpop.eup %25551 }
0x2484   :  { %v15762_v48 = vadd.f32 1.0, %v25552_v2 }
0x2486   :  { %25553 = vrcp.f32 %v15762_v48 }
0x2487   :  { %25555 = vpow2.f32 %v20203_v57 }
0x2490   :  { %v25554_v21 = vpop.eup %25553 }
0x2491   :  { %v25556_v9 = vpop.eup %25555  ;;  %v15766_v5 = vmul.f32 %v25554_v21, %v28211_v43 }
0x2492   :  { %v16279_v14 = vadd.f32 1.0, %v25556_v9 }
0x2494   :  { %25557 = vrcp.f32 %v16279_v14 }
0x249e   :  { %v25558_v52 = vpop.eup %25557 }
0x249f   :  { %v16283_v44 = vmul.f32 %v25558_v52, %v28222_v11 }
0x24dd   :  { %v15769_v34 = vpop.permute.xlu1 %15768 }
0x24de   :  { %v15771_v55 = vmul.f32 %v25554_v21, %v15769_v34 }
0x24e0   :  { %15773 = vrot.lane.b32.xlu1 %v15771_v55, %s25828_s8 }
0x24e4   :  { %16302 = vperm.xlu1 %25354, %v16300_v20  }
0x24e8   :  { %16314 = vperm.xlu1 %25354, %v16312_v37  }
0x24f5   :  { %v16286_v3 = vpop.permute.xlu0 %16285 }
0x24f6   :  { %v16288_v40 = vmul.f32 %v25558_v52, %v16286_v3 }
0x24f8   :  { %16290 = vrot.lane.b32.xlu0 %v16288_v40, %s25828_s8 }
0x2552   :  { %v15774_v17 = vpop.permute.xlu1 %15773 }
0x2553   :  { %v28214_v8 = vadd.f32 %v15774_v17, %v15766_v5 }
0x2555   :  { %25559 = vtanh.f32 %v28214_v8 }
0x255f   :  { %v25560_v41 = vpop.eup %25559 }
0x2560   :  { %15779 = vrot.lane.b32.xlu0 %v25560_v41, %s25837_s20 }
0x2563   :  { %v28229_v23 = vpop.permute.xlu1 %16302 }
0x2564   :  { %vm16304_vm11 = vcmp.eq.s32.totalorder %v28229_v23, 1 }
0x2567   :  { %v28242_v13 = vpop.permute.xlu1 %16314 }
0x2568   :  { %vm16316_vm15 = vcmp.eq.s32.totalorder %v28242_v13, 1  ;;  %v13107_v13 = vsel %vm13106_vm1, %v27829_v50, 0.0  ;;  %vm19546_vm1 = vcmask 523264  }
0x256a   :  { %v16291_v38 = vpop.permute.xlu0 %16290 }
0x256b   :  { %v28225_v12 = vadd.f32 %v16291_v38, %v16283_v44 }
0x256d   :  { %25561 = vtanh.f32 %v28225_v12 }
0x2577   :  { %v25562_v39 = vpop.eup %25561 }
0x2578   :  { %16296 = vrot.lane.b32.xlu0 %v25562_v39, %s25837_s20 }
0x25d2   :  { %v15780_v19 = vpop.permute.xlu0 %15779 }
0x25d3   :  { %v28231_v36 = vmul.f32 %v25554_v21, %v15780_v19 }
0x25d5   :  { %v28238_v49 = vsel %vm16304_vm11, %v28231_v36, %v28104_v46 }
0x25d6   :  { %16335 = vrot.lane.b32.xlu1 %v28238_v49, %s25828_s8 }
0x25ea   :  { %v16297_v26 = vpop.permute.xlu0 %16296 }
0x25eb   :  { %v28244_v2 = vmul.f32 %v25558_v52, %v16297_v26 }
0x25ed   :  { %v28251_v48 = vsel %vm16316_vm15, %v28244_v2, %v28117_v15 }
0x25ee   :  { %16852 = vrot.lane.b32.xlu0 %v28251_v48, %s25828_s8 }
0x2648   :  { %v16336_v46 = vpop.permute.xlu1 %16335 }
0x2649   :  { %v16337_v57 = vsel %vm28917_vm5, %v16336_v46, 0 }
0x264a   :  { %v16408_v42 = vand.u32 4294901760, %v16337_v57 }
0x264c   :  { %v16409_v21 = vsub.f32 %v16337_v57, %v16408_v42  ;;  %23374 = vmatmul.mubr.f32.vlgmr.msra.gmra.mrb[158].mxu1 %v16408_v42 }
0x264d   :  { %25012 = vmatpush3.bf16.msra.mxu1 %v27502_v59  ;;  %23395 = vmatprep.mubr.msk.f32.mxu1 %vm28921_vm10, %v28915_v1 }
0x264e   :  { %v16410_v34 = vand.u32 4294901760, %v16409_v21  ;;  %25013 = vmatprep.subr.bf16.mxu1 %v28913_v0 }
0x2650   :  { %v16411_v55 = vsub.f32 %v16409_v21, %v16410_v34 }
0x2651   :  { %25015 = vmatpush3.bf16.msra.mxu1 %v27512_v7 }
0x2652   :  { %v16412_v15 = vand.u32 4294901760, %v16411_v55  ;;  %25022 = vmatprep.subr.bf16.mxu1 %v28913_v0 }
0x2654   :  { %23396 = vmatmul.mubr.f32.vlgmr.msra.gmra.mrb[160].mxu1 %v16410_v34  ;;  %23363 = vmatmul.mubr.f32.vlgmr.msra.gmra.mrb[158].mxu0 %v16412_v15 }
0x2655   :  { %25006 = vmatpush3.bf16.msra.mxu0 %v27526_v32  ;;  %25024 = vmatpush3.bf16.msra.mxu1 %v27502_v59 }
0x2656   :  { %25007 = vmatprep.subr.bf16.mxu0 %v28913_v0  ;;  %25025 = vmatprep.subr.bf16.mxu1 %v28913_v0 }
0x2657   :  { %23384 = vmatprep.mubr.msk.f32.mxu0 %vm28921_vm10, %v28915_v1  ;;  %23417 = vmatprep.mubr.msk.f32.mxu1 %vm28921_vm10, %v28915_v1 }
0x2659   :  { %25009 = vmatpush3.bf16.msra.mxu0 %v27540_v51  ;;  %25027 = vmatpush3.bf16.msra.mxu1 %v27512_v7 }
0x265a   :  { %25016 = vmatprep.subr.bf16.mxu0 %v28913_v0  ;;  %25034 = vmatprep.subr.bf16.mxu1 %v28913_v0 }
0x265c   :  { %23385 = vmatmul.mubr.f32.vlgmr.msra.gmra.mrb[160].mxu0 %v16409_v21  ;;  %23418 = vmatmul.mubr.f32.vlgmr.msra.gmra.mrb[162].mxu1 %v16408_v42 }
0x265d   :  { %25018 = vmatpush3.bf16.msra.mxu0 %v27560_v30  ;;  %25036 = vmatpush3.bf16.msra.mxu1 %v27592_v56 }
0x265e   :  { %25019 = vmatprep.subr.bf16.mxu0 %v28913_v0  ;;  %25037 = vmatprep.subr.bf16.mxu1 %v28913_v0 }
0x265f   :  { %23406 = vmatprep.mubr.msk.f32.mxu0 %vm28921_vm10, %v28915_v1  ;;  %23439 = vmatprep.mubr.msk.f32.mxu1 %vm28921_vm10, %v28915_v1 }
0x2660   :  { %v16853_v24 = vpop.permute.xlu0 %16852 }
0x2661   :  { %25021 = vmatpush3.bf16.msra.mxu0 %v27576_v33  ;;  %25039 = vmatpush3.bf16.msra.mxu1 %v27602_v27  ;;  %v16854_v20 = vsel %vm28917_vm5, %v16853_v24, 0 }
0x2662   :  { %v16925_v9 = vand.u32 4294901760, %v16854_v20  ;;  %25028 = vmatprep.subr.bf16.mxu0 %v28913_v0  ;;  %25046 = vmatprep.subr.bf16.mxu1 %v28913_v0 }
0x2664   :  { %v16926_v37 = vsub.f32 %v16854_v20, %v16925_v9  ;;  %23407 = vmatmul.mubr.f32.vlgmr.msra.gmra.mrb[162].mxu0 %v16408_v42  ;;  %23440 = vmatmul.mubr.f32.vlgmr.msra.gmra.mrb[164].mxu1 %v16925_v9 }
0x2665   :  { %25030 = vmatpush3.bf16.msra.mxu0 %v27588_v54  ;;  %25048 = vmatpush3.bf16.msra.mxu1 %v27588_v54 }
0x2666   :  { %v16927_v14 = vand.u32 4294901760, %v16926_v37  ;;  %25031 = vmatprep.subr.bf16.mxu0 %v28913_v0  ;;  %25049 = vmatprep.subr.bf16.mxu1 %v28913_v0 }
0x2667   :  { %23461 = vmatprep.mubr.msk.f32.mxu1 %vm28921_vm10, %v28915_v1  ;;  %23428 = vmatprep.mubr.msk.f32.mxu0 %vm28921_vm10, %v28915_v1 }
0x2668   :  { %v16928_v52 = vsub.f32 %v16926_v37, %v16927_v14 }
0x2669   :  { %25033 = vmatpush3.bf16.msra.mxu0 %v27598_v22  ;;  %25051 = vmatpush3.bf16.msra.mxu1 %v27598_v22 }
0x266a   :  { %v16929_v3 = vand.u32 4294901760, %v16928_v52  ;;  %25040 = vmatprep.subr.bf16.mxu0 %v28913_v0  ;;  %25058 = vmatprep.subr.bf16.mxu1 %v28913_v0 }
0x266c   :  { %23462 = vmatmul.mubr.f32.vlgmr.msra.gmra.mrb[166].mxu1 %v16927_v14  ;;  %23429 = vmatmul.mubr.f32.vlgmr.msra.gmra.mrb[164].mxu0 %v16929_v3 }
0x266d   :  { %25042 = vmatpush3.bf16.msra.mxu0 %v27612_v28  ;;  %25060 = vmatpush3.bf16.msra.mxu1 %v27588_v54 }
0x266e   :  { %25043 = vmatprep.subr.bf16.mxu0 %v28913_v0  ;;  %25061 = vmatprep.subr.bf16.mxu1 %v28913_v0 }
0x266f   :  { %23450 = vmatprep.mubr.msk.f32.mxu0 %vm28921_vm10, %v28915_v1  ;;  %23483 = vmatprep.mubr.msk.f32.mxu1 %vm28921_vm10, %v28915_v1 }
0x2671   :  { %25045 = vmatpush3.bf16.msra.mxu0 %v27622_v6  ;;  %25063 = vmatpush3.bf16.msra.mxu1 %v27598_v22 }
0x2672   :  { %25052 = vmatprep.subr.bf16.mxu0 %v28913_v0  ;;  %25070 = vmatprep.subr.bf16.mxu1 %v28913_v0 }
0x2674   :  { %23451 = vmatmul.mubr.f32.vlgmr.msra.gmra.mrb[166].mxu0 %v16926_v37  ;;  %23484 = vmatmul.mubr.f32.vlgmr.msra.gmra.mrb[168].mxu1 %v16925_v9  ;;  %v16333_v37 = vld [vmem:[#allocation4 + $0xa] sm:$0x3] }
0x2675   :  { %25054 = vmatpush3.bf16.msra.mxu0 %v27632_v47  ;;  %23472 = vmatprep.mubr.msk.f32.mxu0 %vm28921_vm10, %v28915_v1 }
0x2676   :  { %25055 = vmatprep.subr.bf16.mxu0 %v28913_v0  ;;  %25072 = vmatpush3.bf16.msra.mxu1 %v27506_v62 }
0x2677   :  { %25073 = vmatprep.subr.bf16.mxu1 %v28913_v0  ;;  %23505 = vmatprep.mubr.msk.f32.mxu1 %vm28921_vm10, %v28915_v1 }
0x2679   :  { %25057 = vmatpush3.bf16.msra.mxu0 %v27640_v63 }
0x267a   :  { %25075 = vmatpush3.bf16.msra.mxu1 %v27516_v18  ;;  %25064 = vmatprep.subr.bf16.mxu0 %v28913_v0 }
0x267b   :  { %25082 = vmatprep.subr.bf16.mxu1 %v28913_v0 }
0x267c   :  { %23473 = vmatmul.mubr.f32.vlgmr.msra.gmra.mrb[168].mxu0 %v16925_v9 }
0x267d   :  { %25066 = vmatpush3.bf16.msra.mxu0 %v27502_v59  ;;  %23494 = vmatprep.mubr.msk.f32.mxu0 %vm28921_vm10, %v28915_v1 }
0x267e   :  { %25067 = vmatprep.subr.bf16.mxu0 %v28913_v0 }
0x2681   :  { %25069 = vmatpush3.bf16.msra.mxu0 %v27512_v7 }
0x2682   :  { %25076 = vmatprep.subr.bf16.mxu0 %v28913_v0 }
0x271f   :  { %v16505_v40 = vpop.f32.mrb[158].mxu1 }
0x2720   :  { %v23375_v5 = vpop.f32.mrb[159].mxu1 }
0x2727   :  { %v16662_v17 = vpop.f32.mrb[160].mxu1  ;;  %v16414_v41 = vpop.f32.mrb[158].mxu0 }
0x2728   :  { %v16506_v44 = vadd.f32 %v16505_v40, %v16414_v41  ;;  %v23397_v38 = vpop.f32.mrb[161].mxu1  ;;  %v23364_v39 = vpop.f32.mrb[159].mxu0 }
0x272f   :  { %v16585_v19 = vpop.f32.mrb[160].mxu0  ;;  %v16820_v26 = vpop.f32.mrb[162].mxu1 }
0x2730   :  { %v16586_v46 = vadd.f32 %v16585_v19, %v16506_v44  ;;  %v23386_v57 = vpop.f32.mrb[161].mxu0  ;;  %v23419_v42 = vpop.f32.mrb[163].mxu1 }
0x2732   :  { %v16663_v21 = vadd.f32 %v16662_v17, %v16586_v46 }
0x2737   :  { %v16745_v34 = vpop.f32.mrb[162].mxu0  ;;  %v17022_v55 = vpop.f32.mrb[164].mxu1 }
0x2738   :  { %v16746_v15 = vadd.f32 %v16745_v34, %v16663_v21  ;;  %v23408_v24 = vpop.f32.mrb[163].mxu0  ;;  %v23441_v20 = vpop.f32.mrb[165].mxu1 }
0x273a   :  { %v16821_v9 = vadd.f32 %v16820_v26, %v16746_v15  ;;  %v16850_v15 = vld [vmem:[#allocation5 + $0x4] sm:$0x3] }
0x273c   :  { %v16824_v14 = vadd.f32 %v16821_v9, %v16333_v37 }
0x273e   :  { %25563 = vtanh.f32 %v16824_v14 }
0x273f   :  { %v17179_v52 = vpop.f32.mrb[166].mxu1  ;;  %v16931_v3 = vpop.f32.mrb[164].mxu0 }
0x2740   :  { %v17023_v40 = vadd.f32 %v17022_v55, %v16931_v3  ;;  %v23463_v5 = vpop.f32.mrb[167].mxu1  ;;  %v23430_v41 = vpop.f32.mrb[165].mxu0  ;;  %v20206_v55 = vmul.f32 -1.442695, %v16824_v14 }
0x2747   :  { %v17102_v38 = vpop.f32.mrb[166].mxu0  ;;  %v17337_v39 = vpop.f32.mrb[168].mxu1 }
0x2748   :  { %v25564_v44 = vpop.eup %25563  ;;  %v17103_v19 = vadd.f32 %v17102_v38, %v17023_v40  ;;  %v23452_v57 = vpop.f32.mrb[167].mxu0  ;;  %v20205_v38 = vld [vmem:[%s28894_s2 + $0x4] sm:$0x3] }
0x2749   :  { %v23485_v17 = vpop.f32.mrb[169].mxu1  ;;  %16834 = vrot.lane.b32.xlu1 %v25564_v44, %s25837_s20  ;;  %vm16331_vm9 = vcmp.gt.f32.partialorder %v20205_v38, 0.5 }
0x274a   :  { %v17180_v46 = vadd.f32 %v17179_v52, %v17103_v19  ;;  %v20204_v52 = vld [vmem:[%s28894_s2 + $0xa] sm:$0x3]  ;;  %v17378_v44 = vsel %vm16331_vm9, 1, %v25836_v4 }
0x274b   :  { %vm16329_vm7 = vcmp.gt.f32.partialorder %v20204_v52, 0.5 }
0x274c   :  { %v17366_v14 = vsel %vm16329_vm7, 1, %v25836_v4 }
0x274f   :  { %v17262_v42 = vpop.f32.mrb[168].mxu0 }
0x2750   :  { %v17263_v21 = vadd.f32 %v17262_v42, %v17180_v46  ;;  %v23474_v26 = vpop.f32.mrb[169].mxu0  ;;  %v28345_v42 = vsel %vm16304_vm11, %v28214_v8, %v28211_v43 }
0x2752   :  { %v17338_v34 = vadd.f32 %v17337_v39, %v17263_v21 }
0x2754   :  { %v17341_v24 = vadd.f32 %v17338_v34, %v16850_v15 }
0x2756   :  { %25565 = vtanh.f32 %v17341_v24  ;;  %v20207_v3 = vmul.f32 -1.442695, %v17341_v24  ;;  %v28356_v24 = vsel %vm16316_vm15, %v28225_v12, %v28222_v11 }
0x2757   :  { %25567 = vpow2.f32 %v20206_v55 }
0x2760   :  { %v25566_v20 = vpop.eup %25565 }
0x2761   :  { %17351 = vrot.lane.b32.xlu0 %v25566_v20, %s25837_s20  ;;  %v25568_v9 = vpop.eup %25567 }
0x2762   :  { %v16828_v37 = vadd.f32 1.0, %v25568_v9 }
0x2764   :  { %25569 = vrcp.f32 %v16828_v37 }
0x2765   :  { %25571 = vpow2.f32 %v20207_v3 }
0x276e   :  { %v25570_v40 = vpop.eup %25569 }
0x276f   :  { %v25572_v39 = vpop.eup %25571  ;;  %v16832_v21 = vmul.f32 %v25570_v40, %v28345_v42 }
0x2770   :  { %v17345_v19 = vadd.f32 1.0, %v25572_v39 }
0x2772   :  { %25573 = vrcp.f32 %v17345_v19 }
0x277c   :  { %v25574_v57 = vpop.eup %25573 }
0x277d   :  { %v17349_v20 = vmul.f32 %v25574_v57, %v28356_v24 }
0x27bb   :  { %v16835_v5 = vpop.permute.xlu1 %16834 }
0x27bc   :  { %v16837_v41 = vmul.f32 %v25570_v40, %v16835_v5 }
0x27be   :  { %16839 = vrot.lane.b32.xlu1 %v16837_v41, %s25828_s8 }
0x27c2   :  { %17368 = vperm.xlu1 %25354, %v17366_v14  }
0x27c6   :  { %17380 = vperm.xlu1 %25354, %v17378_v44  }
0x27d3   :  { %v17352_v17 = vpop.permute.xlu0 %17351 }
0x27d4   :  { %v17354_v46 = vmul.f32 %v25574_v57, %v17352_v17 }
0x27d6   :  { %17356 = vrot.lane.b32.xlu0 %v17354_v46, %s25828_s8 }
0x2830   :  { %v16840_v26 = vpop.permute.xlu1 %16839 }
0x2831   :  { %v28348_v34 = vadd.f32 %v16840_v26, %v16832_v21 }
0x2833   :  { %25575 = vtanh.f32 %v28348_v34 }
0x283d   :  { %v25576_v15 = vpop.eup %25575 }
0x283e   :  { %16845 = vrot.lane.b32.xlu0 %v25576_v15, %s25837_s20 }
0x2841   :  { %v28363_v9 = vpop.permute.xlu1 %17368 }
0x2842   :  { %vm17370_vm13 = vcmp.eq.s32.totalorder %v28363_v9, 1 }
0x2845   :  { %v28376_v12 = vpop.permute.xlu1 %17380 }
0x2846   :  { %vm17382_vm3 = vcmp.eq.s32.totalorder %v28376_v12, 1 }
0x2848   :  { %v17357_v43 = vpop.permute.xlu0 %17356 }
0x2849   :  { %v28359_v8 = vadd.f32 %v17357_v43, %v17349_v20 }
0x284b   :  { %25577 = vtanh.f32 %v28359_v8 }
0x2855   :  { %v25578_v55 = vpop.eup %25577 }
0x2856   :  { %17362 = vrot.lane.b32.xlu0 %v25578_v55, %s25837_s20 }
0x28b0   :  { %v16846_v37 = vpop.permute.xlu0 %16845 }
0x28b1   :  { %v28365_v3 = vmul.f32 %v25570_v40, %v16846_v37 }
0x28b3   :  { %v28372_v11 = vsel %vm17370_vm13, %v28365_v3, %v28238_v49 }
0x28b4   :  { %17401 = vrot.lane.b32.xlu1 %v28372_v11, %s25828_s8 }
0x28c8   :  { %v17363_v52 = vpop.permute.xlu0 %17362 }
0x28c9   :  { %v28378_v5 = vmul.f32 %v25574_v57, %v17363_v52 }
0x28cb   :  { %v28385_v40 = vsel %vm17382_vm3, %v28378_v5, %v28251_v48 }
0x28cc   :  { %17918 = vrot.lane.b32.xlu0 %v28385_v40, %s25828_s8 }
0x2926   :  { %v17402_v49 = vpop.permute.xlu1 %17401 }
0x2927   :  { %v17403_v41 = vsel %vm28917_vm5, %v17402_v49, 0 }
0x2928   :  { %v17474_v38 = vand.u32 4294901760, %v17403_v41 }
0x292a   :  { %v17475_v14 = vsub.f32 %v17403_v41, %v17474_v38  ;;  %23506 = vmatmul.mubr.f32.vlgmr.msra.gmra.mrb[170].mxu1 %v17474_v38 }
0x292b   :  { %25084 = vmatpush3.bf16.msra.mxu1 %v27502_v59  ;;  %23527 = vmatprep.mubr.msk.f32.mxu1 %vm28921_vm10, %v28915_v1 }
0x292c   :  { %v17476_v39 = vand.u32 4294901760, %v17475_v14  ;;  %25085 = vmatprep.subr.bf16.mxu1 %v28913_v0 }
0x292e   :  { %v17477_v44 = vsub.f32 %v17475_v14, %v17476_v39 }
0x292f   :  { %25087 = vmatpush3.bf16.msra.mxu1 %v27512_v7 }
0x2930   :  { %v17478_v48 = vand.u32 4294901760, %v17477_v44  ;;  %25094 = vmatprep.subr.bf16.mxu1 %v28913_v0 }
0x2932   :  { %23528 = vmatmul.mubr.f32.vlgmr.msra.gmra.mrb[172].mxu1 %v17476_v39  ;;  %23495 = vmatmul.mubr.f32.vlgmr.msra.gmra.mrb[170].mxu0 %v17478_v48 }
0x2933   :  { %25078 = vmatpush3.bf16.msra.mxu0 %v27526_v32  ;;  %25096 = vmatpush3.bf16.msra.mxu1 %v27502_v59 }
0x2934   :  { %25079 = vmatprep.subr.bf16.mxu0 %v28913_v0  ;;  %25097 = vmatprep.subr.bf16.mxu1 %v28913_v0 }
0x2935   :  { %23516 = vmatprep.mubr.msk.f32.mxu0 %vm28921_vm10, %v28915_v1  ;;  %23549 = vmatprep.mubr.msk.f32.mxu1 %vm28921_vm10, %v28915_v1 }
0x2937   :  { %25081 = vmatpush3.bf16.msra.mxu0 %v27540_v51  ;;  %25099 = vmatpush3.bf16.msra.mxu1 %v27512_v7 }
0x2938   :  { %25088 = vmatprep.subr.bf16.mxu0 %v28913_v0  ;;  %25106 = vmatprep.subr.bf16.mxu1 %v28913_v0 }
0x293a   :  { %23517 = vmatmul.mubr.f32.vlgmr.msra.gmra.mrb[172].mxu0 %v17475_v14  ;;  %23550 = vmatmul.mubr.f32.vlgmr.msra.gmra.mrb[174].mxu1 %v17474_v38 }
0x293b   :  { %25090 = vmatpush3.bf16.msra.mxu0 %v27560_v30  ;;  %25108 = vmatpush3.bf16.msra.mxu1 %v27592_v56 }
0x293c   :  { %25091 = vmatprep.subr.bf16.mxu0 %v28913_v0  ;;  %25109 = vmatprep.subr.bf16.mxu1 %v28913_v0 }
0x293d   :  { %23538 = vmatprep.mubr.msk.f32.mxu0 %vm28921_vm10, %v28915_v1  ;;  %23571 = vmatprep.mubr.msk.f32.mxu1 %vm28921_vm10, %v28915_v1 }
0x293e   :  { %v17919_v19 = vpop.permute.xlu0 %17918 }
0x293f   :  { %25093 = vmatpush3.bf16.msra.mxu0 %v27576_v33  ;;  %25111 = vmatpush3.bf16.msra.mxu1 %v27602_v27  ;;  %v17920_v57 = vsel %vm28917_vm5, %v17919_v19, 0 }
0x2940   :  { %v17991_v17 = vand.u32 4294901760, %v17920_v57  ;;  %25100 = vmatprep.subr.bf16.mxu0 %v28913_v0  ;;  %25118 = vmatprep.subr.bf16.mxu1 %v28913_v0 }
0x2942   :  { %v17992_v46 = vsub.f32 %v17920_v57, %v17991_v17  ;;  %23539 = vmatmul.mubr.f32.vlgmr.msra.gmra.mrb[174].mxu0 %v17474_v38  ;;  %23572 = vmatmul.mubr.f32.vlgmr.msra.gmra.mrb[176].mxu1 %v17991_v17 }
0x2943   :  { %25102 = vmatpush3.bf16.msra.mxu0 %v27588_v54  ;;  %25120 = vmatpush3.bf16.msra.mxu1 %v27588_v54 }
0x2944   :  { %v17993_v21 = vand.u32 4294901760, %v17992_v46  ;;  %25103 = vmatprep.subr.bf16.mxu0 %v28913_v0  ;;  %25121 = vmatprep.subr.bf16.mxu1 %v28913_v0 }
0x2945   :  { %23593 = vmatprep.mubr.msk.f32.mxu1 %vm28921_vm10, %v28915_v1  ;;  %23560 = vmatprep.mubr.msk.f32.mxu0 %vm28921_vm10, %v28915_v1 }
0x2946   :  { %v17994_v26 = vsub.f32 %v17992_v46, %v17993_v21 }
0x2947   :  { %25105 = vmatpush3.bf16.msra.mxu0 %v27598_v22  ;;  %25123 = vmatpush3.bf16.msra.mxu1 %v27598_v22 }
0x2948   :  { %v17995_v15 = vand.u32 4294901760, %v17994_v26  ;;  %25112 = vmatprep.subr.bf16.mxu0 %v28913_v0  ;;  %25130 = vmatprep.subr.bf16.mxu1 %v28913_v0  ;;  %v17399_v26 = vld [vmem:[#allocation4 + $0xc] sm:$0x3] }
0x294a   :  { %23594 = vmatmul.mubr.f32.vlgmr.msra.gmra.mrb[178].mxu1 %v17993_v21  ;;  %23561 = vmatmul.mubr.f32.vlgmr.msra.gmra.mrb[176].mxu0 %v17995_v15 }
0x294b   :  { %25114 = vmatpush3.bf16.msra.mxu0 %v27612_v28  ;;  %25132 = vmatpush3.bf16.msra.mxu1 %v27588_v54 }
0x294c   :  { %25115 = vmatprep.subr.bf16.mxu0 %v28913_v0  ;;  %25133 = vmatprep.subr.bf16.mxu1 %v28913_v0 }
0x294d   :  { %23582 = vmatprep.mubr.msk.f32.mxu0 %vm28921_vm10, %v28915_v1  ;;  %23615 = vmatprep.mubr.msk.f32.mxu1 %vm28921_vm10, %v28915_v1 }
0x294f   :  { %25117 = vmatpush3.bf16.msra.mxu0 %v27622_v6  ;;  %25135 = vmatpush3.bf16.msra.mxu1 %v27598_v22 }
0x2950   :  { %25124 = vmatprep.subr.bf16.mxu0 %v28913_v0  ;;  %25142 = vmatprep.subr.bf16.mxu1 %v28913_v0 }
0x2952   :  { %23583 = vmatmul.mubr.f32.vlgmr.msra.gmra.mrb[178].mxu0 %v17992_v46  ;;  %23616 = vmatmul.mubr.f32.vlgmr.msra.gmra.mrb[180].mxu1 %v17991_v17 }
0x2953   :  { %25126 = vmatpush3.bf16.msra.mxu0 %v27632_v47  ;;  %23604 = vmatprep.mubr.msk.f32.mxu0 %vm28921_vm10, %v28915_v1 }
0x2954   :  { %25127 = vmatprep.subr.bf16.mxu0 %v28913_v0  ;;  %25144 = vmatpush3.bf16.msra.mxu1 %v27506_v62 }
0x2955   :  { %25145 = vmatprep.subr.bf16.mxu1 %v28913_v0  ;;  %23637 = vmatprep.mubr.msk.f32.mxu1 %vm28921_vm10, %v28915_v1 }
0x2957   :  { %25129 = vmatpush3.bf16.msra.mxu0 %v27640_v63 }
0x2958   :  { %25147 = vmatpush3.bf16.msra.mxu1 %v27516_v18  ;;  %25136 = vmatprep.subr.bf16.mxu0 %v28913_v0 }
0x2959   :  { %25154 = vmatprep.subr.bf16.mxu1 %v28913_v0 }
0x295a   :  { %23605 = vmatmul.mubr.f32.vlgmr.msra.gmra.mrb[180].mxu0 %v17991_v17 }
0x295b   :  { %25138 = vmatpush3.bf16.msra.mxu0 %v27502_v59  ;;  %23626 = vmatprep.mubr.msk.f32.mxu0 %vm28921_vm10, %v28915_v1 }
0x295c   :  { %25139 = vmatprep.subr.bf16.mxu0 %v28913_v0 }
0x295f   :  { %25141 = vmatpush3.bf16.msra.mxu0 %v27512_v7 }
0x2960   :  { %25148 = vmatprep.subr.bf16.mxu0 %v28913_v0 }
0x29fd   :  { %v17571_v62 = vpop.f32.mrb[170].mxu1 }
0x29fe   :  { %v23507_v20 = vpop.f32.mrb[171].mxu1 }
0x2a05   :  { %v17728_v43 = vpop.f32.mrb[172].mxu1  ;;  %v17480_v18 = vpop.f32.mrb[170].mxu0 }
0x2a06   :  { %v17572_v55 = vadd.f32 %v17571_v62, %v17480_v18  ;;  %v23529_v37 = vpop.f32.mrb[173].mxu1  ;;  %v23496_v52 = vpop.f32.mrb[171].mxu0 }
0x2a0d   :  { %v17651_v49 = vpop.f32.mrb[172].mxu0  ;;  %v17886_v41 = vpop.f32.mrb[174].mxu1 }
0x2a0e   :  { %v17652_v38 = vadd.f32 %v17651_v49, %v17572_v55  ;;  %v23518_v14 = vpop.f32.mrb[173].mxu0  ;;  %v23551_v39 = vpop.f32.mrb[175].mxu1 }
0x2a10   :  { %v17729_v44 = vadd.f32 %v17728_v43, %v17652_v38 }
0x2a15   :  { %v17811_v48 = vpop.f32.mrb[174].mxu0  ;;  %v18088_v19 = vpop.f32.mrb[176].mxu1 }
0x2a16   :  { %v17812_v57 = vadd.f32 %v17811_v48, %v17729_v44  ;;  %v23540_v17 = vpop.f32.mrb[175].mxu0  ;;  %v23573_v46 = vpop.f32.mrb[177].mxu1 }
0x2a18   :  { %v17887_v21 = vadd.f32 %v17886_v41, %v17812_v57  ;;  %v17916_v57 = vld [vmem:[#allocation5 + $0x2] sm:$0x3] }
0x2a1a   :  { %v17890_v15 = vadd.f32 %v17887_v21, %v17399_v26 }
0x2a1c   :  { %25579 = vtanh.f32 %v17890_v15 }
0x2a1d   :  { %v18245_v20 = vpop.f32.mrb[178].mxu1  ;;  %v17997_v0 = vpop.f32.mrb[176].mxu0 }
0x2a1e   :  { %v18089_v62 = vadd.f32 %v18088_v19, %v17997_v0  ;;  %v23595_v18 = vpop.f32.mrb[179].mxu1  ;;  %v23562_v37 = vpop.f32.mrb[177].mxu0  ;;  %v20210_v0 = vmul.f32 -1.442695, %v17890_v15 }
0x2a1f   :  { %v20209_v37 = vld [vmem:[%s28894_s2 + $0x2] sm:$0x3] }
0x2a20   :  { %vm17397_vm7 = vcmp.gt.f32.partialorder %v20209_v37, 0.5 }
0x2a25   :  { %v18168_v52 = vpop.f32.mrb[178].mxu0  ;;  %v18403_v1 = vpop.f32.mrb[180].mxu1 }
0x2a26   :  { %v25580_v55 = vpop.eup %25579  ;;  %v18169_v49 = vadd.f32 %v18168_v52, %v18089_v62  ;;  %v23584_v14 = vpop.f32.mrb[179].mxu0 }
0x2a27   :  { %v23617_v43 = vpop.f32.mrb[181].mxu1  ;;  %17900 = vrot.lane.b32.xlu1 %v25580_v55, %s25837_s20  ;;  %v18444_v55 = vsel %vm17397_vm7, 1, %v25836_v4 }
0x2a28   :  { %v18246_v38 = vadd.f32 %v18245_v20, %v18169_v49  ;;  %v20208_v20 = vld [vmem:[%s28894_s2 + $0xc] sm:$0x3] }
0x2a29   :  { %vm17395_vm8 = vcmp.gt.f32.partialorder %v20208_v20, 0.5 }
0x2a2a   :  { %v18432_v15 = vsel %vm17395_vm8, 1, %v25836_v4 }
0x2a2d   :  { %v18328_v39 = vpop.f32.mrb[180].mxu0 }
0x2a2e   :  { %v18329_v44 = vadd.f32 %v18328_v39, %v18246_v38  ;;  %v23606_v41 = vpop.f32.mrb[181].mxu0  ;;  %v28479_v39 = vsel %vm17370_vm13, %v28348_v34, %v28345_v42 }
0x2a30   :  { %v18404_v48 = vadd.f32 %v18403_v1, %v18329_v44 }
0x2a32   :  { %v18407_v17 = vadd.f32 %v18404_v48, %v17916_v57 }
0x2a34   :  { %25581 = vtanh.f32 %v18407_v17  ;;  %v20211_v26 = vmul.f32 -1.442695, %v18407_v17  ;;  %v28490_v17 = vsel %vm17382_vm3, %v28359_v8, %v28356_v24 }
0x2a35   :  { %25583 = vpow2.f32 %v20210_v0 }
0x2a3e   :  { %v25582_v46 = vpop.eup %25581 }
0x2a3f   :  { %18417 = vrot.lane.b32.xlu0 %v25582_v46, %s25837_s20  ;;  %v25584_v19 = vpop.eup %25583 }
0x2a40   :  { %v17894_v21 = vadd.f32 1.0, %v25584_v19 }
0x2a42   :  { %25585 = vrcp.f32 %v17894_v21 }
0x2a43   :  { %25587 = vpow2.f32 %v20211_v26 }
0x2a4c   :  { %v25586_v62 = vpop.eup %25585 }
0x2a4d   :  { %v25588_v52 = vpop.eup %25587  ;;  %v17898_v44 = vmul.f32 %v25586_v62, %v28479_v39 }
0x2a4e   :  { %v18411_v49 = vadd.f32 1.0, %v25588_v52  ;;  %v28922_v52 = vmov 0.0  }
0x2a50   :  { %25589 = vrcp.f32 %v18411_v49  ;;  %v28923_v49 = vmov 0.0|0.0  }
0x2a5a   :  { %v25590_v14 = vpop.eup %25589 }
0x2a5b   :  { %v18415_v46 = vmul.f32 %v25590_v14, %v28490_v17 }
0x2a99   :  { %v17901_v18 = vpop.permute.xlu1 %17900 }
0x2a9a   :  { %v17903_v1 = vmul.f32 %v25586_v62, %v17901_v18 }
0x2a9c   :  { %17905 = vrot.lane.b32.xlu1 %v17903_v1, %s25828_s8 }
0x2aa0   :  { %18434 = vperm.xlu1 %25354, %v18432_v15  }
0x2aa4   :  { %18446 = vperm.xlu1 %25354, %v18444_v55  }
0x2ab1   :  { %v18418_v43 = vpop.permute.xlu0 %18417 }
0x2ab2   :  { %v18420_v38 = vmul.f32 %v25590_v14, %v18418_v43 }
0x2ab4   :  { %18422 = vrot.lane.b32.xlu0 %v18420_v38, %s25828_s8 }
0x2b0e   :  { %v17906_v41 = vpop.permute.xlu1 %17905 }
0x2b0f   :  { %v28482_v48 = vadd.f32 %v17906_v41, %v17898_v44 }
0x2b11   :  { %25591 = vtanh.f32 %v28482_v48 }
0x2b1b   :  { %v25592_v57 = vpop.eup %25591 }
0x2b1c   :  { %17911 = vrot.lane.b32.xlu0 %v25592_v57, %s25837_s20 }
0x2b1f   :  { %v28497_v19 = vpop.permute.xlu1 %18434 }
0x2b20   :  { %vm18436_vm9 = vcmp.eq.s32.totalorder %v28497_v19, 1  ;;  %v16317_v19 = vsel %vm16316_vm15, %v28244_v2, 0.0 }
0x2b23   :  { %v28510_v8 = vpop.permute.xlu1 %18446 }
0x2b24   :  { %vm18448_vm8 = vcmp.eq.s32.totalorder %v28510_v8, 1 }
0x2b26   :  { %v18423_v42 = vpop.permute.xlu0 %18422 }
0x2b27   :  { %v28493_v34 = vadd.f32 %v18423_v42, %v18415_v46 }
0x2b29   :  { %25593 = vtanh.f32 %v28493_v34 }
0x2b33   :  { %v25594_v0 = vpop.eup %25593 }
0x2b34   :  { %18428 = vrot.lane.b32.xlu0 %v25594_v0, %s25837_s20 }
0x2b8e   :  { %v17912_v21 = vpop.permute.xlu0 %17911 }
0x2b8f   :  { %v28499_v26 = vmul.f32 %v25586_v62, %v17912_v21 }
0x2b91   :  { %v28506_v24 = vsel %vm18436_vm9, %v28499_v26, %v28372_v11 }
0x2b92   :  { %18467 = vrot.lane.b32.xlu1 %v28506_v24, %s25828_s8 }
0x2ba6   :  { %v18429_v20 = vpop.permute.xlu0 %18428 }
0x2ba7   :  { %v28512_v18 = vmul.f32 %v25590_v14, %v18429_v20 }
0x2ba9   :  { %v28519_v62 = vsel %vm18448_vm8, %v28512_v18, %v28385_v40 }
0x2baa   :  { %18983 = vrot.lane.b32.xlu0 %v28519_v62, %s25828_s8 }
0x2c04   :  { %v18468_v11 = vpop.permute.xlu1 %18467 }
0x2c05   :  { %v18469_v1 = vsel %vm28917_vm5, %v18468_v11, 0 }
0x2c06   :  { %v18540_v37 = vand.u32 4294901760, %v18469_v1 }
0x2c08   :  { %v18541_v15 = vsub.f32 %v18469_v1, %v18540_v37  ;;  %23638 = vmatmul.mubr.f32.vlgmr.msra.gmra.mrb[182].mxu1 %v18540_v37 }
0x2c09   :  { %25156 = vmatpush3.bf16.msra.mxu1 %v27502_v59  ;;  %23659 = vmatprep.mubr.msk.f32.mxu1 %vm28921_vm10, %v28922_v52 }
0x2c0a   :  { %v18542_v55 = vand.u32 4294901760, %v18541_v15  ;;  %25157 = vmatprep.subr.bf16.mxu1 %v28923_v49 }
0x2c0c   :  { %v18543_v14 = vsub.f32 %v18541_v15, %v18542_v55 }
0x2c0d   :  { %25159 = vmatpush3.bf16.msra.mxu1 %v27512_v7 }
0x2c0e   :  { %v18544_v40 = vand.u32 4294901760, %v18543_v14  ;;  %25166 = vmatprep.subr.bf16.mxu1 %v28923_v49 }
0x2c10   :  { %23660 = vmatmul.mubr.f32.vlgmr.msra.gmra.mrb[184].mxu1 %v18542_v55  ;;  %23627 = vmatmul.mubr.f32.vlgmr.msra.gmra.mrb[182].mxu0 %v18544_v40 }
0x2c11   :  { %25150 = vmatpush3.bf16.msra.mxu0 %v27526_v32  ;;  %25168 = vmatpush3.bf16.msra.mxu1 %v27502_v59 }
0x2c12   :  { %25151 = vmatprep.subr.bf16.mxu0 %v28923_v49  ;;  %25169 = vmatprep.subr.bf16.mxu1 %v28923_v49 }
0x2c13   :  { %23648 = vmatprep.mubr.msk.f32.mxu0 %vm28921_vm10, %v28922_v52  ;;  %23681 = vmatprep.mubr.msk.f32.mxu1 %vm28921_vm10, %v28922_v52 }
0x2c15   :  { %25153 = vmatpush3.bf16.msra.mxu0 %v27540_v51  ;;  %25171 = vmatpush3.bf16.msra.mxu1 %v27512_v7 }
0x2c16   :  { %25160 = vmatprep.subr.bf16.mxu0 %v28923_v49  ;;  %25178 = vmatprep.subr.bf16.mxu1 %v28923_v49 }
0x2c18   :  { %23649 = vmatmul.mubr.f32.vlgmr.msra.gmra.mrb[184].mxu0 %v18541_v15  ;;  %23682 = vmatmul.mubr.f32.vlgmr.msra.gmra.mrb[186].mxu1 %v18540_v37 }
0x2c19   :  { %25162 = vmatpush3.bf16.msra.mxu0 %v27560_v30  ;;  %25180 = vmatpush3.bf16.msra.mxu1 %v27592_v56 }
0x2c1a   :  { %25163 = vmatprep.subr.bf16.mxu0 %v28923_v49  ;;  %25181 = vmatprep.subr.bf16.mxu1 %v28923_v49 }
0x2c1b   :  { %23670 = vmatprep.mubr.msk.f32.mxu0 %vm28921_vm10, %v28922_v52  ;;  %23703 = vmatprep.mubr.msk.f32.mxu1 %vm28921_vm10, %v28922_v52 }
0x2c1c   :  { %v18984_v59 = vpop.permute.xlu0 %18983 }
0x2c1d   :  { %25165 = vmatpush3.bf16.msra.mxu0 %v27576_v33  ;;  %25183 = vmatpush3.bf16.msra.mxu1 %v27602_v27  ;;  %v18985_v7 = vsel %vm28917_vm5, %v18984_v59, 0 }
0x2c1e   :  { %v19056_v32 = vand.u32 4294901760, %v18985_v7  ;;  %25172 = vmatprep.subr.bf16.mxu0 %v28923_v49  ;;  %25190 = vmatprep.subr.bf16.mxu1 %v28923_v49 }
0x2c20   :  { %v19057_v51 = vsub.f32 %v18985_v7, %v19056_v32  ;;  %23671 = vmatmul.mubr.f32.vlgmr.msra.gmra.mrb[186].mxu0 %v18540_v37  ;;  %23704 = vmatmul.mubr.f32.vlgmr.msra.gmra.mrb[188].mxu1 %v19056_v32  ;;  %v18465_v37 = vld [vmem:[#allocation4 + $0xe] sm:$0x3] }
0x2c21   :  { %25174 = vmatpush3.bf16.msra.mxu0 %v27588_v54  ;;  %25192 = vmatpush3.bf16.msra.mxu1 %v27588_v54 }
0x2c22   :  { %v19058_v30 = vand.u32 4294901760, %v19057_v51  ;;  %25175 = vmatprep.subr.bf16.mxu0 %v28923_v49  ;;  %25193 = vmatprep.subr.bf16.mxu1 %v28923_v49 }
0x2c23   :  { %23725 = vmatprep.mubr.msk.f32.mxu1 %vm28921_vm10, %v28922_v52  ;;  %23692 = vmatprep.mubr.msk.f32.mxu0 %vm28921_vm10, %v28922_v52 }
0x2c24   :  { %v19059_v33 = vsub.f32 %v19057_v51, %v19058_v30 }
0x2c25   :  { %25177 = vmatpush3.bf16.msra.mxu0 %v27598_v22  ;;  %25195 = vmatpush3.bf16.msra.mxu1 %v27598_v22 }
0x2c26   :  { %v19060_v56 = vand.u32 4294901760, %v19059_v33  ;;  %25184 = vmatprep.subr.bf16.mxu0 %v28923_v49  ;;  %25202 = vmatprep.subr.bf16.mxu1 %v28923_v49 }
0x2c28   :  { %23726 = vmatmul.mubr.f32.vlgmr.msra.gmra.mrb[190].mxu1 %v19058_v30  ;;  %23693 = vmatmul.mubr.f32.vlgmr.msra.gmra.mrb[188].mxu0 %v19060_v56 }
0x2c29   :  { %25186 = vmatpush3.bf16.msra.mxu0 %v27612_v28  ;;  %25204 = vmatpush3.bf16.msra.mxu1 %v27588_v54 }
0x2c2a   :  { %25187 = vmatprep.subr.bf16.mxu0 %v28923_v49  ;;  %25205 = vmatprep.subr.bf16.mxu1 %v28923_v49 }
0x2c2b   :  { %23714 = vmatprep.mubr.msk.f32.mxu0 %vm28921_vm10, %v28922_v52  ;;  %23747 = vmatprep.mubr.msk.f32.mxu1 %vm28921_vm10, %v28922_v52 }
0x2c2d   :  { %25189 = vmatpush3.bf16.msra.mxu0 %v27622_v6  ;;  %25207 = vmatpush3.bf16.msra.mxu1 %v27598_v22 }
0x2c2e   :  { %25196 = vmatprep.subr.bf16.mxu0 %v28923_v49  ;;  %25208 = vmatprep.subr.bf16.mxu1 %v28923_v49 }
0x2c30   :  { %23715 = vmatmul.mubr.f32.vlgmr.msra.gmra.mrb[190].mxu0 %v19057_v51  ;;  %23748 = vmatmul.mubr.f32.vlgmr.msra.gmra.mrb[192].mxu1 %v19056_v32 }
0x2c31   :  { %25198 = vmatpush3.bf16.msra.mxu0 %v27632_v47  ;;  %23736 = vmatprep.mubr.msk.f32.mxu0 %vm28921_vm10, %v28922_v52 }
0x2c32   :  { %25199 = vmatprep.subr.bf16.mxu0 %v28923_v49  ;;  %23766 = vmatprep.mubr.msk.f32.mxu1 %vm28921_vm10, %v28922_v52 }
0x2c35   :  { %25201 = vmatpush3.bf16.msra.mxu0 %v27640_v63 }
0x2c36   :  { %25244 = vmatprep.subr.bf16.mxu0 %v28923_v49 }
0x2c38   :  { %23737 = vmatmul.mubr.f32.vlgmr.msra.gmra.mrb[192].mxu0 %v19056_v32 }
0x2c39   :  { %23823 = vmatprep.mubr.msk.f32.mxu0 %vm28921_vm10, %v28922_v52 }
0x2cdb   :  { %v18637_v54 = vpop.f32.mrb[182].mxu1 }
0x2cdc   :  { %v23639_v22 = vpop.f32.mrb[183].mxu1 }
0x2ce3   :  { %v18794_v27 = vpop.f32.mrb[184].mxu1  ;;  %v18546_v28 = vpop.f32.mrb[182].mxu0 }
0x2ce4   :  { %v18638_v6 = vadd.f32 %v18637_v54, %v18546_v28  ;;  %v23661_v47 = vpop.f32.mrb[185].mxu1  ;;  %v23628_v43 = vpop.f32.mrb[183].mxu0 }
0x2ce5   :  { %v18981_v43 = vld [vmem:[#allocation5] sm:$0x3] }
0x2ceb   :  { %v18717_v38 = vpop.f32.mrb[184].mxu0  ;;  %v18952_v44 = vpop.f32.mrb[186].mxu1 }
0x2cec   :  { %v18718_v41 = vadd.f32 %v18717_v38, %v18638_v6  ;;  %v23650_v57 = vpop.f32.mrb[185].mxu0  ;;  %v23683_v46 = vpop.f32.mrb[187].mxu1 }
0x2cee   :  { %v18795_v42 = vadd.f32 %v18794_v27, %v18718_v41 }
0x2cf3   :  { %v18877_v63 = vpop.f32.mrb[186].mxu0  ;;  %v19153_v0 = vpop.f32.mrb[188].mxu1 }
0x2cf4   :  { %v18878_v21 = vadd.f32 %v18877_v63, %v18795_v42  ;;  %v23672_v20 = vpop.f32.mrb[187].mxu0  ;;  %v23705_v11 = vpop.f32.mrb[189].mxu1  ;;  %v20212_v63 = vld [vmem:[%s28894_s2 + $0xe] sm:$0x3] }
0x2cf5   :  { %vm18461_vm7 = vcmp.gt.f32.partialorder %v20212_v63, 0.5 }
0x2cf6   :  { %v18953_v1 = vadd.f32 %v18952_v44, %v18878_v21  ;;  %v19497_v11 = vsel %vm18461_vm7, 1, %v25836_v4 }
0x2cf8   :  { %v18956_v15 = vadd.f32 %v18953_v1, %v18465_v37 }
0x2cfa   :  { %25595 = vtanh.f32 %v18956_v15  ;;  %v20213_v41 = vmul.f32 -1.442695, %v18956_v15  ;;  %v18462_v15 = vld [vmem:[%s28894_s2] sm:$0x3] }
0x2cfb   :  { %v19310_v55 = vpop.f32.mrb[190].mxu1  ;;  %v19062_v14 = vpop.f32.mrb[188].mxu0  ;;  %vm18463_vm5 = vcmp.gt.f32.partialorder %v18462_v15, 0.5 }
0x2cfc   :  { %v19154_v40 = vadd.f32 %v19153_v0, %v19062_v14  ;;  %v23727_v59 = vpop.f32.mrb[191].mxu1  ;;  %v23694_v7 = vpop.f32.mrb[189].mxu0 }
0x2cfd   :  { %v19509_v59 = vsel %vm18463_vm5, 1, %v25836_v4  ;;  %v18457_v7 = vsel %vm18436_vm9, %v28482_v48, %v28479_v39 }
0x2d03   :  { %v19233_v32 = vpop.f32.mrb[190].mxu0  ;;  %v19468_v51 = vpop.f32.mrb[192].mxu1 }
0x2d04   :  { %v25596_v30 = vpop.eup %25595  ;;  %v19234_v33 = vadd.f32 %v19233_v32, %v19154_v40  ;;  %v23716_v56 = vpop.f32.mrb[191].mxu0 }
0x2d05   :  { %v23749_v54 = vpop.f32.mrb[193].mxu1  ;;  %18966 = vrot.lane.b32.xlu1 %v25596_v30, %s25837_s20  ;;  %v18459_v56 = vsel %vm18448_vm8, %v28493_v34, %v28490_v17  ;;  %v19532_v17 = vld [vmem:[%s28904_s12 + $0x8] sm:$0xff] }
0x2d06   :  { %v19311_v22 = vadd.f32 %v19310_v55, %v19234_v33 }
0x2d0b   :  { %v19393_v27 = vpop.f32.mrb[192].mxu0 }
0x2d0c   :  { %v19394_v28 = vadd.f32 %v19393_v27, %v19311_v22  ;;  %v23738_v6 = vpop.f32.mrb[193].mxu0 }
0x2d0d   :  { %v19531_v6 = vld [vmem:[%s28904_s12] sm:$0xff] }
0x2d0e   :  { %v19469_v47 = vadd.f32 %v19468_v51, %v19394_v28 }
0x2d10   :  { %v19472_v38 = vadd.f32 %v19469_v47, %v18981_v43  ;;  %v19551_v47 = vand.u32 4294901760, %v19531_v6  ;;  %v19554_v43 = vand.u32 4294901760, %v19532_v17 }
0x2d12   :  { %25597 = vtanh.f32 %v19472_v38  ;;  %v20214_v42 = vmul.f32 -1.442695, %v19472_v38  ;;  %v28631_v38 = vpack.c.bf16 %v19554_v43, %v19551_v47 }
0x2d13   :  { %25599 = vpow2.f32 %v20213_v41  ;;  %v19533_v41 = vld [vmem:[%s28904_s12 + $0x10] sm:$0xff] }
0x2d14   :  { %25246 = vmatpush3.bf16.msra.mxu0 %v28631_v38  ;;  %25210 = vmatpush3.bf16.msra.mxu1 %v28631_v38 }
0x2d15   :  { %25247 = vmatprep.subr.bf16.mxu0 %v28923_v49  ;;  %25211 = vmatprep.subr.bf16.mxu1 %v28923_v49 }
0x2d1c   :  { %v25598_v44 = vpop.eup %25597 }
0x2d1d   :  { %19482 = vrot.lane.b32.xlu0 %v25598_v44, %s25837_s20  ;;  %v25600_v57 = vpop.eup %25599  ;;  %v13119_v44 = vsel %vm13118_vm4, %v27842_v60, 0.0  ;;  %v19535_v60 = vld [vmem:[%s28904_s12 + $0x20] sm:$0xff] }
0x2d1e   :  { %v18960_v46 = vadd.f32 1.0, %v25600_v57  ;;  %v19534_v57 = vld [vmem:[%s28904_s12 + $0x18] sm:$0xff] }
0x2d1f   :  { %v19560_v63 = vand.u32 4294901760, %v19534_v57 }
0x2d20   :  { %25601 = vrcp.f32 %v18960_v46  ;;  %v28642_v46 = vsub.f32 %v19531_v6, %v19551_v47 }
0x2d21   :  { %25603 = vpow2.f32 %v20214_v42  ;;  %v19557_v42 = vand.u32 4294901760, %v19533_v41 }
0x2d23   :  { %v28650_v16 = vpack.c.bf16 %v19560_v63, %v19557_v42 }
0x2d25   :  { %25249 = vmatpush3.bf16.msra.mxu0 %v28650_v16  ;;  %25213 = vmatpush3.bf16.msra.mxu1 %v28650_v16 }
0x2d26   :  { %25250 = vmatprep.subr.bf16.mxu0 %v28923_v49  ;;  %25214 = vmatprep.subr.bf16.mxu1 %v28923_v49 }
0x2d2a   :  { %v25602_v0 = vpop.eup %25601 }
0x2d2b   :  { %v25604_v1 = vpop.eup %25603  ;;  %v18964_v32 = vmul.f32 %v25602_v0, %v18457_v7 }
0x2d2c   :  { %v19476_v37 = vadd.f32 1.0, %v25604_v1  ;;  %v19563_v1 = vand.u32 4294901760, %v19535_v60 }
0x2d2e   :  { %25605 = vrcp.f32 %v19476_v37  ;;  %v28692_v12 = vsub.f32 %v19535_v60, %v19563_v1 }
0x2d30   :  { %v19664_v60 = vand.u32 4294901760, %v28692_v12 }
0x2d38   :  { %v28599_v55 = vpop.eup %25605 }
0x2d39   :  { %v19480_v4 = vmul.f32 %v28599_v55, %v18459_v56  ;;  %v19636_v56 = vand.u32 4294901760, %v28642_v46 }
0x2d77   :  { %v18967_v21 = vpop.permute.xlu1 %18966 }
0x2d78   :  { %v18969_v20 = vmul.f32 %v25602_v0, %v18967_v21  ;;  %v15251_v21 = vsel %vm15250_vm2, %v28110_v61, 0.0  ;;  %v19538_v61 = vld [vmem:[%s28904_s12 + $0x38] sm:$0xff] }
0x2d7a   :  { %18971 = vrot.lane.b32.xlu1 %v18969_v20, %s25828_s8  ;;  %v28662_v20 = vsub.f32 %v19533_v41, %v19557_v42 }
0x2d7e   :  { %19499 = vperm.xlu1 %25354, %v19497_v11   ;;  %v28664_v11 = vsub.f32 %v19534_v57, %v19560_v63 }
0x2d80   :  { %v25236_v2 = vpack.c.bf16 %v28664_v11, %v28662_v20 }
0x2d8f   :  { %v19483_v14 = vpop.permute.xlu0 %19482 }
0x2d90   :  { %v19485_v40 = vmul.f32 %v28599_v55, %v19483_v14  ;;  %v17383_v14 = vsel %vm17382_vm3, %v28378_v5, 0.0 }
0x2d92   :  { %19487 = vrot.lane.b32.xlu0 %v19485_v40, %s25828_s8  ;;  %v19569_v40 = vand.u32 4294901760, %v19537_v29 }
0x2d96   :  { %19511 = vperm.xlu0 %25353, %v19509_v59   ;;  %v19572_v59 = vand.u32 4294901760, %v19538_v61 }
0x2d98   :  { %v28686_v7 = vpack.c.bf16 %v19572_v59, %v19569_v40 }
0x2dec   :  { %v18972_v51 = vpop.permute.xlu1 %18971 }
0x2ded   :  { %v18974_v30 = vadd.f32 %v18972_v51, %v18964_v32  ;;  %v14173_v32 = vsel %vm14172_vm12, %v27963_v31, 0.0  ;;  %v28696_v51 = vsub.f32 %v19537_v29, %v19569_v40  ;;  %v18437_v29 = vsel %vm18436_vm9, %v28499_v26, 0.0 }
0x2dee   :  { %vm28924_vm12 = vcmask 261120  }
0x2def   :  { %25607 = vtanh.f32 %v18974_v30  ;;  %v28698_v30 = vsub.f32 %v19538_v61, %v19572_v59  ;;  %v19678_v40 = vand.u32 4294901760, %v28696_v51 }
0x2df1   :  { %v19685_v59 = vand.u32 4294901760, %v28698_v30  ;;  %v19679_v25 = vsub.f32 %v28696_v51, %v19678_v40  ;;  %v25242_v58 = vpack.c.bf16 %v28698_v30, %v28696_v51 }
0x2df3   :  { %v19680_v26 = vand.u32 4294901760, %v19679_v25 }
0x2df9   :  { %v25608_v33 = vpop.eup %25607 }
0x2dfa   :  { %18977 = vrot.lane.b32.xlu1 %v25608_v33, %s25837_s20 }
0x2dfd   :  { %v28615_v39 = vpop.permute.xlu1 %19499 }
0x2dfe   :  { %vm19501_vm5 = vcmp.eq.s32.totalorder %v28615_v39, 1 }
0x2e04   :  { %v19488_v54 = vpop.permute.xlu0 %19487 }
0x2e05   :  { %v19490_v22 = vadd.f32 %v19488_v54, %v19480_v4  ;;  %v19637_v4 = vsub.f32 %v28642_v46, %v19636_v56 }
0x2e07   :  { %25609 = vtanh.f32 %v19490_v22  ;;  %v16305_v22 = vsel %vm16304_vm11, %v28231_v36, 0.0 }
0x2e11   :  { %v25610_v27 = vpop.eup %25609 }
0x2e12   :  { %19493 = vrot.lane.b32.xlu0 %v25610_v27, %s25837_s20 }
0x2e15   :  { %v19512_v33 = vpop.permute.xlu0 %19511 }
0x2e16   :  { %vm19513_vm4 = vcmp.eq.s32.totalorder %v19512_v33, 1  ;;  %v28747_v33 = vpack.c.bf16 %v19685_v59, %v19678_v40 }
0x2e6c   :  { %v18978_v48 = vpop.permute.xlu1 %18977 }
0x2e6d   :  { %v28617_v28 = vmul.f32 %v25602_v0, %v18978_v48  ;;  %v19536_v0 = vld [vmem:[%s28904_s12 + $0x28] sm:$0xff]  ;;  %v19638_v48 = vand.u32 4294901760, %v19637_v4  ;;  %v18449_v4 = vsel %vm18448_vm8, %v28512_v18, 0.0  ;;  %v17371_v18 = vsel %vm17370_vm13, %v28365_v3, 0.0  ;;  %s25839_s12 = smov [#allocation18]  }
0x2e6e   :  { %v19566_v37 = vand.u32 4294901760, %v19536_v0 }
0x2e6f   :  { %v19520_v34 = vsel %vm19501_vm5, %v28617_v28, %v28506_v24  ;;  %v28644_v24 = vsub.f32 %v19532_v17, %v19554_v43  ;;  %v19650_v17 = vand.u32 4294901760, %v28662_v20  ;;  %v19502_v50 = vsel %vm19501_vm5, %v28617_v28, 0.0 }
0x2e70   :  { %19523 = vrot.lane.b32.xlu1 %v19520_v34, %s25828_s8  ;;  %v28671_v15 = vpack.c.bf16 %v19566_v37, %v19563_v1  ;;  %v28694_v5 = vsub.f32 %v19536_v0, %v19566_v37  ;;  %v19657_v34 = vand.u32 4294901760, %v28664_v11  ;;  %v19665_v1 = vsub.f32 %v28692_v12, %v19664_v60 }
0x2e71   :  { %v19643_v53 = vand.u32 4294901760, %v28644_v24  ;;  %v19651_v41 = vsub.f32 %v28662_v20, %v19650_v17 }
0x2e72   :  { %25252 = vmatpush3.bf16.msra.mxu0 %v28671_v15  ;;  %25216 = vmatpush3.bf16.msra.mxu1 %v28671_v15  ;;  %v19658_v23 = vsub.f32 %v28664_v11, %v19657_v34  ;;  %v19666_v61 = vand.u32 4294901760, %v19665_v1  ;;  %v25239_v8 = vpack.c.bf16 %v28694_v5, %v28692_v12 }
0x2e73   :  { %25253 = vmatprep.subr.bf16.mxu0 %v28923_v49  ;;  %25217 = vmatprep.subr.bf16.mxu1 %v28923_v49  ;;  %v28706_v31 = vpack.c.bf16 %v19643_v53, %v19636_v56  ;;  %v19644_v54 = vsub.f32 %v28644_v24, %v19643_v53  ;;  %v19652_v42 = vand.u32 4294901760, %v19651_v41 }
0x2e74   :  { %13121 = vrot.lane.b32.xlu1 %v13119_v44, %s25828_s8  ;;  %v28720_v44 = vpack.c.bf16 %v19657_v34, %v19650_v17  ;;  %v19659_v63 = vand.u32 4294901760, %v19658_v23 }
0x2e75   :  { %v19645_v6 = vand.u32 4294901760, %v19644_v54  ;;  %v25233_v54 = vpack.c.bf16 %v28644_v24, %v28642_v46 }
0x2e76   :  { %25255 = vmatpush3.bf16.msra.mxu0 %v28686_v7  ;;  %25219 = vmatpush3.bf16.msra.mxu1 %v28686_v7  ;;  %v28729_v0 = vpack.c.bf16 %v19659_v63, %v19652_v42 }
0x2e77   :  { %25256 = vmatprep.subr.bf16.mxu0 %v28923_v49  ;;  %25220 = vmatprep.subr.bf16.mxu1 %v28923_v49  ;;  %v28718_v43 = vpack.c.bf16 %v19645_v6, %v19638_v48 }
0x2e78   :  { %15253 = vrot.lane.b32.xlu1 %v15251_v21, %s25828_s8 }
0x2e7c   :  { %17385 = vrot.lane.b32.xlu1 %v17383_v14, %s25828_s8 }
0x2e80   :  { %14175 = vrot.lane.b32.xlu1 %v14173_v32, %s25828_s8 }
0x2e84   :  { %v19494_v27 = vpop.permute.xlu0 %19493  ;;  %16307 = vrot.lane.b32.xlu1 %v16305_v22, %s25828_s8  ;;  %v15239_v22 = vsel %vm15238_vm14, %v28097_v45, 0.0 }
0x2e85   :  { %v19496_v47 = vmul.f32 %v28599_v55, %v19494_v27  ;;  %v19671_v55 = vand.u32 4294901760, %v28694_v5 }
0x2e87   :  { %v19521_v36 = vsel %vm19513_vm4, %v19496_v47, %v28519_v62  ;;  %v19514_v57 = vsel %vm19513_vm4, %v19496_v47, 0.0  ;;  %v28731_v21 = vpack.c.bf16 %v19671_v55, %v19664_v60  ;;  %v19672_v37 = vsub.f32 %v28694_v5, %v19671_v55 }
0x2e88   :  { %19527 = vrot.lane.b32.xlu0 %v19521_v36, %s25837_s20  ;;  %19516 = vrot.lane.b32.xlu1 %v19514_v57, %s25828_s8  ;;  %v14185_v62 = vsel %vm14184_vm0, %v27976_v10, 0.0  ;;  %v19686_v10 = vsub.f32 %v28698_v30, %v19685_v59  ;;  %s20106_s20 = sshll.u32 %s25839_s12, 4  ;;  %s20107_s20 = int_to_ptr.vmem [resolvable:$true] %s20106_s20 }
0x2e89   :  { %v19673_v14 = vand.u32 4294901760, %v19672_v37  ;;  %s25745_s4 = scalar_lea.vmem %s20107_s20, 256  ;;  %p25750_p7 = scmp.lt.s32.totalorder %s20107_s20, %s20107_s20 }
0x2e8a   :  { %v19687_v56 = vand.u32 4294901760, %v19686_v10  ;;  %p25746_p6 = scmp.ne.s32.totalorder %s20107_s20, %s25745_s4  ;;  %p25751_p8 = scmp.lt.s32.totalorder %s25745_s4, %s25745_s4 }
0x2e8b   :  { %v28745_v32 = vpack.c.bf16 %v19673_v14, %v19666_v61 }
0x2e8c   :  { %14187 = vrot.lane.b32.xlu0 %v14185_v62, %s25828_s8  ;;  %18439 = vrot.lane.b32.xlu1 %v18437_v29, %s25828_s8  ;;  %v28755_v53 = vpack.c.bf16 %v19687_v56, %v19680_v26  ;;  %p25752_p9 = por %p25751_p8, %p25750_p7 }
0x2e8e   :  { %p25753_p10 = pnand %p25752_p9, %p25746_p6 }
0x2e90   :  { %16319 = vrot.lane.b32.xlu0 %v16317_v19, %s25828_s8 }
0x2e94   :  { %18451 = vrot.lane.b32.xlu0 %v18449_v4, %s25828_s8 }
0x2e98   :  { %13109 = vrot.lane.b32.xlu0 %v13107_v13, %s25828_s8 }
0x2e9c   :  { %15241 = vrot.lane.b32.xlu0 %v15239_v22, %s25828_s8 }
0x2ea0   :  { %17373 = vrot.lane.b32.xlu0 %v17371_v18, %s25828_s8 }
0x2ea4   :  { %19504 = vrot.lane.b32.xlu0 %v19502_v50, %s25828_s8 }
0x2ee2   :  { %v19524_v35 = vpop.permute.xlu1 %19523 }
0x2ee6   :  { %v13122_v45 = vpop.permute.xlu1 %13121 }
0x2ee7   :  { %13125 = vst.msk [vmem:[#allocation18 + $0xc] sm:$0x3] %vm1184_vm6, %v13122_v45 }
0x2eea   :  { %v15254_v27 = vpop.permute.xlu1 %15253 }
0x2eeb   :  { %15257 = vst.msk [vmem:[#allocation18 + $0x8] sm:$0x3] %vm1184_vm6, %v15254_v27 }
0x2eee   :  { %v17386_v9 = vpop.permute.xlu1 %17385 }
0x2eef   :  { %17389 = vst.msk [vmem:[#allocation18 + $0x4] sm:$0x3] %vm1184_vm6, %v17386_v9 }
0x2ef2   :  { %v14176_v3 = vpop.permute.xlu1 %14175 }
0x2ef3   :  { %14179 = vst.msk [vmem:[#allocation17 + $0x4] sm:$0x3] %vm1184_vm6, %v14176_v3 }
0x2ef6   :  { %v16308_v48 = vpop.permute.xlu1 %16307 }
0x2ef7   :  { %16311 = vst.msk [vmem:[#allocation17 + $0x8] sm:$0x3] %vm1184_vm6, %v16308_v48 }
0x2efa   :  { %v19528_v39 = vpop.permute.xlu0 %19527  ;;  %v19517_v28 = vpop.permute.xlu1 %19516 }
0x2efb   :  { %v19530_v6 = vsel %vm28924_vm12, %v19524_v35, %v19528_v39  ;;  %19519 = vst.msk [vmem:[#allocation18] sm:$0x3] %vm1184_vm6, %v19517_v28 }
0x2efc   :  { %v19548_v17 = vsel %vm19546_vm1, %v19530_v6, 0 }
0x2efd   :  { %v19623_v34 = vand.u32 4294901760, %v19548_v17 }
0x2efe   :  { %v14188_v47 = vpop.permute.xlu0 %14187  ;;  %v18440_v41 = vpop.permute.xlu1 %18439 }
0x2eff   :  { %v19624_v23 = vsub.f32 %v19548_v17, %v19623_v34  ;;  %14191 = vst.msk [vmem:[#allocation18 + $0xa] sm:$0x3] %vm1184_vm6, %v14188_v47  ;;  %18443 = vst.msk [vmem:[#allocation17 + $0xc] sm:$0x3] %vm1184_vm6, %v18440_v41 }
0x2f01   :  { %v19625_v36 = vand.u32 4294901760, %v19624_v23 }
0x2f02   :  { %v16320_v57 = vpop.permute.xlu0 %16319 }
0x2f03   :  { %16323 = vst.msk [vmem:[#allocation18 + $0x6] sm:$0x3] %vm1184_vm6, %v16320_v57  ;;  %23824 = vmatmul.mubr.f32.vlgmr.msra.gmra.mrb[194].mxu0 %v19625_v36  ;;  %v19626_v42 = vsub.f32 %v19624_v23, %v19625_v36 }
0x2f04   :  { %25258 = vmatpush3.bf16.msra.mxu0 %v28706_v31  ;;  %23842 = vmatprep.mubr.msk.f32.mxu0 %vm28921_vm10, %v28922_v52 }
0x2f05   :  { %25259 = vmatprep.subr.bf16.mxu0 %v28923_v49  ;;  %v19627_v63 = vand.u32 4294901760, %v19626_v42 }
0x2f06   :  { %v18452_v60 = vpop.permute.xlu0 %18451 }
0x2f07   :  { %18455 = vst.msk [vmem:[#allocation18 + $0x2] sm:$0x3] %vm1184_vm6, %v18452_v60  ;;  %23767 = vmatmul.mubr.f32.vlgmr.msra.gmra.mrb[194].mxu1 %v19627_v63 }
0x2f08   :  { %25222 = vmatpush3.bf16.msra.mxu1 %v28718_v43  ;;  %25261 = vmatpush3.bf16.msra.mxu0 %v28720_v44 }
0x2f09   :  { %25223 = vmatprep.subr.bf16.mxu1 %v28923_v49  ;;  %25262 = vmatprep.subr.bf16.mxu0 %v28923_v49 }
0x2f0a   :  { %v13110_v55 = vpop.permute.xlu0 %13109  ;;  %23785 = vmatprep.mubr.msk.f32.mxu1 %vm28921_vm10, %v28922_v52 }
0x2f0b   :  { %13113 = vst.msk [vmem:[#allocation17 + $0x2] sm:$0x3] %vm1184_vm6, %v13110_v55 }
0x2f0c   :  { %25225 = vmatpush3.bf16.msra.mxu1 %v28729_v0  ;;  %25264 = vmatpush3.bf16.msra.mxu0 %v28731_v21 }
0x2f0d   :  { %25226 = vmatprep.subr.bf16.mxu1 %v28923_v49  ;;  %25265 = vmatprep.subr.bf16.mxu0 %v28923_v49 }
0x2f0e   :  { %v15242_v31 = vpop.permute.xlu0 %15241 }
0x2f0f   :  { %15245 = vst.msk [vmem:[#allocation17 + $0x6] sm:$0x3] %vm1184_vm6, %v15242_v31 }
0x2f10   :  { %25228 = vmatpush3.bf16.msra.mxu1 %v28745_v32  ;;  %25267 = vmatpush3.bf16.msra.mxu0 %v28747_v33 }
0x2f11   :  { %25229 = vmatprep.subr.bf16.mxu1 %v28923_v49  ;;  %25268 = vmatprep.subr.bf16.mxu0 %v28923_v49 }
0x2f12   :  { %v17374_v43 = vpop.permute.xlu0 %17373 }
0x2f13   :  { %23843 = vmatmul.mubr.f32.vlgmr.msra.gmra.mrb[194].mxu0 %v19623_v34  ;;  %17377 = vst.msk [vmem:[#allocation17 + $0xa] sm:$0x3] %vm1184_vm6, %v17374_v43 }
0x2f14   :  { %25231 = vmatpush3.bf16.msra.mxu1 %v28755_v53  ;;  %25270 = vmatpush3.bf16.msra.mxu0 %v28631_v38 }
0x2f15   :  { %25232 = vmatprep.subr.bf16.mxu1 %v28923_v49  ;;  %25271 = vmatprep.subr.bf16.mxu0 %v28923_v49 }
0x2f16   :  { %v19505_v44 = vpop.permute.xlu0 %19504  ;;  %23861 = vmatprep.mubr.msk.f32.mxu0 %vm28921_vm10, %v28922_v52 }
0x2f17   :  { %23786 = vmatmul.mubr.f32.vlgmr.msra.gmra.mrb[194].mxu1 %v19623_v34  ;;  %19508 = vst.msk [vmem:[#allocation17 + $0xe] sm:$0x3] %vm1184_vm6, %v19505_v44 }
0x2f18   :  { %25234 = vmatpush3.bf16.msra.mxu1 %v25233_v54  ;;  %25273 = vmatpush3.bf16.msra.mxu0 %v28650_v16 }
0x2f19   :  { %25235 = vmatprep.subr.bf16.mxu1 %v28923_v49  ;;  %25274 = vmatprep.subr.bf16.mxu0 %v28923_v49 }
0x2f1a   :  { %23804 = vmatprep.mubr.msk.f32.mxu1 %vm28921_vm10, %v28922_v52 }
0x2f1c   :  { %25237 = vmatpush3.bf16.msra.mxu1 %v25236_v2  ;;  %25276 = vmatpush3.bf16.msra.mxu0 %v28671_v15 }
0x2f1d   :  { %25238 = vmatprep.subr.bf16.mxu1 %v28923_v49  ;;  %25277 = vmatprep.subr.bf16.mxu0 %v28923_v49 }
0x2f20   :  { %25240 = vmatpush3.bf16.msra.mxu1 %v25239_v8  ;;  %25279 = vmatpush3.bf16.msra.mxu0 %v28686_v7 }
0x2f21   :  { %25241 = vmatprep.subr.bf16.mxu1 %v28923_v49 }
0x2f23   :  { %23862 = vmatmul.mubr.f32.vlgmr.msra.gmra.mrb[194].mxu0 %v19623_v34 }
0x2f24   :  { %25243 = vmatpush3.bf16.msra.mxu1 %v25242_v58 }
0x2f27   :  { %23805 = vmatmul.mubr.f32.vlgmr.msra.gmra.mrb[194].mxu1 %v19624_v23 }
0x2f28   :  { %25756 = shalt.err (!%p25753_p10)
}
0x2f29   :  { %s25757_s19 = scalar_lea.hbm %s28907_s15, 256 }
0x2f2a   :  { %p25758_p11 = scmp.ne.s32.totalorder %s28907_s15, %s25757_s19  ;;  %p25761_p12 = scmp.lt.u32.totalorder %s25757_s19, %s28907_s15 }
0x2f2c   :  { %p25763_p13 = pnand %p25761_p12, %p25758_p11 }
0x2f2e   :  { %25766 = shalt.err (!%p25763_p13)
}
0x2f2f   :  { %20112 = dma.vmem_to_hbm [thread:$0]  %s20107_s20, 256, %s28907_s15, [#allocation19], %s25828_s8, %s25828_s8, %s25829_s21  }
0x2f30   :  { %s25767_s25 = scalar_lea.vmem %s20095_s6, 256  ;;  %p25772_p1 = scmp.lt.s32.totalorder %s20095_s6, %s20095_s6 }
0x2f31   :  { %p25768_p0 = scmp.ne.s32.totalorder %s20095_s6, %s25767_s25  ;;  %p25773_p2 = scmp.lt.s32.totalorder %s25767_s25, %s25767_s25 }
0x2f33   :  { %p25774_p3 = por %p25773_p2, %p25772_p1 }
0x2f35   :  { %p25775_p4 = pnand %p25774_p3, %p25768_p0 }
0x2f37   :  { %25778 = shalt.err (!%p25775_p4)
}
0x2f38   :  { %s25779_s22 = scalar_lea.hbm %s28906_s14, 256 }
0x2f39   :  { %p25780_p5 = scmp.ne.s32.totalorder %s28906_s14, %s25779_s22  ;;  %p25783_p6 = scmp.lt.u32.totalorder %s25779_s22, %s28906_s14 }
0x2f3b   :  { %p25785_p7 = pnand %p25783_p6, %p25780_p5 }
0x2f3d   :  { %25788 = shalt.err (!%p25785_p7)
}
0x2f3e   :  { %20100 = dma.vmem_to_hbm [thread:$0]  %s20095_s6, 256, %s28906_s14, [#allocation8], %s25828_s8, %s25828_s8, %s25829_s21  }
0x2f3f   :  { %v20215_v38 = vld [vmem:[%s28905_s13] ss:$0 sm:$0xff]  ;;  %s25841_s11 = smov [#allocation20]  }
0x2f40   :  { %s20119_s12 = sshll.u32 %s25841_s11, 4  ;;  %s20120_s12 = int_to_ptr.vmem [resolvable:$true] %s20119_s12 }
0x2f41   :  { %s25789_s20 = scalar_lea.vmem %s20120_s12, 32  ;;  %p25794_p9 = scmp.lt.s32.totalorder %s20120_s12, %s20120_s12 }
0x2f42   :  { %p25790_p8 = scmp.ne.s32.totalorder %s20120_s12, %s25789_s20  ;;  %p25795_p10 = scmp.lt.s32.totalorder %s25789_s20, %s25789_s20 }
0x2f44   :  { %p25796_p11 = por %p25795_p10, %p25794_p9 }
0x2f46   :  { %p25797_p12 = pnand %p25796_p11, %p25790_p8 }
0x2ff6   :  { %v20083_v52 = vpop.f32.mrb[194].mxu0 }
0x2ff7   :  { %v23863_v49 = vpop.f32.mrb[195].mxu0 }
0x2ffa   :  { %v19828_v46 = vpop.f32.mrb[194].mxu1 }
0x2ffb   :  { %v25280_v24 = vadd.f32 %v20215_v38, %v19828_v46  ;;  %v23806_v16 = vpop.f32.mrb[195].mxu1 }
0x2ffd   :  { %v25281_v20 = vadd.f32 %v25280_v24, %v20083_v52 }
0x2fff   :  { %25611 = vtanh.f32 %v25281_v20 }
0x3009   :  { %v25612_v11 = vpop.eup %25611 }
0x300a   :  { %20088 = vst.msk [vmem:[#allocation20] sm:$0x3] %vm1184_vm6, %v25612_v11 }
0x300b   :  { %25800 = shalt.err (!%p25797_p12)
}
0x300c   :  { %s28925_s8 = sld [smem:[#allocation28_spill]] }
0x3012   :  { %s25801_s21 = scalar_lea.hbm %s28925_s8, 32 }
0x3013   :  { %p25802_p13 = scmp.ne.s32.totalorder %s28925_s8, %s25801_s21  ;;  %p25805_p0 = scmp.lt.u32.totalorder %s25801_s21, %s28925_s8 }
0x3015   :  { %p25807_p1 = pnand %p25805_p0, %p25802_p13 }
0x3017   :  { %25810 = shalt.err (!%p25807_p1)
}
0x3018   :  { %20122 = dma.vmem_to_hbm [thread:$0]  %s20120_s12, 32, %s28925_s8, [#allocation19]  }
0x3019   :  { %25819 = dma.done.wait [#allocation8], 256  }
0x301a   :  { %25820 = vsyncadd [#allocation8], 4294967040 }
0x301b   :  { %25821 = dma.done.wait [#allocation19], 288  }
0x301c   :  { %25822 = vsyncadd [#allocation19], 4294967008 }
0x301d   :  { %20132 = vsyncpa [#allocation7], 1 }
0x301e   :  { %20133 = vsyncpa [#allocation10], 1 }
0x301f   :  { %20134 = vsyncpa [#allocation13], 1 }
0x3020   :  { %20135 = vsyncpa [#allocation16], 1 }
0x3021   :  { %20136 = vsyncpa [#allocation8], 1 }
0x3022   :  { %20137 = vsyncpa [#allocation19], 1 }

</bundles_post_ra>
